<compile_context>
chip_gen: v7x
topology: tpu7x:2x2x1
jax: 0.10.0
libtpu: 0.0.40
codegen_flags: <defaults>
</compile_context>

<pallas_src>
from math import pi

import numpy as np
import jax
import jax.numpy as jnp
from jax import lax
from jax.experimental import pallas as pl
from jax.experimental.pallas import tpu as pltpu


def _round_up(v, m):
    return (v + m - 1) // m * m


# ----------------------------- Pallas kernel ------------------------------- #

def _make_psf_kernel(chunk, Np, R):
    """Kernel processing `chunk` emitters per grid step at padded size Np.

    R (= N rounded up to the bf16 sublane multiple 16) is the number of
    meaningful rows inside every 128-row per-emitter block; rows R..Np-1 of
    the bf16 scratch buffers are zeroed once at grid step 0 and never written
    again, so the trig / elementwise / restack work only touches R rows.
    """
    two_np = 2 * Np

    def kernel(nvalid_ref, xyzps_ref,                  # SMEM: (1,) i32, (4*n_pad,) f32
               xg_ref, yg_ref, zg_ref,                 # VMEM f32 (Np, Np)
               pconst_ref, circ_ref,                   # VMEM f32 (Np, Np)
               wt_ref,                                  # VMEM bf16 (2Np, 2Np)  [[Mt_re,Mt_im],[-Mt_im,Mt_re]]
               m_ref,                                   # VMEM bf16 (2Np, 2Np)  [[M_re,-M_im],[M_im,M_re]]
               blur_ref,                                # VMEM bf16 (Np, Np)    symmetric banded Toeplitz R
               out_ref,                                 # VMEM f32 (Np, Np)     accumulated frame
               row_ef,                                  # scratch bf16 (chunk*Np, 2Np)  [ef_re | ef_im] row-stacked
               col_t,                                   # scratch bf16 (2Np, chunk*Np)  [T_re ; T_im]  col-stacked
               row_w):                                  # scratch bf16 (chunk*Np, Np)   R@psf restacked to rows
        c = pl.program_id(0)
        dotf = lambda a, b: jnp.dot(a, b, preferred_element_type=jnp.float32)

        # one-time init: scratch pad rows persist across grid steps; frame accumulator
        @pl.when(c == 0)
        def _():
            row_ef[...] = jnp.zeros_like(row_ef)
            col_t[...] = jnp.zeros_like(col_t)
            row_w[...] = jnp.zeros_like(row_w)
            out_ref[...] = jnp.zeros_like(out_ref)

        # hoisted scalar reads (SMEM) before any vector work
        nvalid = nvalid_ref[0]
        base = c * chunk
        xs, ys, zs, ps = [], [], [], []
        for e in range(chunk):
            off = 4 * (base + e)
            xs.append(xyzps_ref[off + 0])
            ys.append(xyzps_ref[off + 1])
            zs.append(xyzps_ref[off + 2])
            ps.append(xyzps_ref[off + 3])

        # only the first R rows of the (Np, Np) constants carry data
        xg = xg_ref[0:R, :]
        yg = yg_ref[0:R, :]
        zg = zg_ref[0:R, :]
        pconst = pconst_ref[0:R, :]
        circ = circ_ref[0:R, :]

        # Build row-stacked pupil fields ef_e = circ * exp(i*phase_e), stored
        # as [Re | Im] along lanes (gives a 256-deep MXU contraction).
        for e in range(chunk):
            @pl.when(base + e < nvalid)            # skip zero-photon pad emitters
            def _(e=e):
                ph = xg * xs[e] + yg * ys[e] + zg * zs[e] + pconst
                row_ef[e * Np:e * Np + R, 0:Np] = (circ * jnp.cos(ph)).astype(jnp.bfloat16)
                row_ef[e * Np:e * Np + R, Np:two_np] = (circ * jnp.sin(ph)).astype(jnp.bfloat16)

        # ---- T_e = ef_e @ M^T : ONE block-real matmul, K = 2*Np = 256 ----
        t_block = dotf(row_ef[...], wt_ref[...])          # (chunk*Np, 2Np) = [T_re | T_im]

        # restack row -> column layout (block moves of the R meaningful rows only)
        for e in range(chunk):
            col_t[0:R, e * Np:(e + 1) * Np] = t_block[e * Np:e * Np + R, 0:Np].astype(jnp.bfloat16)
            col_t[Np:Np + R, e * Np:(e + 1) * Np] = t_block[e * Np:e * Np + R, Np:two_np].astype(jnp.bfloat16)

        # ---- F_e = M @ T_e : ONE block-real matmul, K = 2*Np = 256 ----
        f_block = dotf(m_ref[...], col_t[...])            # (2Np, chunk*Np) = [F_re ; F_im]
        f_re = f_block[0:Np, :]
        f_im = f_block[Np:two_np, :]
        psf = f_re * f_re + f_im * f_im                   # (Np, chunk*Np) col-stacked |field|^2

        # ---- 9x9 gaussian blur as banded matmuls:  B_e = R @ psf_e @ R ----
        r_mat = blur_ref[...]
        w = dotf(r_mat, psf.astype(jnp.bfloat16))         # (Np, chunk*Np)
        for e in range(chunk):                            # restack col -> row layout
            row_w[e * Np:e * Np + R, :] = w[0:R, e * Np:(e + 1) * Np].astype(jnp.bfloat16)
        blurred = dotf(row_w[...], r_mat)                 # (chunk*Np, Np) row-stacked

        # ---- per-emitter photon normalization + in-kernel accumulation ----
        # one vectorized cross-lane reduction; per-emitter sums touch (Np,1) only
        row_tot = jnp.sum(blurred, axis=1, keepdims=True)  # (chunk*Np, 1)
        contrib = jnp.zeros((Np, Np), jnp.float32)
        for e in range(chunk):
            tot = jnp.sum(row_tot[e * Np:(e + 1) * Np, :])     # padded region is exactly zero
            scale = ps[e] / jnp.maximum(tot, 1e-12)            # photons==0 -> contribution 0
            contrib = contrib + scale * blurred[e * Np:(e + 1) * Np, :]
        out_ref[...] += contrib

    return kernel


def psf_image_pallas(xyzps, model, blur_padded_bf16, chunk_size=16):
    """Accumulated camera-plane image (N, N) for all emitters."""
    n = int(xyzps.shape[0])
    Np = model['Np']
    N = model['N']
    R = model['R']
    chunk = max(1, min(int(chunk_size), n))
    num_chunks = (n + chunk - 1) // chunk
    n_pad = num_chunks * chunk

    xyzps = xyzps.astype(jnp.float32)
    if n_pad != n:
        # padded emitters carry photons=0 -> zero contribution
        xyzps = jnp.concatenate(
            [xyzps, jnp.zeros((n_pad - n, 4), jnp.float32)], axis=0)
    xyzps_flat = xyzps.reshape(-1)                 # flat 1-D SMEM layout (no (n,4) padding blow-up)
    nvalid = jnp.array([n], jnp.int32)

    smem = pl.BlockSpec(memory_space=pltpu.MemorySpace.SMEM)
    v2 = lambda s: pl.BlockSpec(s, lambda c: (0, 0))

    frame_pad = pl.pallas_call(
        _make_psf_kernel(chunk, Np, R),
        out_shape=jax.ShapeDtypeStruct((Np, Np), jnp.float32),
        grid=(num_chunks,),
        in_specs=[smem, smem,
                  v2((Np, Np)), v2((Np, Np)), v2((Np, Np)),
                  v2((Np, Np)), v2((Np, Np)),
                  v2((2 * Np, 2 * Np)), v2((2 * Np, 2 * Np)),
                  v2((Np, Np))],
        out_specs=pl.BlockSpec((Np, Np), lambda c: (0, 0)),   # frame stays resident in VMEM
        scratch_shapes=[pltpu.VMEM((chunk * Np, 2 * Np), jnp.bfloat16),
                        pltpu.VMEM((2 * Np, chunk * Np), jnp.bfloat16),
                        pltpu.VMEM((chunk * Np, Np), jnp.bfloat16)],
        compiler_params=pltpu.CompilerParams(
            dimension_semantics=("arbitrary",),               # in-kernel accumulation across chunks
            vmem_limit_bytes=32 * 1024 * 1024),
    )(nvalid, xyzps_flat,
      model['xg_p'], model['yg_p'], model['zg_p'],
      model['pconst_p'], model['circ_p'],
      model['wt_block_p'], model['m_block_p'],
      blur_padded_bf16)

    return frame_pad[:N, :N]


# --------------------------- model construction ---------------------------- #

def build_im_model(params):
    M = params['M']; NA = params['NA']; n_immersion = params['n_immersion']
    lamda = params['lamda']; n_sample = params['n_sample']; f_4f = params['f_4f']
    ps_camera = params['ps_camera']; ps_BFP = params['ps_BFP']; NFP = params['NFP']
    phase_mask = params['phase_mask']; H, W = params['H'], params['W']

    N = np.floor(f_4f * lamda / (ps_camera * ps_BFP))
    N = int(N + 1 - N % 2)
    d_pupil = 2 * f_4f * NA / np.sqrt(M ** 2 - NA ** 2)
    pn_pupil = d_pupil / ps_BFP
    if N < pn_pupil:
        raise Exception('Simulation size is smaller than the pupil!')

    x_phys = np.linspace(-N / 2, N / 2, N) * ps_BFP
    xi, eta = np.meshgrid(x_phys, x_phys)
    x_ang = np.linspace(-1, 1, N) * (N / pn_pupil) * (NA / n_immersion)
    xx_ang, yy_ang = np.meshgrid(x_ang, x_ang)
    r = np.sqrt(xx_ang ** 2 + yy_ang ** 2)

    k_immersion = 2 * pi * n_immersion / lamda
    sin_theta_immersion = r
    circ_NA = (sin_theta_immersion < NA / n_immersion).astype(np.float32)
    cos_theta_immersion = np.sqrt(1 - (sin_theta_immersion * circ_NA) ** 2) * circ_NA
    k_sample = 2 * pi * n_sample / lamda
    sin_theta_sample = n_immersion / n_sample * sin_theta_immersion
    circ_sample = (sin_theta_sample < 1).astype(np.float32)
    cos_theta_sample = (np.sqrt(1 - (sin_theta_sample * circ_sample) ** 2)
                        * circ_sample * circ_NA)
    circ = circ_NA * circ_sample

    Xgrid = 2 * pi * xi * M / (lamda * f_4f)
    Ygrid = 2 * pi * eta * M / (lamda * f_4f)
    Zgrid = k_sample * cos_theta_sample
    NFPgrid = k_immersion * -1 * cos_theta_immersion
    phase_NFP = NFPgrid * NFP
    if phase_mask is None:
        phase_mask = circ
    phase_const = (phase_NFP + phase_mask).astype(np.float32)
    r0, c0 = int(np.round((N - H) / 2)), int(np.round((N - W) / 2))   # same rounding as torch model

    # centered DFT matrix:  fftshift(fft(ifftshift(x))) == Mdft @ x
    F = np.fft.fft(np.eye(N))
    P_pre = np.fft.ifftshift(np.eye(N), axes=0)
    P_post = np.fft.fftshift(np.eye(N), axes=0)
    Mdft = P_post @ F @ P_pre

    # lane-aligned padded working size (>= 128, multiple of 128)
    Np = int(_round_up(max(N, 128), 128))
    # meaningful rows per 128-row emitter block (bf16 sublane multiple)
    R = min(int(_round_up(N, 16)), Np)

    def padf(a):
        out = np.zeros((Np, Np), np.float32)
        out[:N, :N] = a
        return out

    m_re = padf(Mdft.real.astype(np.float32))
    m_im = padf(Mdft.imag.astype(np.float32))

    # 2x2 block-real complex matmuls (K = 2*Np = 256 fills the v6e/v7x MXU):
    #   [ef_re | ef_im] @ wt_block = [T_re | T_im]   with  T = ef @ M^T
    wt_block = np.zeros((2 * Np, 2 * Np), np.float32)
    wt_block[:Np, :Np] = m_re.T
    wt_block[:Np, Np:] = m_im.T
    wt_block[Np:, :Np] = -m_im.T
    wt_block[Np:, Np:] = m_re.T
    #   m_block @ [T_re ; T_im] = [F_re ; F_im]      with  F = M @ T
    m_block = np.zeros((2 * Np, 2 * Np), np.float32)
    m_block[:Np, :Np] = m_re
    m_block[:Np, Np:] = -m_im
    m_block[Np:, :Np] = m_im
    m_block[Np:, Np:] = m_re

    return dict(
        N=N, Np=Np, R=R, H=H, W=W, r0=r0, c0=c0,
        # padded operands for the Pallas kernel
        xg_p=jnp.asarray(padf(Xgrid), jnp.float32),
        yg_p=jnp.asarray(padf(Ygrid), jnp.float32),
        zg_p=jnp.asarray(padf(Zgrid), jnp.float32),
        pconst_p=jnp.asarray(padf(phase_const), jnp.float32),
        circ_p=jnp.asarray(padf(circ), jnp.float32),
        wt_block_p=jnp.asarray(wt_block, jnp.bfloat16),
        m_block_p=jnp.asarray(m_block, jnp.bfloat16),
        # unpadded f32 copies for the pure-JAX reference
        Xgrid=jnp.asarray(Xgrid, jnp.float32),
        Ygrid=jnp.asarray(Ygrid, jnp.float32),
        Zgrid=jnp.asarray(Zgrid, jnp.float32),
        phase_const=jnp.asarray(phase_const, jnp.float32),
        circ=jnp.asarray(circ, jnp.float32),
        g_sigma=params['g_sigma'], bg=params['bg'],
        baseline=params['baseline'], read_std=params['read_std'],
    )


def make_blur_matrix(N, Np, sigma, g_size=9):
    """Padded symmetric banded Toeplitz R so conv2d(psf, K, 'same') == R @ psf @ R."""
    g_r = g_size // 2
    d = (jnp.arange(N)[:, None] - jnp.arange(N)[None, :]).astype(jnp.float32)
    g1d = jnp.where(jnp.abs(d) <= g_r,
                    jnp.exp(-0.5 * d * d / (sigma * sigma)), 0.0)
    g1d = g1d / jnp.sqrt(2.0 * jnp.pi * sigma * sigma)
    g1d = jnp.pad(g1d, ((0, Np - N), (0, Np - N)))
    return g1d.astype(jnp.bfloat16)


def forward(model, xyzps, key):
    """Matches ImModel.forward: PSFs -> sum -> poisson + read noise -> int16."""
    N, H, W, r0, c0 = model['N'], model['H'], model['W'], model['r0'], model['c0']
    k_sig, k_pois, k_base, k_std, k_read = jax.random.split(key, 5)

    g_sigma = model['g_sigma']
    sigma = g_sigma[0] + jax.random.uniform(k_sig, ()) * (g_sigma[1] - g_sigma[0])
    blur_p = make_blur_matrix(N, model['Np'], sigma)

    frame = psf_image_pallas(xyzps.astype(jnp.float32), model, blur_p)
    im = frame[r0:r0 + H, c0:c0 + W]

    # TODO(synk): poisson / gaussian read-noise sampling has no clean in-kernel
    # Pallas primitive; done with jax.random in glue (elementwise, H x W).
    im = jax.random.poisson(k_pois, im + model['bg']).astype(jnp.float32)
    baseline = model['baseline']; read_std_rng = model['read_std']
    read_baseline = baseline[0] + jax.random.uniform(k_base, ()) * (baseline[1] - baseline[0])
    read_std = read_std_rng[0] + jax.random.uniform(k_std, ()) * (read_std_rng[1] - read_std_rng[0])
    im = im + jnp.round(read_baseline + jax.random.normal(k_read, im.shape) * read_std)
    im = jnp.clip(im, 0.0, float(2 ** 16 - 1))
    # deterministic reproduction of torch's .type(torch.int16) wraparound
    im = im.astype(jnp.uint16).astype(jnp.int16)
    return im, frame, sigma


# -------------------------- pure-JAX reference ------------------------------ #

def psf_image_reference(model, xyzps, sigma):
    Xg, Yg, Zg = model['Xgrid'], model['Ygrid'], model['Zgrid']
    phase = (Xg[None] * xyzps[:, 0][:, None, None]
             + Yg[None] * xyzps[:, 1][:, None, None]
             + Zg[None] * xyzps[:, 2][:, None, None]
             + model['phase_const'][None])
    ef = model['circ'][None] * jnp.exp(1j * phase)
    field = jnp.fft.fftshift(
        jnp.fft.fftn(jnp.fft.ifftshift(ef, axes=(1, 2)), axes=(1, 2)), axes=(1, 2))
    psf = jnp.abs(field) ** 2

    g_xs = jnp.arange(-4, 5, dtype=jnp.float32)
    g_xx, g_yy = jnp.meshgrid(g_xs, g_xs)
    K = (1.0 / (2 * jnp.pi * sigma ** 2)) * jnp.exp(-0.5 * (g_xx ** 2 + g_yy ** 2) / sigma ** 2)
    blurred = lax.conv_general_dilated(
        psf[:, None].astype(jnp.float32), K[None, None],
        window_strides=(1, 1), padding='SAME',
        dimension_numbers=('NCHW', 'OIHW', 'NCHW'))[:, 0]
    total = blurred.sum(axis=(1, 2), keepdims=True)
    scaled = blurred / total * xyzps[:, 3][:, None, None]
    return scaled.sum(axis=0)


# --------------------------------- main ------------------------------------- #

if __name__ == "__main__":
    params = dict(
        device=None,
        M=100.0, NA=1.45, n_immersion=1.518, n_sample=1.33,
        lamda=0.66,          # um
        f_4f=100e3,          # um
        ps_camera=11.0,      # um
        ps_BFP=93.75,        # um  -> N = 65 (odd, small)
        NFP=1.0,             # um
        phase_mask=None,
        H=32, W=32,
        g_sigma=(0.8, 1.2),
        bg=10.0,
        baseline=(95.0, 105.0),
        read_std=(2.0, 4.0),
    )
    model = build_im_model(params)

    key = jax.random.PRNGKey(0)
    k_xy, k_z, k_fwd = jax.random.split(key, 3)
    n_emitters = 3
    xy = jax.random.uniform(k_xy, (n_emitters, 2), minval=-2.0, maxval=2.0)
    z = jax.random.uniform(k_z, (n_emitters, 1), minval=0.0, maxval=2.0)
    photons = jnp.full((n_emitters, 1), 5000.0)
    xyzps = jnp.concatenate([xy, z, photons], axis=1).astype(jnp.float32)

    im, frame, sigma = forward(model, xyzps, k_fwd)
    im = jax.block_until_ready(im)
    frame = jax.block_until_ready(frame)

    # correctness of the Pallas PSF hot path vs a pure-JAX FFT + conv reference
    ref_frame = jax.block_until_ready(psf_image_reference(model, xyzps, sigma))
    err = float(jnp.max(jnp.abs(frame - ref_frame)))
    scale = float(jnp.max(jnp.abs(ref_frame)))
    assert np.isfinite(err) and err <= 5e-2 * scale + 1e-2, f"PSF mismatch: {err} vs max {scale}"

    assert im.shape == (params['H'], params['W']) and im.dtype == jnp.int16
    print("KERNEL_OK")
</pallas_src>

<mosaic_0001>
module attributes {stable_mosaic.version = 11 : i64} {
  func.func @kernel(%arg0: i32, %arg1: memref<1xi32, #tpu.memory_space<smem>>, %arg2: memref<12xf32, #tpu.memory_space<smem>>, %arg3: memref<128x128xf32, #tpu.memory_space<vmem>>, %arg4: memref<128x128xf32, #tpu.memory_space<vmem>>, %arg5: memref<128x128xf32, #tpu.memory_space<vmem>>, %arg6: memref<128x128xf32, #tpu.memory_space<vmem>>, %arg7: memref<128x128xf32, #tpu.memory_space<vmem>>, %arg8: memref<256x256xbf16, #tpu.memory_space<vmem>>, %arg9: memref<256x256xbf16, #tpu.memory_space<vmem>>, %arg10: memref<128x128xbf16, #tpu.memory_space<vmem>>, %arg11: memref<128x128xf32, #tpu.memory_space<vmem>>, %arg12: memref<384x256xbf16, #tpu.memory_space<vmem>>, %arg13: memref<256x384xbf16, #tpu.memory_space<vmem>>, %arg14: memref<384x128xbf16, #tpu.memory_space<vmem>>) attributes {dimension_semantics = [#tpu.dimension_semantics<arbitrary>], iteration_bounds = array<i64: 1>, scalar_prefetch = 0 : i64, scratch_operands = 3 : i64, tpu.core_type = #tpu.core_type<tc>, window_params = [{transform_indices = @transform_0, window_bounds = array<i64: 1>}, {transform_indices = @transform_1, window_bounds = array<i64: 12>}, {pipeline_mode = #tpu.pipeline_mode<synchronous>, transform_indices = @transform_2, window_bounds = array<i64: 128, 128>}, {pipeline_mode = #tpu.pipeline_mode<synchronous>, transform_indices = @transform_3, window_bounds = array<i64: 128, 128>}, {pipeline_mode = #tpu.pipeline_mode<synchronous>, transform_indices = @transform_4, window_bounds = array<i64: 128, 128>}, {pipeline_mode = #tpu.pipeline_mode<synchronous>, transform_indices = @transform_5, window_bounds = array<i64: 128, 128>}, {pipeline_mode = #tpu.pipeline_mode<synchronous>, transform_indices = @transform_6, window_bounds = array<i64: 128, 128>}, {pipeline_mode = #tpu.pipeline_mode<synchronous>, transform_indices = @transform_7, window_bounds = array<i64: 256, 256>}, {pipeline_mode = #tpu.pipeline_mode<synchronous>, transform_indices = @transform_8, window_bounds = array<i64: 256, 256>}, {pipeline_mode = #tpu.pipeline_mode<synchronous>, transform_indices = @transform_9, window_bounds = array<i64: 128, 128>}, {pipeline_mode = #tpu.pipeline_mode<synchronous>, transform_indices = @transform_10, window_bounds = array<i64: 128, 128>}]} {
    %c0_i32 = arith.constant 0 : i32
    %0 = arith.cmpi eq, %arg0, %c0_i32 : i32
    %1 = arith.extui %0 : i1 to i32
    %c0_i32_0 = arith.constant 0 : i32
    %2 = arith.cmpi ne, %1, %c0_i32_0 : i32
    scf.if %2 {
      %cst_75 = arith.constant 0.000000e+00 : bf16
      %146 = vector.broadcast %cst_75 : bf16 to vector<384x256xbf16>
      %c0_76 = arith.constant 0 : index
      %c0_77 = arith.constant 0 : index
      %147 = vector.load %arg12[%c0_76, %c0_77] : memref<384x256xbf16, #tpu.memory_space<vmem>>, vector<384x256xbf16>
      tpu.vector_store %arg12[%c0_76, %c0_77], %146 {strides = array<i32>} : memref<384x256xbf16, #tpu.memory_space<vmem>>, vector<384x256xbf16>,
      %cst_78 = arith.constant 0.000000e+00 : bf16
      %148 = vector.broadcast %cst_78 : bf16 to vector<256x384xbf16>
      %c0_79 = arith.constant 0 : index
      %c0_80 = arith.constant 0 : index
      %149 = vector.load %arg13[%c0_79, %c0_80] : memref<256x384xbf16, #tpu.memory_space<vmem>>, vector<256x384xbf16>
      tpu.vector_store %arg13[%c0_79, %c0_80], %148 {strides = array<i32>} : memref<256x384xbf16, #tpu.memory_space<vmem>>, vector<256x384xbf16>,
      %cst_81 = arith.constant 0.000000e+00 : bf16
      %150 = vector.broadcast %cst_81 : bf16 to vector<384x128xbf16>
      %c0_82 = arith.constant 0 : index
      %c0_83 = arith.constant 0 : index
      %151 = vector.load %arg14[%c0_82, %c0_83] : memref<384x128xbf16, #tpu.memory_space<vmem>>, vector<384x128xbf16>
      tpu.vector_store %arg14[%c0_82, %c0_83], %150 {strides = array<i32>} : memref<384x128xbf16, #tpu.memory_space<vmem>>, vector<384x128xbf16>,
      %cst_84 = arith.constant 0.000000e+00 : f32
      %152 = vector.broadcast %cst_84 : f32 to vector<128x128xf32>
      %c0_85 = arith.constant 0 : index
      %c0_86 = arith.constant 0 : index
      %153 = vector.load %arg11[%c0_85, %c0_86] : memref<128x128xf32, #tpu.memory_space<vmem>>, vector<128x128xf32>
      tpu.vector_store %arg11[%c0_85, %c0_86], %152 {strides = array<i32>} : memref<128x128xf32, #tpu.memory_space<vmem>>, vector<128x128xf32>,
    } else {
    }
    %c0 = arith.constant 0 : index
    %3 = memref.load %arg1[%c0] : memref<1xi32, #tpu.memory_space<smem>>
    %c3_i32 = arith.constant 3 : i32
    %4 = arith.muli %arg0, %c3_i32 : i32
    %c0_i32_1 = arith.constant 0 : i32
    %5 = arith.addi %4, %c0_i32_1 : i32
    %c4_i32 = arith.constant 4 : i32
    %6 = arith.muli %c4_i32, %5 : i32
    %c0_i32_2 = arith.constant 0 : i32
    %7 = arith.addi %6, %c0_i32_2 : i32
    %8 = arith.index_cast %7 : i32 to index
    %9 = memref.load %arg2[%8] : memref<12xf32, #tpu.memory_space<smem>>
    %c1_i32 = arith.constant 1 : i32
    %10 = arith.addi %6, %c1_i32 : i32
    %11 = arith.index_cast %10 : i32 to index
    %12 = memref.load %arg2[%11] : memref<12xf32, #tpu.memory_space<smem>>
    %c2_i32 = arith.constant 2 : i32
    %13 = arith.addi %6, %c2_i32 : i32
    %14 = arith.index_cast %13 : i32 to index
    %15 = memref.load %arg2[%14] : memref<12xf32, #tpu.memory_space<smem>>
    %c3_i32_3 = arith.constant 3 : i32
    %16 = arith.addi %6, %c3_i32_3 : i32
    %17 = arith.index_cast %16 : i32 to index
    %18 = memref.load %arg2[%17] : memref<12xf32, #tpu.memory_space<smem>>
    %c1_i32_4 = arith.constant 1 : i32
    %19 = arith.addi %4, %c1_i32_4 : i32
    %c4_i32_5 = arith.constant 4 : i32
    %20 = arith.muli %c4_i32_5, %19 : i32
    %c0_i32_6 = arith.constant 0 : i32
    %21 = arith.addi %20, %c0_i32_6 : i32
    %22 = arith.index_cast %21 : i32 to index
    %23 = memref.load %arg2[%22] : memref<12xf32, #tpu.memory_space<smem>>
    %c1_i32_7 = arith.constant 1 : i32
    %24 = arith.addi %20, %c1_i32_7 : i32
    %25 = arith.index_cast %24 : i32 to index
    %26 = memref.load %arg2[%25] : memref<12xf32, #tpu.memory_space<smem>>
    %c2_i32_8 = arith.constant 2 : i32
    %27 = arith.addi %20, %c2_i32_8 : i32
    %28 = arith.index_cast %27 : i32 to index
    %29 = memref.load %arg2[%28] : memref<12xf32, #tpu.memory_space<smem>>
    %c3_i32_9 = arith.constant 3 : i32
    %30 = arith.addi %20, %c3_i32_9 : i32
    %31 = arith.index_cast %30 : i32 to index
    %32 = memref.load %arg2[%31] : memref<12xf32, #tpu.memory_space<smem>>
    %c2_i32_10 = arith.constant 2 : i32
    %33 = arith.addi %4, %c2_i32_10 : i32
    %c4_i32_11 = arith.constant 4 : i32
    %34 = arith.muli %c4_i32_11, %33 : i32
    %c0_i32_12 = arith.constant 0 : i32
    %35 = arith.addi %34, %c0_i32_12 : i32
    %36 = arith.index_cast %35 : i32 to index
    %37 = memref.load %arg2[%36] : memref<12xf32, #tpu.memory_space<smem>>
    %c1_i32_13 = arith.constant 1 : i32
    %38 = arith.addi %34, %c1_i32_13 : i32
    %39 = arith.index_cast %38 : i32 to index
    %40 = memref.load %arg2[%39] : memref<12xf32, #tpu.memory_space<smem>>
    %c2_i32_14 = arith.constant 2 : i32
    %41 = arith.addi %34, %c2_i32_14 : i32
    %42 = arith.index_cast %41 : i32 to index
    %43 = memref.load %arg2[%42] : memref<12xf32, #tpu.memory_space<smem>>
    %c3_i32_15 = arith.constant 3 : i32
    %44 = arith.addi %34, %c3_i32_15 : i32
    %45 = arith.index_cast %44 : i32 to index
    %46 = memref.load %arg2[%45] : memref<12xf32, #tpu.memory_space<smem>>
    %c0_16 = arith.constant 0 : index
    %c0_17 = arith.constant 0 : index
    %47 = vector.load %arg3[%c0_16, %c0_17] : memref<128x128xf32, #tpu.memory_space<vmem>>, vector<80x128xf32>
    %c0_18 = arith.constant 0 : index
    %c0_19 = arith.constant 0 : index
    %48 = vector.load %arg4[%c0_18, %c0_19] : memref<128x128xf32, #tpu.memory_space<vmem>>, vector<80x128xf32>
    %c0_20 = arith.constant 0 : index
    %c0_21 = arith.constant 0 : index
    %49 = vector.load %arg5[%c0_20, %c0_21] : memref<128x128xf32, #tpu.memory_space<vmem>>, vector<80x128xf32>
    %c0_22 = arith.constant 0 : index
    %c0_23 = arith.constant 0 : index
    %50 = vector.load %arg6[%c0_22, %c0_23] : memref<128x128xf32, #tpu.memory_space<vmem>>, vector<80x128xf32>
    %c0_24 = arith.constant 0 : index
    %c0_25 = arith.constant 0 : index
    %51 = vector.load %arg7[%c0_24, %c0_25] : memref<128x128xf32, #tpu.memory_space<vmem>>, vector<80x128xf32>
    %c0_i32_26 = arith.constant 0 : i32
    %52 = arith.addi %4, %c0_i32_26 : i32
    %53 = arith.cmpi slt, %52, %3 : i32
    %54 = arith.extui %53 : i1 to i32
    %c0_i32_27 = arith.constant 0 : i32
    %55 = arith.cmpi ne, %54, %c0_i32_27 : i32
    scf.if %55 {
      %146 = vector.broadcast %9 : f32 to vector<80x128xf32>
      %147 = arith.mulf %47, %146 : vector<80x128xf32>
      %148 = vector.broadcast %12 : f32 to vector<80x128xf32>
      %149 = arith.mulf %48, %148 : vector<80x128xf32>
      %150 = arith.addf %147, %149 : vector<80x128xf32>
      %151 = vector.broadcast %15 : f32 to vector<80x128xf32>
      %152 = arith.mulf %49, %151 : vector<80x128xf32>
      %153 = arith.addf %150, %152 : vector<80x128xf32>
      %154 = arith.addf %153, %50 : vector<80x128xf32>
      %155 = math.cos %154 : vector<80x128xf32>
      %156 = arith.mulf %51, %155 : vector<80x128xf32>
      %157 = arith.truncf %156 : vector<80x128xf32> to vector<80x128xbf16>
      %c0_75 = arith.constant 0 : index
      %c0_76 = arith.constant 0 : index
      %158 = vector.load %arg12[%c0_75, %c0_76] : memref<384x256xbf16, #tpu.memory_space<vmem>>, vector<80x128xbf16>
      tpu.vector_store %arg12[%c0_75, %c0_76], %157 {strides = array<i32>} : memref<384x256xbf16, #tpu.memory_space<vmem>>, vector<80x128xbf16>,
      %159 = math.sin %154 : vector<80x128xf32>
      %160 = arith.mulf %51, %159 : vector<80x128xf32>
      %161 = arith.truncf %160 : vector<80x128xf32> to vector<80x128xbf16>
      %c0_77 = arith.constant 0 : index
      %c128_78 = arith.constant 128 : index
      %162 = vector.load %arg12[%c0_77, %c128_78] : memref<384x256xbf16, #tpu.memory_space<vmem>>, vector<80x128xbf16>
      tpu.vector_store %arg12[%c0_77, %c128_78], %161 {strides = array<i32>} : memref<384x256xbf16, #tpu.memory_space<vmem>>, vector<80x128xbf16>,
    } else {
    }
    %c1_i32_28 = arith.constant 1 : i32
    %56 = arith.addi %4, %c1_i32_28 : i32
    %57 = arith.cmpi slt, %56, %3 : i32
    %58 = arith.extui %57 : i1 to i32
    %c0_i32_29 = arith.constant 0 : i32
    %59 = arith.cmpi ne, %58, %c0_i32_29 : i32
    scf.if %59 {
      %146 = vector.broadcast %23 : f32 to vector<80x128xf32>
      %147 = arith.mulf %47, %146 : vector<80x128xf32>
      %148 = vector.broadcast %26 : f32 to vector<80x128xf32>
      %149 = arith.mulf %48, %148 : vector<80x128xf32>
      %150 = arith.addf %147, %149 : vector<80x128xf32>
      %151 = vector.broadcast %29 : f32 to vector<80x128xf32>
      %152 = arith.mulf %49, %151 : vector<80x128xf32>
      %153 = arith.addf %150, %152 : vector<80x128xf32>
      %154 = arith.addf %153, %50 : vector<80x128xf32>
      %155 = math.cos %154 : vector<80x128xf32>
      %156 = arith.mulf %51, %155 : vector<80x128xf32>
      %157 = arith.truncf %156 : vector<80x128xf32> to vector<80x128xbf16>
      %c128_75 = arith.constant 128 : index
      %c0_76 = arith.constant 0 : index
      %158 = vector.load %arg12[%c128_75, %c0_76] : memref<384x256xbf16, #tpu.memory_space<vmem>>, vector<80x128xbf16>
      tpu.vector_store %arg12[%c128_75, %c0_76], %157 {strides = array<i32>} : memref<384x256xbf16, #tpu.memory_space<vmem>>, vector<80x128xbf16>,
      %159 = math.sin %154 : vector<80x128xf32>
      %160 = arith.mulf %51, %159 : vector<80x128xf32>
      %161 = arith.truncf %160 : vector<80x128xf32> to vector<80x128xbf16>
      %c128_77 = arith.constant 128 : index
      %c128_78 = arith.constant 128 : index
      %162 = vector.load %arg12[%c128_77, %c128_78] : memref<384x256xbf16, #tpu.memory_space<vmem>>, vector<80x128xbf16>
      tpu.vector_store %arg12[%c128_77, %c128_78], %161 {strides = array<i32>} : memref<384x256xbf16, #tpu.memory_space<vmem>>, vector<80x128xbf16>,
    } else {
    }
    %c2_i32_30 = arith.constant 2 : i32
    %60 = arith.addi %4, %c2_i32_30 : i32
    %61 = arith.cmpi slt, %60, %3 : i32
    %62 = arith.extui %61 : i1 to i32
    %c0_i32_31 = arith.constant 0 : i32
    %63 = arith.cmpi ne, %62, %c0_i32_31 : i32
    scf.if %63 {
      %146 = vector.broadcast %37 : f32 to vector<80x128xf32>
      %147 = arith.mulf %47, %146 : vector<80x128xf32>
      %148 = vector.broadcast %40 : f32 to vector<80x128xf32>
      %149 = arith.mulf %48, %148 : vector<80x128xf32>
      %150 = arith.addf %147, %149 : vector<80x128xf32>
      %151 = vector.broadcast %43 : f32 to vector<80x128xf32>
      %152 = arith.mulf %49, %151 : vector<80x128xf32>
      %153 = arith.addf %150, %152 : vector<80x128xf32>
      %154 = arith.addf %153, %50 : vector<80x128xf32>
      %155 = math.cos %154 : vector<80x128xf32>
      %156 = arith.mulf %51, %155 : vector<80x128xf32>
      %157 = arith.truncf %156 : vector<80x128xf32> to vector<80x128xbf16>
      %c256_75 = arith.constant 256 : index
      %c0_76 = arith.constant 0 : index
      %158 = vector.load %arg12[%c256_75, %c0_76] : memref<384x256xbf16, #tpu.memory_space<vmem>>, vector<80x128xbf16>
      tpu.vector_store %arg12[%c256_75, %c0_76], %157 {strides = array<i32>} : memref<384x256xbf16, #tpu.memory_space<vmem>>, vector<80x128xbf16>,
      %159 = math.sin %154 : vector<80x128xf32>
      %160 = arith.mulf %51, %159 : vector<80x128xf32>
      %161 = arith.truncf %160 : vector<80x128xf32> to vector<80x128xbf16>
      %c256_77 = arith.constant 256 : index
      %c128_78 = arith.constant 128 : index
      %162 = vector.load %arg12[%c256_77, %c128_78] : memref<384x256xbf16, #tpu.memory_space<vmem>>, vector<80x128xbf16>
      tpu.vector_store %arg12[%c256_77, %c128_78], %161 {strides = array<i32>} : memref<384x256xbf16, #tpu.memory_space<vmem>>, vector<80x128xbf16>,
    } else {
    }
    %c0_32 = arith.constant 0 : index
    %c0_33 = arith.constant 0 : index
    %64 = vector.load %arg12[%c0_32, %c0_33] : memref<384x256xbf16, #tpu.memory_space<vmem>>, vector<384x256xbf16>
    %c0_34 = arith.constant 0 : index
    %c0_35 = arith.constant 0 : index
    %65 = vector.load %arg8[%c0_34, %c0_35] : memref<256x256xbf16, #tpu.memory_space<vmem>>, vector<256x256xbf16>
    %cst = arith.constant dense<0.000000e+00> : vector<384x256xf32>
    %66 = tpu.matmul %64, %65, %cst {dimension_numbers = #tpu.dot_dimension_numbers<[1], [0], [0], [1], [0, 0, 1, 1], [], []>} : vector<384x256xbf16>, vector<256x256xbf16>, vector<384x256xf32> -> vector<384x256xf32>
    %67 = vector.extract_strided_slice %66 {offsets = [0, 0], sizes = [80, 128], strides = [1, 1]} : vector<384x256xf32> to vector<80x128xf32>
    %68 = arith.truncf %67 : vector<80x128xf32> to vector<80x128xbf16>
    %c0_36 = arith.constant 0 : index
    %c0_37 = arith.constant 0 : index
    %69 = vector.load %arg13[%c0_36, %c0_37] : memref<256x384xbf16, #tpu.memory_space<vmem>>, vector<80x128xbf16>
    tpu.vector_store %arg13[%c0_36, %c0_37], %68 {strides = array<i32>} : memref<256x384xbf16, #tpu.memory_space<vmem>>, vector<80x128xbf16>,
    %70 = vector.extract_strided_slice %66 {offsets = [0, 128], sizes = [80, 128], strides = [1, 1]} : vector<384x256xf32> to vector<80x128xf32>
    %71 = arith.truncf %70 : vector<80x128xf32> to vector<80x128xbf16>
    %c128 = arith.constant 128 : index
    %c0_38 = arith.constant 0 : index
    %72 = vector.load %arg13[%c128, %c0_38] : memref<256x384xbf16, #tpu.memory_space<vmem>>, vector<80x128xbf16>
    tpu.vector_store %arg13[%c128, %c0_38], %71 {strides = array<i32>} : memref<256x384xbf16, #tpu.memory_space<vmem>>, vector<80x128xbf16>,
    %73 = vector.extract_strided_slice %66 {offsets = [128, 0], sizes = [80, 128], strides = [1, 1]} : vector<384x256xf32> to vector<80x128xf32>
    %74 = arith.truncf %73 : vector<80x128xf32> to vector<80x128xbf16>
    %c0_39 = arith.constant 0 : index
    %c128_40 = arith.constant 128 : index
    %75 = vector.load %arg13[%c0_39, %c128_40] : memref<256x384xbf16, #tpu.memory_space<vmem>>, vector<80x128xbf16>
    tpu.vector_store %arg13[%c0_39, %c128_40], %74 {strides = array<i32>} : memref<256x384xbf16, #tpu.memory_space<vmem>>, vector<80x128xbf16>,
    %76 = vector.extract_strided_slice %66 {offsets = [128, 128], sizes = [80, 128], strides = [1, 1]} : vector<384x256xf32> to vector<80x128xf32>
    %77 = arith.truncf %76 : vector<80x128xf32> to vector<80x128xbf16>
    %c128_41 = arith.constant 128 : index
    %c128_42 = arith.constant 128 : index
    %78 = vector.load %arg13[%c128_41, %c128_42] : memref<256x384xbf16, #tpu.memory_space<vmem>>, vector<80x128xbf16>
    tpu.vector_store %arg13[%c128_41, %c128_42], %77 {strides = array<i32>} : memref<256x384xbf16, #tpu.memory_space<vmem>>, vector<80x128xbf16>,
    %79 = vector.extract_strided_slice %66 {offsets = [256, 0], sizes = [80, 128], strides = [1, 1]} : vector<384x256xf32> to vector<80x128xf32>
    %80 = arith.truncf %79 : vector<80x128xf32> to vector<80x128xbf16>
    %c0_43 = arith.constant 0 : index
    %c256 = arith.constant 256 : index
    %81 = vector.load %arg13[%c0_43, %c256] : memref<256x384xbf16, #tpu.memory_space<vmem>>, vector<80x128xbf16>
    tpu.vector_store %arg13[%c0_43, %c256], %80 {strides = array<i32>} : memref<256x384xbf16, #tpu.memory_space<vmem>>, vector<80x128xbf16>,
    %82 = vector.extract_strided_slice %66 {offsets = [256, 128], sizes = [80, 128], strides = [1, 1]} : vector<384x256xf32> to vector<80x128xf32>
    %83 = arith.truncf %82 : vector<80x128xf32> to vector<80x128xbf16>
    %c128_44 = arith.constant 128 : index
    %c256_45 = arith.constant 256 : index
    %84 = vector.load %arg13[%c128_44, %c256_45] : memref<256x384xbf16, #tpu.memory_space<vmem>>, vector<80x128xbf16>
    tpu.vector_store %arg13[%c128_44, %c256_45], %83 {strides = array<i32>} : memref<256x384xbf16, #tpu.memory_space<vmem>>, vector<80x128xbf16>,
    %c0_46 = arith.constant 0 : index
    %c0_47 = arith.constant 0 : index
    %85 = vector.load %arg9[%c0_46, %c0_47] : memref<256x256xbf16, #tpu.memory_space<vmem>>, vector<256x256xbf16>
    %c0_48 = arith.constant 0 : index
    %c0_49 = arith.constant 0 : index
    %86 = vector.load %arg13[%c0_48, %c0_49] : memref<256x384xbf16, #tpu.memory_space<vmem>>, vector<256x384xbf16>
    %cst_50 = arith.constant dense<0.000000e+00> : vector<256x384xf32>
    %87 = tpu.matmul %85, %86, %cst_50 {dimension_numbers = #tpu.dot_dimension_numbers<[1], [0], [0], [1], [0, 0, 1, 1], [], []>} : vector<256x256xbf16>, vector<256x384xbf16>, vector<256x384xf32> -> vector<256x384xf32>
    %88 = vector.extract_strided_slice %87 {offsets = [0, 0], sizes = [128, 384], strides = [1, 1]} : vector<256x384xf32> to vector<128x384xf32>
    %89 = vector.extract_strided_slice %87 {offsets = [128, 0], sizes = [128, 384], strides = [1, 1]} : vector<256x384xf32> to vector<128x384xf32>
    %90 = arith.mulf %88, %88 : vector<128x384xf32>
    %91 = arith.mulf %89, %89 : vector<128x384xf32>
    %92 = arith.addf %90, %91 : vector<128x384xf32>
    %c0_51 = arith.constant 0 : index
    %c0_52 = arith.constant 0 : index
    %93 = vector.load %arg10[%c0_51, %c0_52] : memref<128x128xbf16, #tpu.memory_space<vmem>>, vector<128x128xbf16>
    %94 = arith.truncf %92 : vector<128x384xf32> to vector<128x384xbf16>
    %cst_53 = arith.constant dense<0.000000e+00> : vector<128x384xf32>
    %95 = tpu.matmul %93, %94, %cst_53 {dimension_numbers = #tpu.dot_dimension_numbers<[1], [0], [0], [1], [0, 0, 1, 1], [], []>} : vector<128x128xbf16>, vector<128x384xbf16>, vector<128x384xf32> -> vector<128x384xf32>
    %96 = vector.extract_strided_slice %95 {offsets = [0, 0], sizes = [80, 128], strides = [1, 1]} : vector<128x384xf32> to vector<80x128xf32>
    %97 = arith.truncf %96 : vector<80x128xf32> to vector<80x128xbf16>
    %c0_54 = arith.constant 0 : index
    %c0_55 = arith.constant 0 : index
    %98 = vector.load %arg14[%c0_54, %c0_55] : memref<384x128xbf16, #tpu.memory_space<vmem>>, vector<80x128xbf16>
    tpu.vector_store %arg14[%c0_54, %c0_55], %97 {strides = array<i32>} : memref<384x128xbf16, #tpu.memory_space<vmem>>, vector<80x128xbf16>,
    %99 = vector.extract_strided_slice %95 {offsets = [0, 128], sizes = [80, 128], strides = [1, 1]} : vector<128x384xf32> to vector<80x128xf32>
    %100 = arith.truncf %99 : vector<80x128xf32> to vector<80x128xbf16>
    %c128_56 = arith.constant 128 : index
    %c0_57 = arith.constant 0 : index
    %101 = vector.load %arg14[%c128_56, %c0_57] : memref<384x128xbf16, #tpu.memory_space<vmem>>, vector<80x128xbf16>
    tpu.vector_store %arg14[%c128_56, %c0_57], %100 {strides = array<i32>} : memref<384x128xbf16, #tpu.memory_space<vmem>>, vector<80x128xbf16>,
    %102 = vector.extract_strided_slice %95 {offsets = [0, 256], sizes = [80, 128], strides = [1, 1]} : vector<128x384xf32> to vector<80x128xf32>
    %103 = arith.truncf %102 : vector<80x128xf32> to vector<80x128xbf16>
    %c256_58 = arith.constant 256 : index
    %c0_59 = arith.constant 0 : index
    %104 = vector.load %arg14[%c256_58, %c0_59] : memref<384x128xbf16, #tpu.memory_space<vmem>>, vector<80x128xbf16>
    tpu.vector_store %arg14[%c256_58, %c0_59], %103 {strides = array<i32>} : memref<384x128xbf16, #tpu.memory_space<vmem>>, vector<80x128xbf16>,
    %c0_60 = arith.constant 0 : index
    %c0_61 = arith.constant 0 : index
    %105 = vector.load %arg14[%c0_60, %c0_61] : memref<384x128xbf16, #tpu.memory_space<vmem>>, vector<384x128xbf16>
    %cst_62 = arith.constant dense<0.000000e+00> : vector<384x128xf32>
    %106 = tpu.matmul %105, %93, %cst_62 {dimension_numbers = #tpu.dot_dimension_numbers<[1], [0], [0], [1], [0, 0, 1, 1], [], []>} : vector<384x128xbf16>, vector<128x128xbf16>, vector<384x128xf32> -> vector<384x128xf32>
    %cst_63 = arith.constant dense<0.000000e+00> : vector<384xf32>
    %107 = vector.multi_reduction <add>, %106, %cst_63 [1] : vector<384x128xf32> to vector<384xf32>
    %108 = vector.shape_cast %107 : vector<384xf32> to vector<384x1xf32>
    %cst_64 = arith.constant 0.000000e+00 : f32
    %109 = vector.broadcast %cst_64 : f32 to vector<128x128xf32>
    %110 = vector.extract_strided_slice %108 {offsets = [0, 0], sizes = [128, 1], strides = [1, 1]} : vector<384x1xf32> to vector<128x1xf32>
    %111 = vector.shape_cast %110 : vector<128x1xf32> to vector<1x128x1xf32>
    %cst_65 = arith.constant dense<0.000000e+00> : vector<1xf32>
    %112 = vector.multi_reduction <add>, %111, %cst_65 [1, 2] : vector<1x128x1xf32> to vector<1xf32>
    %113 = vector.shape_cast %112 : vector<1xf32> to vector<1x1x1xf32>
    %114 = vector.extract %113[0, 0, 0] : f32 from vector<1x1x1xf32>
    %cst_66 = arith.constant 9.99999996E-13 : f32
    %115 = arith.maximumf %114, %cst_66 : f32
    %116 = arith.divf %18, %115 : f32
    %117 = vector.extract_strided_slice %106 {offsets = [0, 0], sizes = [128, 128], strides = [1, 1]} : vector<384x128xf32> to vector<128x128xf32>
    %118 = vector.broadcast %116 : f32 to vector<128x128xf32>
    %119 = arith.mulf %118, %117 : vector<128x128xf32>
    %120 = arith.addf %109, %119 : vector<128x128xf32>
    %121 = vector.extract_strided_slice %108 {offsets = [128, 0], sizes = [128, 1], strides = [1, 1]} : vector<384x1xf32> to vector<128x1xf32>
    %122 = vector.shape_cast %121 : vector<128x1xf32> to vector<1x128x1xf32>
    %cst_67 = arith.constant dense<0.000000e+00> : vector<1xf32>
    %123 = vector.multi_reduction <add>, %122, %cst_67 [1, 2] : vector<1x128x1xf32> to vector<1xf32>
    %124 = vector.shape_cast %123 : vector<1xf32> to vector<1x1x1xf32>
    %125 = vector.extract %124[0, 0, 0] : f32 from vector<1x1x1xf32>
    %cst_68 = arith.constant 9.99999996E-13 : f32
    %126 = arith.maximumf %125, %cst_68 : f32
    %127 = arith.divf %32, %126 : f32
    %128 = vector.extract_strided_slice %106 {offsets = [128, 0], sizes = [128, 128], strides = [1, 1]} : vector<384x128xf32> to vector<128x128xf32>
    %129 = vector.broadcast %127 : f32 to vector<128x128xf32>
    %130 = arith.mulf %129, %128 : vector<128x128xf32>
    %131 = arith.addf %120, %130 : vector<128x128xf32>
    %132 = vector.extract_strided_slice %108 {offsets = [256, 0], sizes = [128, 1], strides = [1, 1]} : vector<384x1xf32> to vector<128x1xf32>
    %133 = vector.shape_cast %132 : vector<128x1xf32> to vector<1x128x1xf32>
    %cst_69 = arith.constant dense<0.000000e+00> : vector<1xf32>
    %134 = vector.multi_reduction <add>, %133, %cst_69 [1, 2] : vector<1x128x1xf32> to vector<1xf32>
    %135 = vector.shape_cast %134 : vector<1xf32> to vector<1x1x1xf32>
    %136 = vector.extract %135[0, 0, 0] : f32 from vector<1x1x1xf32>
    %cst_70 = arith.constant 9.99999996E-13 : f32
    %137 = arith.maximumf %136, %cst_70 : f32
    %138 = arith.divf %46, %137 : f32
    %139 = vector.extract_strided_slice %106 {offsets = [256, 0], sizes = [128, 128], strides = [1, 1]} : vector<384x128xf32> to vector<128x128xf32>
    %140 = vector.broadcast %138 : f32 to vector<128x128xf32>
    %141 = arith.mulf %140, %139 : vector<128x128xf32>
    %142 = arith.addf %131, %141 : vector<128x128xf32>
    %c0_71 = arith.constant 0 : index
    %c0_72 = arith.constant 0 : index
    %143 = vector.load %arg11[%c0_71, %c0_72] : memref<128x128xf32, #tpu.memory_space<vmem>>, vector<128x128xf32>
    %144 = arith.addf %143, %142 : vector<128x128xf32>
    %c0_73 = arith.constant 0 : index
    %c0_74 = arith.constant 0 : index
    %145 = vector.load %arg11[%c0_73, %c0_74] : memref<128x128xf32, #tpu.memory_space<vmem>>, vector<128x128xf32>
    tpu.vector_store %arg11[%c0_73, %c0_74], %144 {strides = array<i32>} : memref<128x128xf32, #tpu.memory_space<vmem>>, vector<128x128xf32>,
    return
  }
  func.func @transform_0(%arg0: i32) -> i32 {
    %c0_i32 = arith.constant 0 : i32
    %c0_i32_0 = arith.constant 0 : i32
    return %c0_i32 : i32
  }
  func.func @transform_1(%arg0: i32) -> i32 {
    %c0_i32 = arith.constant 0 : i32
    %c0_i32_0 = arith.constant 0 : i32
    return %c0_i32 : i32
  }
  func.func @transform_2(%arg0: i32) -> (i32, i32) {
    %c0_i32 = arith.constant 0 : i32
    %c0_i32_0 = arith.constant 0 : i32
    %c0_i32_1 = arith.constant 0 : i32
    return %c0_i32, %c0_i32_0 : i32, i32
  }
  func.func @transform_3(%arg0: i32) -> (i32, i32) {
    %c0_i32 = arith.constant 0 : i32
    %c0_i32_0 = arith.constant 0 : i32
    %c0_i32_1 = arith.constant 0 : i32
    return %c0_i32, %c0_i32_0 : i32, i32
  }
  func.func @transform_4(%arg0: i32) -> (i32, i32) {
    %c0_i32 = arith.constant 0 : i32
    %c0_i32_0 = arith.constant 0 : i32
    %c0_i32_1 = arith.constant 0 : i32
    return %c0_i32, %c0_i32_0 : i32, i32
  }
  func.func @transform_5(%arg0: i32) -> (i32, i32) {
    %c0_i32 = arith.constant 0 : i32
    %c0_i32_0 = arith.constant 0 : i32
    %c0_i32_1 = arith.constant 0 : i32
    return %c0_i32, %c0_i32_0 : i32, i32
  }
  func.func @transform_6(%arg0: i32) -> (i32, i32) {
    %c0_i32 = arith.constant 0 : i32
    %c0_i32_0 = arith.constant 0 : i32
    %c0_i32_1 = arith.constant 0 : i32
    return %c0_i32, %c0_i32_0 : i32, i32
  }
  func.func @transform_7(%arg0: i32) -> (i32, i32) {
    %c0_i32 = arith.constant 0 : i32
    %c0_i32_0 = arith.constant 0 : i32
    %c0_i32_1 = arith.constant 0 : i32
    return %c0_i32, %c0_i32_0 : i32, i32
  }
  func.func @transform_8(%arg0: i32) -> (i32, i32) {
    %c0_i32 = arith.constant 0 : i32
    %c0_i32_0 = arith.constant 0 : i32
    %c0_i32_1 = arith.constant 0 : i32
    return %c0_i32, %c0_i32_0 : i32, i32
  }
  func.func @transform_9(%arg0: i32) -> (i32, i32) {
    %c0_i32 = arith.constant 0 : i32
    %c0_i32_0 = arith.constant 0 : i32
    %c0_i32_1 = arith.constant 0 : i32
    return %c0_i32, %c0_i32_0 : i32, i32
  }
  func.func @transform_10(%arg0: i32) -> (i32, i32) {
    %c0_i32 = arith.constant 0 : i32
    %c0_i32_0 = arith.constant 0 : i32
    %c0_i32_1 = arith.constant 0 : i32
    return %c0_i32, %c0_i32_0 : i32, i32
  }
}

</mosaic_0001>

<bundles_post_ra>
// kernel: tpu_custom_call.1
= control target key start
LH: loop header
LB: loop body
LE: loop exit
PB: predicated region body
PF: predicated region fallthrough
CT: control target
= control target key end

     0   :  { %16 = vsyncpa [#allocation9], 0  ;;  %s15089_s0 = inlined_call_operand.<no memory space> [shape: s32[1], index: 0, kind: input, shape index: {}]   ;;  %s15090_s1 = inlined_call_operand.vmem [shape: f32[12], index: 1, kind: input, shape index: {}]   ;;  %s15091_s2 = inlined_call_operand.hbm [shape: f32[128,128], index: 2, kind: input, shape index: {}]   ;;  %s15092_s3 = inlined_call_operand.hbm [shape: f32[128,128], index: 3, kind: input, shape index: {}]   ;;  %s15093_s4 = inlined_call_operand.hbm [shape: f32[128,128], index: 4, kind: input, shape index: {}]   ;;  %s15094_s5 = inlined_call_operand.hbm [shape: f32[128,128], index: 5, kind: input, shape index: {}]   ;;  %s15095_s6 = inlined_call_operand.hbm [shape: f32[128,128], index: 6, kind: input, shape index: {}]   ;;  %s15096_s7 = inlined_call_operand.hbm [shape: bf16[256,256], index: 7, kind: input, shape index: {}]   ;;  %s15097_s8 = inlined_call_operand.hbm [shape: bf16[256,256], index: 8, kind: input, shape index: {}]   ;;  %s15098_s9 = inlined_call_operand.hbm [shape: bf16[128,128], index: 9, kind: input, shape index: {}]   ;;  %s15099_s10 = inlined_call_operand.hbm [shape: f32[128,128], index: 10, kind: output, shape index: {}]  }
   0x1   :  { %17 = vsyncpa [#allocation7], 0 }
   0x2   :  { %18 = vsyncpa [#allocation12], 0 }
   0x3   :  { %19 = vsyncpa [#allocation15], 0 }
   0x4   :  { %20 = vsyncpa [#allocation18], 0 }
   0x5   :  { %21 = vsyncpa [#allocation21], 0 }
   0x6   :  { %22 = vsyncpa [#allocation8], 0  ;;  %s10382_s13 = smov [#allocation11]   ;;  %s10383_s15 = smov [#allocation14]  }
   0x7   :  { %s52_s14 = sshll.u32 %s10382_s13, 4  ;;  %s76_s16 = sshll.u32 %s10383_s15, 4  ;;  %s53_s14 = int_to_ptr.vmem [resolvable:$true] %s52_s14  ;;  %s10472_s16 = int_to_ptr.vmem [resolvable:$true] %s76_s16 }
   0x8   :  { %s10158_s19 = scalar_lea.hbm %s15092_s3, 2048 }
   0x9   :  { %p10159_p0 = scmp.ne.s32.totalorder %s15092_s3, %s10158_s19  ;;  %p10162_p1 = scmp.lt.u32.totalorder %s10158_s19, %s15092_s3 }
   0xb   :  { %p10164_p2 = pnand %p10162_p1, %p10159_p0 }
   0xd   :  { %10167 = shalt.err (!%p10164_p2)
}
   0xe   :  { %s10168_s24 = scalar_lea.vmem %s53_s14, 2048  ;;  %p10173_p4 = scmp.lt.s32.totalorder %s53_s14, %s53_s14 }
   0xf   :  { %p10169_p3 = scmp.ne.s32.totalorder %s53_s14, %s10168_s24  ;;  %p10174_p5 = scmp.lt.s32.totalorder %s10168_s24, %s10168_s24 }
  0x11   :  { %p10175_p6 = por %p10174_p5, %p10173_p4 }
  0x13   :  { %p10176_p7 = pnand %p10175_p6, %p10169_p3 }
  0x15   :  { %10179 = shalt.err (!%p10176_p7)
}
  0x16   :  { %s10384_s25 = smov 128   ;;  %s10385_s26 = smov 8  }
  0x17   :  { %58 = dma.hbm_to_vmem [thread:$0]  %s15092_s3, 2048, %s53_s14, [#allocation12], %s10384_s25, %s10384_s25, %s10385_s26  }
  0x18   :  { %s10180_s11 = scalar_lea.hbm %s15094_s5, 2048 }
  0x19   :  { %p10181_p8 = scmp.ne.s32.totalorder %s15094_s5, %s10180_s11  ;;  %p10184_p9 = scmp.lt.u32.totalorder %s10180_s11, %s15094_s5 }
  0x1b   :  { %p10186_p10 = pnand %p10184_p9, %p10181_p8 }
  0x1d   :  { %10189 = shalt.err (!%p10186_p10)
}
  0x1e   :  { %s10190_s18 = scalar_lea.vmem %s10472_s16, 2048  ;;  %p10195_p12 = scmp.lt.s32.totalorder %s10472_s16, %s10472_s16 }
  0x1f   :  { %p10191_p11 = scmp.ne.s32.totalorder %s10472_s16, %s10190_s18  ;;  %p10196_p13 = scmp.lt.s32.totalorder %s10190_s18, %s10190_s18 }
  0x21   :  { %p10197_p0 = por %p10196_p13, %p10195_p12 }
  0x23   :  { %p10198_p1 = pnand %p10197_p0, %p10191_p11 }
  0x25   :  { %10201 = shalt.err (!%p10198_p1)
}
  0x26   :  { %82 = dma.hbm_to_vmem [thread:$0]  %s15094_s5, 2048, %s10472_s16, [#allocation15], %s10384_s25, %s10384_s25, %s10385_s26  }
  0x27   :  { %s31_s21 = sshll.u32 %s15090_s1, 4  ;;  %s10386_s22 = smov [#allocation17]   ;;  %s32_s21 = int_to_ptr.vmem [resolvable:$true] %s31_s21 }
  0x28   :  { %s100_s23 = sshll.u32 %s10386_s22, 4  ;;  %s10202_s28 = scalar_lea.hbm %s15096_s7, 4096  ;;  %s101_s23 = int_to_ptr.vmem [resolvable:$true] %s100_s23 }
  0x29   :  { %p10203_p2 = scmp.ne.s32.totalorder %s15096_s7, %s10202_s28  ;;  %p10206_p3 = scmp.lt.u32.totalorder %s10202_s28, %s15096_s7 }
  0x2b   :  { %p10208_p4 = pnand %p10206_p3, %p10203_p2 }
  0x2d   :  { %10211 = shalt.err (!%p10208_p4)
}
  0x2e   :  { %s10212_s5 = scalar_lea.vmem %s101_s23, 4096  ;;  %p10217_p6 = scmp.lt.s32.totalorder %s101_s23, %s101_s23 }
  0x2f   :  { %p10213_p5 = scmp.ne.s32.totalorder %s101_s23, %s10212_s5  ;;  %p10218_p7 = scmp.lt.s32.totalorder %s10212_s5, %s10212_s5 }
  0x31   :  { %p10219_p8 = por %p10218_p7, %p10217_p6 }
  0x33   :  { %p10220_p9 = pnand %p10219_p8, %p10213_p5 }
  0x35   :  { %10223 = shalt.err (!%p10220_p9)
}
  0x36   :  { %106 = dma.hbm_to_vmem [thread:$0]  %s15096_s7, 4096, %s101_s23, [#allocation18], %s10384_s25, %s10384_s25, %s10385_s26  }
  0x37   :  { %s10224_s13 = scalar_lea.vmem %s32_s21, 16  ;;  %p10229_p11 = scmp.lt.s32.totalorder %s32_s21, %s32_s21 }
  0x38   :  { %p10225_p10 = scmp.ne.s32.totalorder %s32_s21, %s10224_s13  ;;  %p10230_p12 = scmp.lt.s32.totalorder %s10224_s13, %s10224_s13 }
  0x3a   :  { %p10231_p13 = por %p10230_p12, %p10229_p11 }
  0x3c   :  { %p10232_p0 = pnand %p10231_p13, %p10225_p10 }
  0x3e   :  { %10235 = shalt.err (!%p10232_p0)
}
  0x3f   :  { %s10387_s15 = smov [#allocation6]   ;;  %s10388_s17 = smov [#allocation10]  }
  0x40   :  { %34 = dma.vmem_to_smem %s32_s21, 16, %s10387_s15, [#allocation9]  }
  0x41   :  { %s40_s18 = sshll.u32 %s10388_s17, 4  ;;  %s10389_s3 = smov [#allocation13]   ;;  %s41_s18 = int_to_ptr.vmem [resolvable:$true] %s40_s18 }
  0x42   :  { %s64_s14 = sshll.u32 %s10389_s3, 4  ;;  %s10236_s7 = scalar_lea.hbm %s15091_s2, 2048  ;;  %s10527_s14 = int_to_ptr.vmem [resolvable:$true] %s64_s14 }
  0x43   :  { %p10237_p1 = scmp.ne.s32.totalorder %s15091_s2, %s10236_s7  ;;  %p10240_p2 = scmp.lt.u32.totalorder %s10236_s7, %s15091_s2 }
  0x45   :  { %p10242_p3 = pnand %p10240_p2, %p10237_p1 }
  0x47   :  { %10245 = shalt.err (!%p10242_p3)
}
  0x48   :  { %s10246_s21 = scalar_lea.vmem %s41_s18, 2048  ;;  %p10251_p5 = scmp.lt.s32.totalorder %s41_s18, %s41_s18 }
  0x49   :  { %p10247_p4 = scmp.ne.s32.totalorder %s41_s18, %s10246_s21  ;;  %p10252_p6 = scmp.lt.s32.totalorder %s10246_s21, %s10246_s21 }
  0x4b   :  { %p10253_p7 = por %p10252_p6, %p10251_p5 }
  0x4d   :  { %p10254_p8 = pnand %p10253_p7, %p10247_p4 }
  0x4f   :  { %10257 = shalt.err (!%p10254_p8)
}
  0x50   :  { %46 = dma.hbm_to_vmem [thread:$0]  %s15091_s2, 2048, %s41_s18, [#allocation7], %s10384_s25, %s10384_s25, %s10385_s26  }
  0x51   :  { %s10258_s12 = scalar_lea.hbm %s15093_s4, 2048 }
  0x52   :  { %p10259_p9 = scmp.ne.s32.totalorder %s15093_s4, %s10258_s12  ;;  %p10262_p10 = scmp.lt.u32.totalorder %s10258_s12, %s15093_s4 }
  0x54   :  { %p10264_p11 = pnand %p10262_p10, %p10259_p9 }
  0x56   :  { %10267 = shalt.err (!%p10264_p11)
}
  0x57   :  { %s10268_s15 = scalar_lea.vmem %s10527_s14, 2048  ;;  %p10273_p13 = scmp.lt.s32.totalorder %s10527_s14, %s10527_s14 }
  0x58   :  { %p10269_p12 = scmp.ne.s32.totalorder %s10527_s14, %s10268_s15  ;;  %p10274_p0 = scmp.lt.s32.totalorder %s10268_s15, %s10268_s15 }
  0x5a   :  { %p10275_p1 = por %p10274_p0, %p10273_p13 }
  0x5c   :  { %p10276_p2 = pnand %p10275_p1, %p10269_p12 }
  0x5e   :  { %10279 = shalt.err (!%p10276_p2)
}
  0x5f   :  { %70 = dma.hbm_to_vmem [thread:$0]  %s15093_s4, 2048, %s10527_s14, [#allocation12], %s10384_s25, %s10384_s25, %s10385_s26  }
  0x60   :  { %s10390_s18 = smov [#allocation16]   ;;  %s10391_s19 = smov [#allocation19]  }
  0x61   :  { %s88_s3 = sshll.u32 %s10390_s18, 4  ;;  %s112_s20 = sshll.u32 %s10391_s19, 4  ;;  %s89_s3 = int_to_ptr.vmem [resolvable:$true] %s88_s3  ;;  %s10564_s20 = int_to_ptr.vmem [resolvable:$true] %s112_s20 }
  0x62   :  { %s10280_s23 = scalar_lea.hbm %s15095_s6, 2048 }
  0x63   :  { %p10281_p3 = scmp.ne.s32.totalorder %s15095_s6, %s10280_s23  ;;  %p10284_p4 = scmp.lt.u32.totalorder %s10280_s23, %s15095_s6 }
  0x65   :  { %p10286_p5 = pnand %p10284_p4, %p10281_p3 }
  0x67   :  { %10289 = shalt.err (!%p10286_p5)
}
  0x68   :  { %s10290_s4 = scalar_lea.vmem %s89_s3, 2048  ;;  %p10295_p7 = scmp.lt.s32.totalorder %s89_s3, %s89_s3 }
  0x69   :  { %p10291_p6 = scmp.ne.s32.totalorder %s89_s3, %s10290_s4  ;;  %p10296_p8 = scmp.lt.s32.totalorder %s10290_s4, %s10290_s4 }
  0x6b   :  { %p10297_p9 = por %p10296_p8, %p10295_p7 }
  0x6d   :  { %p10298_p10 = pnand %p10297_p9, %p10291_p6 }
  0x6f   :  { %10301 = shalt.err (!%p10298_p10)
}
  0x70   :  { %94 = dma.hbm_to_vmem [thread:$0]  %s15095_s6, 2048, %s89_s3, [#allocation15], %s10384_s25, %s10384_s25, %s10385_s26  }
  0x71   :  { %s10302_s12 = scalar_lea.hbm %s15097_s8, 4096 }
  0x72   :  { %p10303_p11 = scmp.ne.s32.totalorder %s15097_s8, %s10302_s12  ;;  %p10306_p12 = scmp.lt.u32.totalorder %s10302_s12, %s15097_s8 }
  0x74   :  { %p10308_p13 = pnand %p10306_p12, %p10303_p11 }
  0x76   :  { %10311 = shalt.err (!%p10308_p13)
}
  0x77   :  { %s10312_s15 = scalar_lea.vmem %s10564_s20, 4096  ;;  %p10317_p1 = scmp.lt.s32.totalorder %s10564_s20, %s10564_s20 }
  0x78   :  { %p10313_p0 = scmp.ne.s32.totalorder %s10564_s20, %s10312_s15  ;;  %p10318_p2 = scmp.lt.s32.totalorder %s10312_s15, %s10312_s15 }
  0x7a   :  { %p10319_p3 = por %p10318_p2, %p10317_p1 }
  0x7c   :  { %p10320_p4 = pnand %p10319_p3, %p10313_p0 }
  0x7e   :  { %10323 = shalt.err (!%p10320_p4)
}
  0x7f   :  { %118 = dma.hbm_to_vmem [thread:$0]  %s15097_s8, 4096, %s10564_s20, [#allocation18], %s10384_s25, %s10384_s25, %s10385_s26  }
  0x80   :  { %s10392_s17 = smov [#allocation20]   ;;  %s10324_s7 = scalar_lea.hbm %s15098_s9, 1024 }
  0x81   :  { %s124_s18 = sshll.u32 %s10392_s17, 4  ;;  %p10325_p5 = scmp.ne.s32.totalorder %s15098_s9, %s10324_s7  ;;  %s125_s18 = int_to_ptr.vmem [resolvable:$true] %s124_s18 }
  0x82   :  { %p10328_p6 = scmp.lt.u32.totalorder %s10324_s7, %s15098_s9 }
  0x84   :  { %p10330_p7 = pnand %p10328_p6, %p10325_p5 }
  0x86   :  { %10333 = shalt.err (!%p10330_p7)
}
  0x87   :  { %s10334_s21 = scalar_lea.vmem %s125_s18, 1024  ;;  %p10339_p9 = scmp.lt.s32.totalorder %s125_s18, %s125_s18 }
  0x88   :  { %p10335_p8 = scmp.ne.s32.totalorder %s125_s18, %s10334_s21  ;;  %p10340_p10 = scmp.lt.s32.totalorder %s10334_s21, %s10334_s21 }
  0x8a   :  { %p10341_p11 = por %p10340_p10, %p10339_p9 }
  0x8c   :  { %p10342_p12 = pnand %p10341_p11, %p10335_p8 }
  0x8e   :  { %10345 = shalt.err (!%p10342_p12)
}
  0x8f   :  { %s10393_s8 = smov 64   ;;  %s10394_s20 = smov 4  }
  0x90   :  { %130 = dma.hbm_to_vmem [thread:$0]  %s15098_s9, 1024, %s125_s18, [#allocation21], %s10393_s8, %s10393_s8, %s10394_s20  }
  0x91   :  { %10368 = dma.done.wait [#allocation9], 16  }
  0x92   :  { %10369 = vsyncadd [#allocation9], 4294967280 }
  0x93   :  { %10370 = dma.done.wait [#allocation7], 2048  }
  0x94   :  { %10371 = vsyncadd [#allocation7], 4294965248 }
  0x95   :  { %10372 = dma.done.wait [#allocation12], 4096  }
  0x96   :  { %10373 = vsyncadd [#allocation12], 4294963200 }
  0x97   :  { %10374 = dma.done.wait [#allocation15], 4096  }
  0x98   :  { %10375 = vsyncadd [#allocation15], 4294963200 }
  0x99   :  { %10376 = dma.done.wait [#allocation18], 8192  }
  0x9a   :  { %10377 = vsyncadd [#allocation18], 4294959104 }
  0x9b   :  { %10378 = dma.done.wait [#allocation21], 1024  }
  0x9c   :  { %10379 = vsyncadd [#allocation21], 4294966272 }
  0x9d   :  { %158 = sfence }
  0x9e   :  { %s10613_s14 = sld [smem:[#allocation6]]  ;;  %s10615_s29 = sld [smem:[#allocation6 + $0x1]]  ;;  %v10617_v0 = vld [vmem:[#allocation10] sm:$0xff]  ;;  %v15100_v1 = vmov 0   ;;  %v10698_v2 = vld [vmem:[#allocation10 + $0x8] sm:$0xff]  ;;  %v10700_v3 = vld [vmem:[#allocation10 + $0x10] sm:$0xff] }
  0x9f   :  { %15320 = vst [vmem:[#allocation30_spill] sm:$0xff] %v10617_v0  ;;  %164 = vst [vmem:[#allocation2] sm:$0xff] %v15100_v1  ;;  %s10694_s9 = sld [smem:[#allocation6 + $0x2]]  ;;  %s10696_s30 = sld [smem:[#allocation6 + $0x3]]  ;;  %v10706_v4 = vld [vmem:[#allocation10 + $0x18] sm:$0xff]  ;;  %v10708_v5 = vld [vmem:[#allocation10 + $0x20] sm:$0xff] }
  0xa0   :  { %165 = vst [vmem:[#allocation2 + $0x8] sm:$0xff] %v15100_v1  ;;  %166 = vst [vmem:[#allocation2 + $0x10] sm:$0xff] %v15100_v1  ;;  %s10702_s11 = sld [smem:[#allocation6 + $0x4]]  ;;  %s10704_s12 = sld [smem:[#allocation6 + $0x5]]  ;;  %v10714_v6 = vld [vmem:[#allocation10 + $0x28] sm:$0xff]  ;;  %v10716_v7 = vld [vmem:[#allocation10 + $0x30] sm:$0xff] }
  0xa1   :  { %167 = vst [vmem:[#allocation2 + $0x18] sm:$0xff] %v15100_v1  ;;  %168 = vst [vmem:[#allocation2 + $0x20] sm:$0xff] %v15100_v1  ;;  %s10710_s5 = sld [smem:[#allocation6 + $0x6]]  ;;  %s10712_s1 = sld [smem:[#allocation6 + $0x7]]  ;;  %v10722_v8 = vld [vmem:[#allocation10 + $0x38] sm:$0xff]  ;;  %v10724_v9 = vld [vmem:[#allocation10 + $0x40] sm:$0xff] }
  0xa2   :  { %169 = vst [vmem:[#allocation2 + $0x28] sm:$0xff] %v15100_v1  ;;  %170 = vst [vmem:[#allocation2 + $0x30] sm:$0xff] %v15100_v1  ;;  %s10718_s16 = sld [smem:[#allocation6 + $0x8]]  ;;  %s10720_s13 = sld [smem:[#allocation6 + $0x9]]  ;;  %v10730_v10 = vld [vmem:[#allocation10 + $0x48] sm:$0xff]  ;;  %v10732_v11 = vld [vmem:[#allocation11] sm:$0xff] }
  0xa3   :  { %171 = vst [vmem:[#allocation2 + $0x38] sm:$0xff] %v15100_v1  ;;  %172 = vst [vmem:[#allocation2 + $0x40] sm:$0xff] %v15100_v1  ;;  %s10726_s15 = sld [smem:[#allocation6 + $0xa]]  ;;  %s10728_s6 = sld [smem:[#allocation6 + $0xb]]  ;;  %v10734_v12 = vld [vmem:[#allocation11 + $0x8] sm:$0xff]  ;;  %v10736_v13 = vld [vmem:[#allocation11 + $0x10] sm:$0xff] }
  0xa4   :  { %173 = vst [vmem:[#allocation2 + $0x48] sm:$0xff] %v15100_v1  ;;  %174 = vst [vmem:[#allocation2 + $0x50] sm:$0xff] %v15100_v1  ;;  %v10738_v14 = vld [vmem:[#allocation11 + $0x18] sm:$0xff]  ;;  %v10740_v15 = vld [vmem:[#allocation11 + $0x20] sm:$0xff]  ;;  %v10396_v18 = vmov 0.0   ;;  %p9156_p13 = scmp.le.s32.totalorder %s15089_s0, 0 }
  0xa5   :  { %175 = vst [vmem:[#allocation2 + $0x58] sm:$0xff] %v15100_v1  ;;  %176 = vst [vmem:[#allocation2 + $0x60] sm:$0xff] %v15100_v1  ;;  %v10742_v16 = vld [vmem:[#allocation11 + $0x28] sm:$0xff]  ;;  %v10744_v17 = vld [vmem:[#allocation11 + $0x30] sm:$0xff] }
  0xa6   :  { %177 = vst [vmem:[#allocation2 + $0x68] sm:$0xff] %v15100_v1  ;;  %178 = vst [vmem:[#allocation2 + $0x70] sm:$0xff] %v15100_v1  ;;  %v10746_v19 = vld [vmem:[#allocation11 + $0x38] sm:$0xff]  ;;  %v10748_v20 = vld [vmem:[#allocation11 + $0x40] sm:$0xff] }
  0xa7   :  { %179 = vst [vmem:[#allocation2 + $0x78] sm:$0xff] %v15100_v1  ;;  %180 = vst [vmem:[#allocation2 + $0x80] sm:$0xff] %v15100_v1  ;;  %v10750_v21 = vld [vmem:[#allocation11 + $0x48] sm:$0xff]  ;;  %v10752_v22 = vld [vmem:[#allocation13] sm:$0xff] }
  0xa8   :  { %181 = vst [vmem:[#allocation2 + $0x88] sm:$0xff] %v15100_v1  ;;  %182 = vst [vmem:[#allocation2 + $0x90] sm:$0xff] %v15100_v1  ;;  %v10754_v23 = vld [vmem:[#allocation13 + $0x8] sm:$0xff]  ;;  %v10756_v24 = vld [vmem:[#allocation13 + $0x10] sm:$0xff] }
  0xa9   :  { %183 = vst [vmem:[#allocation2 + $0x98] sm:$0xff] %v15100_v1  ;;  %184 = vst [vmem:[#allocation2 + $0xa0] sm:$0xff] %v15100_v1  ;;  %v10758_v25 = vld [vmem:[#allocation13 + $0x18] sm:$0xff]  ;;  %v10760_v26 = vld [vmem:[#allocation13 + $0x20] sm:$0xff] }
  0xaa   :  { %185 = vst [vmem:[#allocation2 + $0xa8] sm:$0xff] %v15100_v1  ;;  %186 = vst [vmem:[#allocation2 + $0xb0] sm:$0xff] %v15100_v1  ;;  %v10762_v27 = vld [vmem:[#allocation13 + $0x28] sm:$0xff]  ;;  %v10764_v28 = vld [vmem:[#allocation13 + $0x30] sm:$0xff] }
  0xab   :  { %187 = vst [vmem:[#allocation2 + $0xb8] sm:$0xff] %v15100_v1  ;;  %188 = vst [vmem:[#allocation2 + $0xc0] sm:$0xff] %v15100_v1  ;;  %v10766_v29 = vld [vmem:[#allocation13 + $0x38] sm:$0xff]  ;;  %v10768_v30 = vld [vmem:[#allocation13 + $0x40] sm:$0xff] }
  0xac   :  { %189 = vst [vmem:[#allocation2 + $0xc8] sm:$0xff] %v15100_v1  ;;  %190 = vst [vmem:[#allocation2 + $0xd0] sm:$0xff] %v15100_v1  ;;  %v10770_v31 = vld [vmem:[#allocation13 + $0x48] sm:$0xff]  ;;  %v10772_v32 = vld [vmem:[#allocation14] sm:$0xff] }
  0xad   :  { %191 = vst [vmem:[#allocation2 + $0xd8] sm:$0xff] %v15100_v1  ;;  %192 = vst [vmem:[#allocation2 + $0xe0] sm:$0xff] %v15100_v1  ;;  %v10774_v33 = vld [vmem:[#allocation14 + $0x8] sm:$0xff]  ;;  %v10776_v34 = vld [vmem:[#allocation14 + $0x10] sm:$0xff] }
  0xae   :  { %193 = vst [vmem:[#allocation2 + $0xe8] sm:$0xff] %v15100_v1  ;;  %194 = vst [vmem:[#allocation2 + $0xf0] sm:$0xff] %v15100_v1  ;;  %v10778_v35 = vld [vmem:[#allocation14 + $0x18] sm:$0xff]  ;;  %v10780_v36 = vld [vmem:[#allocation14 + $0x20] sm:$0xff] }
  0xaf   :  { %195 = vst [vmem:[#allocation2 + $0xf8] sm:$0xff] %v15100_v1  ;;  %196 = vst [vmem:[#allocation2 + $0x100] sm:$0xff] %v15100_v1  ;;  %v10782_v37 = vld [vmem:[#allocation14 + $0x28] sm:$0xff]  ;;  %v10784_v38 = vld [vmem:[#allocation14 + $0x30] sm:$0xff] }
  0xb0   :  { %197 = vst [vmem:[#allocation2 + $0x108] sm:$0xff] %v15100_v1  ;;  %198 = vst [vmem:[#allocation2 + $0x110] sm:$0xff] %v15100_v1  ;;  %v10786_v39 = vld [vmem:[#allocation14 + $0x38] sm:$0xff]  ;;  %v10788_v40 = vld [vmem:[#allocation14 + $0x40] sm:$0xff] }
  0xb1   :  { %199 = vst [vmem:[#allocation2 + $0x118] sm:$0xff] %v15100_v1  ;;  %200 = vst [vmem:[#allocation2 + $0x120] sm:$0xff] %v15100_v1  ;;  %v10790_v41 = vld [vmem:[#allocation14 + $0x48] sm:$0xff]  ;;  %v10792_v42 = vld [vmem:[#allocation16] sm:$0xff] }
  0xb2   :  { %201 = vst [vmem:[#allocation2 + $0x128] sm:$0xff] %v15100_v1  ;;  %202 = vst [vmem:[#allocation2 + $0x130] sm:$0xff] %v15100_v1  ;;  %v10794_v43 = vld [vmem:[#allocation16 + $0x8] sm:$0xff]  ;;  %v10796_v44 = vld [vmem:[#allocation16 + $0x10] sm:$0xff] }
  0xb3   :  { %203 = vst [vmem:[#allocation2 + $0x138] sm:$0xff] %v15100_v1  ;;  %204 = vst [vmem:[#allocation2 + $0x140] sm:$0xff] %v15100_v1  ;;  %v10798_v45 = vld [vmem:[#allocation16 + $0x18] sm:$0xff]  ;;  %v10800_v46 = vld [vmem:[#allocation16 + $0x20] sm:$0xff] }
  0xb4   :  { %205 = vst [vmem:[#allocation2 + $0x148] sm:$0xff] %v15100_v1  ;;  %206 = vst [vmem:[#allocation2 + $0x150] sm:$0xff] %v15100_v1  ;;  %v10802_v47 = vld [vmem:[#allocation16 + $0x28] sm:$0xff]  ;;  %v10804_v48 = vld [vmem:[#allocation16 + $0x30] sm:$0xff] }
  0xb5   :  { %207 = vst [vmem:[#allocation2 + $0x158] sm:$0xff] %v15100_v1  ;;  %208 = vst [vmem:[#allocation2 + $0x160] sm:$0xff] %v15100_v1  ;;  %v10806_v49 = vld [vmem:[#allocation16 + $0x38] sm:$0xff]  ;;  %v10808_v50 = vld [vmem:[#allocation16 + $0x40] sm:$0xff] }
  0xb6   :  { %209 = vst [vmem:[#allocation2 + $0x168] sm:$0xff] %v15100_v1  ;;  %210 = vst [vmem:[#allocation2 + $0x170] sm:$0xff] %v15100_v1  ;;  %v10810_v51 = vld [vmem:[#allocation16 + $0x48] sm:$0xff] }
  0xb7   :  { %211 = vst [vmem:[#allocation2 + $0x178] sm:$0xff] %v15100_v1  ;;  %227 = vst [vmem:[#allocation3 + $0x78] sm:$0xff] %v15100_v1 }
  0xb8   :  { %228 = vst [vmem:[#allocation3 + $0x80] sm:$0xff] %v15100_v1  ;;  %229 = vst [vmem:[#allocation3 + $0x88] sm:$0xff] %v15100_v1 }
  0xb9   :  { %230 = vst [vmem:[#allocation3 + $0x90] sm:$0xff] %v15100_v1  ;;  %231 = vst [vmem:[#allocation3 + $0x98] sm:$0xff] %v15100_v1 }
  0xba   :  { %232 = vst [vmem:[#allocation3 + $0xa0] sm:$0xff] %v15100_v1  ;;  %233 = vst [vmem:[#allocation3 + $0xa8] sm:$0xff] %v15100_v1 }
  0xbb   :  { %234 = vst [vmem:[#allocation3 + $0xb0] sm:$0xff] %v15100_v1  ;;  %235 = vst [vmem:[#allocation3 + $0xb8] sm:$0xff] %v15100_v1 }
  0xbc   :  { %251 = vst [vmem:[#allocation3 + $0x138] sm:$0xff] %v15100_v1  ;;  %252 = vst [vmem:[#allocation3 + $0x140] sm:$0xff] %v15100_v1 }
  0xbd   :  { %253 = vst [vmem:[#allocation3 + $0x148] sm:$0xff] %v15100_v1  ;;  %254 = vst [vmem:[#allocation3 + $0x150] sm:$0xff] %v15100_v1 }
  0xbe   :  { %255 = vst [vmem:[#allocation3 + $0x158] sm:$0xff] %v15100_v1  ;;  %256 = vst [vmem:[#allocation3 + $0x160] sm:$0xff] %v15100_v1 }
  0xbf   :  { %257 = vst [vmem:[#allocation3 + $0x168] sm:$0xff] %v15100_v1  ;;  %258 = vst [vmem:[#allocation3 + $0x170] sm:$0xff] %v15100_v1 }
  0xc0   :  { %259 = vst [vmem:[#allocation3 + $0x178] sm:$0xff] %v15100_v1  ;;  %265 = vst [vmem:[#allocation4 + $0x28] sm:$0xff] %v15100_v1 }
  0xc1   :  { %266 = vst [vmem:[#allocation4 + $0x30] sm:$0xff] %v15100_v1  ;;  %267 = vst [vmem:[#allocation4 + $0x38] sm:$0xff] %v15100_v1 }
  0xc2   :  { %273 = vst [vmem:[#allocation4 + $0x68] sm:$0xff] %v15100_v1  ;;  %274 = vst [vmem:[#allocation4 + $0x70] sm:$0xff] %v15100_v1 }
  0xc3   :  { %275 = vst [vmem:[#allocation4 + $0x78] sm:$0xff] %v15100_v1  ;;  %281 = vst [vmem:[#allocation4 + $0xa8] sm:$0xff] %v15100_v1 }
  0xc4   :  { %282 = vst [vmem:[#allocation4 + $0xb0] sm:$0xff] %v15100_v1  ;;  %283 = vst [vmem:[#allocation4 + $0xb8] sm:$0xff] %v15100_v1 }
  0xc5   :  { %15321 = vst [vmem:[#allocation31_spill] sm:$0xff] %v10698_v2  ;;  %15322 = vst [vmem:[#allocation32_spill] sm:$0xff] %v10700_v3 }
  0xc6   :  { %15323 = vst [vmem:[#allocation33_spill] sm:$0xff] %v10706_v4  ;;  %15324 = vst [vmem:[#allocation34_spill] sm:$0xff] %v10708_v5 }
  0xc7   :  { %15325 = vst [vmem:[#allocation35_spill] sm:$0xff] %v10714_v6  ;;  %15326 = vst [vmem:[#allocation36_spill] sm:$0xff] %v10716_v7 }
  0xc8   :  { %15327 = vst [vmem:[#allocation37_spill] sm:$0xff] %v10722_v8  ;;  %15328 = vst [vmem:[#allocation38_spill] sm:$0xff] %v10724_v9 }
  0xc9   :  { %15329 = vst [vmem:[#allocation39_spill] sm:$0xff] %v10730_v10  ;;  %15330 = vst [vmem:[#allocation40_spill] sm:$0xff] %v10732_v11 }
  0xca   :  { %15331 = vst [vmem:[#allocation41_spill] sm:$0xff] %v10734_v12  ;;  %15332 = vst [vmem:[#allocation42_spill] sm:$0xff] %v10736_v13 }
  0xcb   :  { %15333 = vst [vmem:[#allocation43_spill] sm:$0xff] %v10738_v14  ;;  %15334 = vst [vmem:[#allocation44_spill] sm:$0xff] %v10740_v15 }
  0xcc   :  { %15335 = vst [vmem:[#allocation45_spill] sm:$0xff] %v10742_v16  ;;  %15336 = vst [vmem:[#allocation46_spill] sm:$0xff] %v10744_v17 }
  0xcd   :  { %284 = vst [vmem:[#allocation22] sm:$0xff] %v10396_v18  ;;  %285 = vst [vmem:[#allocation22 + $0x8] sm:$0xff] %v10396_v18 }
  0xce   :  { %286 = vst [vmem:[#allocation22 + $0x10] sm:$0xff] %v10396_v18  ;;  %287 = vst [vmem:[#allocation22 + $0x18] sm:$0xff] %v10396_v18 }
  0xcf   :  { %288 = vst [vmem:[#allocation22 + $0x20] sm:$0xff] %v10396_v18  ;;  %289 = vst [vmem:[#allocation22 + $0x28] sm:$0xff] %v10396_v18 }
  0xd0   :  { %290 = vst [vmem:[#allocation22 + $0x30] sm:$0xff] %v10396_v18  ;;  %291 = vst [vmem:[#allocation22 + $0x38] sm:$0xff] %v10396_v18 }
  0xd1   :  { %292 = vst [vmem:[#allocation22 + $0x40] sm:$0xff] %v10396_v18  ;;  %293 = vst [vmem:[#allocation22 + $0x48] sm:$0xff] %v10396_v18 }
  0xd2   :  { %294 = vst [vmem:[#allocation22 + $0x50] sm:$0xff] %v10396_v18  ;;  %295 = vst [vmem:[#allocation22 + $0x58] sm:$0xff] %v10396_v18 }
  0xd3   :  { %296 = vst [vmem:[#allocation22 + $0x60] sm:$0xff] %v10396_v18  ;;  %297 = vst [vmem:[#allocation22 + $0x68] sm:$0xff] %v10396_v18 }
  0xd4   :  { %298 = vst [vmem:[#allocation22 + $0x70] sm:$0xff] %v10396_v18  ;;  %299 = vst [vmem:[#allocation22 + $0x78] sm:$0xff] %v10396_v18 }
  0xd5   :  { %15337 = vst [vmem:[#allocation47_spill] sm:$0xff] %v10746_v19  ;;  %15338 = vst [vmem:[#allocation48_spill] sm:$0xff] %v10748_v20 }
  0xd6   :  { %15339 = vst [vmem:[#allocation49_spill] sm:$0xff] %v10750_v21  ;;  %15340 = vst [vmem:[#allocation50_spill] sm:$0xff] %v10752_v22 }
  0xd7   :  { %15341 = vst [vmem:[#allocation51_spill] sm:$0xff] %v10754_v23  ;;  %15342 = vst [vmem:[#allocation52_spill] sm:$0xff] %v10756_v24 }
  0xd8   :  { %15343 = vst [vmem:[#allocation53_spill] sm:$0xff] %v10758_v25  ;;  %15344 = vst [vmem:[#allocation54_spill] sm:$0xff] %v10760_v26 }
  0xd9   :  { %15345 = vst [vmem:[#allocation55_spill] sm:$0xff] %v10762_v27  ;;  %15346 = vst [vmem:[#allocation56_spill] sm:$0xff] %v10764_v28 }
  0xda   :  { %15347 = vst [vmem:[#allocation57_spill] sm:$0xff] %v10766_v29  ;;  %15348 = vst [vmem:[#allocation58_spill] sm:$0xff] %v10768_v30 }
  0xdb   :  { %15349 = vst [vmem:[#allocation59_spill] sm:$0xff] %v10770_v31  ;;  %15350 = vst [vmem:[#allocation60_spill] sm:$0xff] %v10772_v32 }
  0xdc   :  { %15351 = vst [vmem:[#allocation61_spill] sm:$0xff] %v10774_v33  ;;  %15352 = vst [vmem:[#allocation62_spill] sm:$0xff] %v10776_v34 }
  0xdd   :  { %15353 = vst [vmem:[#allocation63_spill] sm:$0xff] %v10778_v35  ;;  %15354 = vst [vmem:[#allocation64_spill] sm:$0xff] %v10780_v36 }
  0xde   :  { %15355 = vst [vmem:[#allocation65_spill] sm:$0xff] %v10782_v37  ;;  %15356 = vst [vmem:[#allocation66_spill] sm:$0xff] %v10784_v38 }
  0xdf   :  { %15357 = vst [vmem:[#allocation67_spill] sm:$0xff] %v10786_v39  ;;  %15358 = vst [vmem:[#allocation68_spill] sm:$0xff] %v10788_v40  ;;  %381 = sbr.rel (%p9156_p13) target bundleno = 544 (0x220), region = 85 }
  0xe0   :  { %15359 = vst [vmem:[#allocation69_spill] sm:$0xff] %v10790_v41  ;;  %15360 = vst [vmem:[#allocation70_spill] sm:$0xff] %v10792_v42 }
  0xe1   :  { %15361 = vst [vmem:[#allocation71_spill] sm:$0xff] %v10794_v43  ;;  %15362 = vst [vmem:[#allocation72_spill] sm:$0xff] %v10796_v44 }
  0xe2   :  { %15363 = vst [vmem:[#allocation73_spill] sm:$0xff] %v10798_v45  ;;  %15364 = vst [vmem:[#allocation74_spill] sm:$0xff] %v10800_v46 }
  0xe3   :  { %15365 = vst [vmem:[#allocation75_spill] sm:$0xff] %v10802_v47  ;;  %15366 = vst [vmem:[#allocation76_spill] sm:$0xff] %v10804_v48 }
  0xe4   :  { %15367 = vst [vmem:[#allocation77_spill] sm:$0xff] %v10806_v49  ;;  %15368 = vst [vmem:[#allocation78_spill] sm:$0xff] %v10808_v50 }
  0xe5   :  { %15369 = vst [vmem:[#allocation79_spill] sm:$0xff] %v10810_v51 }
  0xe6   :  { %v10816_v52 = vstv %s10613_s14  ;;  %v10819_v53 = vstv %s10615_s29  ;;  %v10834_v60 = vstv %s10694_s9  ;;  %v15157_v50 = vmov 1326507024  }
  0xe7   :  { %v383_v54 = vmul.f32 %v10816_v52, %v10617_v0  ;;  %v384_v55 = vmul.f32 %v10816_v52, %v10698_v2  ;;  %v394_v56 = vmul.f32 %v10819_v53, %v10732_v11  ;;  %v395_v57 = vmul.f32 %v10819_v53, %v10734_v12 }
  0xe8   :  { %v385_v58 = vmul.f32 %v10816_v52, %v10700_v3  ;;  %v396_v59 = vmul.f32 %v10819_v53, %v10736_v13  ;;  %v415_v63 = vmul.f32 %v10834_v60, %v10752_v22  ;;  %v416_v18 = vmul.f32 %v10834_v60, %v10754_v23 }
  0xe9   :  { %v404_v61 = vadd.f32 %v394_v56, %v383_v54  ;;  %v405_v62 = vadd.f32 %v395_v57, %v384_v55  ;;  %v417_v12 = vmul.f32 %v10834_v60, %v10756_v24 }
  0xea   :  { %v406_v1 = vadd.f32 %v396_v59, %v385_v58 }
  0xeb   :  { %v425_v11 = vadd.f32 %v415_v63, %v404_v61  ;;  %v426_v2 = vadd.f32 %v416_v18, %v405_v62  ;;  %v10866_v63 = vmul.f32 %v10816_v52, %v10708_v5 }
  0xec   :  { %v427_v3 = vadd.f32 %v417_v12, %v406_v1 }
  0xed   :  { %v10843_v0 = vadd.f32 %v425_v11, %v10772_v32  ;;  %v10846_v13 = vadd.f32 %v426_v2, %v10774_v33  ;;  %v386_v11 = vmul.f32 %v10816_v52, %v10706_v4  ;;  %v397_v2 = vmul.f32 %v10819_v53, %v10738_v14 }
  0xee   :  { %v10851_v56 = vadd.f32 %v427_v3, %v10776_v34  ;;  %v10870_v4 = vmul.f32 %v10816_v52, %v10714_v6 }
  0xef   :  { %15370 = vst [vmem:[#allocation80_spill] sm:$0xff] %v10843_v0  ;;  %15371 = vst [vmem:[#allocation81_spill] sm:$0xff] %v10846_v13  ;;  %v15108_v54 = vand.u32 2147483647, %v10843_v0  ;;  %v448_v55 = vand.u32 2139095040, %v10843_v0  ;;  %v551_v1 = vand.u32 2139095040, %v10846_v13 }
  0xf0   :  { %15372 = vst [vmem:[#allocation82_spill] sm:$0xff] %v10851_v56  ;;  %v15112_v59 = vand.u32 2147483647, %v10846_v13  ;;  %v654_v62 = vand.u32 2139095040, %v10851_v56 }
  0xf1   :  { %v449_v57 = vshrl.u32 %v448_v55, 23  ;;  %v452_v58 = vand.u32 8388607, %v15108_v54  ;;  %v552_v61 = vshrl.u32 %v551_v1, 23 }
  0xf2   :  { %v555_v3 = vand.u32 8388607, %v15112_v59  ;;  %v655_v33 = vshrl.u32 %v654_v62, 23  ;;  %v15146_v62 = vmov 2475754826  }
  0xf3   :  { %v9157_v12 = vadd.s32 4294967169, %v449_v57  ;;  %v453_v55 = vor.u32 8388608, %v452_v58  ;;  %v9161_v54 = vadd.s32 4294967169, %v552_v61  ;;  %v10872_v57 = vadd.f32 %v397_v2, %v386_v11 }
  0xf4   :  { %v556_v34 = vor.u32 8388608, %v555_v3  ;;  %v10878_v58 = vadd.s32 4294967169, %v655_v33  ;;  %v15141_v61 = vmov 683565275   ;;  %v15148_v2 = vmov 2131351028  }
  0xf5   :  { %v455_v18 = vadd.s32 1, %v9157_v12  ;;  %v558_v59 = vadd.s32 1, %v9161_v54  ;;  %v10874_v24 = vshll.u32 %v453_v55, 8  ;;  %v15153_v54 = vmov 2102212464  }
  0xf6   :  { %v10876_v5 = vshll.u32 %v556_v34, 8  ;;  %v15155_v55 = vmov 920167782  }
  0xf7   :  { %vm456_vm0 = vcmp.gt.s32.totalorder %v455_v18, 0  ;;  %vm559_vm1 = vcmp.gt.s32.totalorder %v558_v59, 0 }
  0xf8   :  { %v457_v1 = vsel %vm456_vm0, %v455_v18, 0  ;;  %v560_v46 = vsel %vm559_vm1, %v558_v59, 0 }
  0xf9   :  { %v458_v14 = vshrl.u32 %v457_v1, 5  ;;  %v459_v32 = vand.u32 31, %v457_v1  ;;  %v561_v44 = vshrl.u32 %v560_v46, 5 }
  0xfb   :  { %v460_v12 = vsub.s32 32, %v459_v32  ;;  %v462_v3 = vshll.u32 %v15141_v61, %v459_v32  ;;  %v465_v11 = vshll.u32 %v15146_v62, %v459_v32  ;;  %v468_v18 = vshll.u32 %v15148_v2, %v459_v32 }
  0xfc   :  { %v471_v1 = vshll.u32 %v15153_v54, %v459_v32  ;;  %v474_v6 = vshll.u32 %v15155_v55, %v459_v32  ;;  %vm477_vm2 = vcmp.lt.s32.totalorder %v458_v14, 1  ;;  %vm478_vm3 = vcmp.lt.s32.totalorder %v458_v14, 2 }
  0xfd   :  { %v461_v33 = vshrl.u32 %v15141_v61, %v460_v12  ;;  %v463_v34 = vshrl.u32 %v15146_v62, %v460_v12  ;;  %v466_v23 = vshrl.u32 %v15148_v2, %v460_v12  ;;  %v469_v22 = vshrl.u32 %v15153_v54, %v460_v12 }
  0xfe   :  { %v472_v51 = vshrl.u32 %v15155_v55, %v460_v12  ;;  %v475_v49 = vshrl.u32 %v15157_v50, %v460_v12  ;;  %vm479_vm4 = vcmp.lt.s32.totalorder %v458_v14, 3  ;;  %vm480_vm5 = vcmp.lt.s32.totalorder %v458_v14, 4 }
  0xff   :  { %v464_v48 = vor.u32 %v463_v34, %v462_v3  ;;  %v467_v47 = vor.u32 %v466_v23, %v465_v11  ;;  %v470_v32 = vor.u32 %v469_v22, %v468_v18  ;;  %v562_v62 = vand.u32 31, %v560_v46 }
 0x100   :  { %v473_v45 = vor.u32 %v472_v51, %v471_v1  ;;  %v476_v61 = vor.u32 %v475_v49, %v474_v6  ;;  %v15373_v49 = vmov 683565275   ;;  %v15375_v18 = vmov 2131351028  }
 0x101   :  { %v481_v2 = vsel %vm477_vm2, %v461_v33, %v464_v48  ;;  %v482_v43 = vsel %vm480_vm5, %v470_v32, 2102212464  ;;  %v485_v54 = vsel %vm477_vm2, %v464_v48, %v467_v47  ;;  %v489_v55 = vsel %vm477_vm2, %v467_v47, %v470_v32 }
 0x102   :  { %v483_v12 = vsel %vm479_vm4, %v467_v47, %v482_v43  ;;  %v486_v50 = vsel %vm480_vm5, %v473_v45, 920167782  ;;  %v490_v42 = vsel %vm480_vm5, %v476_v61, 1326507024  ;;  %v563_v3 = vsub.s32 32, %v562_v62 }
 0x103   :  { %v484_v22 = vsel %vm478_vm3, %v481_v2, %v483_v12  ;;  %v487_v23 = vsel %vm479_vm4, %v470_v32, %v486_v50  ;;  %v491_v6 = vsel %vm479_vm4, %v473_v45, %v490_v42  ;;  %v565_v46 = vshll.u32 %v15373_v49, %v562_v62 }
 0x104   :  { %v488_v51 = vsel %vm478_vm3, %v485_v54, %v487_v23  ;;  %v492_v59 = vsel %vm478_vm3, %v489_v55, %v491_v6  ;;  %v500_v48 = vmul.u32 %v10874_v24, %v484_v22  ;;  %v564_v11 = vshrl.u32 %v15373_v49, %v563_v3 }
 0x105   :  { %v10905_v43 = vmul.u32.u64.low %v10874_v24, %v492_v59  ;;  %v10906_v47 = vmul.u32.u64.high %v10874_v24, %v492_v59, %v10905_v43  ;;  %v10909_v61 = vmul.u32.u64.low %v10874_v24, %v488_v51  ;;  %v10910_v2 = vmul.u32.u64.high %v10874_v24, %v488_v51, %v10909_v61 }
 0x106   :  { %v15374_v42 = vmov 2475754826   ;;  %v569_v14 = vshrl.u32 %v15375_v18, %v563_v3  ;;  %v571_v54 = vshll.u32 %v15375_v18, %v562_v62  ;;  %v15376_v1 = vmov 2102212464  }
 0x107   :  { %v566_v45 = vshrl.u32 %v15374_v42, %v563_v3  ;;  %v568_v50 = vshll.u32 %v15374_v42, %v562_v62  ;;  %v572_v55 = vshrl.u32 %v15376_v1, %v563_v3  ;;  %v574_v33 = vshll.u32 %v15376_v1, %v562_v62 }
 0x108   :  { %v15377_v34 = vmov 920167782   ;;  %v15378_v23 = vmov 1326507024   ;;  %vm580_vm6 = vcmp.lt.s32.totalorder %v561_v44, 1  ;;  %vm502_vm7 = vc.u32 %v10906_v47, %v10909_v61 }
 0x109   :  { %v575_v32 = vshrl.u32 %v15377_v34, %v563_v3  ;;  %v577_v12 = vshll.u32 %v15377_v34, %v562_v62  ;;  %v567_v22 = vor.u32 %v566_v45, %v565_v46  ;;  %v570_v24 = vor.u32 %v569_v14, %v568_v50 }
 0x10a   :  { %v578_v6 = vshrl.u32 %v15378_v23, %v563_v3  ;;  %v503_v51 = vadd.s32 1, %v10910_v2  ;;  %v573_v59 = vor.u32 %v572_v55, %v571_v54  ;;  %v661_v43 = vadd.s32 1, %v10878_v58 }
 0x10b   :  { %v576_v13 = vor.u32 %v575_v32, %v574_v33  ;;  %vm581_vm8 = vcmp.lt.s32.totalorder %v561_v44, 2  ;;  %vm582_vm9 = vcmp.lt.s32.totalorder %v561_v44, 3  ;;  %vm583_vm10 = vcmp.lt.s32.totalorder %v561_v44, 4 }
 0x10c   :  { %v579_v41 = vor.u32 %v578_v6, %v577_v12  ;;  %v504_v40 = vsel %vm502_vm7, %v503_v51, %v10910_v2  ;;  %v584_v62 = vsel %vm580_vm6, %v564_v11, %v567_v22  ;;  %v588_v3 = vsel %vm580_vm6, %v567_v22, %v570_v24 }
 0x10d   :  { %v505_v46 = vadd.s32 %v504_v40, %v500_v48  ;;  %v585_v45 = vsel %vm583_vm10, %v573_v59, 2102212464  ;;  %v589_v50 = vsel %vm583_vm10, %v576_v13, 920167782  ;;  %v592_v14 = vsel %vm580_vm6, %v570_v24, %v573_v59 }
 0x10e   :  { %v586_v54 = vsel %vm582_vm9, %v570_v24, %v585_v45  ;;  %v590_v58 = vsel %vm582_vm9, %v573_v59, %v589_v50  ;;  %v593_v55 = vsel %vm583_vm10, %v579_v41, 1326507024  ;;  %vm662_vm11 = vcmp.gt.s32.totalorder %v661_v43, 0 }
 0x10f   :  { %v418_v33 = vmul.f32 %v10834_v60, %v10758_v25  ;;  %v506_v2 = vadd.s32 536870912, %v505_v46  ;;  %v591_v32 = vsel %vm581_vm8, %v588_v3, %v590_v58  ;;  %v594_v11 = vsel %vm582_vm9, %v576_v13, %v593_v55 }
 0x110   :  { %v587_v40 = vsel %vm581_vm8, %v584_v62, %v586_v54  ;;  %v595_v48 = vsel %vm581_vm8, %v592_v14, %v594_v11  ;;  %v10939_v12 = vmul.u32.u64.low %v10876_v5, %v591_v32  ;;  %v10940_v22 = vmul.u32.u64.high %v10876_v5, %v591_v32, %v10939_v12 }
 0x111   :  { %v10943_v24 = vshrl.u32 %v506_v2, 30  ;;  %v10946_v41 = vmul.u32.u64.low %v10876_v5, %v595_v48  ;;  %v10947_v6 = vmul.u32.u64.high %v10876_v5, %v595_v48, %v10946_v41  ;;  %v663_v51 = vsel %vm662_vm11, %v661_v43, 0 }
 0x112   :  { %v10951_v59 = vmul.f32 %v10816_v52, %v10716_v7  ;;  %v10955_v13 = vmul.f32 %v10816_v52, %v10722_v8  ;;  %v10959_v44 = vmul.f32 %v10816_v52, %v10724_v9  ;;  %v665_v62 = vand.u32 31, %v663_v51 }
 0x113   :  { %v398_v3 = vmul.f32 %v10819_v53, %v10740_v15  ;;  %v428_v45 = vadd.f32 %v418_v33, %v10872_v57  ;;  %v508_v43 = vshll.u32 %v10943_v24, 30  ;;  %v603_v50 = vmul.u32 %v10876_v5, %v587_v40 }
 0x114   :  { %v10968_v14 = vmul.f32 %v10816_v52, %v10730_v10  ;;  %v399_v54 = vmul.f32 %v10819_v53, %v10742_v16  ;;  %v606_v58 = vadd.s32 1, %v10940_v22  ;;  %v15167_v55 = vand.u32 2147483647, %v10851_v56 }
 0x115   :  { %v400_v2 = vmul.f32 %v10819_v53, %v10744_v17  ;;  %v10976_v32 = vsub.s32 %v505_v46, %v508_v43  ;;  %vm605_vm12 = vc.u32 %v10947_v6, %v10939_v12  ;;  %v666_v5 = vsub.s32 32, %v665_v62 }
 0x116   :  { %v401_v52 = vmul.f32 %v10819_v53, %v10746_v19  ;;  %v402_v57 = vmul.f32 %v10819_v53, %v10748_v20  ;;  %v10986_v33 = vmul.f32 %v10819_v53, %v10750_v21  ;;  %v607_v11 = vsel %vm605_vm12, %v606_v58, %v10940_v22 }
 0x117   :  { %v10990_v40 = vadd.f32 %v398_v3, %v10866_v63  ;;  %v10993_v46 = vadd.f32 %v428_v45, %v10778_v35  ;;  %v511_v48 = vsub.s32 0, %v10976_v32  ;;  %v608_v41 = vadd.s32 %v607_v11, %v603_v50 }
 0x118   :  { %v658_v43 = vand.u32 8388607, %v15167_v55  ;;  %v664_v19 = vshrl.u32 %v663_v51, 5  ;;  %v668_v20 = vshll.u32 %v15373_v49, %v665_v62  ;;  %v677_v53 = vshll.u32 %v15376_v1, %v665_v62 }
 0x119   :  { %v9158_v21 = vmin.u32 %v511_v48, %v10976_v32  ;;  %v669_v22 = vshrl.u32 %v15374_v42, %v666_v5  ;;  %v671_v63 = vshll.u32 %v15374_v42, %v665_v62  ;;  %v672_v3 = vshrl.u32 %v15375_v18, %v666_v5 }
 0x11a   :  { %v609_v45 = vadd.s32 536870912, %v608_v41  ;;  %v674_v58 = vshll.u32 %v15375_v18, %v665_v62  ;;  %v675_v50 = vshrl.u32 %v15376_v1, %v666_v5  ;;  %v678_v11 = vshrl.u32 %v15377_v34, %v666_v5 }
 0x11b   :  { %v11008_v51 = vadd.f32 %v399_v54, %v10870_v4  ;;  %v513_v55 = vclz %v9158_v21  ;;  %v680_v35 = vshll.u32 %v15377_v34, %v665_v62  ;;  %v681_v48 = vshrl.u32 %v15378_v23, %v666_v5 }
 0x11c   :  { %v11012_v17 = vshrl.u32 %v609_v45, 30  ;;  %v659_v16 = vor.u32 8388608, %v658_v43  ;;  %v679_v10 = vor.u32 %v678_v11, %v677_v53  ;;  %v757_v15 = vand.u32 2139095040, %v10993_v46 }
 0x11d   :  { %v9159_v9 = vadd.s32 4294967294, %v513_v55  ;;  %v670_v8 = vor.u32 %v669_v22, %v668_v20  ;;  %v673_v7 = vor.u32 %v672_v3, %v671_v63  ;;  %vm686_vm13 = vcmp.lt.s32.totalorder %v664_v19, 4 }
 0x11e   :  { %v611_v25 = vshll.u32 %v11012_v17, 30  ;;  %v676_v56 = vor.u32 %v675_v50, %v674_v58  ;;  %v682_v4 = vor.u32 %v681_v48, %v680_v35  ;;  %vm683_vm14 = vcmp.lt.s32.totalorder %v664_v19, 1 }
 0x11f   :  { %vm9160_vm15 = vcmp.lt.s32.totalorder %v9159_v9, 0  ;;  %v667_v21 = vshrl.u32 %v15373_v49, %v666_v5  ;;  %vm685_vm0 = vcmp.lt.s32.totalorder %v664_v19, 3  ;;  %v692_v62 = vsel %vm686_vm13, %v679_v10, 920167782 }
 0x120   :  { %v516_v54 = vsel %vm9160_vm15, 0, %v9159_v9  ;;  %v11018_v43 = vsub.s32 %v608_v41, %v611_v25  ;;  %v699_v53 = vshll.u32 %v659_v16, 8  ;;  %v758_v45 = vshrl.u32 %v757_v15, 23 }
 0x121   :  { %v521_v55 = vsub.s32 4294967266, %v516_v54  ;;  %vm684_vm1 = vcmp.lt.s32.totalorder %v664_v19, 2  ;;  %v688_v20 = vsel %vm686_vm13, %v676_v56, 2102212464  ;;  %v691_v22 = vsel %vm683_vm14, %v670_v8, %v673_v7 }
 0x122   :  { %v614_v35 = vsub.s32 0, %v11018_v43  ;;  %v693_v63 = vsel %vm685_vm0, %v676_v56, %v692_v62  ;;  %v695_v5 = vsel %vm683_vm14, %v673_v7, %v676_v56  ;;  %v696_v3 = vsel %vm686_vm13, %v682_v4, 1326507024 }
 0x123   :  { %v410_v9 = vadd.f32 %v400_v2, %v10951_v59  ;;  %v501_v16 = vadd.s32 %v10909_v61, %v10906_v47  ;;  %v687_v15 = vsel %vm683_vm14, %v667_v21, %v670_v8  ;;  %v697_v25 = vsel %vm685_vm0, %v679_v10, %v696_v3 }
 0x124   :  { %v517_v41 = vsub.s32 32, %v516_v54  ;;  %v9162_v58 = vmin.u32 %v614_v35, %v11018_v43  ;;  %v689_v50 = vsel %vm685_vm0, %v673_v7, %v688_v20  ;;  %v694_v11 = vsel %vm684_vm1, %v691_v22, %v693_v63 }
 0x125   :  { %v411_v56 = vadd.f32 %v401_v52, %v10955_v13  ;;  %v412_v48 = vadd.f32 %v402_v57, %v10959_v44  ;;  %v522_v4 = vadd.s32 127, %v521_v55  ;;  %v698_v59 = vsel %vm684_vm1, %v695_v5, %v697_v25 }
 0x126   :  { %v616_v2 = vclz %v9162_v58  ;;  %v11037_v47 = vmul.u32.u64.low %v699_v53, %v698_v59  ;;  %v11038_v61 = vmul.u32.u64.high %v699_v53, %v698_v59, %v11037_v47  ;;  %v9169_v8 = vadd.s32 4294967169, %v758_v45 }
 0x127   :  { %v419_v10 = vmul.f32 %v10834_v60, %v10760_v26  ;;  %v690_v21 = vsel %vm684_vm1, %v687_v15, %v689_v50  ;;  %v11043_v7 = vmul.u32.u64.low %v699_v53, %v694_v11  ;;  %v11044_v62 = vmul.u32.u64.high %v699_v53, %v694_v11, %v11043_v7 }
 0x128   :  { %v518_v13 = vshll.u32 %v10976_v32, %v516_v54  ;;  %v519_v44 = vshrl.u32 %v501_v16, %v517_v41  ;;  %v9163_v52 = vadd.s32 4294967294, %v616_v2  ;;  %v764_v57 = vadd.s32 1, %v9169_v8 }
 0x129   :  { %v420_v55 = vmul.f32 %v10834_v60, %v10762_v27  ;;  %v421_v45 = vmul.f32 %v10834_v60, %v10764_v28  ;;  %v422_v20 = vmul.f32 %v10834_v60, %v10766_v29  ;;  %v523_v19 = vshll.u32 %v522_v4, 23 }
 0x12a   :  { %v706_v22 = vmul.u32 %v699_v53, %v690_v21  ;;  %vm708_vm2 = vc.u32 %v11038_v61, %v11043_v7  ;;  %v15180_v35 = vand.u32 2147483647, %v10993_v46  ;;  %vm765_vm3 = vcmp.gt.s32.totalorder %v764_v57, 0 }
 0x12b   :  { %v423_v32 = vmul.f32 %v10834_v60, %v10768_v30  ;;  %vm9164_vm4 = vcmp.lt.s32.totalorder %v9163_v52, 0  ;;  %v709_v54 = vadd.s32 1, %v11044_v62  ;;  %v766_v63 = vsel %vm765_vm3, %v764_v57, 0 }
 0x12c   :  { %v413_v5 = vadd.f32 %v10986_v33, %v10968_v14  ;;  %v424_v3 = vmul.f32 %v10834_v60, %v10770_v31  ;;  %v429_v53 = vadd.f32 %v419_v10, %v10990_v40  ;;  %v520_v16 = vor.u32 %v519_v44, %v518_v13 }
 0x12d   :  { %v524_v15 = vor.u32 4788187, %v523_v19  ;;  %v710_v25 = vsel %vm708_vm2, %v709_v54, %v11044_v62  ;;  %v768_v41 = vand.u32 31, %v766_v63  ;;  %v430_v58 = vadd.f32 %v420_v55, %v11008_v51 }
 0x12e   :  { %v11067_v50 = vsel %vm9164_vm4, 0, %v9163_v52  ;;  %v711_v11 = vadd.s32 %v710_v25, %v706_v22  ;;  %v761_v4 = vand.u32 8388607, %v15180_v35  ;;  %v11071_v59 = vadd.f32 %v421_v45, %v410_v9 }
 0x12f   :  { %v11073_v14 = vadd.f32 %v422_v20, %v411_v56  ;;  %v11075_v60 = vadd.f32 %v423_v32, %v412_v48  ;;  %v769_v33 = vsub.s32 32, %v768_v41  ;;  %v11077_v40 = vadd.f32 %v424_v3, %v413_v5 }
 0x130   :  { %v11080_v2 = vadd.f32 %v429_v53, %v10780_v36  ;;  %v527_v47 = vcvt.s32.f32 %v520_v16  ;;  %v712_v51 = vadd.s32 536870912, %v711_v11  ;;  %v525_v8 = vand.u32 2147483647, %v524_v15 }
 0x131   :  { %v624_v10 = vsub.s32 4294967266, %v11067_v50  ;;  %v771_v21 = vshll.u32 %v15373_v49, %v768_v41  ;;  %v772_v9 = vshrl.u32 %v15374_v42, %v769_v33  ;;  %v762_v56 = vor.u32 8388608, %v761_v4 }
 0x132   :  { %v11085_v62 = vshrl.u32 %v712_v51, 30  ;;  %v774_v48 = vshll.u32 %v15374_v42, %v768_v41  ;;  %v775_v13 = vshrl.u32 %v15375_v18, %v769_v33  ;;  %v604_v44 = vadd.s32 %v10939_v12, %v10947_v6 }
 0x133   :  { %v767_v52 = vshrl.u32 %v766_v63, 5  ;;  %v777_v57 = vshll.u32 %v15375_v18, %v768_v41  ;;  %v778_v55 = vshrl.u32 %v15376_v1, %v769_v33  ;;  %v620_v45 = vsub.s32 32, %v11067_v50 }
 0x134   :  { %v714_v20 = vshll.u32 %v11085_v62, 30  ;;  %v780_v19 = vshll.u32 %v15376_v1, %v768_v41  ;;  %v860_v22 = vand.u32 2139095040, %v11080_v2  ;;  %v528_v32 = vmul.f32 %v527_v47, %v525_v8 }
 0x135   :  { %v625_v54 = vadd.s32 127, %v624_v10  ;;  %v773_v5 = vor.u32 %v772_v9, %v771_v21  ;;  %v781_v3 = vshrl.u32 %v15377_v34, %v769_v33  ;;  %v776_v12 = vor.u32 %v775_v13, %v774_v48 }
 0x136   :  { %v11098_v53 = vsub.s32 %v711_v11, %v714_v20  ;;  %v783_v6 = vshll.u32 %v15377_v34, %v768_v41  ;;  %v784_v63 = vshrl.u32 %v15378_v23, %v769_v33  ;;  %v621_v16 = vshll.u32 %v11018_v43, %v11067_v50 }
 0x137   :  { %v779_v15 = vor.u32 %v778_v55, %v777_v57  ;;  %v782_v25 = vor.u32 %v781_v3, %v780_v19  ;;  %vm786_vm5 = vcmp.lt.s32.totalorder %v767_v52, 1  ;;  %v622_v4 = vshrl.u32 %v604_v44, %v620_v45 }
 0x138   :  { %v717_v47 = vsub.s32 0, %v11098_v53  ;;  %vm788_vm6 = vcmp.lt.s32.totalorder %v767_v52, 3  ;;  %vm789_vm7 = vcmp.lt.s32.totalorder %v767_v52, 4  ;;  %v626_v51 = vshll.u32 %v625_v54, 23 }
 0x139   :  { %v770_v11 = vshrl.u32 %v15373_v49, %v769_v33  ;;  %vm787_vm8 = vcmp.lt.s32.totalorder %v767_v52, 2  ;;  %v795_v8 = vsel %vm789_vm7, %v782_v25, 920167782  ;;  %v785_v10 = vor.u32 %v784_v63, %v783_v6 }
 0x13a   :  { %v9166_v41 = vmin.u32 %v717_v47, %v11098_v53  ;;  %v791_v21 = vsel %vm789_vm7, %v779_v15, 2102212464  ;;  %v794_v43 = vsel %vm786_vm5, %v773_v5, %v776_v12  ;;  %v11111_v50 = vadd.f32 %v430_v58, %v10782_v37 }
 0x13b   :  { %vm447_vm9 = vcmp.lt.s32.totalorder %v10843_v0, 0  ;;  %v796_v9 = vsel %vm788_vm6, %v779_v15, %v795_v8  ;;  %v802_v48 = vshll.u32 %v762_v56, 8  ;;  %v15379_v33 = vand.u32 2147483647, %v10843_v0 }
 0x13c   :  { %v529_v44 = vxor.u32 2147483648, %v528_v32  ;;  %v719_v57 = vclz %v9166_v41  ;;  %v861_v55 = vshrl.u32 %v860_v22, 23  ;;  %v790_v45 = vsel %vm786_vm5, %v770_v11, %v773_v5 }
 0x13d   :  { %vm11117_vm10 = vcmp.le.f32.partialorder %v15379_v33, 0.7853982  ;;  %v792_v20 = vsel %vm788_vm6, %v776_v12, %v791_v21  ;;  %v797_v58 = vsel %vm787_vm8, %v794_v43, %v796_v9  ;;  %v798_v19 = vsel %vm786_vm5, %v776_v12, %v779_v15 }
 0x13e   :  { %v623_v54 = vor.u32 %v622_v4, %v621_v16  ;;  %v627_v3 = vor.u32 4788187, %v626_v51  ;;  %v9167_v56 = vadd.s32 4294967294, %v719_v57  ;;  %v799_v6 = vsel %vm789_vm7, %v785_v10, 1326507024 }
 0x13f   :  { %v531_v63 = vsub.s32 4, %v10943_v24  ;;  %v800_v47 = vsel %vm788_vm6, %v782_v25, %v799_v6  ;;  %v11128_v8 = vmul.u32.u64.low %v802_v48, %v797_v58  ;;  %v11129_v41 = vmul.u32.u64.high %v802_v48, %v797_v58, %v11128_v8 }
 0x140   :  { %vm9168_vm11 = vcmp.lt.s32.totalorder %v9167_v56, 0  ;;  %v793_v22 = vsel %vm787_vm8, %v790_v45, %v792_v20  ;;  %v801_v5 = vsel %vm787_vm8, %v798_v19, %v800_v47  ;;  %v9173_v11 = vadd.s32 4294967169, %v861_v55 }
 0x141   :  { %v707_v12 = vadd.s32 %v11043_v7, %v11038_v61  ;;  %v722_v16 = vsel %vm9168_vm11, 0, %v9167_v56  ;;  %v11136_v15 = vmul.u32.u64.low %v802_v48, %v801_v5  ;;  %v11137_v4 = vmul.u32.u64.high %v802_v48, %v801_v5, %v11136_v15  ;;  %v15383_v56 = vld [vmem:[#allocation69_spill] sm:$0xff] }
 0x142   :  { %v530_v25 = vsel %vm447_vm9, %v529_v44, %v528_v32  ;;  %v628_v51 = vand.u32 2147483647, %v627_v3  ;;  %v630_v10 = vcvt.s32.f32 %v623_v54  ;;  %v727_v21 = vsub.s32 4294967266, %v722_v16  ;;  %v15382_v3 = vld [vmem:[#allocation68_spill] sm:$0xff] }
 0x143   :  { %v723_v43 = vsub.s32 32, %v722_v16  ;;  %v809_v9 = vmul.u32 %v802_v48, %v793_v22  ;;  %v812_v33 = vadd.s32 1, %v11129_v41  ;;  %v867_v52 = vadd.s32 1, %v9173_v11 }
 0x144   :  { %v11144_v57 = vadd.f32 %v11071_v59, %v10784_v38  ;;  %v11148_v61 = vadd.f32 %v11073_v14, %v10786_v39  ;;  %v728_v7 = vadd.s32 127, %v727_v21  ;;  %v15179_v55 = vand.u32 2147483647, %v11080_v2 }
 0x145   :  { %v532_v32 = vsel %vm447_vm9, %v531_v63, %v10943_v24  ;;  %v533_v48 = vsel %vm11117_vm10, %v10843_v0, %v530_v25  ;;  %vm811_vm12 = vc.u32 %v11137_v4, %v11128_v8  ;;  %vm868_vm13 = vcmp.gt.s32.totalorder %v867_v52, 0 }
 0x146   :  { %v631_v59 = vmul.f32 %v630_v10, %v628_v51  ;;  %v724_v44 = vshll.u32 %v11098_v53, %v722_v16  ;;  %v813_v14 = vsel %vm811_vm12, %v812_v33, %v11129_v41  ;;  %v869_v45 = vsel %vm868_vm13, %v867_v52, 0  ;;  %v15384_v53 = vld [vmem:[#allocation81_spill] sm:$0xff] }
 0x147   :  { %v725_v20 = vshrl.u32 %v707_v12, %v723_v43  ;;  %v729_v58 = vshll.u32 %v728_v7, 23  ;;  %v814_v19 = vadd.s32 %v813_v14, %v809_v9  ;;  %v871_v54 = vand.u32 31, %v869_v45 }
 0x148   :  { %v11163_v24 = vadd.f32 %v11075_v60, %v15382_v3  ;;  %v11167_v6 = vadd.f32 %v11077_v40, %v15383_v56  ;;  %v11171_v63 = vsel %vm11117_vm10, 0, %v532_v32  ;;  %vm550_vm14 = vcmp.lt.s32.totalorder %v15384_v53, 0 }
 0x149   :  { %v11175_v47 = vand.u32 3, %v11171_v63  ;;  %v15385_v41 = vand.u32 2147483647, %v15384_v53  ;;  %v815_v60 = vadd.s32 536870912, %v814_v19  ;;  %v872_v5 = vsub.s32 32, %v871_v54 }
 0x14a   :  { %9928 = vcosq.f32 %v533_v48  ;;  %v632_v40 = vxor.u32 2147483648, %v631_v59  ;;  %v864_v13 = vand.u32 8388607, %v15179_v55  ;;  %v726_v12 = vor.u32 %v725_v20, %v724_v44 }
 0x14b   :  { %vm11179_vm15 = vcmp.le.f32.partialorder %v15385_v41, 0.7853982  ;;  %v730_v16 = vor.u32 4788187, %v729_v58  ;;  %v11186_v15 = vshrl.u32 %v815_v60, 30  ;;  %v870_v25 = vshrl.u32 %v869_v45, 5 }
 0x14c   :  { %v874_v51 = vshll.u32 %v15373_v49, %v871_v54  ;;  %v875_v10 = vshrl.u32 %v15374_v42, %v872_v5  ;;  %v877_v21 = vshll.u32 %v15374_v42, %v871_v54  ;;  %v878_v43 = vshrl.u32 %v15375_v18, %v872_v5 }
 0x14d   :  { %v817_v9 = vshll.u32 %v11186_v15, 30  ;;  %v880_v33 = vshll.u32 %v15375_v18, %v871_v54  ;;  %v881_v52 = vshrl.u32 %v15376_v1, %v872_v5  ;;  %v883_v7 = vshll.u32 %v15376_v1, %v871_v54 }
 0x14e   :  { %9930 = vsinq.f32 %v533_v48  ;;  %v633_v32 = vsel %vm550_vm14, %v632_v40, %v631_v59  ;;  %v865_v44 = vor.u32 8388608, %v864_v13  ;;  %v884_v14 = vshrl.u32 %v15377_v34, %v872_v5  ;;  %v15388_v13 = vld [vmem:[#allocation82_spill] sm:$0xff] }
 0x14f   :  { %v733_v45 = vcvt.s32.f32 %v726_v12  ;;  %v11199_v20 = vsub.s32 %v814_v19, %v817_v9  ;;  %v886_v58 = vshll.u32 %v15377_v34, %v871_v54  ;;  %v887_v3 = vshrl.u32 %v15378_v23, %v872_v5 }
 0x150   :  { %v731_v56 = vand.u32 2147483647, %v730_v16  ;;  %v873_v41 = vshrl.u32 %v15373_v49, %v872_v5  ;;  %v876_v60 = vor.u32 %v875_v10, %v874_v51  ;;  %v879_v55 = vor.u32 %v878_v43, %v877_v21 }
 0x151   :  { %v820_v48 = vsub.s32 0, %v11199_v20  ;;  %v882_v35 = vor.u32 %v881_v52, %v880_v33  ;;  %v885_v11 = vor.u32 %v884_v14, %v883_v7  ;;  %vm889_vm0 = vcmp.lt.s32.totalorder %v870_v25, 1 }
 0x152   :  { %v737_v59 = vsub.s32 4, %v11085_v62  ;;  %v888_v40 = vor.u32 %v887_v3, %v886_v58  ;;  %vm892_vm1 = vcmp.lt.s32.totalorder %v870_v25, 4  ;;  %v963_v19 = vand.u32 2139095040, %v11111_v50 }
 0x153   :  { %v636_v54 = vsel %vm11179_vm15, %v15384_v53, %v633_v32  ;;  %vm653_vm2 = vcmp.lt.s32.totalorder %v15388_v13, 0  ;;  %v9170_v5 = vmin.u32 %v820_v48, %v11199_v20  ;;  %vm891_vm3 = vcmp.lt.s32.totalorder %v870_v25, 3 }
 0x154   :  { %v905_v12 = vshll.u32 %v865_v44, 8  ;;  %v11212_v16 = vpop.eup %9928  ;;  %v734_v51 = vmul.f32 %v733_v45, %v731_v56  ;;  %vm890_vm4 = vcmp.lt.s32.totalorder %v870_v25, 2  ;;  %v894_v10 = vsel %vm892_vm1, %v882_v35, 2102212464 }
 0x155   :  { %v897_v21 = vsel %vm889_vm0, %v876_v60, %v879_v55  ;;  %v822_v43 = vclz %v9170_v5  ;;  %v893_v9 = vsel %vm889_vm0, %v873_v41, %v876_v60  ;;  %v898_v33 = vsel %vm892_vm1, %v885_v11, 920167782 }
 0x156   :  { %v901_v52 = vsel %vm889_vm0, %v879_v55, %v882_v35  ;;  %vm540_vm5 = vcmp.eq.s32.totalorder %v11175_v47, 0  ;;  %v895_v7 = vsel %vm891_vm3, %v879_v55, %v894_v10  ;;  %v899_v32 = vsel %vm891_vm3, %v882_v35, %v898_v33 }
 0x157   :  { %v902_v44 = vsel %vm892_vm1, %v888_v40, 1326507024  ;;  %v964_v14 = vshrl.u32 %v963_v19, 23  ;;  %9932 = vcosq.f32 %v636_v54  ;;  %v15389_v45 = vand.u32 2147483647, %v15388_v13 }
 0x158   :  { %v9171_v3 = vadd.s32 4294967294, %v822_v43  ;;  %v900_v56 = vsel %vm890_vm4, %v897_v21, %v899_v32  ;;  %v903_v41 = vsel %vm891_vm3, %v885_v11, %v902_v44  ;;  %v11231_v60 = vpop.eup %9930  ;;  %v896_v19 = vsel %vm890_vm4, %v893_v9, %v895_v7 }
 0x159   :  { %vm11225_vm6 = vcmp.le.f32.partialorder %v15389_v45, 0.7853982  ;;  %v904_v55 = vsel %vm890_vm4, %v901_v52, %v903_v41  ;;  %v11234_v35 = vmul.u32.u64.low %v905_v12, %v900_v56  ;;  %v11235_v48 = vmul.u32.u64.high %v905_v12, %v900_v56, %v11234_v35 }
 0x15a   :  { %v9177_v40 = vadd.s32 4294967169, %v964_v14  ;;  %vm9172_vm7 = vcmp.lt.s32.totalorder %v9171_v3, 0  ;;  %v11239_v5 = vmul.u32.u64.low %v905_v12, %v904_v55  ;;  %v11240_v10 = vmul.u32.u64.high %v905_v12, %v904_v55, %v11239_v5 }
 0x15b   :  { %vm543_vm8 = vcmp.eq.s32.totalorder %v11175_v47, 2  ;;  %v735_v21 = vxor.u32 2147483648, %v734_v51  ;;  %v825_v43 = vsel %vm9172_vm7, 0, %v9171_v3  ;;  %v15392_v33 = vsub.s32 4, %v11012_v17 }
 0x15c   :  { %v970_v11 = vadd.s32 1, %v9177_v40  ;;  %v810_v32 = vadd.s32 %v11128_v8, %v11137_v4  ;;  %v826_v44 = vsub.s32 32, %v825_v43  ;;  %v830_v25 = vsub.s32 4294967266, %v825_v43 }
 0x15d   :  { %v635_v52 = vsel %vm550_vm14, %v15392_v33, %v11012_v17  ;;  %v738_v9 = vsel %vm653_vm2, %v737_v59, %v11085_v62  ;;  %v912_v7 = vmul.u32 %v905_v12, %v896_v19  ;;  %v915_v14 = vadd.s32 1, %v11235_v48 }
 0x15e   :  { %vm971_vm9 = vcmp.gt.s32.totalorder %v970_v11, 0  ;;  %v15182_v45 = vxor.u32 2147483648, %v11231_v60  ;;  %v15181_v3 = vxor.u32 2147483648, %v11212_v16  ;;  %9934 = vsinq.f32 %v636_v54 }
 0x15f   :  { %v831_v56 = vadd.s32 127, %v830_v25  ;;  %v736_v17 = vsel %vm653_vm2, %v735_v21, %v734_v51  ;;  %vm914_vm10 = vc.u32 %v11240_v10, %v11234_v35  ;;  %v15183_v8 = vand.u32 2147483647, %v11111_v50 }
 0x160   :  { %v972_v4 = vsel %vm971_vm9, %v970_v11, 0  ;;  %v827_v62 = vshll.u32 %v11199_v20, %v825_v43  ;;  %v828_v59 = vshrl.u32 %v810_v32, %v826_v44  ;;  %v916_v41 = vsel %vm914_vm10, %v915_v14, %v11235_v48 }
 0x161   :  { %v832_v12 = vshll.u32 %v831_v56, 23  ;;  %v11265_v55 = vsel %vm11179_vm15, 0, %v635_v52  ;;  %v11269_v54 = vsel %vm11225_vm6, 0, %v738_v9  ;;  %v917_v51 = vadd.s32 %v916_v41, %v912_v7  ;;  %v11271_v19 = vpop.eup %9932 }
 0x162   :  { %v974_v40 = vand.u32 31, %v972_v4  ;;  %15393 = vst [vmem:[#allocation83_spill] sm:$0xff] %v11271_v19  ;;  %v11278_v20 = vsel %vm540_vm5, %v11212_v16, %v15182_v45  ;;  %v11285_v22 = vsel %vm543_vm8, %v15181_v3, %v11231_v60  ;;  %v11288_v48 = vand.u32 3, %v11265_v55 }
 0x163   :  { %v11291_v5 = vand.u32 3, %v11269_v54  ;;  %v739_v21 = vsel %vm11225_vm6, %v15388_v13, %v736_v17  ;;  %v918_v43 = vadd.s32 536870912, %v917_v51  ;;  %v967_v11 = vand.u32 8388607, %v15183_v8 }
 0x164   :  { %v975_v33 = vsub.s32 32, %v974_v40  ;;  %v829_v52 = vor.u32 %v828_v59, %v827_v62  ;;  %v833_v32 = vor.u32 4788187, %v832_v12  ;;  %v11298_v44 = vshrl.u32 %v972_v4, 5 }
 0x165   :  { %v977_v25 = vshll.u32 %v15373_v49, %v974_v40  ;;  %v11301_v9 = vshrl.u32 %v918_v43, 30  ;;  %v980_v14 = vshll.u32 %v15374_v42, %v974_v40  ;;  %v983_v56 = vshll.u32 %v15375_v18, %v974_v40 }
 0x166   :  { %v978_v7 = vshrl.u32 %v15374_v42, %v975_v33  ;;  %v981_v58 = vshrl.u32 %v15375_v18, %v975_v33  ;;  %v984_v17 = vshrl.u32 %v15376_v1, %v975_v33  ;;  %v986_v41 = vshll.u32 %v15376_v1, %v974_v40 }
 0x167   :  { %v987_v62 = vshrl.u32 %v15377_v34, %v975_v33  ;;  %9936 = vcosq.f32 %v739_v21  ;;  %v920_v59 = vshll.u32 %v11301_v9, 30  ;;  %v989_v12 = vshll.u32 %v15377_v34, %v974_v40 }
 0x168   :  { %v11313_v43 = vpop.eup %9934  ;;  %vm539_vm11 = vcmp.lt.s32.totalorder %v11175_v47, 2  ;;  %vm646_vm12 = vcmp.eq.s32.totalorder %v11288_v48, 2  ;;  %9938 = vsinq.f32 %v739_v21  ;;  %v836_v3 = vcvt.s32.f32 %v829_v52 }
 0x169   :  { %15394 = vst [vmem:[#allocation84_spill] sm:$0xff] %v11313_v43  ;;  %v968_v45 = vor.u32 8388608, %v967_v11  ;;  %v990_v8 = vshrl.u32 %v15378_v23, %v975_v33  ;;  %vm643_vm13 = vcmp.eq.s32.totalorder %v11288_v48, 0  ;;  %v11319_v39 = vsub.s32 %v917_v51, %v920_v59 }
 0x16a   :  { %v976_v4 = vshrl.u32 %v15373_v49, %v975_v33  ;;  %v979_v38 = vor.u32 %v978_v7, %v977_v25  ;;  %v982_v37 = vor.u32 %v981_v58, %v980_v14  ;;  %v834_v40 = vand.u32 2147483647, %v833_v32 }
 0x16b   :  { %v985_v36 = vor.u32 %v984_v17, %v983_v56  ;;  %v988_v31 = vor.u32 %v987_v62, %v986_v41  ;;  %vm992_vm14 = vcmp.lt.s32.totalorder %v11298_v44, 1  ;;  %v15192_v30 = vxor.u32 2147483648, %v11313_v43 }
 0x16c   :  { %vm756_vm15 = vcmp.lt.s32.totalorder %v10993_v46, 0  ;;  %v923_v21 = vsub.s32 0, %v11319_v39  ;;  %v991_v11 = vor.u32 %v990_v8, %v989_v12  ;;  %vm995_vm0 = vcmp.lt.s32.totalorder %v11298_v44, 4 }
 0x16d   :  { %vm994_vm1 = vcmp.lt.s32.totalorder %v11298_v44, 3  ;;  %v997_v51 = vsel %vm995_vm0, %v985_v36, 2102212464  ;;  %v1008_v33 = vshll.u32 %v968_v45, 8  ;;  %v1066_v52 = vand.u32 2139095040, %v11144_v57 }
 0x16e   :  { %vm642_vm2 = vcmp.lt.s32.totalorder %v11288_v48, 2  ;;  %v9174_v32 = vmin.u32 %v923_v21, %v11319_v39  ;;  %vm993_vm3 = vcmp.lt.s32.totalorder %v11298_v44, 2  ;;  %v996_v25 = vsel %vm992_vm14, %v976_v4, %v979_v38 }
 0x16f   :  { %v1000_v8 = vsel %vm992_vm14, %v979_v38, %v982_v37  ;;  %v15395_v7 = vand.u32 2147483647, %v10993_v46  ;;  %v837_v45 = vmul.f32 %v836_v3, %v834_v40  ;;  %v998_v58 = vsel %vm994_vm1, %v982_v37, %v997_v51 }
 0x170   :  { %v1001_v56 = vsel %vm995_vm0, %v988_v31, 920167782  ;;  %v1004_v17 = vsel %vm992_vm14, %v982_v37, %v985_v36  ;;  %vm537_vm5 = vweird.f32 %v10843_v0  ;;  %v840_v38 = vsub.s32 4, %v11186_v15 }
 0x171   :  { %vm11340_vm4 = vcmp.le.f32.partialorder %v15395_v7, 0.7853982  ;;  %v925_v41 = vclz %v9174_v32  ;;  %v1002_v62 = vsel %vm994_vm1, %v985_v36, %v1001_v56  ;;  %v1005_v3 = vsel %vm995_vm0, %v991_v11, 1326507024  ;;  %v11364_v40 = vpop.eup %9936 }
 0x172   :  { %vm640_vm6 = vweird.f32 %v15384_v53  ;;  %vm746_vm7 = vcmp.eq.s32.totalorder %v11291_v5, 0  ;;  %v999_v4 = vsel %vm993_vm3, %v996_v25, %v998_v58  ;;  %v1003_v37 = vsel %vm993_vm3, %v1000_v8, %v1002_v62  ;;  %15398 = vst [vmem:[#allocation85_spill] sm:$0xff] %v11364_v40  ;;  %v11372_v32 = vpop.eup %9938 }
 0x173   :  { %v1006_v59 = vsel %vm994_vm1, %v988_v31, %v1005_v3  ;;  %v1067_v12 = vshrl.u32 %v1066_v52, 23  ;;  %v9175_v36 = vadd.s32 4294967294, %v925_v41  ;;  %15399 = vst [vmem:[#allocation86_spill] sm:$0xff] %v11372_v32  ;;  %v838_v25 = vxor.u32 2147483648, %v837_v45 }
 0x174   :  { %v1007_v21 = vsel %vm993_vm3, %v1004_v17, %v1006_v59  ;;  %v11368_v11 = vmul.u32.u64.low %v1008_v33, %v1003_v37  ;;  %v11369_v51 = vmul.u32.u64.high %v1008_v33, %v1003_v37, %v11368_v11  ;;  %v546_v31 = vsel %vm539_vm11, %v11278_v20, %v11285_v22 }
 0x175   :  { %v11374_v7 = vmul.u32.u64.low %v1008_v33, %v1007_v21  ;;  %v11375_v58 = vmul.u32.u64.high %v1008_v33, %v1007_v21, %v11374_v7  ;;  %v9181_v8 = vadd.s32 4294967169, %v1067_v12  ;;  %v15400_v44 = vxor.u32 2147483648, %v11271_v19 }
 0x176   :  { %vm749_vm8 = vcmp.eq.s32.totalorder %v11291_v5, 2  ;;  %vm9176_vm9 = vcmp.lt.s32.totalorder %v9175_v36, 0  ;;  %v645_v56 = vsel %vm643_vm13, %v11271_v19, %v15192_v30  ;;  %v1015_v41 = vmul.u32 %v1008_v33, %v999_v4 }
 0x177   :  { %v648_v52 = vsel %vm646_vm12, %v15400_v44, %v11313_v43  ;;  %v928_v17 = vsel %vm9176_vm9, 0, %v9175_v36  ;;  %v1073_v62 = vadd.s32 1, %v9181_v8  ;;  %v913_v47 = vadd.s32 %v11234_v35, %v11240_v10 }
 0x178   :  { %v929_v20 = vsub.s32 32, %v928_v17  ;;  %v933_v22 = vsub.s32 4294967266, %v928_v17  ;;  %v1018_v3 = vadd.s32 1, %v11369_v51  ;;  %v839_v37 = vsel %vm756_vm15, %v838_v25, %v837_v45 }
 0x179   :  { %v841_v59 = vsel %vm756_vm15, %v840_v38, %v11186_v15  ;;  %vm1017_vm10 = vc.u32 %v11375_v58, %v11368_v11  ;;  %vm1074_vm11 = vcmp.gt.s32.totalorder %v1073_v62, 0  ;;  %v15191_v33 = vxor.u32 2147483648, %v11372_v32 }
 0x17a   :  { %v15190_v4 = vxor.u32 2147483648, %v11364_v40  ;;  %v934_v35 = vadd.s32 127, %v933_v22  ;;  %v1019_v10 = vsel %vm1017_vm10, %v1018_v3, %v11369_v51  ;;  %v649_v12 = vsel %vm642_vm2, %v645_v56, %v648_v52 }
 0x17b   :  { %v1020_v36 = vadd.s32 %v1019_v10, %v1015_v41  ;;  %v15193_v45 = vand.u32 2147483647, %v11144_v57  ;;  %v1075_v21 = vsel %vm1074_vm11, %v1073_v62, 0  ;;  %v842_v15 = vsel %vm11340_vm4, %v10993_v46, %v839_v37 }
 0x17c   :  { %v930_v38 = vshll.u32 %v11319_v39, %v928_v17  ;;  %v931_v25 = vshrl.u32 %v913_v47, %v929_v20  ;;  %v935_v7 = vshll.u32 %v934_v35, 23  ;;  %v11414_v8 = vsel %vm537_vm5, nan, %v546_v31 }
 0x17d   :  { %v11418_v48 = vsel %vm11340_vm4, 0, %v841_v59  ;;  %v1021_v51 = vadd.s32 536870912, %v1020_v36  ;;  %v1077_v44 = vand.u32 31, %v1075_v21  ;;  %v11422_v52 = vsel %vm640_vm6, nan, %v649_v12 }
 0x17e   :  { %v11429_v39 = vsel %vm746_vm7, %v11364_v40, %v15191_v33  ;;  %v11436_v14 = vsel %vm749_vm8, %v15190_v4, %v11372_v32  ;;  %v11439_v31 = vand.u32 3, %v11418_v48  ;;  %9940 = vcosq.f32 %v842_v15 }
 0x17f   :  { %v11441_v56 = vshrl.u32 %v1021_v51, 30  ;;  %v1070_v17 = vand.u32 8388607, %v15193_v45  ;;  %v1078_v41 = vsub.s32 32, %v1077_v44  ;;  %v932_v62 = vor.u32 %v931_v25, %v930_v38 }
 0x180   :  { %v936_v47 = vor.u32 4788187, %v935_v7  ;;  %v1076_v20 = vshrl.u32 %v1075_v21, 5  ;;  %v1080_v22 = vshll.u32 %v15373_v49, %v1077_v44  ;;  %v1083_v59 = vshll.u32 %v15374_v42, %v1077_v44 }
 0x181   :  { %v1023_v3 = vshll.u32 %v11441_v56, 30  ;;  %v1081_v37 = vshrl.u32 %v15374_v42, %v1078_v41  ;;  %v1086_v35 = vshll.u32 %v15375_v18, %v1077_v44  ;;  %v1084_v10 = vshrl.u32 %v15375_v18, %v1078_v41 }
 0x182   :  { %v1087_v12 = vshrl.u32 %v15376_v1, %v1078_v41  ;;  %v1089_v51 = vshll.u32 %v15376_v1, %v1077_v44  ;;  %v1090_v38 = vshrl.u32 %v15377_v34, %v1078_v41  ;;  %9942 = vsinq.f32 %v842_v15 }
 0x183   :  { %v11454_v21 = vsub.s32 %v1020_v36, %v1023_v3  ;;  %v1071_v25 = vor.u32 8388608, %v1070_v17  ;;  %v1169_v7 = vand.u32 2139095040, %v11148_v61  ;;  %v937_v4 = vand.u32 2147483647, %v936_v47 }
 0x184   :  { %v939_v33 = vcvt.s32.f32 %v932_v62  ;;  %v1079_v30 = vshrl.u32 %v15373_v49, %v1078_v41  ;;  %v1092_v45 = vshll.u32 %v15377_v34, %v1077_v44  ;;  %vm745_vm12 = vcmp.lt.s32.totalorder %v11291_v5, 2 }
 0x185   :  { %vm859_vm13 = vcmp.lt.s32.totalorder %v11080_v2, 0  ;;  %v1026_v29 = vsub.s32 0, %v11454_v21  ;;  %v1082_v28 = vor.u32 %v1081_v37, %v1080_v22  ;;  %v1085_v27 = vor.u32 %v1084_v10, %v1083_v59 }
 0x186   :  { %v1093_v36 = vshrl.u32 %v15378_v23, %v1078_v41  ;;  %v943_v15 = vsub.s32 4, %v11301_v9  ;;  %v1088_v17 = vor.u32 %v1087_v12, %v1086_v35  ;;  %v1091_v3 = vor.u32 %v1090_v38, %v1089_v51 }
 0x187   :  { %vm1095_vm14 = vcmp.lt.s32.totalorder %v1076_v20, 1  ;;  %v9178_v62 = vmin.u32 %v1026_v29, %v11454_v21  ;;  %vm1098_vm15 = vcmp.lt.s32.totalorder %v1076_v20, 4  ;;  %v11465_v47 = vshll.u32 %v1071_v25, 8 }
 0x188   :  { %v1170_v44 = vshrl.u32 %v1169_v7, 23  ;;  %vm743_vm0 = vweird.f32 %v15388_v13  ;;  %v940_v26 = vmul.f32 %v939_v33, %v937_v4  ;;  %v1094_v53 = vor.u32 %v1093_v36, %v1092_v45  ;;  %v11468_v22 = vpop.eup %9940 }
 0x189   :  { %vm1096_vm1 = vcmp.lt.s32.totalorder %v1076_v20, 2  ;;  %vm1097_vm2 = vcmp.lt.s32.totalorder %v1076_v20, 3  ;;  %15401 = vst [vmem:[#allocation87_spill] sm:$0xff] %v11468_v22  ;;  %v15402_v41 = vand.u32 2147483647, %v11080_v2  ;;  %v1028_v59 = vclz %v9178_v62 }
 0x18a   :  { %v1099_v29 = vsel %vm1095_vm14, %v1079_v30, %v1082_v28  ;;  %v1100_v35 = vsel %vm1098_vm15, %v1088_v17, 2102212464  ;;  %v1103_v10 = vsel %vm1095_vm14, %v1082_v28, %v1085_v27  ;;  %v1104_v33 = vsel %vm1098_vm15, %v1091_v3, 920167782 }
 0x18b   :  { %vm11472_vm3 = vcmp.le.f32.partialorder %v15402_v41, 0.7853982  ;;  %v1101_v12 = vsel %vm1097_vm2, %v1085_v27, %v1100_v35  ;;  %v1107_v4 = vsel %vm1095_vm14, %v1085_v27, %v1088_v17  ;;  %v1108_v45 = vsel %vm1098_vm15, %v1094_v53, 1326507024 }
 0x18c   :  { %vm849_vm4 = vcmp.eq.s32.totalorder %v11439_v31, 0  ;;  %v1016_v51 = vadd.s32 %v11368_v11, %v11375_v58  ;;  %v9179_v38 = vadd.s32 4294967294, %v1028_v59  ;;  %v1105_v25 = vsel %vm1097_vm2, %v1088_v17, %v1104_v33  ;;  %v11487_v41 = vpop.eup %9942 }
 0x18d   :  { %v1109_v7 = vsel %vm1097_vm2, %v1091_v3, %v1108_v45  ;;  %v941_v30 = vxor.u32 2147483648, %v940_v26  ;;  %v1106_v36 = vsel %vm1096_vm1, %v1103_v10, %v1105_v25  ;;  %v9185_v62 = vadd.s32 4294967169, %v1170_v44  ;;  %15405 = vst [vmem:[#allocation88_spill] sm:$0xff] %v11487_v41 }
 0x18e   :  { %v1110_v28 = vsel %vm1096_vm1, %v1107_v4, %v1109_v7  ;;  %vm9180_vm7 = vcmp.lt.s32.totalorder %v9179_v38, 0  ;;  %v1102_v27 = vsel %vm1096_vm1, %v1099_v29, %v1101_v12  ;;  %vm852_vm8 = vcmp.eq.s32.totalorder %v11439_v31, 2 }
 0x18f   :  { %v11491_v53 = vmul.u32.u64.low %v11465_v47, %v1110_v28  ;;  %v11492_v35 = vmul.u32.u64.high %v11465_v47, %v1110_v28, %v11491_v53  ;;  %v1031_v0 = vsel %vm9180_vm7, 0, %v9179_v38  ;;  %v1176_v17 = vadd.s32 1, %v9185_v62 }
 0x190   :  { %v11495_v11 = vmul.u32.u64.low %v11465_v47, %v1106_v36  ;;  %v11496_v58 = vmul.u32.u64.high %v11465_v47, %v1106_v36, %v11495_v11  ;;  %v1032_v3 = vsub.s32 32, %v1031_v0  ;;  %v1033_v44 = vshll.u32 %v11454_v21, %v1031_v0 }
 0x191   :  { %v1036_v59 = vsub.s32 4294967266, %v1031_v0  ;;  %v752_v20 = vsel %vm745_vm12, %v11429_v39, %v11436_v14  ;;  %v942_v29 = vsel %vm859_vm13, %v941_v30, %v940_v26  ;;  %v944_v10 = vsel %vm859_vm13, %v943_v15, %v11301_v9 }
 0x192   :  { %vm1177_vm9 = vcmp.gt.s32.totalorder %v1176_v17, 0  ;;  %v1034_v12 = vshrl.u32 %v1016_v51, %v1032_v3  ;;  %v1118_v4 = vmul.u32 %v11465_v47, %v1102_v27  ;;  %vm1120_vm10 = vc.u32 %v11492_v35, %v11495_v11 }
 0x193   :  { %v1037_v33 = vadd.s32 127, %v1036_v59  ;;  %v15201_v0 = vxor.u32 2147483648, %v11487_v41  ;;  %v15200_v5 = vxor.u32 2147483648, %v11468_v22  ;;  %vm962_vm11 = vcmp.lt.s32.totalorder %v11111_v50, 0 }
 0x194   :  { %v1121_v26 = vadd.s32 1, %v11496_v58  ;;  %v1178_v39 = vsel %vm1177_vm9, %v1176_v17, 0  ;;  %v11519_v9 = vsel %vm743_vm0, nan, %v752_v20  ;;  %v1035_v14 = vor.u32 %v1034_v12, %v1033_v44 }
 0x195   :  { %v1038_v21 = vshll.u32 %v1037_v33, 23  ;;  %v15202_v15 = vand.u32 2147483647, %v11148_v61  ;;  %v945_v47 = vsel %vm11472_vm3, %v11080_v2, %v942_v29  ;;  %v11527_v45 = vsel %vm11472_vm3, 0, %v944_v10 }
 0x196   :  { %v1122_v51 = vsel %vm1120_vm10, %v1121_v26, %v11496_v58  ;;  %v1180_v38 = vand.u32 31, %v1178_v39  ;;  %v11531_v25 = vand.u32 3, %v11527_v45  ;;  %v15406_v7 = vand.u32 2147483647, %v11111_v50 }
 0x197   :  { %v1039_v36 = vor.u32 4788187, %v1038_v21  ;;  %v1042_v28 = vcvt.s32.f32 %v1035_v14  ;;  %v1123_v62 = vadd.s32 %v1122_v51, %v1118_v4  ;;  %v11544_v37 = vsel %vm849_vm4, %v11468_v22, %v15201_v0 }
 0x198   :  { %vm11535_vm12 = vcmp.le.f32.partialorder %v15406_v7, 0.7853982  ;;  %v11551_v27 = vsel %vm852_vm8, %v15200_v5, %v11487_v41  ;;  %v1046_v53 = vsub.s32 4, %v11441_v56  ;;  %v1181_v58 = vsub.s32 32, %v1180_v38 }
 0x199   :  { %9944 = vcosq.f32 %v945_v47  ;;  %v1040_v17 = vand.u32 2147483647, %v1039_v36  ;;  %v1124_v3 = vadd.s32 536870912, %v1123_v62  ;;  %v1173_v44 = vand.u32 8388607, %v15202_v15 }
 0x19a   :  { %v1183_v59 = vshll.u32 %v15373_v49, %v1180_v38  ;;  %v1184_v20 = vshrl.u32 %v15374_v42, %v1181_v58  ;;  %v1186_v29 = vshll.u32 %v15374_v42, %v1180_v38  ;;  %v1187_v10 = vshrl.u32 %v15375_v18, %v1181_v58 }
 0x19b   :  { %v1043_v12 = vmul.f32 %v1042_v28, %v1040_v17  ;;  %v11560_v33 = vshrl.u32 %v1124_v3, 30  ;;  %v1179_v4 = vshrl.u32 %v1178_v39, 5  ;;  %v1192_v26 = vshll.u32 %v15376_v1, %v1180_v38 }
 0x19c   :  { %v1189_v14 = vshll.u32 %v15375_v18, %v1180_v38  ;;  %v1190_v21 = vshrl.u32 %v15376_v1, %v1181_v58  ;;  %v1193_v51 = vshrl.u32 %v15377_v34, %v1181_v58  ;;  %v1195_v7 = vshll.u32 %v15377_v34, %v1180_v38 }
 0x19d   :  { %9946 = vsinq.f32 %v945_v47  ;;  %v1044_v36 = vxor.u32 2147483648, %v1043_v12  ;;  %v1126_v5 = vshll.u32 %v11560_v33, 30  ;;  %v1174_v0 = vor.u32 8388608, %v1173_v44 }
 0x19e   :  { %v1185_v15 = vor.u32 %v1184_v20, %v1183_v59  ;;  %v1188_v28 = vor.u32 %v1187_v10, %v1186_v29  ;;  %v1194_v17 = vor.u32 %v1193_v51, %v1192_v26  ;;  %v1196_v39 = vshrl.u32 %v15378_v23, %v1181_v58 }
 0x19f   :  { %v1045_v3 = vsel %vm962_vm11, %v1044_v36, %v1043_v12  ;;  %v11571_v13 = vsub.s32 %v1123_v62, %v1126_v5  ;;  %v1182_v22 = vshrl.u32 %v15373_v49, %v1181_v58  ;;  %vm1198_vm13 = vcmp.lt.s32.totalorder %v1179_v4, 1 }
 0x1a0   :  { %vm848_vm14 = vcmp.lt.s32.totalorder %v11439_v31, 2  ;;  %v1047_v47 = vsel %vm962_vm11, %v1046_v53, %v11441_v56  ;;  %v1191_v38 = vor.u32 %v1190_v21, %v1189_v14  ;;  %v1197_v44 = vor.u32 %v1196_v39, %v1195_v7 }
 0x1a1   :  { %vm1201_vm15 = vcmp.lt.s32.totalorder %v1179_v4, 4  ;;  %v1129_v59 = vsub.s32 0, %v11571_v13  ;;  %vm1199_vm1 = vcmp.lt.s32.totalorder %v1179_v4, 2  ;;  %vm1200_vm2 = vcmp.lt.s32.totalorder %v1179_v4, 3 }
 0x1a2   :  { %v1214_v20 = vshll.u32 %v1174_v0, 8  ;;  %v1048_v5 = vsel %vm11535_vm12, %v11111_v50, %v1045_v3  ;;  %v1203_v62 = vsel %vm1201_vm15, %v1191_v38, 2102212464  ;;  %v1206_v58 = vsel %vm1198_vm13, %v1185_v15, %v1188_v28 }
 0x1a3   :  { %v1207_v29 = vsel %vm1201_vm15, %v1194_v17, 920167782  ;;  %v11585_v10 = vpop.eup %9944  ;;  %vm952_vm3 = vcmp.eq.s32.totalorder %v11531_v25, 0  ;;  %vm955_vm4 = vcmp.eq.s32.totalorder %v11531_v25, 2  ;;  %v11591_v56 = vsel %vm11535_vm12, 0, %v1047_v47 }
 0x1a4   :  { %15409 = vst [vmem:[#allocation89_spill] sm:$0xff] %v11585_v10  ;;  %15410 = vst [vmem:[#allocation90_spill] sm:$0xff] %v11591_v56  ;;  %vm1065_vm7 = vcmp.lt.s32.totalorder %v11144_v57, 0  ;;  %v9182_v0 = vmin.u32 %v1129_v59, %v11571_v13  ;;  %v1202_v53 = vsel %vm1198_vm13, %v1182_v22, %v1185_v15  ;;  %v1272_v12 = vand.u32 2139095040, %v11163_v24 }
 0x1a5   :  { %v1204_v26 = vsel %vm1200_vm2, %v1188_v28, %v1203_v62  ;;  %v1208_v14 = vsel %vm1200_vm2, %v1191_v38, %v1207_v29  ;;  %v1210_v21 = vsel %vm1198_vm13, %v1188_v28, %v1191_v38  ;;  %v1211_v51 = vsel %vm1201_vm15, %v1197_v44, 1326507024 }
 0x1a6   :  { %9948 = vcosq.f32 %v1048_v5  ;;  %v1131_v30 = vclz %v9182_v0  ;;  %v1209_v7 = vsel %vm1199_vm1, %v1206_v58, %v1208_v14  ;;  %v1212_v36 = vsel %vm1200_vm2, %v1194_v17, %v1211_v51 }
 0x1a7   :  { %v15411_v39 = vand.u32 2147483647, %v11144_v57  ;;  %v1205_v15 = vsel %vm1199_vm1, %v1202_v53, %v1204_v26  ;;  %v1213_v3 = vsel %vm1199_vm1, %v1210_v21, %v1212_v36  ;;  %v11614_v38 = vpop.eup %9946  ;;  %v1273_v17 = vshrl.u32 %v1272_v12, 23 }
 0x1a8   :  { %v11611_v47 = vmul.u32.u64.low %v1214_v20, %v1209_v7  ;;  %v11612_v28 = vmul.u32.u64.high %v1214_v20, %v1209_v7, %v11611_v47  ;;  %15414 = vst [vmem:[#allocation91_spill] sm:$0xff] %v11614_v38  ;;  %v9183_v44 = vadd.s32 4294967294, %v1131_v30  ;;  %v11620_v58 = vand.u32 3, %v11591_v56 }
 0x1a9   :  { %vm11605_vm8 = vcmp.le.f32.partialorder %v15411_v39, 0.7853982  ;;  %v11616_v59 = vmul.u32.u64.low %v1214_v20, %v1213_v3  ;;  %v11617_v62 = vmul.u32.u64.high %v1214_v20, %v1213_v3, %v11616_v59  ;;  %v1119_v29 = vadd.s32 %v11495_v11, %v11492_v35 }
 0x1aa   :  { %v1149_v0 = vsub.s32 4, %v11560_v33  ;;  %v15208_v4 = vand.u32 2147483647, %v11163_v24  ;;  %v15206_v53 = vxor.u32 2147483648, %v11585_v10  ;;  %9950 = vsinq.f32 %v1048_v5 }
 0x1ab   :  { %vm9184_vm9 = vcmp.lt.s32.totalorder %v9183_v44, 0  ;;  %v9189_v26 = vadd.s32 4294967169, %v1273_v17  ;;  %v15207_v14 = vxor.u32 2147483648, %v11614_v38  ;;  %v1221_v51 = vmul.u32 %v1214_v20, %v1205_v15 }
 0x1ac   :  { %v1134_v21 = vsel %vm9184_vm9, 0, %v9183_v44  ;;  %v1224_v12 = vadd.s32 1, %v11612_v28  ;;  %v11633_v35 = vsel %vm848_vm14, %v11544_v37, %v11551_v27  ;;  %vm1058_vm10 = vcmp.eq.s32.totalorder %v11620_v58, 2 }
 0x1ad   :  { %v1135_v11 = vsub.s32 32, %v1134_v21  ;;  %v1136_v30 = vshll.u32 %v11571_v13, %v1134_v21  ;;  %v1139_v7 = vsub.s32 4294967266, %v1134_v21  ;;  %v1150_v5 = vsel %vm1065_vm7, %v1149_v0, %v11560_v33 }
 0x1ae   :  { %vm1223_vm11 = vc.u32 %v11617_v62, %v11611_v47  ;;  %v1279_v20 = vadd.s32 1, %v9189_v26  ;;  %v1276_v31 = vand.u32 8388607, %v15208_v4  ;;  %v11649_v13 = vsel %vm952_vm3, %v11585_v10, %v15207_v14 }
 0x1af   :  { %v1137_v36 = vshrl.u32 %v1119_v29, %v1135_v11  ;;  %v1140_v39 = vadd.s32 127, %v1139_v7  ;;  %v1225_v15 = vsel %vm1223_vm11, %v1224_v12, %v11612_v28  ;;  %v11656_v37 = vsel %vm955_vm4, %v15206_v53, %v11614_v38 }
 0x1b0   :  { %v1226_v27 = vadd.s32 %v1225_v15, %v1221_v51  ;;  %vm1280_vm12 = vcmp.gt.s32.totalorder %v1279_v20, 0  ;;  %v11658_v33 = vpop.eup %9948  ;;  %vm1055_vm13 = vcmp.eq.s32.totalorder %v11620_v58, 0  ;;  %v11663_v44 = vsel %vm11605_vm8, 0, %v1150_v5 }
 0x1b1   :  { %v1138_v3 = vor.u32 %v1137_v36, %v1136_v30  ;;  %v1141_v28 = vshll.u32 %v1140_v39, 23  ;;  %v1281_v59 = vsel %vm1280_vm12, %v1279_v20, 0  ;;  %v1375_v26 = vand.u32 2139095040, %v11167_v6 }
 0x1b2   :  { %v1227_v17 = vadd.s32 536870912, %v1226_v27  ;;  %v1283_v29 = vand.u32 31, %v1281_v59  ;;  %v11668_v12 = vadd.s32 %v11611_v47, %v11617_v62  ;;  %v1277_v11 = vor.u32 8388608, %v1276_v31 }
 0x1b3   :  { %v1142_v21 = vor.u32 4788187, %v1141_v28  ;;  %v1145_v51 = vcvt.s32.f32 %v1138_v3  ;;  %v1282_v36 = vshrl.u32 %v1281_v59, 5  ;;  %v1376_v10 = vshrl.u32 %v1375_v26, 23 }
 0x1b4   :  { %v11671_v7 = vshrl.u32 %v1227_v17, 30  ;;  %v1284_v5 = vsub.s32 32, %v1283_v29  ;;  %v11673_v39 = vpop.eup %9950  ;;  %v1286_v15 = vshll.u32 %v15373_v49, %v1283_v29  ;;  %v1289_v53 = vshll.u32 %v15374_v42, %v1283_v29 }
 0x1b5   :  { %v1143_v20 = vand.u32 2147483647, %v1142_v21  ;;  %v1292_v28 = vshll.u32 %v15375_v18, %v1283_v29  ;;  %v1295_v62 = vshll.u32 %v15376_v1, %v1283_v29  ;;  %v1298_v31 = vshll.u32 %v15377_v34, %v1283_v29 }
 0x1b6   :  { %v1229_v3 = vshll.u32 %v11671_v7, 30  ;;  %v1287_v47 = vshrl.u32 %v15374_v42, %v1284_v5  ;;  %v1290_v59 = vshrl.u32 %v15375_v18, %v1284_v5  ;;  %v1293_v14 = vshrl.u32 %v15376_v1, %v1284_v5 }
 0x1b7   :  { %v1146_v17 = vmul.f32 %v1145_v51, %v1143_v20  ;;  %v1296_v21 = vshrl.u32 %v15377_v34, %v1284_v5  ;;  %v1299_v30 = vshrl.u32 %v15378_v23, %v1284_v5  ;;  %v15415_v38 = vxor.u32 2147483648, %v11658_v33 }
 0x1b8   :  { %v11686_v0 = vsub.s32 %v1226_v27, %v1229_v3  ;;  %v1285_v20 = vshrl.u32 %v15373_v49, %v1284_v5  ;;  %v11695_v41 = vshll.u32 %v1277_v11, 8  ;;  %vm951_vm14 = vcmp.lt.s32.totalorder %v11531_v25, 2 }
 0x1b9   :  { %v1060_v29 = vsel %vm1058_vm10, %v15415_v38, %v11673_v39  ;;  %v1147_v51 = vxor.u32 2147483648, %v1146_v17  ;;  %vm1054_vm15 = vcmp.lt.s32.totalorder %v11620_v58, 2  ;;  %v1288_v3 = vor.u32 %v1287_v47, %v1286_v15 }
 0x1ba   :  { %v1232_v27 = vsub.s32 0, %v11686_v0  ;;  %v1291_v4 = vor.u32 %v1290_v59, %v1289_v53  ;;  %v1294_v26 = vor.u32 %v1293_v14, %v1292_v28  ;;  %v1297_v40 = vor.u32 %v1296_v21, %v1295_v62 }
 0x1bb   :  { %v1148_v56 = vsel %vm1065_vm7, %v1147_v51, %v1146_v17  ;;  %v1300_v32 = vor.u32 %v1299_v30, %v1298_v31  ;;  %vm1301_vm1 = vcmp.lt.s32.totalorder %v1282_v36, 1  ;;  %v15416_v38 = vxor.u32 2147483648, %v11673_v39 }
 0x1bc   :  { %v9186_v5 = vmin.u32 %v1232_v27, %v11686_v0  ;;  %v1252_v19 = vsub.s32 4, %v11671_v7  ;;  %v9193_v43 = vadd.s32 4294967169, %v1376_v10  ;;  %vm846_vm2 = vweird.f32 %v10993_v46 }
 0x1bd   :  { %v1057_v11 = vsel %vm1055_vm13, %v11658_v33, %v15416_v38  ;;  %v1151_v53 = vsel %vm11605_vm8, %v11144_v57, %v1148_v56  ;;  %vm1302_vm3 = vcmp.lt.s32.totalorder %v1282_v36, 2  ;;  %vm1303_vm4 = vcmp.lt.s32.totalorder %v1282_v36, 3 }
 0x1be   :  { %vm1304_vm7 = vcmp.lt.s32.totalorder %v1282_v36, 4  ;;  %vm949_vm9 = vweird.f32 %v11080_v2  ;;  %vm1052_vm10 = vweird.f32 %v11111_v50  ;;  %vm1168_vm11 = vcmp.lt.s32.totalorder %v11148_v61, 0 }
 0x1bf   :  { %v1234_v14 = vclz %v9186_v5  ;;  %v1305_v30 = vsel %vm1301_vm1, %v1285_v20, %v1288_v3  ;;  %v1306_v15 = vsel %vm1304_vm7, %v1294_v26, 2102212464  ;;  %v1309_v10 = vsel %vm1301_vm1, %v1288_v3, %v1291_v4 }
 0x1c0   :  { %v1307_v28 = vsel %vm1303_vm4, %v1291_v4, %v1306_v15  ;;  %v1310_v47 = vsel %vm1304_vm7, %v1297_v40, 920167782  ;;  %v1313_v56 = vsel %vm1301_vm1, %v1291_v4, %v1294_v26  ;;  %v1314_v22 = vsel %vm1304_vm7, %v1300_v32, 1326507024 }
 0x1c1   :  { %9952 = vcosq.f32 %v1151_v53  ;;  %v9187_v62 = vadd.s32 4294967294, %v1234_v14  ;;  %v1311_v31 = vsel %vm1303_vm4, %v1294_v26, %v1310_v47  ;;  %v1315_v17 = vsel %vm1303_vm4, %v1297_v40, %v1314_v22 }
 0x1c2   :  { %9954 = vsinq.f32 %v1151_v53  ;;  %v1308_v59 = vsel %vm1302_vm3, %v1305_v30, %v1307_v28  ;;  %v1312_v21 = vsel %vm1302_vm3, %v1309_v10, %v1311_v31  ;;  %v1316_v51 = vsel %vm1302_vm3, %v1313_v56, %v1315_v17 }
 0x1c3   :  { %vm9188_vm8 = vcmp.lt.s32.totalorder %v9187_v62, 0  ;;  %v11726_v20 = vmul.u32.u64.low %v11695_v41, %v1316_v51  ;;  %v11727_v27 = vmul.u32.u64.high %v11695_v41, %v1316_v51, %v11726_v20  ;;  %v1382_v4 = vadd.s32 1, %v9193_v43 }
 0x1c4   :  { %v1237_v32 = vsel %vm9188_vm8, 0, %v9187_v62  ;;  %v11730_v3 = vmul.u32.u64.low %v11695_v41, %v1312_v21  ;;  %v11731_v38 = vmul.u32.u64.high %v11695_v41, %v1312_v21, %v11730_v3  ;;  %v15417_v40 = vand.u32 2147483647, %v11167_v6 }
 0x1c5   :  { %v1238_v5 = vsub.s32 32, %v1237_v32  ;;  %v1239_v53 = vshll.u32 %v11686_v0, %v1237_v32  ;;  %v1242_v36 = vsub.s32 4294967266, %v1237_v32  ;;  %vm1383_vm12 = vcmp.gt.s32.totalorder %v1382_v4, 0 }
 0x1c6   :  { %v1379_v26 = vand.u32 8388607, %v15417_v40  ;;  %v958_v14 = vsel %vm951_vm14, %v11649_v13, %v11656_v37  ;;  %v1061_v43 = vsel %vm1054_vm15, %v1057_v11, %v1060_v29  ;;  %v11744_v30 = vand.u32 3, %v11663_v44 }
 0x1c7   :  { %v1384_v15 = vsel %vm1383_vm12, %v1382_v4, 0  ;;  %v1240_v10 = vshrl.u32 %v11668_v12, %v1238_v5  ;;  %v1243_v28 = vadd.s32 127, %v1242_v36  ;;  %v1324_v47 = vmul.u32 %v11695_v41, %v1308_v59  ;;  %v15421_v4 = vld [vmem:[#allocation70_spill] sm:$0xff] }
 0x1c8   :  { %vm1326_vm13 = vc.u32 %v11727_v27, %v11730_v3  ;;  %v1253_v25 = vsel %vm1168_vm11, %v1252_v19, %v11671_v7  ;;  %v1327_v13 = vadd.s32 1, %v11731_v38  ;;  %v1380_v58 = vor.u32 8388608, %v1379_v26 }
 0x1c9   :  { %v1386_v37 = vand.u32 31, %v1384_v15  ;;  %v856_v0 = vsel %vm846_vm2, nan, %v11633_v35  ;;  %v15418_v12 = vand.u32 2147483647, %v11148_v61  ;;  %v1241_v41 = vor.u32 %v1240_v10, %v1239_v53 }
 0x1ca   :  { %v1244_v11 = vshll.u32 %v1243_v28, 23  ;;  %v11765_v56 = vsel %vm949_vm9, nan, %v958_v14  ;;  %v11769_v19 = vsel %vm1052_vm10, nan, %v1061_v43  ;;  %v1328_v7 = vsel %vm1326_vm13, %v1327_v13, %v11731_v38  ;;  %v15422_v38 = vld [vmem:[#allocation71_spill] sm:$0xff] }
 0x1cb   :  { %vm11759_vm14 = vcmp.le.f32.partialorder %v15418_v12, 0.7853982  ;;  %v1387_v22 = vsub.s32 32, %v1386_v37  ;;  %v11772_v35 = vpop.eup %9952  ;;  %v1248_v31 = vcvt.s32.f32 %v1241_v41  ;;  %v1329_v59 = vadd.s32 %v1328_v7, %v1324_v47 }
 0x1cc   :  { %v1245_v62 = vor.u32 4788187, %v1244_v11  ;;  %v11776_v17 = vsel %vm11759_vm14, 0, %v1253_v25  ;;  %v11778_v21 = vpop.eup %9954  ;;  %vm1158_vm15 = vcmp.eq.s32.totalorder %v11744_v30, 0  ;;  %vm1161_vm1 = vcmp.eq.s32.totalorder %v11744_v30, 2 }
 0x1cd   :  { %v11783_v51 = vand.u32 3, %v11776_v17  ;;  %v11785_v20 = vshll.u32 %v1380_v58, 8  ;;  %v11789_v32 = vmul.f32 %v11414_v8, %v15421_v4  ;;  %v11793_v40 = vmul.f32 %v11422_v52, %v15422_v38 }
 0x1ce   :  { %v1246_v26 = vand.u32 2147483647, %v1245_v62  ;;  %v1330_v5 = vadd.s32 536870912, %v1329_v59  ;;  %v1389_v53 = vshll.u32 %v15373_v49, %v1386_v37  ;;  %v1390_v36 = vshrl.u32 %v15374_v42, %v1387_v22 }
 0x1cf   :  { %v1392_v14 = vshll.u32 %v15374_v42, %v1386_v37  ;;  %v1393_v43 = vshrl.u32 %v15375_v18, %v1387_v22  ;;  %v1395_v10 = vshll.u32 %v15375_v18, %v1386_v37  ;;  %v1396_v28 = vshrl.u32 %v15376_v1, %v1387_v22 }
 0x1d0   :  { %v1249_v8 = vmul.f32 %v1248_v31, %v1246_v26  ;;  %v11801_v47 = vshrl.u32 %v1330_v5, 30  ;;  %v1385_v25 = vshrl.u32 %v1384_v15, 5  ;;  %v1398_v52 = vshll.u32 %v15376_v1, %v1386_v37 }
 0x1d1   :  { %v1162_v13 = vxor.u32 2147483648, %v11772_v35  ;;  %v1399_v58 = vshrl.u32 %v15377_v34, %v1387_v22  ;;  %v1401_v12 = vshll.u32 %v15377_v34, %v1386_v37  ;;  %v1402_v42 = vshrl.u32 %v15378_v23, %v1387_v22  ;;  %v15423_v37 = vld [vmem:[#allocation72_spill] sm:$0xff] }
 0x1d2   :  { %v1159_v41 = vxor.u32 2147483648, %v11778_v21  ;;  %v1250_v11 = vxor.u32 2147483648, %v1249_v8  ;;  %v1332_v18 = vshll.u32 %v11801_v47, 30  ;;  %v1388_v7 = vshrl.u32 %v15373_v49, %v1387_v22  ;;  %v15424_v22 = vld [vmem:[#allocation73_spill] sm:$0xff] }
 0x1d3   :  { %vm1157_vm3 = vcmp.lt.s32.totalorder %v11744_v30, 2  ;;  %v1391_v15 = vor.u32 %v1390_v36, %v1389_v53  ;;  %v1394_v62 = vor.u32 %v1393_v43, %v1392_v14  ;;  %v1397_v1 = vor.u32 %v1396_v28, %v1395_v10 }
 0x1d4   :  { %v1400_v31 = vor.u32 %v1399_v58, %v1398_v52  ;;  %v1251_v26 = vsel %vm1168_vm11, %v1250_v11, %v1249_v8  ;;  %v11814_v5 = vsub.s32 %v1329_v59, %v1332_v18  ;;  %vm1404_vm4 = vcmp.lt.s32.totalorder %v1385_v25, 1  ;;  %v15425_v18 = vld [vmem:[#allocation74_spill] sm:$0xff] }
 0x1d5   :  { %vm1407_vm7 = vcmp.lt.s32.totalorder %v1385_v25, 4  ;;  %v1254_v34 = vsel %vm11759_vm14, %v11148_v61, %v1251_v26  ;;  %v1403_v23 = vor.u32 %v1402_v42, %v1401_v12  ;;  %v1477_v49 = vmul.f32 %v11519_v9, %v15423_v37 }
 0x1d6   :  { %v1478_v53 = vmul.f32 %v856_v0, %v15424_v22  ;;  %9956 = vcosq.f32 %v1254_v34  ;;  %v1335_v36 = vsub.s32 0, %v11814_v5  ;;  %vm1406_vm8 = vcmp.lt.s32.totalorder %v1385_v25, 3 }
 0x1d7   :  { %v1409_v14 = vsel %vm1407_vm7, %v1397_v1, 2102212464  ;;  %9958 = vsinq.f32 %v1254_v34  ;;  %vm1405_vm11 = vcmp.lt.s32.totalorder %v1385_v25, 2  ;;  %v1412_v59 = vsel %vm1404_vm4, %v1391_v15, %v1394_v62 }
 0x1d8   :  { %v1413_v43 = vsel %vm1407_vm7, %v1400_v31, 920167782  ;;  %v1160_v9 = vsel %vm1158_vm15, %v11772_v35, %v1159_v41  ;;  %v1163_v0 = vsel %vm1161_vm1, %v1162_v13, %v11778_v21  ;;  %v9190_v29 = vmin.u32 %v1335_v36, %v11814_v5  ;;  %v15426_v36 = vld [vmem:[#allocation75_spill] sm:$0xff] }
 0x1d9   :  { %v1408_v10 = vsel %vm1404_vm4, %v1388_v7, %v1391_v15  ;;  %v1410_v28 = vsel %vm1406_vm8, %v1394_v62, %v1409_v14  ;;  %v1414_v8 = vsel %vm1406_vm8, %v1397_v1, %v1413_v43  ;;  %v1416_v52 = vsel %vm1404_vm4, %v1394_v62, %v1397_v1 }
 0x1da   :  { %v1417_v58 = vsel %vm1407_vm7, %v1403_v23, 1326507024  ;;  %v1337_v12 = vclz %v9190_v29  ;;  %v1415_v42 = vsel %vm1405_vm11, %v1412_v59, %v1414_v8  ;;  %v1479_v26 = vmul.f32 %v11765_v56, %v15425_v18 }
 0x1db   :  { %v1418_v11 = vsel %vm1406_vm8, %v1400_v31, %v1417_v58  ;;  %v11848_v7 = vmul.u32.u64.low %v11785_v20, %v1415_v42  ;;  %v11849_v15 = vmul.u32.u64.high %v11785_v20, %v1415_v42, %v11848_v7  ;;  %v1480_v62 = vmul.f32 %v11769_v19, %v15426_v36 }
 0x1dc   :  { %v1419_v34 = vsel %vm1405_vm11, %v1416_v52, %v1418_v11  ;;  %v9191_v1 = vadd.s32 4294967294, %v1337_v12  ;;  %v1411_v23 = vsel %vm1405_vm11, %v1408_v10, %v1410_v28  ;;  %vm15225_vm12 = vweird.f32 %v11144_v57 }
 0x1dd   :  { %v11856_v14 = vmul.u32.u64.low %v11785_v20, %v1419_v34  ;;  %v11857_v59 = vmul.u32.u64.high %v11785_v20, %v1419_v34, %v11856_v14  ;;  %v1485_v56 = vpack.c.bf16 %v11793_v40, %v11789_v32  ;;  %v1486_v31 = vpack.c.bf16 %v1478_v53, %v1477_v49 }
 0x1de   :  { %v1487_v43 = vpack.c.bf16 %v1480_v62, %v1479_v26  ;;  %v1164_v29 = vsel %vm1157_vm3, %v1160_v9, %v1163_v0  ;;  %vm1260_vm13 = vcmp.lt.s32.totalorder %v11783_v51, 2  ;;  %v1325_v19 = vadd.s32 %v11730_v3, %v11727_v27  ;;  %v15427_v62 = vld [vmem:[#allocation76_spill] sm:$0xff] }
 0x1df   :  { %vm9192_vm14 = vcmp.lt.s32.totalorder %v9191_v1, 0  ;;  %vm1264_vm15 = vcmp.eq.s32.totalorder %v11783_v51, 2  ;;  %v1427_v10 = vmul.u32 %v11785_v20, %v1411_v23  ;;  %v1430_v28 = vadd.s32 1, %v11849_v15  ;;  %1490 = vst [vmem:[#allocation2] sm:$0xff] %v1485_v56  ;;  %1491 = vst [vmem:[#allocation2 + $0x10] sm:$0xff] %v1486_v31 }
 0x1e0   :  { %v1340_v25 = vsel %vm9192_vm14, 0, %v9191_v1  ;;  %1492 = vst [vmem:[#allocation2 + $0x20] sm:$0xff] %v1487_v43  ;;  %v11870_v32 = vpop.eup %9956  ;;  %v1588_v53 = vadd.s32 3, %v11171_v63  ;;  %v1165_v3 = vsel %vm15225_vm12, nan, %v1164_v29  ;;  %vm1261_vm1 = vcmp.eq.s32.totalorder %v11783_v51, 0  ;;  %v15428_v43 = vld [vmem:[#allocation77_spill] sm:$0xff] }
 0x1e1   :  { %v1341_v30 = vsub.s32 32, %v1340_v25  ;;  %v1342_v40 = vshll.u32 %v11814_v5, %v1340_v25  ;;  %v1345_v49 = vsub.s32 4294967266, %v1340_v25  ;;  %v11874_v27 = vpop.eup %9958  ;;  %v1265_v20 = vxor.u32 2147483648, %v11870_v32 }
 0x1e2   :  { %vm1429_vm3 = vc.u32 %v11857_v59, %v11848_v7  ;;  %v1262_v9 = vxor.u32 2147483648, %v11874_v27  ;;  %vm15224_vm4 = vweird.f32 %v11148_v61  ;;  %v1692_v58 = vadd.s32 3, %v11265_v55 }
 0x1e3   :  { %v1343_v0 = vshrl.u32 %v1325_v19, %v1341_v30  ;;  %v1346_v8 = vadd.s32 127, %v1345_v49  ;;  %v1431_v5 = vsel %vm1429_vm3, %v1430_v28, %v11849_v15  ;;  %v1266_v63 = vsel %vm1264_vm15, %v1265_v20, %v11874_v27 }
 0x1e4   :  { %v1432_v52 = vadd.s32 %v1431_v5, %v1427_v10  ;;  %v1263_v12 = vsel %vm1261_vm1, %v11870_v32, %v1262_v9  ;;  %v1589_v26 = vand.u32 3, %v1588_v53  ;;  %v1481_v1 = vmul.f32 %v1165_v3, %v15427_v62 }
 0x1e5   :  { %v1344_v42 = vor.u32 %v1343_v0, %v1342_v40  ;;  %v1347_v11 = vshll.u32 %v1346_v8, 23  ;;  %v1267_v34 = vsel %vm1260_vm13, %v1263_v12, %v1266_v63  ;;  %v1796_v23 = vadd.s32 3, %v11269_v54 }
 0x1e6   :  { %v1433_v15 = vadd.s32 536870912, %v1432_v52  ;;  %v1268_v14 = vsel %vm15224_vm4, nan, %v1267_v34  ;;  %vm1591_vm7 = vcmp.eq.s32.totalorder %v1589_v26, 0  ;;  %v1693_v25 = vand.u32 3, %v1692_v58 }
 0x1e7   :  { %v1348_v56 = vor.u32 4788187, %v1347_v11  ;;  %v1351_v55 = vcvt.s32.f32 %v1344_v42  ;;  %v1482_v29 = vmul.f32 %v1268_v14, %v15428_v43  ;;  %vm1594_vm8 = vcmp.eq.s32.totalorder %v1589_v26, 2 }
 0x1e8   :  { %v11900_v31 = vshrl.u32 %v1433_v15, 30  ;;  %v1797_v28 = vand.u32 3, %v1796_v23  ;;  %v1355_v54 = vsub.s32 4, %v11801_v47  ;;  %v1900_v40 = vadd.s32 3, %v11418_v48  ;;  %v15434_v15 = vld [vmem:[#allocation84_spill] sm:$0xff] }
 0x1e9   :  { %v1349_v19 = vand.u32 2147483647, %v1348_v56  ;;  %v1488_v10 = vpack.c.bf16 %v1482_v29, %v1481_v1  ;;  %v15429_v49 = vand.u32 2147483647, %v11163_v24  ;;  %vm1271_vm13 = vcmp.lt.s32.totalorder %v11163_v24, 0  ;;  %v15438_v56 = vld [vmem:[#allocation86_spill] sm:$0xff] }
 0x1ea   :  { %v1435_v51 = vshll.u32 %v11900_v31, 30  ;;  %vm1590_vm14 = vcmp.lt.s32.totalorder %v1589_v26, 2  ;;  %v15432_v8 = vxor.u32 2147483648, %v11231_v60  ;;  %v15433_v48 = vxor.u32 2147483648, %v11212_v16 }
 0x1eb   :  { %v1352_v30 = vmul.f32 %v1351_v55, %v1349_v19  ;;  %vm11908_vm11 = vcmp.le.f32.partialorder %v15429_v49, 0.7853982  ;;  %1493 = vst [vmem:[#allocation2 + $0x30] sm:$0xff] %v1488_v10  ;;  %vm1695_vm15 = vcmp.eq.s32.totalorder %v1693_v25, 0  ;;  %vm1698_vm1 = vcmp.eq.s32.totalorder %v1693_v25, 2 }
 0x1ec   :  { %v11913_v3 = vsub.s32 %v1432_v52, %v1435_v51  ;;  %v1593_v5 = vsel %vm1591_vm7, %v11212_v16, %v15432_v8  ;;  %v1596_v63 = vsel %vm1594_vm8, %v15433_v48, %v11231_v60  ;;  %vm1799_vm3 = vcmp.eq.s32.totalorder %v1797_v28, 0  ;;  %v15436_v60 = vld [vmem:[#allocation83_spill] sm:$0xff] }
 0x1ed   :  { %v1353_v0 = vxor.u32 2147483648, %v1352_v30  ;;  %vm1802_vm4 = vcmp.eq.s32.totalorder %v1797_v28, 2  ;;  %v1356_v52 = vsel %vm1271_vm13, %v1355_v54, %v11801_v47  ;;  %v11923_v42 = vand.u32 3, %v1900_v40  ;;  %v15440_v47 = vld [vmem:[#allocation85_spill] sm:$0xff] }
 0x1ee   :  { %v1438_v58 = vsub.s32 0, %v11913_v3  ;;  %v2004_v11 = vadd.s32 3, %v11527_v45  ;;  %v1597_v34 = vsel %vm1590_vm14, %v1593_v5, %v1596_v63  ;;  %vm1694_vm7 = vcmp.lt.s32.totalorder %v1693_v25, 2 }
 0x1ef   :  { %v1354_v12 = vsel %vm1271_vm13, %v1353_v0, %v1352_v30  ;;  %v15435_v16 = vxor.u32 2147483648, %v15434_v15  ;;  %v15437_v23 = vxor.u32 2147483648, %v15436_v60  ;;  %vm1798_vm8 = vcmp.lt.s32.totalorder %v1797_v28, 2  ;;  %v15443_v0 = vld [vmem:[#allocation90_spill] sm:$0xff] }
 0x1f0   :  { %v9194_v26 = vmin.u32 %v1438_v58, %v11913_v3  ;;  %v15439_v55 = vxor.u32 2147483648, %v15438_v56  ;;  %v15441_v45 = vxor.u32 2147483648, %v15440_v47  ;;  %v1357_v51 = vsel %vm11908_vm11, %v11163_v24, %v1354_v12  ;;  %v15444_v58 = vld [vmem:[#allocation88_spill] sm:$0xff] }
 0x1f1   :  { %v1697_v1 = vsel %vm1695_vm15, %v15436_v60, %v15435_v16  ;;  %v1700_v14 = vsel %vm1698_vm1, %v15437_v23, %v15434_v15  ;;  %v11944_v10 = vsel %vm11908_vm11, 0, %v1356_v52  ;;  %v1428_v30 = vadd.s32 %v11848_v7, %v11857_v59  ;;  %v15446_v52 = vld [vmem:[#allocation87_spill] sm:$0xff] }
 0x1f2   :  { %v1801_v29 = vsel %vm1799_vm3, %v15440_v47, %v15439_v55  ;;  %v1804_v19 = vsel %vm1802_vm4, %v15441_v45, %v15438_v56  ;;  %v1440_v28 = vclz %v9194_v26  ;;  %v11950_v40 = vsel %vm537_vm5, nan, %v1597_v34  ;;  %v15448_v56 = vld [vmem:[#allocation91_spill] sm:$0xff]  ;;  %v15450_v47 = vld [vmem:[#allocation89_spill] sm:$0xff] }
 0x1f3   :  { %vm1903_vm13 = vcmp.eq.s32.totalorder %v11923_v42, 0  ;;  %v2005_v49 = vand.u32 3, %v2004_v11  ;;  %v2108_v8 = vadd.s32 3, %v15443_v0  ;;  %v1458_v48 = vsub.s32 4, %v11900_v31 }
 0x1f4   :  { %v9195_v5 = vadd.s32 4294967294, %v1440_v28  ;;  %v1701_v53 = vsel %vm1694_vm7, %v1697_v1, %v1700_v14  ;;  %v1805_v63 = vsel %vm1798_vm8, %v1801_v29, %v1804_v19  ;;  %9960 = vcosq.f32 %v1357_v51 }
 0x1f5   :  { %vm1902_vm4 = vcmp.lt.s32.totalorder %v11923_v42, 2  ;;  %v2109_v7 = vand.u32 3, %v2108_v8  ;;  %v2212_v59 = vadd.s32 3, %v11663_v44  ;;  %9962 = vsinq.f32 %v1357_v51 }
 0x1f6   :  { %vm9196_vm5 = vcmp.lt.s32.totalorder %v9195_v5, 0  ;;  %v15445_v12 = vxor.u32 2147483648, %v15444_v58  ;;  %v2316_v26 = vadd.s32 3, %v11776_v17  ;;  %vm1906_vm11 = vcmp.eq.s32.totalorder %v11923_v42, 2 }
 0x1f7   :  { %v1443_v34 = vsel %vm9196_vm5, 0, %v9195_v5  ;;  %vm2006_vm14 = vcmp.lt.s32.totalorder %v2005_v49, 2  ;;  %vm2007_vm15 = vcmp.eq.s32.totalorder %v2005_v49, 0  ;;  %vm2010_vm1 = vcmp.eq.s32.totalorder %v2005_v49, 2 }
 0x1f8   :  { %v1905_v11 = vsel %vm1903_vm13, %v15446_v52, %v15445_v12  ;;  %v1444_v25 = vsub.s32 32, %v1443_v34  ;;  %v1445_v15 = vshll.u32 %v11913_v3, %v1443_v34  ;;  %v1448_v16 = vsub.s32 4294967266, %v1443_v34 }
 0x1f9   :  { %vm1374_vm3 = vcmp.lt.s32.totalorder %v11167_v6, 0  ;;  %vm2111_vm7 = vcmp.eq.s32.totalorder %v2109_v7, 0  ;;  %vm2114_vm8 = vcmp.eq.s32.totalorder %v2109_v7, 2  ;;  %v2213_v44 = vand.u32 3, %v2212_v59 }
 0x1fa   :  { %v2317_v60 = vand.u32 3, %v2316_v26  ;;  %v1446_v1 = vshrl.u32 %v1428_v30, %v1444_v25  ;;  %v1449_v23 = vadd.s32 127, %v1448_v16  ;;  %v15447_v17 = vxor.u32 2147483648, %v15446_v52 }
 0x1fb   :  { %v15449_v55 = vxor.u32 2147483648, %v15448_v56  ;;  %v15451_v3 = vxor.u32 2147483648, %v15450_v47  ;;  %vm2110_vm13 = vcmp.lt.s32.totalorder %v2109_v7, 2  ;;  %vm2215_vm5 = vcmp.eq.s32.totalorder %v2213_v44, 0 }
 0x1fc   :  { %v1908_v14 = vsel %vm1906_vm11, %v15447_v17, %v15444_v58  ;;  %vm2218_vm12 = vcmp.eq.s32.totalorder %v2213_v44, 2  ;;  %v1447_v19 = vor.u32 %v1446_v1, %v1445_v15  ;;  %v1450_v51 = vshll.u32 %v1449_v23, 23 }
 0x1fd   :  { %v2009_v29 = vsel %vm2007_vm15, %v15450_v47, %v15449_v55  ;;  %v2012_v45 = vsel %vm2010_vm1, %v15451_v3, %v15448_v56  ;;  %v15452_v30 = vxor.u32 2147483648, %v11673_v39  ;;  %v15453_v54 = vxor.u32 2147483648, %v11658_v33 }
 0x1fe   :  { %vm2214_vm11 = vcmp.lt.s32.totalorder %v2213_v44, 2  ;;  %v2217_v8 = vsel %vm2215_vm5, %v11772_v35, %v1159_v41  ;;  %v2220_v5 = vsel %vm2218_vm12, %v1162_v13, %v11778_v21  ;;  %vm2319_vm15 = vcmp.eq.s32.totalorder %v2317_v60, 0  ;;  %v9961_v52 = vpop.eup %9960 }
 0x1ff   :  { %v2113_v28 = vsel %vm2111_vm7, %v11658_v33, %v15452_v30  ;;  %v2116_v0 = vsel %vm2114_vm8, %v15453_v54, %v11673_v39  ;;  %v1451_v59 = vor.u32 4788187, %v1450_v51  ;;  %v1454_v58 = vcvt.s32.f32 %v1447_v19  ;;  %v9963_v35 = vpop.eup %9962 }
 0x200   :  { %v1909_v12 = vsel %vm1902_vm4, %v1905_v11, %v1908_v14  ;;  %vm2318_vm1 = vcmp.lt.s32.totalorder %v2317_v60, 2  ;;  %v1702_v33 = vsel %vm640_vm6, nan, %v1701_v53  ;;  %v2013_v39 = vsel %vm2006_vm14, %v2009_v29, %v2012_v45 }
 0x201   :  { %v2321_v41 = vsel %vm2319_vm15, %v11870_v32, %v1262_v9  ;;  %vm2322_vm7 = vcmp.eq.s32.totalorder %v2317_v60, 2  ;;  %v1452_v21 = vand.u32 2147483647, %v1451_v59  ;;  %v2117_v13 = vsel %vm2110_vm13, %v2113_v28, %v2116_v0 }
 0x202   :  { %v2221_v34 = vsel %vm2214_vm11, %v2217_v8, %v2220_v5  ;;  %v2324_v42 = vsel %vm2322_vm7, %v1265_v20, %v11874_v27  ;;  %v15455_v11 = vand.u32 2147483647, %v11167_v6  ;;  %v1806_v9 = vsel %vm743_vm0, nan, %v1805_v63 }
 0x203   :  { %v1910_v25 = vsel %vm846_vm2, nan, %v1909_v12  ;;  %v2325_v7 = vsel %vm2318_vm1, %v2321_v41, %v2324_v42  ;;  %v1455_v15 = vmul.f32 %v1454_v58, %v1452_v21  ;;  %v1459_v16 = vsel %vm1374_vm3, %v1458_v48, %v11900_v31  ;;  %v15462_v21 = vld [vmem:[#allocation79_spill] sm:$0xff] }
 0x204   :  { %vm12001_vm6 = vcmp.le.f32.partialorder %v15455_v11, 0.7853982  ;;  %v2014_v32 = vsel %vm949_vm9, nan, %v2013_v39  ;;  %v2420_v27 = vadd.s32 3, %v11944_v10  ;;  %v2118_v20 = vsel %vm1052_vm10, nan, %v2117_v13 }
 0x205   :  { %vm15459_vm12 = vweird.f32 %v11144_v57  ;;  %v2535_v46 = vmul.f32 %v11950_v40, %v15421_v4  ;;  %v2536_v44 = vmul.f32 %v1702_v33, %v15422_v38  ;;  %v1456_v60 = vxor.u32 2147483648, %v1455_v15 }
 0x206   :  { %v2222_v63 = vsel %vm15459_vm12, nan, %v2221_v34  ;;  %vm15460_vm0 = vweird.f32 %v11148_v61  ;;  %v2537_v2 = vmul.f32 %v1806_v9, %v15423_v37  ;;  %v2538_v48 = vmul.f32 %v1910_v25, %v15424_v22 }
 0x207   :  { %v2326_v31 = vsel %vm15460_vm0, nan, %v2325_v7  ;;  %v1362_v1 = vand.u32 3, %v11944_v10  ;;  %v1461_v50 = vsel %vm12001_vm6, 0, %v1459_v16  ;;  %v1457_v57 = vsel %vm1374_vm3, %v1456_v60, %v1455_v15 }
 0x208   :  { %v2539_v4 = vmul.f32 %v2014_v32, %v15425_v18  ;;  %v2540_v38 = vmul.f32 %v2118_v20, %v15426_v36  ;;  %v2541_v40 = vmul.f32 %v2222_v63, %v15427_v62  ;;  %v1460_v61 = vsel %vm12001_vm6, %v11167_v6, %v1457_v57 }
 0x209   :  { %v2421_v37 = vand.u32 3, %v2420_v27  ;;  %v2542_v22 = vmul.f32 %v2326_v31, %v15428_v43  ;;  %v2545_v10 = vpack.c.bf16 %v2536_v44, %v2535_v46  ;;  %9964 = vcosq.f32 %v1460_v61 }
 0x20a   :  { %v2546_v23 = vpack.c.bf16 %v2538_v48, %v2537_v2  ;;  %v2547_v17 = vpack.c.bf16 %v2540_v38, %v2539_v4  ;;  %v1365_v14 = vxor.u32 2147483648, %v9963_v35  ;;  %v1368_v56 = vxor.u32 2147483648, %v9961_v52 }
 0x20b   :  { %9966 = vsinq.f32 %v1460_v61  ;;  %v2548_v55 = vpack.c.bf16 %v2542_v22, %v2541_v40  ;;  %2550 = vst [vmem:[#allocation2 + $0x8] sm:$0xff] %v2545_v10  ;;  %vm1364_vm2 = vcmp.eq.s32.totalorder %v1362_v1, 0  ;;  %vm1367_vm9 = vcmp.eq.s32.totalorder %v1362_v1, 2 }
 0x20c   :  { %v2524_v18 = vadd.s32 3, %v1461_v50  ;;  %2551 = vst [vmem:[#allocation2 + $0x18] sm:$0xff] %v2546_v23  ;;  %2552 = vst [vmem:[#allocation2 + $0x28] sm:$0xff] %v2547_v17  ;;  %vm2423_vm10 = vcmp.eq.s32.totalorder %v2421_v37, 0  ;;  %vm2426_vm4 = vcmp.eq.s32.totalorder %v2421_v37, 2  ;;  %vm1363_vm14 = vcmp.lt.s32.totalorder %v1362_v1, 2 }
 0x20d   :  { %2553 = vst [vmem:[#allocation2 + $0x38] sm:$0xff] %v2548_v55  ;;  %v1366_v36 = vsel %vm1364_vm2, %v9961_v52, %v1365_v14  ;;  %v1369_v62 = vsel %vm1367_vm9, %v1368_v56, %v9963_v35  ;;  %v1465_v43 = vand.u32 3, %v1461_v50  ;;  %vm2422_vm3 = vcmp.lt.s32.totalorder %v2421_v37, 2 }
 0x20e   :  { %v2425_v47 = vsel %vm2423_vm10, %v9961_v52, %v1365_v14  ;;  %v2428_v29 = vsel %vm2426_vm4, %v1368_v56, %v9963_v35  ;;  %v2525_v3 = vand.u32 3, %v2524_v18  ;;  %vm1361_vm8 = vweird.f32 %v11163_v24  ;;  %v15461_v52 = vld [vmem:[#allocation78_spill] sm:$0xff] }
 0x20f   :  { %v1370_v45 = vsel %vm1363_vm14, %v1366_v36, %v1369_v62  ;;  %v2429_v19 = vsel %vm2422_vm3, %v2425_v47, %v2428_v29  ;;  %vm1470_vm13 = vcmp.eq.s32.totalorder %v1465_v43, 2  ;;  %vm1466_vm11 = vcmp.lt.s32.totalorder %v1465_v43, 2 }
 0x210   :  { %vm2530_vm5 = vcmp.eq.s32.totalorder %v2525_v3, 2  ;;  %vm1467_vm15 = vcmp.eq.s32.totalorder %v1465_v43, 0  ;;  %vm2527_vm1 = vcmp.eq.s32.totalorder %v2525_v3, 0  ;;  %v1371_v54 = vsel %vm1361_vm8, nan, %v1370_v45 }
 0x211   :  { %v2430_v8 = vsel %vm1361_vm8, nan, %v2429_v19  ;;  %vm2526_vm7 = vcmp.lt.s32.totalorder %v2525_v3, 2  ;;  %vm1464_vm6 = vweird.f32 %v11167_v6  ;;  %v1483_v26 = vmul.f32 %v1371_v54, %v15461_v52 }
 0x212   :  { %v2543_v39 = vmul.f32 %v2430_v8, %v15461_v52 }
 0x213   :  { %v9965_v51 = vpop.eup %9964 }
 0x214   :  { %v1471_v28 = vxor.u32 2147483648, %v9965_v51 }
 0x215   :  { %v9967_v30 = vpop.eup %9966 }
 0x216   :  { %v1468_v0 = vxor.u32 2147483648, %v9967_v30  ;;  %v1472_v5 = vsel %vm1470_vm13, %v1471_v28, %v9967_v30  ;;  %v2532_v59 = vsel %vm2530_vm5, %v1471_v28, %v9967_v30 }
 0x218   :  { %v1469_v58 = vsel %vm1467_vm15, %v9965_v51, %v1468_v0  ;;  %v2529_v24 = vsel %vm2527_vm1, %v9965_v51, %v1468_v0 }
 0x219   :  { %v1473_v12 = vsel %vm1466_vm11, %v1469_v58, %v1472_v5  ;;  %v2533_v33 = vsel %vm2526_vm7, %v2529_v24, %v2532_v59 }
 0x21a   :  { %v1474_v41 = vsel %vm1464_vm6, nan, %v1473_v12  ;;  %v2534_v35 = vsel %vm1464_vm6, nan, %v2533_v33 }
 0x21b   :  { %v1484_v13 = vmul.f32 %v1474_v41, %v15462_v21  ;;  %v2544_v34 = vmul.f32 %v2534_v35, %v15462_v21 }
 0x21d   :  { %v1489_v42 = vpack.c.bf16 %v1484_v13, %v1483_v26  ;;  %v2549_v11 = vpack.c.bf16 %v2544_v34, %v2543_v39 }
 0x21f   :  { %1494 = vst [vmem:[#allocation2 + $0x40] sm:$0xff] %v1489_v42  ;;  %2554 = vst [vmem:[#allocation2 + $0x48] sm:$0xff] %v2549_v11 }
 0x220 PF:  { %p9238_p0 = scmp.le.s32.totalorder %s15089_s0, 1 }
 0x222   :  { %2558 = sbr.rel (%p9238_p0) target bundleno = 865 (0x361), region = 89 }
 0x229   :  { %v12048_v6 = vstv %s10702_s11  ;;  %v12051_v49 = vstv %s10704_s12  ;;  %v15463_v53 = vld [vmem:[#allocation30_spill] sm:$0xff]  ;;  %v15464_v25 = vld [vmem:[#allocation31_spill] sm:$0xff]  ;;  %v15465_v15 = vld [vmem:[#allocation40_spill] sm:$0xff]  ;;  %v12066_v60 = vstv %s10710_s5 }
 0x22a   :  { %v2560_v9 = vmul.f32 %v12048_v6, %v15463_v53  ;;  %v2561_v7 = vmul.f32 %v12048_v6, %v15464_v25  ;;  %v2571_v16 = vmul.f32 %v12051_v49, %v15465_v15  ;;  %v15466_v32 = vld [vmem:[#allocation41_spill] sm:$0xff]  ;;  %v15467_v20 = vld [vmem:[#allocation32_spill] sm:$0xff]  ;;  %v15468_v46 = vld [vmem:[#allocation42_spill] sm:$0xff] }
 0x22b   :  { %v2572_v27 = vmul.f32 %v12051_v49, %v15466_v32  ;;  %v2562_v63 = vmul.f32 %v12048_v6, %v15467_v20  ;;  %v2573_v44 = vmul.f32 %v12051_v49, %v15468_v46  ;;  %v15469_v48 = vld [vmem:[#allocation50_spill] sm:$0xff]  ;;  %v15470_v50 = vld [vmem:[#allocation51_spill] sm:$0xff]  ;;  %v15471_v38 = vld [vmem:[#allocation52_spill] sm:$0xff] }
 0x22c   :  { %v2581_v31 = vadd.f32 %v2571_v16, %v2560_v9  ;;  %v2592_v1 = vmul.f32 %v12066_v60, %v15469_v48  ;;  %v2593_v57 = vmul.f32 %v12066_v60, %v15470_v50  ;;  %v2594_v40 = vmul.f32 %v12066_v60, %v15471_v38  ;;  %v15472_v10 = vld [vmem:[#allocation60_spill] sm:$0xff]  ;;  %v15474_v17 = vld [vmem:[#allocation61_spill] sm:$0xff]  ;;  %v15476_v18 = vld [vmem:[#allocation62_spill] sm:$0xff] }
 0x22d   :  { %v2582_v2 = vadd.f32 %v2572_v27, %v2561_v7  ;;  %v2583_v4 = vadd.f32 %v2573_v44, %v2562_v63  ;;  %v15478_v3 = vld [vmem:[#allocation33_spill] sm:$0xff]  ;;  %v15479_v19 = vld [vmem:[#allocation43_spill] sm:$0xff]  ;;  %v15480_v8 = vld [vmem:[#allocation34_spill] sm:$0xff]  ;;  %v15244_v9 = vmov 683565275  }
 0x22e   :  { %v2602_v61 = vadd.f32 %v2592_v1, %v2581_v31  ;;  %v2563_v45 = vmul.f32 %v12048_v6, %v15478_v3  ;;  %v2574_v51 = vmul.f32 %v12051_v49, %v15479_v19  ;;  %v12098_v5 = vmul.f32 %v12048_v6, %v15480_v8  ;;  %v15481_v26 = vld [vmem:[#allocation35_spill] sm:$0xff] }
 0x22f   :  { %v2603_v37 = vadd.f32 %v2593_v57, %v2582_v2  ;;  %v2604_v22 = vadd.f32 %v2594_v40, %v2583_v4  ;;  %v12102_v33 = vmul.f32 %v12048_v6, %v15481_v26  ;;  %v15242_v7 = vmov 2475754826  }
 0x230   :  { %v12075_v23 = vadd.f32 %v2602_v61, %v15472_v10  ;;  %v12104_v39 = vadd.f32 %v2574_v51, %v2563_v45  ;;  %v15237_v16 = vmov 2131351028   ;;  %v15233_v27 = vmov 2102212464  }
 0x231   :  { %v12078_v14 = vadd.f32 %v2603_v37, %v15474_v17  ;;  %v12083_v36 = vadd.f32 %v2604_v22, %v15476_v18  ;;  %v15235_v63 = vmov 920167782   ;;  %v15260_v50 = vmov 1326507024  }
 0x232   :  { %15473 = vst [vmem:[#allocation92_spill] sm:$0xff] %v12075_v23  ;;  %v2622_v56 = vand.u32 2147483647, %v12075_v23  ;;  %v2625_v55 = vand.u32 2139095040, %v12075_v23 }
 0x233   :  { %15475 = vst [vmem:[#allocation93_spill] sm:$0xff] %v12078_v14  ;;  %15477 = vst [vmem:[#allocation94_spill] sm:$0xff] %v12083_v36  ;;  %v2725_v47 = vand.u32 2147483647, %v12078_v14  ;;  %v2728_v29 = vand.u32 2139095040, %v12078_v14  ;;  %v2831_v0 = vand.u32 2139095040, %v12083_v36 }
 0x234   :  { %v2626_v62 = vshrl.u32 %v2625_v55, 23  ;;  %v2629_v43 = vand.u32 8388607, %v2622_v56 }
 0x235   :  { %v2729_v28 = vshrl.u32 %v2728_v29, 23  ;;  %v2732_v54 = vand.u32 8388607, %v2725_v47  ;;  %v2832_v52 = vshrl.u32 %v2831_v0, 23 }
 0x236   :  { %v9239_v30 = vadd.s32 4294967169, %v2626_v62  ;;  %v2630_v58 = vor.u32 8388608, %v2629_v43 }
 0x237   :  { %v9243_v24 = vadd.s32 4294967169, %v2729_v28  ;;  %v2733_v12 = vor.u32 8388608, %v2732_v54  ;;  %v12110_v11 = vadd.s32 4294967169, %v2832_v52 }
 0x238   :  { %v2632_v59 = vadd.s32 1, %v9239_v30  ;;  %v12106_v34 = vshll.u32 %v2630_v58, 8 }
 0x239   :  { %v2735_v35 = vadd.s32 1, %v9243_v24  ;;  %v12108_v42 = vshll.u32 %v2733_v12, 8 }
 0x23a   :  { %vm2633_vm12 = vcmp.gt.s32.totalorder %v2632_v59, 0 }
 0x23b   :  { %v2634_v41 = vsel %vm2633_vm12, %v2632_v59, 0  ;;  %vm2736_vm0 = vcmp.gt.s32.totalorder %v2735_v35, 0 }
 0x23c   :  { %v2635_v21 = vshrl.u32 %v2634_v41, 5  ;;  %v2636_v13 = vand.u32 31, %v2634_v41  ;;  %v2737_v61 = vsel %vm2736_vm0, %v2735_v35, 0 }
 0x23d   :  { %v2738_v10 = vshrl.u32 %v2737_v61, 5  ;;  %v2739_v17 = vand.u32 31, %v2737_v61 }
 0x23e   :  { %v2637_v53 = vsub.s32 32, %v2636_v13  ;;  %v2639_v25 = vshll.u32 %v15244_v9, %v2636_v13  ;;  %v2642_v15 = vshll.u32 %v15242_v7, %v2636_v13  ;;  %v2645_v32 = vshll.u32 %v15237_v16, %v2636_v13 }
 0x23f   :  { %v2648_v20 = vshll.u32 %v15233_v27, %v2636_v13  ;;  %v2651_v46 = vshll.u32 %v15235_v63, %v2636_v13  ;;  %vm2654_vm2 = vcmp.lt.s32.totalorder %v2635_v21, 1  ;;  %vm2655_vm9 = vcmp.lt.s32.totalorder %v2635_v21, 2 }
 0x240   :  { %v2638_v44 = vshrl.u32 %v15244_v9, %v2637_v53  ;;  %v2640_v31 = vshrl.u32 %v15242_v7, %v2637_v53  ;;  %v2643_v2 = vshrl.u32 %v15237_v16, %v2637_v53  ;;  %v2646_v48 = vshrl.u32 %v15233_v27, %v2637_v53 }
 0x241   :  { %v2649_v1 = vshrl.u32 %v15235_v63, %v2637_v53  ;;  %v2652_v57 = vshrl.u32 %v15260_v50, %v2637_v53  ;;  %vm2656_vm10 = vcmp.lt.s32.totalorder %v2635_v21, 3  ;;  %vm2657_vm4 = vcmp.lt.s32.totalorder %v2635_v21, 4 }
 0x242   :  { %v2641_v4 = vor.u32 %v2640_v31, %v2639_v25  ;;  %v2644_v38 = vor.u32 %v2643_v2, %v2642_v15  ;;  %v2647_v40 = vor.u32 %v2646_v48, %v2645_v32  ;;  %v2740_v19 = vsub.s32 32, %v2739_v17 }
 0x243   :  { %v2650_v37 = vor.u32 %v2649_v1, %v2648_v20  ;;  %v2653_v22 = vor.u32 %v2652_v57, %v2651_v46  ;;  %v2742_v54 = vshll.u32 %v15244_v9, %v2739_v17  ;;  %v2745_v35 = vshll.u32 %v15242_v7, %v2739_v17 }
 0x244   :  { %v2658_v55 = vsel %vm2654_vm2, %v2638_v44, %v2641_v4  ;;  %v2659_v18 = vsel %vm2657_vm4, %v2647_v40, 2102212464  ;;  %v2662_v62 = vsel %vm2654_vm2, %v2641_v4, %v2644_v38  ;;  %v2666_v43 = vsel %vm2654_vm2, %v2644_v38, %v2647_v40 }
 0x245   :  { %v2660_v29 = vsel %vm2656_vm10, %v2644_v38, %v2659_v18  ;;  %v2663_v3 = vsel %vm2657_vm4, %v2650_v37, 920167782  ;;  %v2667_v45 = vsel %vm2657_vm4, %v2653_v22, 1326507024  ;;  %v2741_v58 = vshrl.u32 %v15244_v9, %v2740_v19  ;;  %v15482_v18 = vld [vmem:[#allocation53_spill] sm:$0xff] }
 0x246   :  { %v2661_v51 = vsel %vm2655_vm9, %v2658_v55, %v2660_v29  ;;  %v2664_v30 = vsel %vm2656_vm10, %v2647_v40, %v2663_v3  ;;  %v2668_v28 = vsel %vm2656_vm10, %v2650_v37, %v2667_v45  ;;  %v2743_v41 = vshrl.u32 %v15242_v7, %v2740_v19 }
 0x247   :  { %v2665_v0 = vsel %vm2655_vm9, %v2662_v62, %v2664_v30  ;;  %v2669_v8 = vsel %vm2655_vm9, %v2666_v43, %v2668_v28  ;;  %v2677_v59 = vmul.u32 %v12106_v34, %v2661_v51  ;;  %v2746_v21 = vshrl.u32 %v15237_v16, %v2740_v19 }
 0x248   :  { %v12137_v24 = vmul.u32.u64.low %v12106_v34, %v2669_v8  ;;  %v12138_v12 = vmul.u32.u64.high %v12106_v34, %v2669_v8, %v12137_v24  ;;  %v12141_v52 = vmul.u32.u64.low %v12106_v34, %v2665_v0  ;;  %v12142_v26 = vmul.u32.u64.high %v12106_v34, %v2665_v0, %v12141_v52 }
 0x249   :  { %v2748_v13 = vshll.u32 %v15237_v16, %v2739_v17  ;;  %v2749_v53 = vshrl.u32 %v15233_v27, %v2740_v19  ;;  %v2751_v25 = vshll.u32 %v15233_v27, %v2739_v17  ;;  %v2752_v15 = vshrl.u32 %v15235_v63, %v2740_v19  ;;  %v15484_v24 = vld [vmem:[#allocation37_spill] sm:$0xff] }
 0x24a   :  { %v2754_v32 = vshll.u32 %v15235_v63, %v2739_v17  ;;  %v2744_v20 = vor.u32 %v2743_v41, %v2742_v54  ;;  %v2747_v34 = vor.u32 %v2746_v21, %v2745_v35  ;;  %v2755_v46 = vshrl.u32 %v15260_v50, %v2740_v19  ;;  %v15486_v21 = vld [vmem:[#allocation44_spill] sm:$0xff] }
 0x24b   :  { %vm2757_vm14 = vcmp.lt.s32.totalorder %v2738_v10, 1  ;;  %vm2679_vm3 = vc.u32 %v12138_v12, %v12141_v52  ;;  %v2680_v44 = vadd.s32 1, %v12142_v26  ;;  %v2750_v31 = vor.u32 %v2749_v53, %v2748_v13 }
 0x24c   :  { %v2838_v2 = vadd.s32 1, %v12110_v11  ;;  %v2753_v48 = vor.u32 %v2752_v15, %v2751_v25  ;;  %v2756_v1 = vor.u32 %v2755_v46, %v2754_v32  ;;  %vm2758_vm8 = vcmp.lt.s32.totalorder %v2738_v10, 2  ;;  %v15487_v32 = vld [vmem:[#allocation39_spill] sm:$0xff] }
 0x24d   :  { %vm2759_vm13 = vcmp.lt.s32.totalorder %v2738_v10, 3  ;;  %v2681_v57 = vsel %vm2679_vm3, %v2680_v44, %v12142_v26  ;;  %vm2760_vm5 = vcmp.lt.s32.totalorder %v2738_v10, 4  ;;  %v2761_v4 = vsel %vm2757_vm14, %v2741_v58, %v2744_v20  ;;  %v15485_v26 = vld [vmem:[#allocation38_spill] sm:$0xff] }
 0x24e   :  { %v2765_v38 = vsel %vm2757_vm14, %v2744_v20, %v2747_v34  ;;  %v2682_v40 = vadd.s32 %v2681_v57, %v2677_v59  ;;  %v2762_v61 = vsel %vm2760_vm5, %v2750_v31, 2102212464  ;;  %v2766_v37 = vsel %vm2760_vm5, %v2753_v48, 920167782  ;;  %v15483_v59 = vld [vmem:[#allocation36_spill] sm:$0xff] }
 0x24f   :  { %v2769_v22 = vsel %vm2757_vm14, %v2747_v34, %v2750_v31  ;;  %v2763_v17 = vsel %vm2759_vm13, %v2747_v34, %v2762_v61  ;;  %v2767_v11 = vsel %vm2759_vm13, %v2750_v31, %v2766_v37  ;;  %v2770_v55 = vsel %vm2760_vm5, %v2756_v1, 1326507024  ;;  %v15488_v34 = vld [vmem:[#allocation45_spill] sm:$0xff]  ;;  %v15491_v57 = vld [vmem:[#allocation48_spill] sm:$0xff] }
 0x250   :  { %vm2839_vm11 = vcmp.gt.s32.totalorder %v2838_v2, 0  ;;  %v2595_v62 = vmul.f32 %v12066_v60, %v15482_v18  ;;  %v2683_v43 = vadd.s32 536870912, %v2682_v40  ;;  %v2768_v29 = vsel %vm2758_vm8, %v2765_v38, %v2767_v11  ;;  %v15492_v38 = vld [vmem:[#allocation49_spill] sm:$0xff] }
 0x251   :  { %v2771_v3 = vsel %vm2759_vm13, %v2753_v48, %v2770_v55  ;;  %v2764_v45 = vsel %vm2758_vm8, %v2761_v4, %v2763_v17  ;;  %v12171_v51 = vmul.u32.u64.low %v12108_v42, %v2768_v29  ;;  %v12172_v30 = vmul.u32.u64.high %v12108_v42, %v2768_v29, %v12171_v51 }
 0x252   :  { %v2772_v19 = vsel %vm2758_vm8, %v2769_v22, %v2771_v3  ;;  %v12175_v28 = vshrl.u32 %v2683_v43, 30  ;;  %v2840_v8 = vsel %vm2839_vm11, %v2838_v2, 0  ;;  %v12183_v58 = vmul.f32 %v12048_v6, %v15483_v59  ;;  %v15489_v2 = vld [vmem:[#allocation46_spill] sm:$0xff] }
 0x253   :  { %v12178_v54 = vmul.u32.u64.low %v12108_v42, %v2772_v19  ;;  %v12179_v0 = vmul.u32.u64.high %v12108_v42, %v2772_v19, %v12178_v54  ;;  %v12187_v10 = vmul.f32 %v12048_v6, %v15484_v24  ;;  %v12191_v41 = vmul.f32 %v12048_v6, %v15485_v26 }
 0x254   :  { %v2842_v35 = vand.u32 31, %v2840_v8  ;;  %v2575_v13 = vmul.f32 %v12051_v49, %v15486_v21  ;;  %v2605_v53 = vadd.f32 %v2595_v62, %v12104_v39  ;;  %v2685_v25 = vshll.u32 %v12175_v28, 30 }
 0x255   :  { %v2780_v15 = vmul.u32 %v12108_v42, %v2764_v45  ;;  %v12200_v20 = vmul.f32 %v12048_v6, %v15487_v32  ;;  %v2576_v46 = vmul.f32 %v12051_v49, %v15488_v34  ;;  %v2783_v44 = vadd.s32 1, %v12172_v30  ;;  %v15490_v42 = vld [vmem:[#allocation47_spill] sm:$0xff] }
 0x256   :  { %v2828_v31 = vand.u32 2147483647, %v12083_v36  ;;  %v2577_v48 = vmul.f32 %v12051_v49, %v15489_v2  ;;  %v12208_v1 = vsub.s32 %v2682_v40, %v2685_v25  ;;  %vm2782_vm15 = vc.u32 %v12179_v0, %v12171_v51  ;;  %v15493_v40 = vld [vmem:[#allocation63_spill] sm:$0xff] }
 0x257   :  { %v2843_v39 = vsub.s32 32, %v2842_v35  ;;  %v2578_v6 = vmul.f32 %v12051_v49, %v15490_v42  ;;  %v2579_v4 = vmul.f32 %v12051_v49, %v15491_v57  ;;  %v12218_v61 = vmul.f32 %v12051_v49, %v15492_v38 }
 0x258   :  { %v2784_v37 = vsel %vm2782_vm15, %v2783_v44, %v12172_v30  ;;  %v12222_v22 = vadd.f32 %v2575_v13, %v12098_v5  ;;  %v12225_v17 = vadd.f32 %v2605_v53, %v15493_v40  ;;  %v2688_v11 = vsub.s32 0, %v12208_v1 }
 0x259   :  { %v2785_v55 = vadd.s32 %v2784_v37, %v2780_v15  ;;  %v2835_v18 = vand.u32 8388607, %v2828_v31  ;;  %v2841_v62 = vshrl.u32 %v2840_v8, 5  ;;  %v2845_v43 = vshll.u32 %v15244_v9, %v2842_v35 }
 0x25a   :  { %v2854_v49 = vshll.u32 %v15233_v27, %v2842_v35  ;;  %v9240_v29 = vmin.u32 %v2688_v11, %v12208_v1  ;;  %v2846_v3 = vshrl.u32 %v15242_v7, %v2843_v39  ;;  %v2848_v5 = vshll.u32 %v15242_v7, %v2842_v35 }
 0x25b   :  { %v2849_v45 = vshrl.u32 %v15237_v16, %v2843_v39  ;;  %v2786_v19 = vadd.s32 536870912, %v2785_v55  ;;  %v2851_v30 = vshll.u32 %v15237_v16, %v2842_v35  ;;  %v2852_v54 = vshrl.u32 %v15233_v27, %v2843_v39 }
 0x25c   :  { %v2855_v59 = vshrl.u32 %v15235_v63, %v2843_v39  ;;  %v12240_v8 = vadd.f32 %v2576_v46, %v12102_v33  ;;  %v2690_v24 = vclz %v9240_v29  ;;  %v2857_v26 = vshll.u32 %v15235_v63, %v2842_v35 }
 0x25d   :  { %v2858_v21 = vshrl.u32 %v15260_v50, %v2843_v39  ;;  %v12244_v13 = vshrl.u32 %v2786_v19, 30  ;;  %v2836_v53 = vor.u32 8388608, %v2835_v18  ;;  %v2934_v15 = vand.u32 2139095040, %v12225_v17 }
 0x25e   :  { %v2856_v25 = vor.u32 %v2855_v59, %v2854_v49  ;;  %v9241_v32 = vadd.s32 4294967294, %v2690_v24  ;;  %v2847_v34 = vor.u32 %v2846_v3, %v2845_v43  ;;  %v2850_v44 = vor.u32 %v2849_v45, %v2848_v5 }
 0x25f   :  { %vm2863_vm1 = vcmp.lt.s32.totalorder %v2841_v62, 4  ;;  %v2788_v2 = vshll.u32 %v12244_v13, 30  ;;  %v2853_v42 = vor.u32 %v2852_v54, %v2851_v30  ;;  %v2859_v33 = vor.u32 %v2858_v21, %v2857_v26 }
 0x260   :  { %vm2860_vm7 = vcmp.lt.s32.totalorder %v2841_v62, 1  ;;  %vm9242_vm6 = vcmp.lt.s32.totalorder %v9241_v32, 0  ;;  %v2844_v35 = vshrl.u32 %v15244_v9, %v2843_v39  ;;  %vm2862_vm12 = vcmp.lt.s32.totalorder %v2841_v62, 3 }
 0x261   :  { %v2869_v46 = vsel %vm2863_vm1, %v2856_v25, 920167782  ;;  %v2693_v57 = vsel %vm9242_vm6, 0, %v9241_v32  ;;  %v12250_v38 = vsub.s32 %v2785_v55, %v2788_v2  ;;  %v2876_v37 = vshll.u32 %v2836_v53, 8 }
 0x262   :  { %v2935_v40 = vshrl.u32 %v2934_v15, 23  ;;  %v2698_v11 = vsub.s32 4294967266, %v2693_v57  ;;  %vm2861_vm0 = vcmp.lt.s32.totalorder %v2841_v62, 2  ;;  %v2865_v18 = vsel %vm2863_vm1, %v2853_v42, 2102212464 }
 0x263   :  { %v2868_v43 = vsel %vm2860_vm7, %v2847_v34, %v2850_v44  ;;  %v2791_v49 = vsub.s32 0, %v12250_v38  ;;  %v2870_v29 = vsel %vm2862_vm12, %v2853_v42, %v2869_v46  ;;  %v2872_v39 = vsel %vm2860_vm7, %v2850_v44, %v2853_v42  ;;  %v15495_v42 = vld [vmem:[#allocation55_spill] sm:$0xff] }
 0x264   :  { %v2873_v3 = vsel %vm2863_vm1, %v2859_v33, 1326507024  ;;  %v2587_v5 = vadd.f32 %v2577_v48, %v12183_v58  ;;  %v2678_v55 = vadd.s32 %v12141_v52, %v12138_v12  ;;  %v2864_v45 = vsel %vm2860_vm7, %v2844_v35, %v2847_v34  ;;  %v15496_v35 = vld [vmem:[#allocation56_spill] sm:$0xff] }
 0x265   :  { %v2874_v19 = vsel %vm2862_vm12, %v2856_v25, %v2873_v3  ;;  %v2694_v30 = vsub.s32 32, %v2693_v57  ;;  %v9244_v54 = vmin.u32 %v2791_v49, %v12250_v38  ;;  %v2866_v59 = vsel %vm2862_vm12, %v2850_v44, %v2865_v18  ;;  %v15494_v25 = vld [vmem:[#allocation54_spill] sm:$0xff]  ;;  %v15499_v3 = vld [vmem:[#allocation59_spill] sm:$0xff] }
 0x266   :  { %v2871_v24 = vsel %vm2861_vm0, %v2868_v43, %v2870_v29  ;;  %v2588_v26 = vadd.f32 %v2578_v6, %v12187_v10  ;;  %v2589_v21 = vadd.f32 %v2579_v4, %v12191_v41  ;;  %v2699_v53 = vadd.s32 127, %v2698_v11 }
 0x267   :  { %v2875_v58 = vsel %vm2861_vm0, %v2872_v39, %v2874_v19  ;;  %v2793_v48 = vclz %v9244_v54  ;;  %v9251_v15 = vadd.s32 4294967169, %v2935_v40  ;;  %v2596_v32 = vmul.f32 %v12066_v60, %v15494_v25  ;;  %v15497_v40 = vld [vmem:[#allocation57_spill] sm:$0xff] }
 0x268   :  { %v12269_v12 = vmul.u32.u64.low %v2876_v37, %v2875_v58  ;;  %v12270_v52 = vmul.u32.u64.high %v2876_v37, %v2875_v58, %v12269_v12  ;;  %v2867_v34 = vsel %vm2861_vm0, %v2864_v45, %v2866_v59  ;;  %v2695_v10 = vshll.u32 %v12208_v1, %v2693_v57  ;;  %v15498_v1 = vld [vmem:[#allocation58_spill] sm:$0xff] }
 0x269   :  { %v12275_v44 = vmul.u32.u64.low %v2876_v37, %v2871_v24  ;;  %v12276_v2 = vmul.u32.u64.high %v2876_v37, %v2871_v24, %v12275_v44  ;;  %v2696_v41 = vshrl.u32 %v2678_v55, %v2694_v30  ;;  %v9245_v6 = vadd.s32 4294967294, %v2793_v48  ;;  %v15500_v12 = vld [vmem:[#allocation64_spill] sm:$0xff] }
 0x26a   :  { %v2941_v4 = vadd.s32 1, %v9251_v15  ;;  %v2597_v33 = vmul.f32 %v12066_v60, %v15495_v42  ;;  %v2598_v46 = vmul.f32 %v12066_v60, %v15496_v35  ;;  %v2599_v11 = vmul.f32 %v12066_v60, %v15497_v40 }
 0x26b   :  { %v2700_v62 = vshll.u32 %v2699_v53, 23  ;;  %v2883_v18 = vmul.u32 %v2876_v37, %v2867_v34  ;;  %vm2885_vm2 = vc.u32 %v12270_v52, %v12275_v44  ;;  %v2931_v43 = vand.u32 2147483647, %v12225_v17 }
 0x26c   :  { %vm2942_vm9 = vcmp.gt.s32.totalorder %v2941_v4, 0  ;;  %v2600_v57 = vmul.f32 %v12066_v60, %v15498_v1  ;;  %vm9246_vm10 = vcmp.lt.s32.totalorder %v9245_v6, 0  ;;  %v2886_v49 = vadd.s32 1, %v12276_v2 }
 0x26d   :  { %v2943_v29 = vsel %vm2942_vm9, %v2941_v4, 0  ;;  %v2590_v39 = vadd.f32 %v12218_v61, %v12200_v20  ;;  %v2601_v55 = vmul.f32 %v12066_v60, %v15499_v3  ;;  %v2606_v37 = vadd.f32 %v2596_v32, %v12222_v22 }
 0x26e   :  { %v2697_v45 = vor.u32 %v2696_v41, %v2695_v10  ;;  %v2701_v19 = vor.u32 4788187, %v2700_v62  ;;  %v2887_v30 = vsel %vm2885_vm2, %v2886_v49, %v12276_v2  ;;  %v2945_v54 = vand.u32 31, %v2943_v29 }
 0x26f   :  { %v2607_v59 = vadd.f32 %v2597_v33, %v12240_v8  ;;  %v12299_v24 = vsel %vm9246_vm10, 0, %v9245_v6  ;;  %v2888_v53 = vadd.s32 %v2887_v30, %v2883_v18  ;;  %v2938_v58 = vand.u32 8388607, %v2931_v43 }
 0x270   :  { %v12303_v48 = vadd.f32 %v2598_v46, %v2587_v5  ;;  %v12305_v20 = vadd.f32 %v2599_v11, %v2588_v26  ;;  %v12307_v60 = vadd.f32 %v2600_v57, %v2589_v21  ;;  %v2946_v61 = vsub.s32 32, %v2945_v54 }
 0x271   :  { %v12309_v22 = vadd.f32 %v2601_v55, %v2590_v39  ;;  %v12312_v15 = vadd.f32 %v2606_v37, %v15500_v12  ;;  %v2704_v25 = vcvt.s32.f32 %v2697_v45  ;;  %v2889_v8 = vadd.s32 536870912, %v2888_v53 }
 0x272   :  { %v2702_v32 = vand.u32 2147483647, %v2701_v19  ;;  %v2801_v34 = vsub.s32 4294967266, %v12299_v24  ;;  %v2948_v2 = vshll.u32 %v15244_v9, %v2945_v54  ;;  %v2949_v5 = vshrl.u32 %v15242_v7, %v2946_v61 }
 0x273   :  { %v12317_v10 = vshrl.u32 %v2889_v8, 30  ;;  %v2939_v26 = vor.u32 8388608, %v2938_v58  ;;  %v2951_v21 = vshll.u32 %v15242_v7, %v2945_v54  ;;  %v2952_v41 = vshrl.u32 %v15237_v16, %v2946_v61 }
 0x274   :  { %v2781_v6 = vadd.s32 %v12171_v51, %v12179_v0  ;;  %v2944_v4 = vshrl.u32 %v2943_v29, 5  ;;  %v2954_v42 = vshll.u32 %v15237_v16, %v2945_v54  ;;  %v2955_v33 = vshrl.u32 %v15233_v27, %v2946_v61 }
 0x275   :  { %v2797_v35 = vsub.s32 32, %v12299_v24  ;;  %v2891_v46 = vshll.u32 %v12317_v10, 30  ;;  %v2957_v40 = vshll.u32 %v15233_v27, %v2945_v54  ;;  %v3037_v11 = vand.u32 2139095040, %v12312_v15 }
 0x276   :  { %v2705_v62 = vmul.f32 %v2704_v25, %v2702_v32  ;;  %v2802_v18 = vadd.s32 127, %v2801_v34  ;;  %v2950_v1 = vor.u32 %v2949_v5, %v2948_v2  ;;  %v2958_v57 = vshrl.u32 %v15235_v63, %v2946_v61 }
 0x277   :  { %v12330_v49 = vsub.s32 %v2888_v53, %v2891_v46  ;;  %v2953_v51 = vor.u32 %v2952_v41, %v2951_v21  ;;  %v2960_v0 = vshll.u32 %v15235_v63, %v2945_v54  ;;  %v2961_v29 = vshrl.u32 %v15260_v50, %v2946_v61 }
 0x278   :  { %v2798_v39 = vshll.u32 %v12250_v38, %v12299_v24  ;;  %v2956_v3 = vor.u32 %v2955_v33, %v2954_v42  ;;  %v2959_v55 = vor.u32 %v2958_v57, %v2957_v40  ;;  %vm2963_vm4 = vcmp.lt.s32.totalorder %v2944_v4, 1  ;;  %v15501_v24 = vld [vmem:[#allocation65_spill] sm:$0xff] }
 0x279   :  { %v2799_v37 = vshrl.u32 %v2781_v6, %v2797_v35  ;;  %v2894_v45 = vsub.s32 0, %v12330_v49  ;;  %vm2965_vm14 = vcmp.lt.s32.totalorder %v2944_v4, 3  ;;  %vm2966_vm3 = vcmp.lt.s32.totalorder %v2944_v4, 4 }
 0x27a   :  { %v2803_v19 = vshll.u32 %v2802_v18, 23  ;;  %v2947_v30 = vshrl.u32 %v15244_v9, %v2946_v61  ;;  %vm2964_vm8 = vcmp.lt.s32.totalorder %v2944_v4, 2  ;;  %v2972_v53 = vsel %vm2966_vm3, %v2959_v55, 920167782 }
 0x27b   :  { %v9248_v54 = vmin.u32 %v2894_v45, %v12330_v49  ;;  %v2962_v58 = vor.u32 %v2961_v29, %v2960_v0  ;;  %v2968_v12 = vsel %vm2966_vm3, %v2956_v3, 2102212464  ;;  %v2971_v38 = vsel %vm2963_vm4, %v2950_v1, %v2953_v51 }
 0x27c   :  { %v12343_v25 = vadd.f32 %v2607_v59, %v15501_v24  ;;  %vm2624_vm13 = vcmp.lt.s32.totalorder %v12075_v23, 0  ;;  %v2973_v8 = vsel %vm2965_vm14, %v2956_v3, %v2972_v53  ;;  %v2979_v32 = vshll.u32 %v2939_v26, 8 }
 0x27d   :  { %vm12349_vm5 = vcmp.le.f32.partialorder %v2622_v56, 0.7853982  ;;  %v2706_v34 = vxor.u32 2147483648, %v2705_v62  ;;  %v2896_v2 = vclz %v9248_v54  ;;  %v3038_v5 = vshrl.u32 %v3037_v11, 23  ;;  %v15504_v54 = vld [vmem:[#allocation66_spill] sm:$0xff] }
 0x27e   :  { %v2967_v21 = vsel %vm2963_vm4, %v2947_v30, %v2950_v1  ;;  %v2969_v41 = vsel %vm2965_vm14, %v2953_v51, %v2968_v12  ;;  %v2974_v59 = vsel %vm2964_vm8, %v2971_v38, %v2973_v8  ;;  %v2975_v6 = vsel %vm2963_vm4, %v2953_v51, %v2956_v3 }
 0x27f   :  { %v2800_v42 = vor.u32 %v2799_v37, %v2798_v39  ;;  %v2804_v33 = vor.u32 4788187, %v2803_v19  ;;  %v9249_v26 = vadd.s32 4294967294, %v2896_v2  ;;  %v2976_v35 = vsel %vm2966_vm3, %v2962_v58, 1326507024 }
 0x280   :  { %v2708_v56 = vsub.s32 4, %v12175_v28  ;;  %v2977_v46 = vsel %vm2965_vm14, %v2959_v55, %v2976_v35  ;;  %v12360_v40 = vmul.u32.u64.low %v2979_v32, %v2974_v59  ;;  %v12361_v18 = vmul.u32.u64.high %v2979_v32, %v2974_v59, %v12360_v40  ;;  %v15507_v59 = vld [vmem:[#allocation69_spill] sm:$0xff] }
 0x281   :  { %vm9250_vm11 = vcmp.lt.s32.totalorder %v9249_v26, 0  ;;  %v2970_v11 = vsel %vm2964_vm8, %v2967_v21, %v2969_v41  ;;  %v2978_v1 = vsel %vm2964_vm8, %v2975_v6, %v2977_v46  ;;  %v9255_v57 = vadd.s32 4294967169, %v3038_v5  ;;  %v15506_v41 = vld [vmem:[#allocation68_spill] sm:$0xff] }
 0x282   :  { %v2884_v51 = vadd.s32 %v12275_v44, %v12270_v52  ;;  %v2899_v0 = vsel %vm9250_vm11, 0, %v9249_v26  ;;  %v12368_v29 = vmul.u32.u64.low %v2979_v32, %v2978_v1  ;;  %v12369_v39 = vmul.u32.u64.high %v2979_v32, %v2978_v1, %v12368_v29  ;;  %v15505_v52 = vld [vmem:[#allocation67_spill] sm:$0xff] }
 0x283   :  { %v2707_v3 = vsel %vm2624_vm13, %v2706_v34, %v2705_v62  ;;  %v2805_v55 = vand.u32 2147483647, %v2804_v33  ;;  %v2807_v37 = vcvt.s32.f32 %v2800_v42  ;;  %v2904_v45 = vsub.s32 4294967266, %v2899_v0 }
 0x284   :  { %v2900_v19 = vsub.s32 32, %v2899_v0  ;;  %v2986_v30 = vmul.u32 %v2979_v32, %v2970_v11  ;;  %v2989_v53 = vadd.s32 1, %v12361_v18  ;;  %v3044_v4 = vadd.s32 1, %v9255_v57 }
 0x285   :  { %v12376_v58 = vadd.f32 %v12303_v48, %v15504_v54  ;;  %v12380_v44 = vadd.f32 %v12305_v20, %v15505_v52  ;;  %v2905_v12 = vadd.s32 127, %v2904_v45  ;;  %v3034_v38 = vand.u32 2147483647, %v12312_v15 }
 0x286   :  { %v2709_v62 = vsel %vm2624_vm13, %v2708_v56, %v12175_v28  ;;  %v2710_v24 = vsel %vm12349_vm5, %v12075_v23, %v2707_v3  ;;  %vm2988_vm15 = vc.u32 %v12369_v39, %v12360_v40  ;;  %vm3045_vm1 = vcmp.gt.s32.totalorder %v3044_v4, 0 }
 0x287   :  { %v2808_v48 = vmul.f32 %v2807_v37, %v2805_v55  ;;  %v2901_v8 = vshll.u32 %v12330_v49, %v2899_v0  ;;  %v2990_v20 = vsel %vm2988_vm15, %v2989_v53, %v12361_v18  ;;  %v3046_v32 = vsel %vm3045_vm1, %v3044_v4, 0 }
 0x288   :  { %v2902_v34 = vshrl.u32 %v2884_v51, %v2900_v19  ;;  %v2906_v2 = vshll.u32 %v2905_v12, 23  ;;  %v2991_v5 = vadd.s32 %v2990_v20, %v2986_v30  ;;  %v3048_v21 = vand.u32 31, %v3046_v32 }
 0x289   :  { %v12395_v28 = vadd.f32 %v12307_v60, %v15506_v41  ;;  %v12399_v6 = vadd.f32 %v12309_v22, %v15507_v59  ;;  %v12403_v42 = vsel %vm12349_vm5, 0, %v2709_v62  ;;  %vm2727_vm7 = vcmp.lt.s32.totalorder %v12078_v14, 0 }
 0x28a   :  { %v12407_v49 = vand.u32 3, %v12403_v42  ;;  %vm12411_vm6 = vcmp.le.f32.partialorder %v2725_v47, 0.7853982  ;;  %v2992_v60 = vadd.s32 536870912, %v2991_v5  ;;  %v3049_v26 = vsub.s32 32, %v3048_v21 }
 0x28b   :  { %9968 = vcosq.f32 %v2710_v24  ;;  %v2809_v22 = vxor.u32 2147483648, %v2808_v48  ;;  %v2811_v35 = vsub.s32 4, %v12244_v13  ;;  %v3041_v61 = vand.u32 8388607, %v3034_v38 }
 0x28c   :  { %v2903_v56 = vor.u32 %v2902_v34, %v2901_v8  ;;  %v2907_v46 = vor.u32 4788187, %v2906_v2  ;;  %v12418_v18 = vshrl.u32 %v2992_v60, 30  ;;  %v3047_v11 = vshrl.u32 %v3046_v32, 5 }
 0x28d   :  { %v3051_v1 = vshll.u32 %v15244_v9, %v3048_v21  ;;  %v3052_v47 = vshrl.u32 %v15242_v7, %v3049_v26  ;;  %v3054_v57 = vshll.u32 %v15242_v7, %v3048_v21  ;;  %v3055_v51 = vshrl.u32 %v15237_v16, %v3049_v26 }
 0x28e   :  { %v2994_v0 = vshll.u32 %v12418_v18, 30  ;;  %v3057_v29 = vshll.u32 %v15237_v16, %v3048_v21  ;;  %v3058_v3 = vshrl.u32 %v15233_v27, %v3049_v26  ;;  %v3060_v55 = vshll.u32 %v15233_v27, %v3048_v21 }
 0x28f   :  { %9970 = vsinq.f32 %v2710_v24  ;;  %v2810_v37 = vsel %vm2727_vm7, %v2809_v22, %v2808_v48  ;;  %v3042_v45 = vor.u32 8388608, %v3041_v61  ;;  %v3061_v19 = vshrl.u32 %v15235_v63, %v3049_v26 }
 0x290   :  { %v2910_v30 = vcvt.s32.f32 %v2903_v56  ;;  %v12431_v53 = vsub.s32 %v2991_v5, %v2994_v0  ;;  %v3063_v4 = vshll.u32 %v15235_v63, %v3048_v21  ;;  %v3064_v54 = vshrl.u32 %v15260_v50, %v3049_v26 }
 0x291   :  { %v2908_v52 = vand.u32 2147483647, %v2907_v46  ;;  %v3050_v12 = vshrl.u32 %v15244_v9, %v3049_v26  ;;  %v3053_v62 = vor.u32 %v3052_v47, %v3051_v1  ;;  %v3056_v8 = vor.u32 %v3055_v51, %v3054_v57 }
 0x292   :  { %v2997_v24 = vsub.s32 0, %v12431_v53  ;;  %v3059_v20 = vor.u32 %v3058_v3, %v3057_v29  ;;  %v3062_v32 = vor.u32 %v3061_v19, %v3060_v55  ;;  %vm3066_vm12 = vcmp.lt.s32.totalorder %v3047_v11, 1 }
 0x293   :  { %v2914_v48 = vsub.s32 4, %v12317_v10  ;;  %v3065_v34 = vor.u32 %v3064_v54, %v3063_v4  ;;  %vm3069_vm0 = vcmp.lt.s32.totalorder %v3047_v11, 4  ;;  %v3140_v2 = vand.u32 2139095040, %v12343_v25 }
 0x294   :  { %v2813_v5 = vsel %vm12411_vm6, %v12078_v14, %v2810_v37  ;;  %vm2830_vm2 = vcmp.lt.s32.totalorder %v12083_v36, 0  ;;  %v9252_v21 = vmin.u32 %v2997_v24, %v12431_v53  ;;  %vm3068_vm9 = vcmp.lt.s32.totalorder %v3047_v11, 3 }
 0x295   :  { %v3082_v41 = vshll.u32 %v3042_v45, 8  ;;  %v12444_v59 = vpop.eup %9968  ;;  %v2911_v60 = vmul.f32 %v2910_v30, %v2908_v52  ;;  %vm3067_vm10 = vcmp.lt.s32.totalorder %v3047_v11, 2  ;;  %v3071_v26 = vsel %vm3069_vm0, %v3059_v20, 2102212464 }
 0x296   :  { %v3074_v22 = vsel %vm3066_vm12, %v3053_v62, %v3056_v8  ;;  %v2999_v61 = vclz %v9252_v21  ;;  %v3070_v56 = vsel %vm3066_vm12, %v3050_v12, %v3053_v62  ;;  %v3075_v46 = vsel %vm3069_vm0, %v3062_v32, 920167782 }
 0x297   :  { %v3078_v1 = vsel %vm3066_vm12, %v3056_v8, %v3059_v20  ;;  %vm2717_vm4 = vcmp.eq.s32.totalorder %v12407_v49, 0  ;;  %v3072_v47 = vsel %vm3068_vm9, %v3056_v8, %v3071_v26  ;;  %v3076_v57 = vsel %vm3068_vm9, %v3059_v20, %v3075_v46 }
 0x298   :  { %v3079_v51 = vsel %vm3069_vm0, %v3065_v34, 1326507024  ;;  %v3141_v0 = vshrl.u32 %v3140_v2, 23  ;;  %9972 = vcosq.f32 %v2813_v5  ;;  %vm12457_vm14 = vcmp.le.f32.partialorder %v2828_v31, 0.7853982 }
 0x299   :  { %v9253_v3 = vadd.s32 4294967294, %v2999_v61  ;;  %v3077_v55 = vsel %vm3067_vm10, %v3074_v22, %v3076_v57  ;;  %v3080_v37 = vsel %vm3068_vm9, %v3062_v32, %v3079_v51  ;;  %v12463_v45 = vpop.eup %9970  ;;  %v3073_v31 = vsel %vm3067_vm10, %v3070_v56, %v3072_v47 }
 0x29a   :  { %v3081_v19 = vsel %vm3067_vm10, %v3078_v1, %v3080_v37  ;;  %v12466_v30 = vmul.u32.u64.low %v3082_v41, %v3077_v55  ;;  %v12467_v4 = vmul.u32.u64.high %v3082_v41, %v3077_v55, %v12466_v30  ;;  %v9259_v54 = vadd.s32 4294967169, %v3141_v0 }
 0x29b   :  { %vm9254_vm3 = vcmp.lt.s32.totalorder %v9253_v3, 0  ;;  %v12471_v52 = vmul.u32.u64.low %v3082_v41, %v3081_v19  ;;  %v12472_v12 = vmul.u32.u64.high %v3082_v41, %v3081_v19, %v12471_v52  ;;  %vm2720_vm8 = vcmp.eq.s32.totalorder %v12407_v49, 2 }
 0x29c   :  { %v2912_v62 = vxor.u32 2147483648, %v2911_v60  ;;  %v3002_v8 = vsel %vm9254_vm3, 0, %v9253_v3  ;;  %v3147_v24 = vadd.s32 1, %v9259_v54  ;;  %v2812_v20 = vsel %vm2727_vm7, %v2811_v35, %v12244_v13 }
 0x29d   :  { %v2987_v32 = vadd.s32 %v12360_v40, %v12369_v39  ;;  %v3003_v34 = vsub.s32 32, %v3002_v8  ;;  %v3007_v11 = vsub.s32 4294967266, %v3002_v8  ;;  %v2915_v2 = vsel %vm2830_vm2, %v2914_v48, %v12317_v10 }
 0x29e   :  { %v3089_v21 = vmul.u32 %v3082_v41, %v3073_v31  ;;  %v3092_v26 = vadd.s32 1, %v12467_v4  ;;  %vm3148_vm13 = vcmp.gt.s32.totalorder %v3147_v24, 0  ;;  %v15227_v22 = vxor.u32 2147483648, %v12463_v45 }
 0x29f   :  { %v15226_v61 = vxor.u32 2147483648, %v12444_v59  ;;  %9974 = vsinq.f32 %v2813_v5  ;;  %v3008_v56 = vadd.s32 127, %v3007_v11  ;;  %v2913_v13 = vsel %vm2830_vm2, %v2912_v62, %v2911_v60 }
 0x2a0   :  { %vm3091_vm5 = vc.u32 %v12472_v12, %v12466_v30  ;;  %v3137_v40 = vand.u32 2147483647, %v12343_v25  ;;  %v3149_v39 = vsel %vm3148_vm13, %v3147_v24, 0  ;;  %v3004_v10 = vshll.u32 %v12431_v53, %v3002_v8 }
 0x2a1   :  { %v3005_v35 = vshrl.u32 %v2987_v32, %v3003_v34  ;;  %v3009_v48 = vshll.u32 %v3008_v56, 23  ;;  %v3093_v41 = vsel %vm3091_vm5, %v3092_v26, %v12467_v4  ;;  %v12497_v46 = vsel %vm12411_vm6, 0, %v2812_v20 }
 0x2a2   :  { %v12501_v5 = vsel %vm12457_vm14, 0, %v2915_v2  ;;  %v3094_v60 = vadd.s32 %v3093_v41, %v3089_v21  ;;  %v3151_v1 = vand.u32 31, %v3149_v39  ;;  %v12503_v47 = vpop.eup %9972  ;;  %v12510_v53 = vsel %vm2717_vm4, %v12444_v59, %v15227_v22 }
 0x2a3   :  { %15512 = vst [vmem:[#allocation95_spill] sm:$0xff] %v12503_v47  ;;  %v12517_v33 = vsel %vm2720_vm8, %v15226_v61, %v12463_v45  ;;  %v12520_v57 = vand.u32 3, %v12497_v46  ;;  %v12523_v51 = vand.u32 3, %v12501_v5  ;;  %v2916_v0 = vsel %vm12457_vm14, %v12083_v36, %v2913_v13 }
 0x2a4   :  { %v3095_v3 = vadd.s32 536870912, %v3094_v60  ;;  %v3144_v55 = vand.u32 8388607, %v3137_v40  ;;  %v3152_v37 = vsub.s32 32, %v3151_v1  ;;  %v3006_v19 = vor.u32 %v3005_v35, %v3004_v10 }
 0x2a5   :  { %v3010_v4 = vor.u32 4788187, %v3009_v48  ;;  %v12530_v54 = vshrl.u32 %v3149_v39, 5  ;;  %v3154_v31 = vshll.u32 %v15244_v9, %v3151_v1  ;;  %v3157_v8 = vshll.u32 %v15242_v7, %v3151_v1 }
 0x2a6   :  { %v12533_v52 = vshrl.u32 %v3095_v3, 30  ;;  %v3155_v62 = vshrl.u32 %v15242_v7, %v3152_v37  ;;  %v3158_v29 = vshrl.u32 %v15237_v16, %v3152_v37  ;;  %v3160_v24 = vshll.u32 %v15237_v16, %v3151_v1 }
 0x2a7   :  { %v3161_v20 = vshrl.u32 %v15233_v27, %v3152_v37  ;;  %v3163_v32 = vshll.u32 %v15233_v27, %v3151_v1  ;;  %v3164_v34 = vshrl.u32 %v15235_v63, %v3152_v37  ;;  %v15230_v11 = vxor.u32 2147483648, %v12503_v47 }
 0x2a8   :  { %9976 = vcosq.f32 %v2916_v0  ;;  %v3097_v2 = vshll.u32 %v12533_v52, 30  ;;  %v3166_v21 = vshll.u32 %v15235_v63, %v3151_v1  ;;  %vm2716_vm11 = vcmp.lt.s32.totalorder %v12407_v49, 2 }
 0x2a9   :  { %v12545_v26 = vpop.eup %9974  ;;  %vm2823_vm15 = vcmp.eq.s32.totalorder %v12520_v57, 2  ;;  %9978 = vsinq.f32 %v2916_v0  ;;  %v3013_v56 = vcvt.s32.f32 %v3006_v19  ;;  %v3145_v13 = vor.u32 8388608, %v3144_v55 }
 0x2aa   :  { %v3167_v39 = vshrl.u32 %v15260_v50, %v3152_v37  ;;  %vm2820_vm1 = vcmp.eq.s32.totalorder %v12520_v57, 0  ;;  %v12551_v10 = vsub.s32 %v3094_v60, %v3097_v2  ;;  %v3153_v35 = vshrl.u32 %v15244_v9, %v3152_v37 }
 0x2ab   :  { %v3156_v48 = vor.u32 %v3155_v62, %v3154_v31  ;;  %v3159_v41 = vor.u32 %v3158_v29, %v3157_v8  ;;  %v3011_v1 = vand.u32 2147483647, %v3010_v4  ;;  %v3162_v3 = vor.u32 %v3161_v20, %v3160_v24 }
 0x2ac   :  { %v3165_v61 = vor.u32 %v3164_v34, %v3163_v32  ;;  %vm3169_vm7 = vcmp.lt.s32.totalorder %v12530_v54, 1  ;;  %v15231_v22 = vxor.u32 2147483648, %v12545_v26  ;;  %vm2933_vm6 = vcmp.lt.s32.totalorder %v12225_v17, 0 }
 0x2ad   :  { %v3100_v0 = vsub.s32 0, %v12551_v10  ;;  %v3168_v55 = vor.u32 %v3167_v39, %v3166_v21  ;;  %vm3172_vm12 = vcmp.lt.s32.totalorder %v12530_v54, 4  ;;  %vm3171_vm0 = vcmp.lt.s32.totalorder %v12530_v54, 3 }
 0x2ae   :  { %v3174_v60 = vsel %vm3172_vm12, %v3162_v3, 2102212464  ;;  %v3185_v37 = vshll.u32 %v3145_v13, 8  ;;  %v3243_v19 = vand.u32 2139095040, %v12376_v58  ;;  %vm2819_vm2 = vcmp.lt.s32.totalorder %v12520_v57, 2 }
 0x2af   :  { %v9256_v4 = vmin.u32 %v3100_v0, %v12551_v10  ;;  %vm3170_vm9 = vcmp.lt.s32.totalorder %v12530_v54, 2  ;;  %v3173_v31 = vsel %vm3169_vm7, %v3153_v35, %v3156_v48  ;;  %v3177_v62 = vsel %vm3169_vm7, %v3156_v48, %v3159_v41 }
 0x2b0   :  { %vm12572_vm10 = vcmp.le.f32.partialorder %v2931_v43, 0.7853982  ;;  %v3014_v29 = vmul.f32 %v3013_v56, %v3011_v1  ;;  %v3175_v24 = vsel %vm3171_vm0, %v3159_v41, %v3174_v60  ;;  %v3178_v20 = vsel %vm3172_vm12, %v3165_v61, 920167782 }
 0x2b1   :  { %v3181_v32 = vsel %vm3169_vm7, %v3159_v41, %v3162_v3  ;;  %vm2714_vm4 = vweird.f32 %v12075_v23  ;;  %v3017_v34 = vsub.s32 4, %v12418_v18  ;;  %v3102_v2 = vclz %v9256_v4 }
 0x2b2   :  { %v3179_v43 = vsel %vm3171_vm0, %v3162_v3, %v3178_v20  ;;  %v3182_v21 = vsel %vm3172_vm12, %v3168_v55, 1326507024  ;;  %vm2817_vm14 = vweird.f32 %v12078_v14  ;;  %vm2923_vm3 = vcmp.eq.s32.totalorder %v12523_v51, 0  ;;  %v12596_v48 = vpop.eup %9976 }
 0x2b3   :  { %v3176_v56 = vsel %vm3170_vm9, %v3173_v31, %v3175_v24  ;;  %v3180_v13 = vsel %vm3170_vm9, %v3177_v62, %v3179_v43  ;;  %v3183_v39 = vsel %vm3171_vm0, %v3165_v61, %v3182_v21  ;;  %v3244_v35 = vshrl.u32 %v3243_v19, 23  ;;  %15515 = vst [vmem:[#allocation96_spill] sm:$0xff] %v12596_v48  ;;  %v12604_v55 = vpop.eup %9978 }
 0x2b4   :  { %v9257_v41 = vadd.s32 4294967294, %v3102_v2  ;;  %v3184_v1 = vsel %vm3170_vm9, %v3181_v32, %v3183_v39  ;;  %v12600_v3 = vmul.u32.u64.low %v3185_v37, %v3180_v13  ;;  %v12601_v0 = vmul.u32.u64.high %v3185_v37, %v3180_v13, %v12600_v3  ;;  %15516 = vst [vmem:[#allocation97_spill] sm:$0xff] %v12604_v55 }
 0x2b5   :  { %v3015_v60 = vxor.u32 2147483648, %v3014_v29  ;;  %v12606_v4 = vmul.u32.u64.low %v3185_v37, %v3184_v1  ;;  %v12607_v31 = vmul.u32.u64.high %v3185_v37, %v3184_v1, %v12606_v4  ;;  %v9263_v62 = vadd.s32 4294967169, %v3244_v35 }
 0x2b6   :  { %v2723_v61 = vsel %vm2716_vm11, %v12510_v53, %v12517_v33  ;;  %v2825_v54 = vsel %vm2823_vm15, %v15230_v11, %v12545_v26  ;;  %vm2926_vm8 = vcmp.eq.s32.totalorder %v12523_v51, 2  ;;  %vm9258_vm13 = vcmp.lt.s32.totalorder %v9257_v41, 0 }
 0x2b7   :  { %v2822_v19 = vsel %vm2820_vm1, %v12503_v47, %v15231_v22  ;;  %v3105_v24 = vsel %vm9258_vm13, 0, %v9257_v41  ;;  %v3192_v20 = vmul.u32 %v3185_v37, %v3176_v56  ;;  %v3250_v32 = vadd.s32 1, %v9263_v62 }
 0x2b8   :  { %v3090_v49 = vadd.s32 %v12466_v30, %v12472_v12  ;;  %v3106_v53 = vsub.s32 32, %v3105_v24  ;;  %v3110_v33 = vsub.s32 4294967266, %v3105_v24  ;;  %v3195_v2 = vadd.s32 1, %v12601_v0 }
 0x2b9   :  { %v3016_v43 = vsel %vm2933_vm6, %v3015_v60, %v3014_v29  ;;  %v3018_v21 = vsel %vm2933_vm6, %v3017_v34, %v12418_v18  ;;  %vm3194_vm5 = vc.u32 %v12607_v31, %v12600_v3  ;;  %vm3251_vm11 = vcmp.gt.s32.totalorder %v3250_v32, 0 }
 0x2ba   :  { %v15229_v37 = vxor.u32 2147483648, %v12604_v55  ;;  %v15228_v56 = vxor.u32 2147483648, %v12596_v48  ;;  %v3111_v30 = vadd.s32 127, %v3110_v33  ;;  %v3196_v12 = vsel %vm3194_vm5, %v3195_v2, %v12601_v0 }
 0x2bb   :  { %v2826_v13 = vsel %vm2819_vm2, %v2822_v19, %v2825_v54  ;;  %v3197_v39 = vadd.s32 %v3196_v12, %v3192_v20  ;;  %v15232_v29 = vand.u32 2147483647, %v12376_v58  ;;  %v3252_v35 = vsel %vm3251_vm11, %v3250_v32, 0 }
 0x2bc   :  { %v3019_v18 = vsel %vm12572_vm10, %v12225_v17, %v3016_v43  ;;  %v3107_v34 = vshll.u32 %v12551_v10, %v3105_v24  ;;  %v3108_v41 = vshrl.u32 %v3090_v49, %v3106_v53  ;;  %v3112_v1 = vshll.u32 %v3111_v30, 23 }
 0x2bd   :  { %v12646_v60 = vsel %vm2714_vm4, nan, %v2723_v61  ;;  %v12650_v57 = vsel %vm12572_vm10, 0, %v3018_v21  ;;  %v3198_v0 = vadd.s32 536870912, %v3197_v39  ;;  %v3254_v4 = vand.u32 31, %v3252_v35 }
 0x2be   :  { %v12654_v62 = vsel %vm2817_vm14, nan, %v2826_v13  ;;  %v12661_v10 = vsel %vm2923_vm3, %v12596_v48, %v15229_v37  ;;  %v12668_v8 = vsel %vm2926_vm8, %v15228_v56, %v12604_v55  ;;  %v12671_v61 = vand.u32 3, %v12650_v57 }
 0x2bf   :  { %9980 = vcosq.f32 %v3019_v18  ;;  %v12673_v54 = vshrl.u32 %v3198_v0, 30  ;;  %v3247_v19 = vand.u32 8388607, %v15232_v29  ;;  %v3255_v24 = vsub.s32 32, %v3254_v4 }
 0x2c0   :  { %v3109_v20 = vor.u32 %v3108_v41, %v3107_v34  ;;  %v3113_v32 = vor.u32 4788187, %v3112_v1  ;;  %v3253_v49 = vshrl.u32 %v3252_v35, 5  ;;  %v3257_v53 = vshll.u32 %v15244_v9, %v3254_v4 }
 0x2c1   :  { %v3200_v33 = vshll.u32 %v12673_v54, 30  ;;  %v3258_v2 = vshrl.u32 %v15242_v7, %v3255_v24  ;;  %v3260_v43 = vshll.u32 %v15242_v7, %v3254_v4  ;;  %v3263_v21 = vshll.u32 %v15237_v16, %v3254_v4 }
 0x2c2   :  { %v3261_v30 = vshrl.u32 %v15237_v16, %v3255_v24  ;;  %v3264_v12 = vshrl.u32 %v15233_v27, %v3255_v24  ;;  %v3266_v13 = vshll.u32 %v15233_v27, %v3254_v4  ;;  %v3267_v34 = vshrl.u32 %v15235_v63, %v3255_v24 }
 0x2c3   :  { %9982 = vsinq.f32 %v3019_v18  ;;  %v12686_v35 = vsub.s32 %v3197_v39, %v3200_v33  ;;  %v3248_v41 = vor.u32 8388608, %v3247_v19  ;;  %v3346_v1 = vand.u32 2139095040, %v12380_v44 }
 0x2c4   :  { %v3114_v0 = vand.u32 2147483647, %v3113_v32  ;;  %v3116_v56 = vcvt.s32.f32 %v3109_v20  ;;  %v3256_v37 = vshrl.u32 %v15244_v9, %v3255_v24  ;;  %v3269_v11 = vshll.u32 %v15235_v63, %v3254_v4 }
 0x2c5   :  { %vm2922_vm15 = vcmp.lt.s32.totalorder %v12523_v51, 2  ;;  %vm3036_vm1 = vcmp.lt.s32.totalorder %v12312_v15, 0  ;;  %v3203_v22 = vsub.s32 0, %v12686_v35  ;;  %v3259_v29 = vor.u32 %v3258_v2, %v3257_v53 }
 0x2c6   :  { %v3262_v27 = vor.u32 %v3261_v30, %v3260_v43  ;;  %v3270_v39 = vshrl.u32 %v15260_v50, %v3255_v24  ;;  %v3120_v18 = vsub.s32 4, %v12533_v52  ;;  %v3265_v19 = vor.u32 %v3264_v12, %v3263_v21 }
 0x2c7   :  { %v3268_v33 = vor.u32 %v3267_v34, %v3266_v13  ;;  %vm3272_vm7 = vcmp.lt.s32.totalorder %v3253_v49, 1  ;;  %v9260_v20 = vmin.u32 %v3203_v22, %v12686_v35  ;;  %vm3275_vm6 = vcmp.lt.s32.totalorder %v3253_v49, 4 }
 0x2c8   :  { %v12697_v32 = vshll.u32 %v3248_v41, 8  ;;  %v3347_v4 = vshrl.u32 %v3346_v1, 23  ;;  %vm2920_vm12 = vweird.f32 %v12083_v36  ;;  %v3117_v63 = vmul.f32 %v3116_v56, %v3114_v0 }
 0x2c9   :  { %v3271_v16 = vor.u32 %v3270_v39, %v3269_v11  ;;  %vm3273_vm0 = vcmp.lt.s32.totalorder %v3253_v49, 2  ;;  %vm3274_vm2 = vcmp.lt.s32.totalorder %v3253_v49, 3  ;;  %v12700_v53 = vpop.eup %9980  ;;  %vm12704_vm9 = vcmp.le.f32.partialorder %v3034_v38, 0.7853982 }
 0x2ca   :  { %15517 = vst [vmem:[#allocation98_spill] sm:$0xff] %v12700_v53  ;;  %v3205_v2 = vclz %v9260_v20  ;;  %v3276_v22 = vsel %vm3272_vm7, %v3256_v37, %v3259_v29  ;;  %v3277_v43 = vsel %vm3275_vm6, %v3265_v19, 2102212464  ;;  %v3280_v21 = vsel %vm3272_vm7, %v3259_v29, %v3262_v27 }
 0x2cb   :  { %v3278_v30 = vsel %vm3274_vm2, %v3262_v27, %v3277_v43  ;;  %v3281_v11 = vsel %vm3275_vm6, %v3268_v33, 920167782  ;;  %v3284_v56 = vsel %vm3272_vm7, %v3262_v27, %v3265_v19  ;;  %v3285_v12 = vsel %vm3275_vm6, %v3271_v16, 1326507024 }
 0x2cc   :  { %vm3026_vm10 = vcmp.eq.s32.totalorder %v12671_v61, 0  ;;  %v3193_v38 = vadd.s32 %v12600_v3, %v12607_v31  ;;  %v9261_v13 = vadd.s32 4294967294, %v3205_v2  ;;  %v3282_v34 = vsel %vm3274_vm2, %v3265_v19, %v3281_v11 }
 0x2cd   :  { %v3286_v41 = vsel %vm3274_vm2, %v3268_v33, %v3285_v12  ;;  %v3118_v37 = vxor.u32 2147483648, %v3117_v63  ;;  %v3283_v1 = vsel %vm3273_vm0, %v3280_v21, %v3282_v34  ;;  %v9267_v0 = vadd.s32 4294967169, %v3347_v4  ;;  %v12719_v39 = vpop.eup %9982 }
 0x2ce   :  { %v3287_v29 = vsel %vm3273_vm0, %v3284_v56, %v3286_v41  ;;  %15520 = vst [vmem:[#allocation99_spill] sm:$0xff] %v12719_v39  ;;  %vm9262_vm3 = vcmp.lt.s32.totalorder %v9261_v13, 0  ;;  %v3279_v27 = vsel %vm3273_vm0, %v3276_v22, %v3278_v30  ;;  %vm3029_vm8 = vcmp.eq.s32.totalorder %v12671_v61, 2 }
 0x2cf   :  { %v12723_v16 = vmul.u32.u64.low %v12697_v32, %v3287_v29  ;;  %v12724_v20 = vmul.u32.u64.high %v12697_v32, %v3287_v29, %v12723_v16  ;;  %v3208_v43 = vsel %vm9262_vm3, 0, %v9261_v13  ;;  %v3353_v19 = vadd.s32 1, %v9267_v0 }
 0x2d0   :  { %v12727_v3 = vmul.u32.u64.low %v12697_v32, %v3283_v1  ;;  %v12728_v31 = vmul.u32.u64.high %v12697_v32, %v3283_v1, %v12727_v3  ;;  %v3209_v33 = vsub.s32 32, %v3208_v43  ;;  %v3210_v4 = vshll.u32 %v12686_v35, %v3208_v43 }
 0x2d1   :  { %v3213_v2 = vsub.s32 4294967266, %v3208_v43  ;;  %v2929_v49 = vsel %vm2922_vm15, %v12661_v10, %v12668_v8  ;;  %v3119_v22 = vsel %vm3036_vm1, %v3118_v37, %v3117_v63  ;;  %v3121_v21 = vsel %vm3036_vm1, %v3120_v18, %v12533_v52 }
 0x2d2   :  { %vm3354_vm13 = vcmp.gt.s32.totalorder %v3353_v19, 0  ;;  %v3211_v30 = vshrl.u32 %v3193_v38, %v3209_v33  ;;  %v3295_v56 = vmul.u32 %v12697_v32, %v3279_v27  ;;  %vm3297_vm5 = vc.u32 %v12724_v20, %v12727_v3 }
 0x2d3   :  { %v3214_v11 = vadd.s32 127, %v3213_v2  ;;  %v15240_v35 = vxor.u32 2147483648, %v12719_v39  ;;  %v15239_v51 = vxor.u32 2147483648, %v12700_v53  ;;  %vm3139_vm11 = vcmp.lt.s32.totalorder %v12343_v25, 0 }
 0x2d4   :  { %v3298_v63 = vadd.s32 1, %v12728_v31  ;;  %v3355_v10 = vsel %vm3354_vm13, %v3353_v19, 0  ;;  %v12751_v52 = vsel %vm2920_vm12, nan, %v2929_v49  ;;  %v3212_v8 = vor.u32 %v3211_v30, %v3210_v4 }
 0x2d5   :  { %v3215_v18 = vshll.u32 %v3214_v11, 23  ;;  %v15241_v32 = vand.u32 2147483647, %v12380_v44  ;;  %v3122_v12 = vsel %vm12704_vm9, %v12312_v15, %v3119_v22  ;;  %v12759_v38 = vsel %vm12704_vm9, 0, %v3121_v21 }
 0x2d6   :  { %v3299_v13 = vsel %vm3297_vm5, %v3298_v63, %v12728_v31  ;;  %v3357_v34 = vand.u32 31, %v3355_v10  ;;  %v12763_v41 = vand.u32 3, %v12759_v38  ;;  %vm12767_vm15 = vcmp.le.f32.partialorder %v3137_v40, 0.7853982 }
 0x2d7   :  { %v3216_v1 = vor.u32 4788187, %v3215_v18  ;;  %v3219_v29 = vcvt.s32.f32 %v3212_v8  ;;  %v3300_v0 = vadd.s32 %v3299_v13, %v3295_v56  ;;  %v12776_v24 = vsel %vm3026_vm10, %v12700_v53, %v15240_v35 }
 0x2d8   :  { %v12783_v27 = vsel %vm3029_vm8, %v15239_v51, %v12719_v39  ;;  %v3223_v40 = vsub.s32 4, %v12673_v54  ;;  %v3358_v16 = vsub.s32 32, %v3357_v34  ;;  %9984 = vcosq.f32 %v3122_v12 }
 0x2d9   :  { %v3217_v43 = vand.u32 2147483647, %v3216_v1  ;;  %v3301_v31 = vadd.s32 536870912, %v3300_v0  ;;  %v3350_v19 = vand.u32 8388607, %v15241_v32  ;;  %v3360_v33 = vshll.u32 %v15244_v9, %v3357_v34 }
 0x2da   :  { %v3361_v4 = vshrl.u32 %v15242_v7, %v3358_v16  ;;  %v3363_v2 = vshll.u32 %v15242_v7, %v3357_v34  ;;  %v15523_v49 = vmov 2131351028   ;;  %v3356_v11 = vshrl.u32 %v3355_v10, 5 }
 0x2db   :  { %v3364_v22 = vshrl.u32 %v15523_v49, %v3358_v16  ;;  %v3220_v21 = vmul.f32 %v3219_v29, %v3217_v43  ;;  %v12792_v30 = vshrl.u32 %v3301_v31, 30  ;;  %v15524_v56 = vmov 2102212464  }
 0x2dc   :  { %v3369_v63 = vshll.u32 %v15524_v56, %v3357_v34  ;;  %v3366_v8 = vshll.u32 %v15523_v49, %v3357_v34  ;;  %v3367_v18 = vshrl.u32 %v15524_v56, %v3358_v16  ;;  %v15525_v13 = vmov 920167782  }
 0x2dd   :  { %v3370_v1 = vshrl.u32 %v15525_v13, %v3358_v16  ;;  %v3372_v51 = vshll.u32 %v15525_v13, %v3357_v34  ;;  %9986 = vsinq.f32 %v3122_v12  ;;  %v3221_v35 = vxor.u32 2147483648, %v3220_v21 }
 0x2de   :  { %v3303_v32 = vshll.u32 %v12792_v30, 30  ;;  %v3351_v7 = vor.u32 8388608, %v3350_v19  ;;  %v3362_v9 = vor.u32 %v3361_v4, %v3360_v33  ;;  %v3365_v29 = vor.u32 %v3364_v22, %v3363_v2 }
 0x2df   :  { %v3371_v43 = vor.u32 %v3370_v1, %v3369_v63  ;;  %v3373_v10 = vshrl.u32 %v15260_v50, %v3358_v16  ;;  %v3222_v31 = vsel %vm3139_vm11, %v3221_v35, %v3220_v21  ;;  %v15526_v14 = vmov 683565275  }
 0x2e0   :  { %v12803_v36 = vsub.s32 %v3300_v0, %v3303_v32  ;;  %v3359_v53 = vshrl.u32 %v15526_v14, %v3358_v16  ;;  %vm3375_vm1 = vcmp.lt.s32.totalorder %v3356_v11, 1  ;;  %vm3025_vm7 = vcmp.lt.s32.totalorder %v12671_v61, 2 }
 0x2e1   :  { %v3224_v12 = vsel %vm3139_vm11, %v3223_v40, %v12673_v54  ;;  %v3368_v34 = vor.u32 %v3367_v18, %v3366_v8  ;;  %v3374_v19 = vor.u32 %v3373_v10, %v3372_v51  ;;  %vm3378_vm6 = vcmp.lt.s32.totalorder %v3356_v11, 4 }
 0x2e2   :  { %v3306_v33 = vsub.s32 0, %v12803_v36  ;;  %vm3376_vm0 = vcmp.lt.s32.totalorder %v3356_v11, 2  ;;  %vm3377_vm2 = vcmp.lt.s32.totalorder %v3356_v11, 3  ;;  %v3391_v4 = vshll.u32 %v3351_v7, 8  ;;  %v12817_v2 = vpop.eup %9984 }
 0x2e3   :  { %v3225_v35 = vsel %vm12767_vm15, %v12343_v25, %v3222_v31  ;;  %v3380_v32 = vsel %vm3378_vm6, %v3368_v34, 2102212464  ;;  %v3383_v0 = vsel %vm3375_vm1, %v3362_v9, %v3365_v29  ;;  %v3384_v16 = vsel %vm3378_vm6, %v3371_v43, 920167782  ;;  %15527 = vst [vmem:[#allocation100_spill] sm:$0xff] %v12817_v2 }
 0x2e4   :  { %vm3129_vm9 = vcmp.eq.s32.totalorder %v12763_v41, 0  ;;  %vm3132_vm10 = vcmp.eq.s32.totalorder %v12763_v41, 2  ;;  %v12823_v54 = vsel %vm12767_vm15, 0, %v3224_v12  ;;  %vm3242_vm3 = vcmp.lt.s32.totalorder %v12376_v58, 0 }
 0x2e5   :  { %15528 = vst [vmem:[#allocation101_spill] sm:$0xff] %v12823_v54  ;;  %v9264_v7 = vmin.u32 %v3306_v33, %v12803_v36  ;;  %v3379_v51 = vsel %vm3375_vm1, %v3359_v53, %v3362_v9  ;;  %v3449_v40 = vand.u32 2139095040, %v12395_v28  ;;  %v3381_v22 = vsel %vm3377_vm2, %v3365_v29, %v3380_v32 }
 0x2e6   :  { %v3385_v21 = vsel %vm3377_vm2, %v3368_v34, %v3384_v16  ;;  %v3387_v63 = vsel %vm3375_vm1, %v3365_v29, %v3368_v34  ;;  %v3388_v8 = vsel %vm3378_vm6, %v3374_v19, 1326507024  ;;  %9988 = vcosq.f32 %v3225_v35 }
 0x2e7   :  { %v3308_v37 = vclz %v9264_v7  ;;  %v3386_v18 = vsel %vm3376_vm0, %v3383_v0, %v3385_v21  ;;  %v3389_v1 = vsel %vm3377_vm2, %v3371_v43, %v3388_v8  ;;  %v15529_v10 = vand.u32 2147483647, %v12376_v58  ;;  %v12846_v34 = vpop.eup %9986 }
 0x2e8   :  { %v3382_v53 = vsel %vm3376_vm0, %v3379_v51, %v3381_v22  ;;  %v3390_v31 = vsel %vm3376_vm0, %v3387_v63, %v3389_v1  ;;  %v12843_v12 = vmul.u32.u64.low %v3391_v4, %v3386_v18  ;;  %v12844_v29 = vmul.u32.u64.high %v3391_v4, %v3386_v18, %v12843_v12  ;;  %15532 = vst [vmem:[#allocation102_spill] sm:$0xff] %v12846_v34 }
 0x2e9   :  { %vm12837_vm8 = vcmp.le.f32.partialorder %v15529_v10, 0.7853982  ;;  %v9265_v19 = vadd.s32 4294967294, %v3308_v37  ;;  %v12848_v33 = vmul.u32.u64.low %v3391_v4, %v3390_v31  ;;  %v12849_v32 = vmul.u32.u64.high %v3391_v4, %v3390_v31, %v12848_v33 }
 0x2ea   :  { %v3450_v43 = vshrl.u32 %v3449_v40, 23  ;;  %v12852_v0 = vand.u32 3, %v12823_v54  ;;  %v3296_v16 = vadd.s32 %v12727_v3, %v12724_v20  ;;  %v3326_v7 = vsub.s32 4, %v12792_v30 }
 0x2eb   :  { %v15252_v11 = vand.u32 2147483647, %v12395_v28  ;;  %v15250_v51 = vxor.u32 2147483648, %v12817_v2  ;;  %9990 = vsinq.f32 %v3225_v35  ;;  %vm9266_vm13 = vcmp.lt.s32.totalorder %v9265_v19, 0 }
 0x2ec   :  { %v9271_v22 = vadd.s32 4294967169, %v3450_v43  ;;  %v15251_v21 = vxor.u32 2147483648, %v12846_v34  ;;  %v3311_v63 = vsel %vm9266_vm13, 0, %v9265_v19  ;;  %v3398_v8 = vmul.u32 %v3391_v4, %v3382_v53 }
 0x2ed   :  { %v3401_v40 = vadd.s32 1, %v12844_v29  ;;  %v12865_v20 = vsel %vm3025_vm7, %v12776_v24, %v12783_v27  ;;  %v3312_v3 = vsub.s32 32, %v3311_v63  ;;  %v3313_v37 = vshll.u32 %v12803_v36, %v3311_v63 }
 0x2ee   :  { %v3316_v18 = vsub.s32 4294967266, %v3311_v63  ;;  %vm3235_vm5 = vcmp.eq.s32.totalorder %v12852_v0, 2  ;;  %v3327_v35 = vsel %vm3242_vm3, %v3326_v7, %v12792_v30  ;;  %vm3400_vm11 = vc.u32 %v12849_v32, %v12843_v12 }
 0x2ef   :  { %v3456_v4 = vadd.s32 1, %v9271_v22  ;;  %v3314_v1 = vshrl.u32 %v3296_v16, %v3312_v3  ;;  %v3402_v53 = vsel %vm3400_vm11, %v3401_v40, %v12844_v29  ;;  %v3453_v61 = vand.u32 8388607, %v15252_v11 }
 0x2f0   :  { %v3317_v10 = vadd.s32 127, %v3316_v18  ;;  %v12881_v36 = vsel %vm3129_vm9, %v12817_v2, %v15251_v21  ;;  %v12888_v24 = vsel %vm3132_vm10, %v15250_v51, %v12846_v34  ;;  %v3403_v27 = vadd.s32 %v3402_v53, %v3398_v8  ;;  %v12890_v30 = vpop.eup %9988 }
 0x2f1   :  { %vm3457_vm15 = vcmp.gt.s32.totalorder %v3456_v4, 0  ;;  %vm3232_vm1 = vcmp.eq.s32.totalorder %v12852_v0, 0  ;;  %v3315_v31 = vor.u32 %v3314_v1, %v3313_v37  ;;  %v12895_v19 = vsel %vm12837_vm8, 0, %v3327_v35 }
 0x2f2   :  { %v3318_v29 = vshll.u32 %v3317_v10, 23  ;;  %v3458_v33 = vsel %vm3457_vm15, %v3456_v4, 0  ;;  %v3404_v43 = vadd.s32 536870912, %v3403_v27  ;;  %v3552_v22 = vand.u32 2139095040, %v12399_v6 }
 0x2f3   :  { %v3460_v16 = vand.u32 31, %v3458_v33  ;;  %v3322_v8 = vcvt.s32.f32 %v3315_v31  ;;  %v12900_v40 = vadd.s32 %v12843_v12, %v12849_v32  ;;  %v3454_v3 = vor.u32 8388608, %v3453_v61 }
 0x2f4   :  { %v3319_v63 = vor.u32 4788187, %v3318_v29  ;;  %v12903_v18 = vshrl.u32 %v3404_v43, 30  ;;  %v3459_v1 = vshrl.u32 %v3458_v33, 5  ;;  %v15533_v51 = vmov 2475754826  }
 0x2f5   :  { %v3461_v35 = vsub.s32 32, %v3460_v16  ;;  %v12905_v10 = vpop.eup %9990  ;;  %v3463_v53 = vshll.u32 %v15526_v14, %v3460_v16  ;;  %v3466_v21 = vshll.u32 %v15533_v51, %v3460_v16  ;;  %v3469_v29 = vshll.u32 %v15523_v49, %v3460_v16 }
 0x2f6   :  { %v3320_v4 = vand.u32 2147483647, %v3319_v63  ;;  %v3406_v31 = vshll.u32 %v12903_v18, 30  ;;  %v3472_v32 = vshll.u32 %v15524_v56, %v3460_v16  ;;  %v3475_v61 = vshll.u32 %v15525_v13, %v3460_v16 }
 0x2f7   :  { %v3464_v12 = vshrl.u32 %v15533_v51, %v3461_v35  ;;  %v3467_v33 = vshrl.u32 %v15523_v49, %v3461_v35  ;;  %v3470_v11 = vshrl.u32 %v15524_v56, %v3461_v35  ;;  %v3473_v63 = vshrl.u32 %v15525_v13, %v3461_v35 }
 0x2f8   :  { %v3323_v43 = vmul.f32 %v3322_v8, %v3320_v4  ;;  %v12918_v37 = vsub.s32 %v3403_v27, %v3406_v31  ;;  %v3476_v2 = vshrl.u32 %v15260_v50, %v3461_v35  ;;  %v3553_v34 = vshrl.u32 %v3552_v22, 23 }
 0x2f9   :  { %v15534_v39 = vxor.u32 2147483648, %v12890_v30  ;;  %v3462_v4 = vshrl.u32 %v15526_v14, %v3461_v35  ;;  %v12927_v54 = vshll.u32 %v3454_v3, 8  ;;  %vm3128_vm7 = vcmp.lt.s32.totalorder %v12763_v41, 2 }
 0x2fa   :  { %v3324_v8 = vxor.u32 2147483648, %v3323_v43  ;;  %vm3231_vm6 = vcmp.lt.s32.totalorder %v12852_v0, 2  ;;  %v3409_v27 = vsub.s32 0, %v12918_v37  ;;  %v3465_v31 = vor.u32 %v3464_v12, %v3463_v53 }
 0x2fb   :  { %v3237_v16 = vsel %vm3235_vm5, %v15534_v39, %v12905_v10  ;;  %v3468_v50 = vor.u32 %v3467_v33, %v3466_v21  ;;  %v3471_v22 = vor.u32 %v3470_v11, %v3469_v29  ;;  %v3474_v23 = vor.u32 %v3473_v63, %v3472_v32 }
 0x2fc   :  { %v3325_v7 = vsel %vm3242_vm3, %v3324_v8, %v3323_v43  ;;  %v3477_v48 = vor.u32 %v3476_v2, %v3475_v61  ;;  %vm3478_vm0 = vcmp.lt.s32.totalorder %v3459_v1, 1  ;;  %v15535_v39 = vxor.u32 2147483648, %v12905_v10 }
 0x2fd   :  { %v9268_v35 = vmin.u32 %v3409_v27, %v12918_v37  ;;  %v3429_v55 = vsub.s32 4, %v12903_v18  ;;  %v9275_v47 = vadd.s32 4294967169, %v3553_v34  ;;  %vm3023_vm2 = vweird.f32 %v12225_v17 }
 0x2fe   :  { %v3234_v3 = vsel %vm3232_vm1, %v12890_v30, %v15535_v39  ;;  %v3328_v11 = vsel %vm12837_vm8, %v12376_v58, %v3325_v7  ;;  %vm3479_vm9 = vcmp.lt.s32.totalorder %v3459_v1, 2  ;;  %vm3480_vm10 = vcmp.lt.s32.totalorder %v3459_v1, 3 }
 0x2ff   :  { %vm3481_vm3 = vcmp.lt.s32.totalorder %v3459_v1, 4  ;;  %vm3126_vm13 = vweird.f32 %v12312_v15  ;;  %vm3229_vm5 = vweird.f32 %v12343_v25  ;;  %vm3345_vm11 = vcmp.lt.s32.totalorder %v12380_v44, 0 }
 0x300   :  { %v3411_v2 = vclz %v9268_v35  ;;  %v3482_v21 = vsel %vm3478_vm0, %v3462_v4, %v3465_v31  ;;  %v3483_v53 = vsel %vm3481_vm3, %v3471_v22, 2102212464  ;;  %v3486_v34 = vsel %vm3478_vm0, %v3465_v31, %v3468_v50 }
 0x301   :  { %v3484_v29 = vsel %vm3480_vm10, %v3468_v50, %v3483_v53  ;;  %v3487_v12 = vsel %vm3481_vm3, %v3474_v23, 920167782  ;;  %v3490_v9 = vsel %vm3478_vm0, %v3468_v50, %v3471_v22  ;;  %v3491_v7 = vsel %vm3481_vm3, %v3477_v48, 1326507024 }
 0x302   :  { %9992 = vcosq.f32 %v3328_v11  ;;  %v9269_v32 = vadd.s32 4294967294, %v3411_v2  ;;  %v3488_v61 = vsel %vm3480_vm10, %v3471_v22, %v3487_v12  ;;  %v3492_v43 = vsel %vm3480_vm10, %v3474_v23, %v3491_v7 }
 0x303   :  { %9994 = vsinq.f32 %v3328_v11  ;;  %v3485_v33 = vsel %vm3479_vm9, %v3482_v21, %v3484_v29  ;;  %v3489_v63 = vsel %vm3479_vm9, %v3486_v34, %v3488_v61  ;;  %v3493_v8 = vsel %vm3479_vm9, %v3490_v9, %v3492_v43 }
 0x304   :  { %vm9270_vm8 = vcmp.lt.s32.totalorder %v9269_v32, 0  ;;  %v12958_v4 = vmul.u32.u64.low %v12927_v54, %v3493_v8  ;;  %v12959_v27 = vmul.u32.u64.high %v12927_v54, %v3493_v8, %v12958_v4  ;;  %v3559_v50 = vadd.s32 1, %v9275_v47 }
 0x305   :  { %v3414_v48 = vsel %vm9270_vm8, 0, %v9269_v32  ;;  %v12962_v31 = vmul.u32.u64.low %v12927_v54, %v3489_v63  ;;  %v12963_v39 = vmul.u32.u64.high %v12927_v54, %v3489_v63, %v12962_v31  ;;  %v15536_v23 = vand.u32 2147483647, %v12399_v6 }
 0x306   :  { %v3415_v35 = vsub.s32 32, %v3414_v48  ;;  %v3416_v11 = vshll.u32 %v12918_v37, %v3414_v48  ;;  %v3419_v1 = vsub.s32 4294967266, %v3414_v48  ;;  %vm3560_vm15 = vcmp.gt.s32.totalorder %v3559_v50, 0 }
 0x307   :  { %v3556_v22 = vand.u32 8388607, %v15536_v23  ;;  %v3135_v2 = vsel %vm3128_vm7, %v12881_v36, %v12888_v24  ;;  %v3238_v47 = vsel %vm3231_vm6, %v3234_v3, %v3237_v16  ;;  %v12976_v21 = vand.u32 3, %v12895_v19 }
 0x308   :  { %v3561_v53 = vsel %vm3560_vm15, %v3559_v50, 0  ;;  %v3417_v34 = vshrl.u32 %v12900_v40, %v3415_v35  ;;  %v3420_v29 = vadd.s32 127, %v3419_v1  ;;  %v3501_v12 = vmul.u32 %v12927_v54, %v3485_v33  ;;  %v15540_v50 = vld [vmem:[#allocation70_spill] sm:$0xff] }
 0x309   :  { %vm3503_vm1 = vc.u32 %v12959_v27, %v12962_v31  ;;  %v3430_v41 = vsel %vm3345_vm11, %v3429_v55, %v12903_v18  ;;  %v3504_v36 = vadd.s32 1, %v12963_v39  ;;  %v3557_v0 = vor.u32 8388608, %v3556_v22 }
 0x30a   :  { %v3563_v24 = vand.u32 31, %v3561_v53  ;;  %v3033_v37 = vsel %vm3023_vm2, nan, %v12865_v20  ;;  %v15537_v40 = vand.u32 2147483647, %v12380_v44  ;;  %v3418_v54 = vor.u32 %v3417_v34, %v3416_v11 }
 0x30b   :  { %v3421_v3 = vshll.u32 %v3420_v29, 23  ;;  %v12997_v9 = vsel %vm3126_vm13, nan, %v3135_v2  ;;  %v13001_v55 = vsel %vm3229_vm5, nan, %v3238_v47  ;;  %v3505_v18 = vsel %vm3503_vm1, %v3504_v36, %v12963_v39  ;;  %v15541_v39 = vld [vmem:[#allocation71_spill] sm:$0xff] }
 0x30c   :  { %vm12991_vm7 = vcmp.le.f32.partialorder %v15537_v40, 0.7853982  ;;  %v3564_v7 = vsub.s32 32, %v3563_v24  ;;  %v13004_v20 = vpop.eup %9992  ;;  %v3425_v61 = vcvt.s32.f32 %v3418_v54  ;;  %v3506_v33 = vadd.s32 %v3505_v18, %v3501_v12 }
 0x30d   :  { %v3422_v32 = vor.u32 4788187, %v3421_v3  ;;  %v13008_v43 = vsel %vm12991_vm7, 0, %v3430_v41  ;;  %v13010_v63 = vpop.eup %9994  ;;  %vm3335_vm6 = vcmp.eq.s32.totalorder %v12976_v21, 0  ;;  %vm3338_vm0 = vcmp.eq.s32.totalorder %v12976_v21, 2 }
 0x30e   :  { %v13015_v8 = vand.u32 3, %v13008_v43  ;;  %v13017_v4 = vshll.u32 %v3557_v0, 8  ;;  %v13021_v48 = vmul.f32 %v12646_v60, %v15540_v50  ;;  %v13025_v23 = vmul.f32 %v12654_v62, %v15541_v39 }
 0x30f   :  { %v3423_v22 = vand.u32 2147483647, %v3422_v32  ;;  %v3507_v35 = vadd.s32 536870912, %v3506_v33  ;;  %v3566_v11 = vshll.u32 %v15526_v14, %v3563_v24  ;;  %v3567_v1 = vshrl.u32 %v15533_v51, %v3564_v7 }
 0x310   :  { %v3569_v2 = vshll.u32 %v15533_v51, %v3563_v24  ;;  %v3570_v47 = vshrl.u32 %v15523_v49, %v3564_v7  ;;  %v3572_v34 = vshll.u32 %v15523_v49, %v3563_v24  ;;  %v3573_v29 = vshrl.u32 %v15524_v56, %v3564_v7 }
 0x311   :  { %v3426_v60 = vmul.f32 %v3425_v61, %v3423_v22  ;;  %v13033_v12 = vshrl.u32 %v3507_v35, 30  ;;  %v3562_v41 = vshrl.u32 %v3561_v53, 5  ;;  %v3575_v62 = vshll.u32 %v15524_v56, %v3563_v24 }
 0x312   :  { %v3576_v0 = vshrl.u32 %v15525_v13, %v3564_v7  ;;  %v3578_v40 = vshll.u32 %v15525_v13, %v3563_v24  ;;  %v15542_v54 = vmov 1326507024   ;;  %v3336_v3 = vxor.u32 2147483648, %v13010_v63 }
 0x313   :  { %v3579_v51 = vshrl.u32 %v15542_v54, %v3564_v7  ;;  %v3427_v18 = vxor.u32 2147483648, %v3426_v60  ;;  %v3509_v49 = vshll.u32 %v13033_v12, 30  ;;  %v3565_v32 = vshrl.u32 %v15526_v14, %v3564_v7  ;;  %v15543_v54 = vld [vmem:[#allocation72_spill] sm:$0xff]  ;;  %v15544_v7 = vld [vmem:[#allocation73_spill] sm:$0xff] }
 0x314   :  { %vm3334_vm9 = vcmp.lt.s32.totalorder %v12976_v21, 2  ;;  %v3568_v53 = vor.u32 %v3567_v1, %v3566_v11  ;;  %v3571_v61 = vor.u32 %v3570_v47, %v3569_v2  ;;  %v3574_v56 = vor.u32 %v3573_v29, %v3572_v34 }
 0x315   :  { %v3577_v22 = vor.u32 %v3576_v0, %v3575_v62  ;;  %v3428_v35 = vsel %vm3345_vm11, %v3427_v18, %v3426_v60  ;;  %v13046_v36 = vsub.s32 %v3506_v33, %v3509_v49  ;;  %vm3581_vm10 = vcmp.lt.s32.totalorder %v3562_v41, 1 }
 0x316   :  { %vm3584_vm3 = vcmp.lt.s32.totalorder %v3562_v41, 4  ;;  %v3431_v13 = vsel %vm12991_vm7, %v12380_v44, %v3428_v35  ;;  %v3580_v24 = vor.u32 %v3579_v51, %v3578_v40  ;;  %v3654_v14 = vmul.f32 %v12751_v52, %v15543_v54  ;;  %v15546_v35 = vld [vmem:[#allocation74_spill] sm:$0xff] }
 0x317   :  { %v3655_v11 = vmul.f32 %v3033_v37, %v15544_v7  ;;  %9996 = vcosq.f32 %v3431_v13  ;;  %v3512_v1 = vsub.s32 0, %v13046_v36  ;;  %vm3583_vm8 = vcmp.lt.s32.totalorder %v3562_v41, 3 }
 0x318   :  { %v3586_v2 = vsel %vm3584_vm3, %v3574_v56, 2102212464  ;;  %9998 = vsinq.f32 %v3431_v13  ;;  %vm3582_vm11 = vcmp.lt.s32.totalorder %v3562_v41, 2  ;;  %v3589_v33 = vsel %vm3581_vm10, %v3568_v53, %v3571_v61 }
 0x319   :  { %v3590_v47 = vsel %vm3584_vm3, %v3577_v22, 920167782  ;;  %v3337_v52 = vsel %vm3335_vm6, %v13004_v20, %v3336_v3  ;;  %v15545_v37 = vxor.u32 2147483648, %v13004_v20  ;;  %v9272_v34 = vmin.u32 %v3512_v1, %v13046_v36 }
 0x31a   :  { %v3585_v29 = vsel %vm3581_vm10, %v3565_v32, %v3568_v53  ;;  %v3587_v60 = vsel %vm3583_vm8, %v3571_v61, %v3586_v2  ;;  %v3591_v62 = vsel %vm3583_vm8, %v3574_v56, %v3590_v47  ;;  %v3593_v0 = vsel %vm3581_vm10, %v3571_v61, %v3574_v56  ;;  %v15547_v2 = vld [vmem:[#allocation75_spill] sm:$0xff] }
 0x31b   :  { %v3340_v16 = vsel %vm3338_vm0, %v15545_v37, %v13010_v63  ;;  %v3594_v40 = vsel %vm3584_vm3, %v3580_v24, 1326507024  ;;  %v3514_v51 = vclz %v9272_v34  ;;  %v3592_v18 = vsel %vm3582_vm11, %v3589_v33, %v3591_v62 }
 0x31c   :  { %v3595_v49 = vsel %vm3583_vm8, %v3577_v22, %v3594_v40  ;;  %v3656_v13 = vmul.f32 %v12997_v9, %v15546_v35  ;;  %v13080_v32 = vmul.u32.u64.low %v13017_v4, %v3592_v18  ;;  %v13081_v53 = vmul.u32.u64.high %v13017_v4, %v3592_v18, %v13080_v32 }
 0x31d   :  { %v3596_v1 = vsel %vm3582_vm11, %v3593_v0, %v3595_v49  ;;  %v3657_v61 = vmul.f32 %v13001_v55, %v15547_v2  ;;  %v9273_v56 = vadd.s32 4294967294, %v3514_v51  ;;  %v3588_v24 = vsel %vm3582_vm11, %v3585_v29, %v3587_v60 }
 0x31e   :  { %v13088_v33 = vmul.u32.u64.low %v13017_v4, %v3596_v1  ;;  %v13089_v47 = vmul.u32.u64.high %v13017_v4, %v3596_v1, %v13088_v33  ;;  %vm15269_vm15 = vweird.f32 %v12376_v58  ;;  %v3662_v9 = vpack.c.bf16 %v13025_v23, %v13021_v48 }
 0x31f   :  { %v3663_v22 = vpack.c.bf16 %v3655_v11, %v3654_v14  ;;  %v3664_v37 = vpack.c.bf16 %v3657_v61, %v3656_v13  ;;  %v3341_v34 = vsel %vm3334_vm9, %v3337_v52, %v3340_v16  ;;  %vm3437_vm1 = vcmp.lt.s32.totalorder %v13015_v8, 2  ;;  %v15548_v61 = vld [vmem:[#allocation76_spill] sm:$0xff] }
 0x320   :  { %v3502_v55 = vadd.s32 %v12962_v31, %v12959_v27  ;;  %vm9274_vm7 = vcmp.lt.s32.totalorder %v9273_v56, 0  ;;  %vm3441_vm6 = vcmp.eq.s32.totalorder %v13015_v8, 2  ;;  %v3604_v29 = vmul.u32 %v13017_v4, %v3588_v24  ;;  %3667 = vst [vmem:[#allocation2 + $0x80] sm:$0xff] %v3662_v9 }
 0x321   :  { %v3517_v41 = vsel %vm9274_vm7, 0, %v9273_v56  ;;  %v3607_v60 = vadd.s32 1, %v13081_v53  ;;  %3668 = vst [vmem:[#allocation2 + $0x90] sm:$0xff] %v3663_v22  ;;  %3669 = vst [vmem:[#allocation2 + $0xa0] sm:$0xff] %v3664_v37  ;;  %v13102_v48 = vpop.eup %9996  ;;  %v3765_v11 = vadd.s32 3, %v12403_v42  ;;  %v3342_v31 = vsel %vm15269_vm15, nan, %v3341_v34 }
 0x322   :  { %v3518_v21 = vsub.s32 32, %v3517_v41  ;;  %v3519_v23 = vshll.u32 %v13046_v36, %v3517_v41  ;;  %v3522_v14 = vsub.s32 4294967266, %v3517_v41  ;;  %v13106_v27 = vpop.eup %9998  ;;  %vm3438_vm0 = vcmp.eq.s32.totalorder %v13015_v8, 0  ;;  %v15549_v37 = vld [vmem:[#allocation77_spill] sm:$0xff] }
 0x323   :  { %v3442_v4 = vxor.u32 2147483648, %v13102_v48  ;;  %vm3606_vm9 = vc.u32 %v13089_v47, %v13080_v32  ;;  %v3439_v52 = vxor.u32 2147483648, %v13106_v27  ;;  %vm15268_vm10 = vweird.f32 %v12380_v44 }
 0x324   :  { %v3520_v16 = vshrl.u32 %v3502_v55, %v3518_v21  ;;  %v3523_v62 = vadd.s32 127, %v3522_v14  ;;  %v3608_v36 = vsel %vm3606_vm9, %v3607_v60, %v13081_v53  ;;  %v3869_v40 = vadd.s32 3, %v12497_v46 }
 0x325   :  { %v3443_v42 = vsel %vm3441_vm6, %v3442_v4, %v13106_v27  ;;  %v3609_v0 = vadd.s32 %v3608_v36, %v3604_v29  ;;  %v3440_v51 = vsel %vm3438_vm0, %v13102_v48, %v3439_v52  ;;  %v3766_v13 = vand.u32 3, %v3765_v11 }
 0x326   :  { %v3521_v18 = vor.u32 %v3520_v16, %v3519_v23  ;;  %v3524_v49 = vshll.u32 %v3523_v62, 23  ;;  %v3444_v1 = vsel %vm3437_vm1, %v3440_v51, %v3443_v42  ;;  %v3658_v56 = vmul.f32 %v3342_v31, %v15548_v61 }
 0x327   :  { %v3610_v53 = vadd.s32 536870912, %v3609_v0  ;;  %v3973_v24 = vadd.s32 3, %v12501_v5  ;;  %v3445_v33 = vsel %vm15268_vm10, nan, %v3444_v1  ;;  %vm3768_vm3 = vcmp.eq.s32.totalorder %v3766_v13, 0 }
 0x328   :  { %v3525_v9 = vor.u32 4788187, %v3524_v49  ;;  %v3528_v46 = vcvt.s32.f32 %v3521_v18  ;;  %v3659_v34 = vmul.f32 %v3445_v33, %v15549_v37  ;;  %v3870_v41 = vand.u32 3, %v3869_v40  ;;  %v15558_v33 = vld [vmem:[#allocation97_spill] sm:$0xff] }
 0x329   :  { %v13132_v22 = vshrl.u32 %v3610_v53, 30  ;;  %vm3771_vm8 = vcmp.eq.s32.totalorder %v3766_v13, 2  ;;  %v3974_v60 = vand.u32 3, %v3973_v24  ;;  %v3532_v5 = vsub.s32 4, %v13033_v12 }
 0x32a   :  { %v3526_v55 = vand.u32 2147483647, %v3525_v9  ;;  %v3665_v29 = vpack.c.bf16 %v3659_v34, %v3658_v56  ;;  %v4077_v23 = vadd.s32 3, %v12650_v57  ;;  %v15550_v14 = vand.u32 2147483647, %v12395_v28 }
 0x32b   :  { %v3612_v8 = vshll.u32 %v13132_v22, 30  ;;  %vm3448_vm1 = vcmp.lt.s32.totalorder %v12395_v28, 0  ;;  %vm3767_vm7 = vcmp.lt.s32.totalorder %v3766_v13, 2  ;;  %v15553_v62 = vxor.u32 2147483648, %v12463_v45 }
 0x32c   :  { %v3529_v21 = vmul.f32 %v3528_v46, %v3526_v55  ;;  %vm13140_vm11 = vcmp.le.f32.partialorder %v15550_v14, 0.7853982  ;;  %3670 = vst [vmem:[#allocation2 + $0xb0] sm:$0xff] %v3665_v29  ;;  %v15554_v57 = vxor.u32 2147483648, %v12444_v59  ;;  %vm3872_vm6 = vcmp.eq.s32.totalorder %v3870_v41, 0 }
 0x32d   :  { %v13145_v31 = vsub.s32 %v3609_v0, %v3612_v8  ;;  %v3770_v36 = vsel %vm3768_vm3, %v12444_v59, %v15553_v62  ;;  %vm3875_vm0 = vcmp.eq.s32.totalorder %v3870_v41, 2  ;;  %vm3976_vm9 = vcmp.eq.s32.totalorder %v3974_v60, 0 }
 0x32e   :  { %v3530_v16 = vxor.u32 2147483648, %v3529_v21  ;;  %v3773_v42 = vsel %vm3771_vm8, %v15554_v57, %v12463_v45  ;;  %vm3979_vm10 = vcmp.eq.s32.totalorder %v3974_v60, 2  ;;  %v3533_v0 = vsel %vm3448_vm1, %v3532_v5, %v13033_v12  ;;  %v15556_v45 = vld [vmem:[#allocation95_spill] sm:$0xff]  ;;  %v15560_v12 = vld [vmem:[#allocation96_spill] sm:$0xff] }
 0x32f   :  { %v3615_v40 = vsub.s32 0, %v13145_v31  ;;  %v13155_v18 = vand.u32 3, %v4077_v23  ;;  %v4181_v49 = vadd.s32 3, %v12759_v38  ;;  %v3774_v1 = vsel %vm3767_vm7, %v3770_v36, %v3773_v42  ;;  %v15563_v23 = vld [vmem:[#allocation101_spill] sm:$0xff]  ;;  %v15564_v57 = vld [vmem:[#allocation99_spill] sm:$0xff] }
 0x330   :  { %v3531_v51 = vsel %vm3448_vm1, %v3530_v16, %v3529_v21  ;;  %vm3871_vm3 = vcmp.lt.s32.totalorder %v3870_v41, 2  ;;  %v15555_v59 = vxor.u32 2147483648, %v12545_v26  ;;  %v15557_v56 = vxor.u32 2147483648, %v15556_v45 }
 0x331   :  { %v9276_v13 = vmin.u32 %v3615_v40, %v13145_v31  ;;  %vm3975_vm8 = vcmp.lt.s32.totalorder %v3974_v60, 2  ;;  %v15559_v9 = vxor.u32 2147483648, %v15558_v33  ;;  %v15561_v38 = vxor.u32 2147483648, %v15560_v12  ;;  %v15566_v40 = vld [vmem:[#allocation98_spill] sm:$0xff] }
 0x332   :  { %v3874_v53 = vsel %vm3872_vm6, %v15556_v45, %v15555_v59  ;;  %v3877_v24 = vsel %vm3875_vm0, %v15557_v56, %v12545_v26  ;;  %v3534_v55 = vsel %vm13140_vm11, %v12395_v28, %v3531_v51  ;;  %v13176_v8 = vsel %vm13140_vm11, 0, %v3533_v0 }
 0x333   :  { %v3978_v46 = vsel %vm3976_vm9, %v15560_v12, %v15559_v9  ;;  %v3981_v34 = vsel %vm3979_vm10, %v15561_v38, %v15558_v33  ;;  %v3605_v26 = vadd.s32 %v13080_v32, %v13089_v47  ;;  %v3617_v29 = vclz %v9276_v13  ;;  %v15570_v9 = vld [vmem:[#allocation100_spill] sm:$0xff] }
 0x334   :  { %v13182_v21 = vsel %vm2714_vm4, nan, %v3774_v1  ;;  %vm4080_vm1 = vcmp.eq.s32.totalorder %v13155_v18, 0  ;;  %v4182_v5 = vand.u32 3, %v4181_v49  ;;  %v4285_v14 = vadd.s32 3, %v15563_v23 }
 0x335   :  { %v9277_v16 = vadd.s32 4294967294, %v3617_v29  ;;  %v3635_v62 = vsub.s32 4, %v13132_v22  ;;  %v3878_v11 = vsel %vm3871_vm3, %v3874_v53, %v3877_v24  ;;  %v3982_v36 = vsel %vm3975_vm8, %v3978_v46, %v3981_v34  ;;  %v15568_v24 = vld [vmem:[#allocation102_spill] sm:$0xff] }
 0x336   :  { %10000 = vcosq.f32 %v3534_v55  ;;  %vm4079_vm10 = vcmp.lt.s32.totalorder %v13155_v18, 2  ;;  %v4286_v32 = vand.u32 3, %v4285_v14  ;;  %v4389_v47 = vadd.s32 3, %v12895_v19 }
 0x337   :  { %10002 = vsinq.f32 %v3534_v55  ;;  %vm9278_vm4 = vcmp.lt.s32.totalorder %v9277_v16, 0  ;;  %v15565_v42 = vxor.u32 2147483648, %v15564_v57  ;;  %v4493_v0 = vadd.s32 3, %v13008_v43 }
 0x338   :  { %v3620_v49 = vsel %vm9278_vm4, 0, %v9277_v16  ;;  %vm4083_vm11 = vcmp.eq.s32.totalorder %v13155_v18, 2  ;;  %vm4183_vm7 = vcmp.lt.s32.totalorder %v4182_v5, 2  ;;  %vm4184_vm6 = vcmp.eq.s32.totalorder %v4182_v5, 0 }
 0x339   :  { %v4082_v51 = vsel %vm4080_vm1, %v15566_v40, %v15565_v42  ;;  %v3621_v41 = vsub.s32 32, %v3620_v49  ;;  %v3622_v13 = vshll.u32 %v13145_v31, %v3620_v49  ;;  %v3625_v1 = vsub.s32 4294967266, %v3620_v49 }
 0x33a   :  { %vm4187_vm0 = vcmp.eq.s32.totalorder %v4182_v5, 2  ;;  %vm3551_vm9 = vcmp.lt.s32.totalorder %v12399_v6, 0  ;;  %vm4288_vm3 = vcmp.eq.s32.totalorder %v4286_v32, 0  ;;  %vm4291_vm8 = vcmp.eq.s32.totalorder %v4286_v32, 2 }
 0x33b   :  { %v4390_v19 = vand.u32 3, %v4389_v47  ;;  %v4494_v59 = vand.u32 3, %v4493_v0  ;;  %v3623_v45 = vshrl.u32 %v3605_v26, %v3621_v41  ;;  %v3626_v53 = vadd.s32 127, %v3625_v1 }
 0x33c   :  { %v15567_v43 = vxor.u32 2147483648, %v15566_v40  ;;  %v15569_v33 = vxor.u32 2147483648, %v15568_v24  ;;  %v15571_v31 = vxor.u32 2147483648, %v15570_v9  ;;  %vm4287_vm1 = vcmp.lt.s32.totalorder %v4286_v32, 2 }
 0x33d   :  { %vm4392_vm4 = vcmp.eq.s32.totalorder %v4390_v19, 0  ;;  %vm4395_vm15 = vcmp.eq.s32.totalorder %v4390_v19, 2  ;;  %v3624_v38 = vor.u32 %v3623_v45, %v3622_v13  ;;  %v3627_v34 = vshll.u32 %v3626_v53, 23 }
 0x33e   :  { %v4085_v56 = vsel %vm4083_vm11, %v15567_v43, %v15564_v57  ;;  %v4186_v12 = vsel %vm4184_vm6, %v15570_v9, %v15569_v33  ;;  %v4189_v46 = vsel %vm4187_vm0, %v15571_v31, %v15568_v24  ;;  %v15572_v55 = vxor.u32 2147483648, %v12905_v10 }
 0x33f   :  { %v15573_v29 = vxor.u32 2147483648, %v12890_v30  ;;  %vm4391_vm11 = vcmp.lt.s32.totalorder %v4390_v19, 2  ;;  %v4394_v23 = vsel %vm4392_vm4, %v13004_v20, %v3336_v3  ;;  %v15574_v14 = vxor.u32 2147483648, %v13004_v20 }
 0x340   :  { %v4290_v26 = vsel %vm4288_vm3, %v12890_v30, %v15572_v55  ;;  %vm4496_vm6 = vcmp.eq.s32.totalorder %v4494_v59, 0  ;;  %v3628_v47 = vor.u32 4788187, %v3627_v34  ;;  %v3631_v57 = vcvt.s32.f32 %v3624_v38  ;;  %v10001_v40 = vpop.eup %10000 }
 0x341   :  { %v4293_v60 = vsel %vm4291_vm8, %v15573_v29, %v12905_v10  ;;  %v4397_v16 = vsel %vm4395_vm15, %v15574_v14, %v13010_v63  ;;  %v4086_v42 = vsel %vm4079_vm10, %v4082_v51, %v4085_v56  ;;  %vm4495_vm0 = vcmp.lt.s32.totalorder %v4494_v59, 2  ;;  %v10003_v20 = vpop.eup %10002 }
 0x342   :  { %v3879_v30 = vsel %vm2817_vm14, nan, %v3878_v11  ;;  %v4190_v10 = vsel %vm4183_vm7, %v4186_v12, %v4189_v46  ;;  %v4498_v3 = vsel %vm4496_vm6, %v13102_v48, %v3439_v52  ;;  %vm4499_vm3 = vcmp.eq.s32.totalorder %v4494_v59, 2 }
 0x343   :  { %v3629_v63 = vand.u32 2147483647, %v3628_v47  ;;  %v4294_v49 = vsel %vm4287_vm1, %v4290_v26, %v4293_v60  ;;  %v4398_v41 = vsel %vm4391_vm11, %v4394_v23, %v4397_v16  ;;  %v4501_v18 = vsel %vm4499_vm3, %v3442_v4, %v13106_v27 }
 0x344   :  { %v15576_v51 = vand.u32 2147483647, %v12399_v6  ;;  %v3983_v52 = vsel %vm2920_vm12, nan, %v3982_v36  ;;  %v4087_v13 = vsel %vm3023_vm2, nan, %v4086_v42  ;;  %v4502_v32 = vsel %vm4495_vm0, %v4498_v3, %v4501_v18 }
 0x345   :  { %v3632_v1 = vmul.f32 %v3631_v57, %v3629_v63  ;;  %v3636_v19 = vsel %vm3551_vm9, %v3635_v62, %v13132_v22  ;;  %v4191_v48 = vsel %vm3126_vm13, nan, %v4190_v10  ;;  %v4597_v27 = vadd.s32 3, %v13176_v8  ;;  %v15583_v63 = vld [vmem:[#allocation79_spill] sm:$0xff] }
 0x346   :  { %vm13233_vm14 = vcmp.le.f32.partialorder %v15576_v51, 0.7853982  ;;  %v4295_v4 = vsel %vm3229_vm5, nan, %v4294_v49  ;;  %vm15580_vm15 = vweird.f32 %v12376_v58  ;;  %v4712_v17 = vmul.f32 %v13182_v21, %v15540_v50 }
 0x347   :  { %v4399_v36 = vsel %vm15580_vm15, nan, %v4398_v41  ;;  %v4713_v59 = vmul.f32 %v3879_v30, %v15541_v39  ;;  %v3633_v45 = vxor.u32 2147483648, %v3632_v1  ;;  %vm15581_vm12 = vweird.f32 %v12380_v44 }
 0x348   :  { %v4503_v22 = vsel %vm15581_vm12, nan, %v4502_v32  ;;  %v4714_v15 = vmul.f32 %v3983_v52, %v15543_v54  ;;  %v4715_v62 = vmul.f32 %v4087_v13, %v15544_v7  ;;  %v3539_v53 = vand.u32 3, %v13176_v8 }
 0x349   :  { %v3638_v25 = vsel %vm13233_vm14, 0, %v3636_v19  ;;  %v3634_v58 = vsel %vm3551_vm9, %v3633_v45, %v3632_v1  ;;  %v4716_v50 = vmul.f32 %v4191_v48, %v15546_v35  ;;  %v4717_v39 = vmul.f32 %v4295_v4, %v15547_v2 }
 0x34a   :  { %v4718_v21 = vmul.f32 %v4399_v36, %v15548_v61  ;;  %v3637_v44 = vsel %vm13233_vm14, %v12399_v6, %v3634_v58  ;;  %v4598_v54 = vand.u32 3, %v4597_v27  ;;  %v4719_v7 = vmul.f32 %v4503_v22, %v15549_v37 }
 0x34b   :  { %v4722_v8 = vpack.c.bf16 %v4713_v59, %v4712_v17  ;;  %10004 = vcosq.f32 %v3637_v44  ;;  %v4723_v43 = vpack.c.bf16 %v4715_v62, %v4714_v15  ;;  %v4724_v56 = vpack.c.bf16 %v4717_v39, %v4716_v50 }
 0x34c   :  { %v3542_v24 = vxor.u32 2147483648, %v10003_v20  ;;  %v3545_v33 = vxor.u32 2147483648, %v10001_v40  ;;  %10006 = vsinq.f32 %v3637_v44  ;;  %v4725_v9 = vpack.c.bf16 %v4719_v7, %v4718_v21 }
 0x34d   :  { %4727 = vst [vmem:[#allocation2 + $0x88] sm:$0xff] %v4722_v8  ;;  %vm3541_vm2 = vcmp.eq.s32.totalorder %v3539_v53, 0  ;;  %vm3544_vm13 = vcmp.eq.s32.totalorder %v3539_v53, 2  ;;  %v4701_v35 = vadd.s32 3, %v3638_v25  ;;  %4728 = vst [vmem:[#allocation2 + $0x98] sm:$0xff] %v4723_v43  ;;  %vm4600_vm5 = vcmp.eq.s32.totalorder %v4598_v54, 0 }
 0x34e   :  { %4729 = vst [vmem:[#allocation2 + $0xa8] sm:$0xff] %v4724_v56  ;;  %vm4603_vm10 = vcmp.eq.s32.totalorder %v4598_v54, 2  ;;  %4730 = vst [vmem:[#allocation2 + $0xb8] sm:$0xff] %v4725_v9  ;;  %vm3540_vm7 = vcmp.lt.s32.totalorder %v3539_v53, 2  ;;  %v3543_v2 = vsel %vm3541_vm2, %v10001_v40, %v3542_v24  ;;  %v3546_v61 = vsel %vm3544_vm13, %v3545_v33, %v10003_v20 }
 0x34f   :  { %v3642_v37 = vand.u32 3, %v3638_v25  ;;  %vm4599_vm9 = vcmp.lt.s32.totalorder %v4598_v54, 2  ;;  %v4602_v12 = vsel %vm4600_vm5, %v10001_v40, %v3542_v24  ;;  %v4605_v31 = vsel %vm4603_vm10, %v3545_v33, %v10003_v20  ;;  %v15582_v40 = vld [vmem:[#allocation78_spill] sm:$0xff] }
 0x350   :  { %v4702_v46 = vand.u32 3, %v4701_v35  ;;  %vm3538_vm8 = vweird.f32 %v12395_v28  ;;  %v3547_v38 = vsel %vm3540_vm7, %v3543_v2, %v3546_v61  ;;  %v4606_v34 = vsel %vm4599_vm9, %v4602_v12, %v4605_v31 }
 0x351   :  { %vm3647_vm1 = vcmp.eq.s32.totalorder %v3642_v37, 2  ;;  %vm3643_vm11 = vcmp.lt.s32.totalorder %v3642_v37, 2  ;;  %vm3644_vm6 = vcmp.eq.s32.totalorder %v3642_v37, 0  ;;  %v3548_v60 = vsel %vm3538_vm8, nan, %v3547_v38 }
 0x352   :  { %vm4707_vm4 = vcmp.eq.s32.totalorder %v4702_v46, 2  ;;  %vm4704_vm0 = vcmp.eq.s32.totalorder %v4702_v46, 0  ;;  %v4607_v14 = vsel %vm3538_vm8, nan, %v4606_v34  ;;  %vm4703_vm3 = vcmp.lt.s32.totalorder %v4702_v46, 2 }
 0x353   :  { %vm3641_vm14 = vweird.f32 %v12399_v6  ;;  %v3660_v0 = vmul.f32 %v3548_v60, %v15582_v40  ;;  %v4720_v10 = vmul.f32 %v4607_v14, %v15582_v40 }
 0x355   :  { %v10005_v55 = vpop.eup %10004 }
 0x356   :  { %v10007_v26 = vpop.eup %10006  ;;  %v3648_v29 = vxor.u32 2147483648, %v10005_v55 }
 0x357   :  { %v3645_v23 = vxor.u32 2147483648, %v10007_v26 }
 0x358   :  { %v3649_v16 = vsel %vm3647_vm1, %v3648_v29, %v10007_v26  ;;  %v4709_v47 = vsel %vm4707_vm4, %v3648_v29, %v10007_v26 }
 0x359   :  { %v3646_v57 = vsel %vm3644_vm6, %v10005_v55, %v3645_v23  ;;  %v4706_v28 = vsel %vm4704_vm0, %v10005_v55, %v3645_v23 }
 0x35a   :  { %v3650_v42 = vsel %vm3643_vm11, %v3646_v57, %v3649_v16  ;;  %v4710_v30 = vsel %vm4703_vm3, %v4706_v28, %v4709_v47 }
 0x35b   :  { %v3651_v3 = vsel %vm3641_vm14, nan, %v3650_v42  ;;  %v4711_v20 = vsel %vm3641_vm14, nan, %v4710_v30 }
 0x35c   :  { %v3661_v49 = vmul.f32 %v3651_v3, %v15583_v63  ;;  %v4721_v41 = vmul.f32 %v4711_v20, %v15583_v63 }
 0x35e   :  { %v3666_v18 = vpack.c.bf16 %v3661_v49, %v3660_v0  ;;  %v4726_v51 = vpack.c.bf16 %v4721_v41, %v4720_v10 }
 0x360   :  { %3671 = vst [vmem:[#allocation2 + $0xc0] sm:$0xff] %v3666_v18  ;;  %4731 = vst [vmem:[#allocation2 + $0xc8] sm:$0xff] %v4726_v51 }
 0x361 PF:  { %p9320_p1 = scmp.le.s32.totalorder %s15089_s0, 2 }
 0x363   :  { %4735 = sbr.rel (%p9320_p1) target bundleno = 1186 (0x4a2), region = 93 }
 0x36a   :  { %v13280_v6 = vstv %s10718_s16  ;;  %v13283_v5 = vstv %s10720_s13  ;;  %v15584_v11 = vld [vmem:[#allocation30_spill] sm:$0xff]  ;;  %v15585_v13 = vld [vmem:[#allocation31_spill] sm:$0xff]  ;;  %v15586_v1 = vld [vmem:[#allocation40_spill] sm:$0xff]  ;;  %v13298_v45 = vstv %s10726_s15 }
 0x36b   :  { %v4737_v52 = vmul.f32 %v13280_v6, %v15584_v11  ;;  %v4738_v32 = vmul.f32 %v13280_v6, %v15585_v13  ;;  %v4748_v19 = vmul.f32 %v13283_v5, %v15586_v1  ;;  %v15587_v48 = vld [vmem:[#allocation41_spill] sm:$0xff]  ;;  %v15588_v4 = vld [vmem:[#allocation32_spill] sm:$0xff]  ;;  %v15589_v17 = vld [vmem:[#allocation42_spill] sm:$0xff] }
 0x36c   :  { %v4749_v27 = vmul.f32 %v13283_v5, %v15587_v48  ;;  %v4739_v36 = vmul.f32 %v13280_v6, %v15588_v4  ;;  %v4750_v59 = vmul.f32 %v13283_v5, %v15589_v17  ;;  %v15590_v62 = vld [vmem:[#allocation50_spill] sm:$0xff]  ;;  %v15591_v25 = vld [vmem:[#allocation51_spill] sm:$0xff]  ;;  %v15592_v39 = vld [vmem:[#allocation52_spill] sm:$0xff] }
 0x36d   :  { %v4758_v22 = vadd.f32 %v4748_v19, %v4737_v52  ;;  %v4769_v53 = vmul.f32 %v13298_v45, %v15590_v62  ;;  %v4770_v58 = vmul.f32 %v13298_v45, %v15591_v25  ;;  %v4771_v21 = vmul.f32 %v13298_v45, %v15592_v39  ;;  %v15593_v8 = vld [vmem:[#allocation60_spill] sm:$0xff]  ;;  %v15595_v56 = vld [vmem:[#allocation61_spill] sm:$0xff]  ;;  %v15597_v35 = vld [vmem:[#allocation62_spill] sm:$0xff] }
 0x36e   :  { %v4759_v15 = vadd.f32 %v4749_v27, %v4738_v32  ;;  %v4760_v50 = vadd.f32 %v4750_v59, %v4739_v36  ;;  %v15599_v46 = vld [vmem:[#allocation33_spill] sm:$0xff]  ;;  %v15600_v34 = vld [vmem:[#allocation43_spill] sm:$0xff]  ;;  %v15601_v14 = vld [vmem:[#allocation34_spill] sm:$0xff]  ;;  %v15288_v52 = vmov 683565275  }
 0x36f   :  { %v4779_v44 = vadd.f32 %v4769_v53, %v4758_v22  ;;  %v4740_v38 = vmul.f32 %v13280_v6, %v15599_v46  ;;  %v4751_v55 = vmul.f32 %v13283_v5, %v15600_v34  ;;  %v13330_v16 = vmul.f32 %v13280_v6, %v15601_v14  ;;  %v15602_v0 = vld [vmem:[#allocation35_spill] sm:$0xff] }
 0x370   :  { %v4780_v54 = vadd.f32 %v4770_v58, %v4759_v15  ;;  %v4781_v7 = vadd.f32 %v4771_v21, %v4760_v50  ;;  %v13334_v30 = vmul.f32 %v13280_v6, %v15602_v0  ;;  %v15286_v32 = vmov 2475754826  }
 0x371   :  { %v13307_v43 = vadd.f32 %v4779_v44, %v15593_v8  ;;  %v13336_v10 = vadd.f32 %v4751_v55, %v4740_v38  ;;  %v15281_v19 = vmov 2131351028   ;;  %v15277_v27 = vmov 2102212464  }
 0x372   :  { %v13310_v24 = vadd.f32 %v4780_v54, %v15595_v56  ;;  %v13315_v2 = vadd.f32 %v4781_v7, %v15597_v35  ;;  %v15279_v36 = vmov 920167782   ;;  %v15304_v25 = vmov 1326507024  }
 0x373   :  { %15594 = vst [vmem:[#allocation103_spill] sm:$0xff] %v13307_v43  ;;  %v4799_v33 = vand.u32 2147483647, %v13307_v43  ;;  %v4802_v9 = vand.u32 2139095040, %v13307_v43 }
 0x374   :  { %15596 = vst [vmem:[#allocation104_spill] sm:$0xff] %v13310_v24  ;;  %15598 = vst [vmem:[#allocation105_spill] sm:$0xff] %v13315_v2  ;;  %v4902_v12 = vand.u32 2147483647, %v13310_v24  ;;  %v4905_v31 = vand.u32 2139095040, %v13310_v24  ;;  %v5008_v23 = vand.u32 2139095040, %v13315_v2 }
 0x375   :  { %v4803_v61 = vshrl.u32 %v4802_v9, 23  ;;  %v4806_v37 = vand.u32 8388607, %v4799_v33 }
 0x376   :  { %v4906_v29 = vshrl.u32 %v4905_v31, 23  ;;  %v4909_v60 = vand.u32 8388607, %v4902_v12  ;;  %v5009_v40 = vshrl.u32 %v5008_v23, 23 }
 0x377   :  { %v9321_v26 = vadd.s32 4294967169, %v4803_v61  ;;  %v4807_v57 = vor.u32 8388608, %v4806_v37 }
 0x378   :  { %v9325_v28 = vadd.s32 4294967169, %v4906_v29  ;;  %v4910_v42 = vor.u32 8388608, %v4909_v60  ;;  %v13342_v51 = vadd.s32 4294967169, %v5009_v40 }
 0x379   :  { %v4809_v47 = vadd.s32 1, %v9321_v26  ;;  %v13338_v41 = vshll.u32 %v4807_v57, 8 }
 0x37a   :  { %v4912_v20 = vadd.s32 1, %v9325_v28  ;;  %v13340_v18 = vshll.u32 %v4910_v42, 8 }
 0x37b   :  { %vm4810_vm15 = vcmp.gt.s32.totalorder %v4809_v47, 0 }
 0x37c   :  { %v4811_v3 = vsel %vm4810_vm15, %v4809_v47, 0  ;;  %vm4913_vm12 = vcmp.gt.s32.totalorder %v4912_v20, 0 }
 0x37d   :  { %v4812_v63 = vshrl.u32 %v4811_v3, 5  ;;  %v4813_v49 = vand.u32 31, %v4811_v3  ;;  %v4914_v44 = vsel %vm4913_vm12, %v4912_v20, 0 }
 0x37e   :  { %v4915_v8 = vshrl.u32 %v4914_v44, 5  ;;  %v4916_v56 = vand.u32 31, %v4914_v44 }
 0x37f   :  { %v4814_v11 = vsub.s32 32, %v4813_v49  ;;  %v4816_v13 = vshll.u32 %v15288_v52, %v4813_v49  ;;  %v4819_v1 = vshll.u32 %v15286_v32, %v4813_v49  ;;  %v4822_v48 = vshll.u32 %v15281_v19, %v4813_v49 }
 0x380   :  { %v4825_v4 = vshll.u32 %v15277_v27, %v4813_v49  ;;  %v4828_v17 = vshll.u32 %v15279_v36, %v4813_v49  ;;  %vm4831_vm2 = vcmp.lt.s32.totalorder %v4812_v63, 1  ;;  %vm4832_vm13 = vcmp.lt.s32.totalorder %v4812_v63, 2 }
 0x381   :  { %v4815_v59 = vshrl.u32 %v15288_v52, %v4814_v11  ;;  %v4817_v22 = vshrl.u32 %v15286_v32, %v4814_v11  ;;  %v4820_v15 = vshrl.u32 %v15281_v19, %v4814_v11  ;;  %v4823_v62 = vshrl.u32 %v15277_v27, %v4814_v11 }
 0x382   :  { %v4826_v53 = vshrl.u32 %v15279_v36, %v4814_v11  ;;  %v4829_v58 = vshrl.u32 %v15304_v25, %v4814_v11  ;;  %vm4833_vm5 = vcmp.lt.s32.totalorder %v4812_v63, 3  ;;  %vm4834_vm10 = vcmp.lt.s32.totalorder %v4812_v63, 4 }
 0x383   :  { %v4818_v50 = vor.u32 %v4817_v22, %v4816_v13  ;;  %v4821_v39 = vor.u32 %v4820_v15, %v4819_v1  ;;  %v4824_v21 = vor.u32 %v4823_v62, %v4822_v48  ;;  %v4917_v34 = vsub.s32 32, %v4916_v56 }
 0x384   :  { %v4827_v54 = vor.u32 %v4826_v53, %v4825_v4  ;;  %v4830_v7 = vor.u32 %v4829_v58, %v4828_v17  ;;  %v4919_v60 = vshll.u32 %v15288_v52, %v4916_v56  ;;  %v4922_v20 = vshll.u32 %v15286_v32, %v4916_v56 }
 0x385   :  { %v4835_v9 = vsel %vm4831_vm2, %v4815_v59, %v4818_v50  ;;  %v4836_v35 = vsel %vm4834_vm10, %v4824_v21, 2102212464  ;;  %v4839_v61 = vsel %vm4831_vm2, %v4818_v50, %v4821_v39  ;;  %v4843_v37 = vsel %vm4831_vm2, %v4821_v39, %v4824_v21 }
 0x386   :  { %v4837_v31 = vsel %vm4833_vm5, %v4821_v39, %v4836_v35  ;;  %v4840_v46 = vsel %vm4834_vm10, %v4827_v54, 920167782  ;;  %v4844_v38 = vsel %vm4834_vm10, %v4830_v7, 1326507024  ;;  %v4918_v57 = vshrl.u32 %v15288_v52, %v4917_v34  ;;  %v15603_v35 = vld [vmem:[#allocation53_spill] sm:$0xff] }
 0x387   :  { %v4838_v55 = vsel %vm4832_vm13, %v4835_v9, %v4837_v31  ;;  %v4841_v26 = vsel %vm4833_vm5, %v4824_v21, %v4840_v46  ;;  %v4845_v29 = vsel %vm4833_vm5, %v4827_v54, %v4844_v38  ;;  %v4920_v3 = vshrl.u32 %v15286_v32, %v4917_v34 }
 0x388   :  { %v4842_v23 = vsel %vm4832_vm13, %v4839_v61, %v4841_v26  ;;  %v4846_v14 = vsel %vm4832_vm13, %v4843_v37, %v4845_v29  ;;  %v4854_v47 = vmul.u32 %v13338_v41, %v4838_v55  ;;  %v4923_v63 = vshrl.u32 %v15281_v19, %v4917_v34 }
 0x389   :  { %v13369_v28 = vmul.u32.u64.low %v13338_v41, %v4846_v14  ;;  %v13370_v42 = vmul.u32.u64.high %v13338_v41, %v4846_v14, %v13369_v28  ;;  %v13373_v40 = vmul.u32.u64.low %v13338_v41, %v4842_v23  ;;  %v13374_v0 = vmul.u32.u64.high %v13338_v41, %v4842_v23, %v13373_v40 }
 0x38a   :  { %v4925_v49 = vshll.u32 %v15281_v19, %v4916_v56  ;;  %v4926_v11 = vshrl.u32 %v15277_v27, %v4917_v34  ;;  %v4928_v13 = vshll.u32 %v15277_v27, %v4916_v56  ;;  %v4929_v1 = vshrl.u32 %v15279_v36, %v4917_v34  ;;  %v15605_v28 = vld [vmem:[#allocation37_spill] sm:$0xff] }
 0x38b   :  { %v4931_v48 = vshll.u32 %v15279_v36, %v4916_v56  ;;  %v4921_v4 = vor.u32 %v4920_v3, %v4919_v60  ;;  %v4924_v41 = vor.u32 %v4923_v63, %v4922_v20  ;;  %v4932_v17 = vshrl.u32 %v15304_v25, %v4917_v34  ;;  %v15607_v63 = vld [vmem:[#allocation44_spill] sm:$0xff] }
 0x38c   :  { %vm4934_vm7 = vcmp.lt.s32.totalorder %v4915_v8, 1  ;;  %vm4856_vm9 = vc.u32 %v13370_v42, %v13373_v40  ;;  %v4857_v59 = vadd.s32 1, %v13374_v0  ;;  %v4927_v22 = vor.u32 %v4926_v11, %v4925_v49 }
 0x38d   :  { %v5015_v15 = vadd.s32 1, %v13342_v51  ;;  %v4930_v62 = vor.u32 %v4929_v1, %v4928_v13  ;;  %v4933_v53 = vor.u32 %v4932_v17, %v4931_v48  ;;  %vm4935_vm8 = vcmp.lt.s32.totalorder %v4915_v8, 2  ;;  %v15608_v48 = vld [vmem:[#allocation39_spill] sm:$0xff] }
 0x38e   :  { %vm4936_vm1 = vcmp.lt.s32.totalorder %v4915_v8, 3  ;;  %v4858_v58 = vsel %vm4856_vm9, %v4857_v59, %v13374_v0  ;;  %vm4937_vm4 = vcmp.lt.s32.totalorder %v4915_v8, 4  ;;  %v4938_v50 = vsel %vm4934_vm7, %v4918_v57, %v4921_v4  ;;  %v15606_v0 = vld [vmem:[#allocation38_spill] sm:$0xff] }
 0x38f   :  { %v4942_v39 = vsel %vm4934_vm7, %v4921_v4, %v4924_v41  ;;  %v4859_v21 = vadd.s32 %v4858_v58, %v4854_v47  ;;  %v4939_v44 = vsel %vm4937_vm4, %v4927_v22, 2102212464  ;;  %v4943_v54 = vsel %vm4937_vm4, %v4930_v62, 920167782  ;;  %v15604_v47 = vld [vmem:[#allocation36_spill] sm:$0xff] }
 0x390   :  { %v4946_v7 = vsel %vm4934_vm7, %v4924_v41, %v4927_v22  ;;  %v4940_v56 = vsel %vm4936_vm1, %v4924_v41, %v4939_v44  ;;  %v4944_v51 = vsel %vm4936_vm1, %v4927_v22, %v4943_v54  ;;  %v4947_v9 = vsel %vm4937_vm4, %v4933_v53, 1326507024  ;;  %v15609_v41 = vld [vmem:[#allocation45_spill] sm:$0xff]  ;;  %v15612_v58 = vld [vmem:[#allocation48_spill] sm:$0xff] }
 0x391   :  { %vm5016_vm11 = vcmp.gt.s32.totalorder %v5015_v15, 0  ;;  %v4772_v61 = vmul.f32 %v13298_v45, %v15603_v35  ;;  %v4860_v37 = vadd.s32 536870912, %v4859_v21  ;;  %v4945_v31 = vsel %vm4935_vm8, %v4942_v39, %v4944_v51  ;;  %v15613_v39 = vld [vmem:[#allocation49_spill] sm:$0xff] }
 0x392   :  { %v4948_v46 = vsel %vm4936_vm1, %v4930_v62, %v4947_v9  ;;  %v4941_v38 = vsel %vm4935_vm8, %v4938_v50, %v4940_v56  ;;  %v13403_v55 = vmul.u32.u64.low %v13340_v18, %v4945_v31  ;;  %v13404_v26 = vmul.u32.u64.high %v13340_v18, %v4945_v31, %v13403_v55 }
 0x393   :  { %v4949_v34 = vsel %vm4935_vm8, %v4946_v7, %v4948_v46  ;;  %v13407_v29 = vshrl.u32 %v4860_v37, 30  ;;  %v5017_v14 = vsel %vm5016_vm11, %v5015_v15, 0  ;;  %v13415_v57 = vmul.f32 %v13280_v6, %v15604_v47  ;;  %v15610_v15 = vld [vmem:[#allocation46_spill] sm:$0xff] }
 0x394   :  { %v13410_v60 = vmul.u32.u64.low %v13340_v18, %v4949_v34  ;;  %v13411_v23 = vmul.u32.u64.high %v13340_v18, %v4949_v34, %v13410_v60  ;;  %v13419_v8 = vmul.f32 %v13280_v6, %v15605_v28  ;;  %v13423_v3 = vmul.f32 %v13280_v6, %v15606_v0 }
 0x395   :  { %v5019_v20 = vand.u32 31, %v5017_v14  ;;  %v4752_v49 = vmul.f32 %v13283_v5, %v15607_v63  ;;  %v4782_v11 = vadd.f32 %v4772_v61, %v13336_v10  ;;  %v4862_v13 = vshll.u32 %v13407_v29, 30 }
 0x396   :  { %v4957_v1 = vmul.u32 %v13340_v18, %v4941_v38  ;;  %v13432_v4 = vmul.f32 %v13280_v6, %v15608_v48  ;;  %v4753_v17 = vmul.f32 %v13283_v5, %v15609_v41  ;;  %v4960_v59 = vadd.s32 1, %v13404_v26  ;;  %v15611_v18 = vld [vmem:[#allocation47_spill] sm:$0xff] }
 0x397   :  { %v5005_v22 = vand.u32 2147483647, %v13315_v2  ;;  %v4754_v62 = vmul.f32 %v13283_v5, %v15610_v15  ;;  %v13440_v53 = vsub.s32 %v4859_v21, %v4862_v13  ;;  %vm4959_vm6 = vc.u32 %v13411_v23, %v13403_v55  ;;  %v15614_v21 = vld [vmem:[#allocation63_spill] sm:$0xff] }
 0x398   :  { %v5020_v10 = vsub.s32 32, %v5019_v20  ;;  %v4755_v6 = vmul.f32 %v13283_v5, %v15611_v18  ;;  %v4756_v50 = vmul.f32 %v13283_v5, %v15612_v58  ;;  %v13450_v44 = vmul.f32 %v13283_v5, %v15613_v39 }
 0x399   :  { %v4961_v54 = vsel %vm4959_vm6, %v4960_v59, %v13404_v26  ;;  %v13454_v7 = vadd.f32 %v4752_v49, %v13330_v16  ;;  %v13457_v56 = vadd.f32 %v4782_v11, %v15614_v21  ;;  %v4865_v51 = vsub.s32 0, %v13440_v53 }
 0x39a   :  { %v4962_v9 = vadd.s32 %v4961_v54, %v4957_v1  ;;  %v5012_v35 = vand.u32 8388607, %v5005_v22  ;;  %v5018_v61 = vshrl.u32 %v5017_v14, 5  ;;  %v5022_v37 = vshll.u32 %v15288_v52, %v5019_v20 }
 0x39b   :  { %v5031_v5 = vshll.u32 %v15277_v27, %v5019_v20  ;;  %v9322_v31 = vmin.u32 %v4865_v51, %v13440_v53  ;;  %v5023_v46 = vshrl.u32 %v15286_v32, %v5020_v10  ;;  %v5025_v16 = vshll.u32 %v15286_v32, %v5019_v20 }
 0x39c   :  { %v5026_v38 = vshrl.u32 %v15281_v19, %v5020_v10  ;;  %v4963_v34 = vadd.s32 536870912, %v4962_v9  ;;  %v5028_v26 = vshll.u32 %v15281_v19, %v5019_v20  ;;  %v5029_v60 = vshrl.u32 %v15277_v27, %v5020_v10 }
 0x39d   :  { %v5032_v47 = vshrl.u32 %v15279_v36, %v5020_v10  ;;  %v13472_v14 = vadd.f32 %v4753_v17, %v13334_v30  ;;  %v4867_v28 = vclz %v9322_v31  ;;  %v5034_v0 = vshll.u32 %v15279_v36, %v5019_v20 }
 0x39e   :  { %v5035_v63 = vshrl.u32 %v15304_v25, %v5020_v10  ;;  %v13476_v49 = vshrl.u32 %v4963_v34, 30  ;;  %v5013_v11 = vor.u32 8388608, %v5012_v35  ;;  %v5111_v1 = vand.u32 2139095040, %v13457_v56 }
 0x39f   :  { %v5033_v13 = vor.u32 %v5032_v47, %v5031_v5  ;;  %v9323_v48 = vadd.s32 4294967294, %v4867_v28  ;;  %v5024_v41 = vor.u32 %v5023_v46, %v5022_v37  ;;  %v5027_v59 = vor.u32 %v5026_v38, %v5025_v16 }
 0x3a0   :  { %vm5040_vm0 = vcmp.lt.s32.totalorder %v5018_v61, 4  ;;  %v4965_v15 = vshll.u32 %v13476_v49, 30  ;;  %v5030_v18 = vor.u32 %v5029_v60, %v5028_v26  ;;  %v5036_v30 = vor.u32 %v5035_v63, %v5034_v0 }
 0x3a1   :  { %vm5037_vm3 = vcmp.lt.s32.totalorder %v5018_v61, 1  ;;  %vm9324_vm14 = vcmp.lt.s32.totalorder %v9323_v48, 0  ;;  %v5021_v20 = vshrl.u32 %v15288_v52, %v5020_v10  ;;  %vm5039_vm15 = vcmp.lt.s32.totalorder %v5018_v61, 3 }
 0x3a2   :  { %v5046_v17 = vsel %vm5040_vm0, %v5033_v13, 920167782  ;;  %v4870_v58 = vsel %vm9324_vm14, 0, %v9323_v48  ;;  %v13482_v39 = vsub.s32 %v4962_v9, %v4965_v15  ;;  %v5053_v54 = vshll.u32 %v5013_v11, 8 }
 0x3a3   :  { %v5112_v21 = vshrl.u32 %v5111_v1, 23  ;;  %v4875_v51 = vsub.s32 4294967266, %v4870_v58  ;;  %vm5038_vm12 = vcmp.lt.s32.totalorder %v5018_v61, 2  ;;  %v5042_v35 = vsel %vm5040_vm0, %v5030_v18, 2102212464 }
 0x3a4   :  { %v5045_v37 = vsel %vm5037_vm3, %v5024_v41, %v5027_v59  ;;  %v4968_v5 = vsub.s32 0, %v13482_v39  ;;  %v5047_v31 = vsel %vm5039_vm15, %v5030_v18, %v5046_v17  ;;  %v5049_v10 = vsel %vm5037_vm3, %v5027_v59, %v5030_v18  ;;  %v15616_v18 = vld [vmem:[#allocation55_spill] sm:$0xff] }
 0x3a5   :  { %v5050_v46 = vsel %vm5040_vm0, %v5036_v30, 1326507024  ;;  %v4764_v16 = vadd.f32 %v4754_v62, %v13415_v57  ;;  %v4855_v9 = vadd.s32 %v13373_v40, %v13370_v42  ;;  %v5041_v38 = vsel %vm5037_vm3, %v5021_v20, %v5024_v41  ;;  %v15617_v20 = vld [vmem:[#allocation56_spill] sm:$0xff] }
 0x3a6   :  { %v5051_v34 = vsel %vm5039_vm15, %v5033_v13, %v5050_v46  ;;  %v4871_v26 = vsub.s32 32, %v4870_v58  ;;  %v9326_v60 = vmin.u32 %v4968_v5, %v13482_v39  ;;  %v5043_v47 = vsel %vm5039_vm15, %v5027_v59, %v5042_v35  ;;  %v15615_v13 = vld [vmem:[#allocation54_spill] sm:$0xff]  ;;  %v15620_v46 = vld [vmem:[#allocation59_spill] sm:$0xff] }
 0x3a7   :  { %v5048_v28 = vsel %vm5038_vm12, %v5045_v37, %v5047_v31  ;;  %v4765_v0 = vadd.f32 %v4755_v6, %v13419_v8  ;;  %v4766_v63 = vadd.f32 %v4756_v50, %v13423_v3  ;;  %v4876_v11 = vadd.s32 127, %v4875_v51 }
 0x3a8   :  { %v5052_v57 = vsel %vm5038_vm12, %v5049_v10, %v5051_v34  ;;  %v4970_v62 = vclz %v9326_v60  ;;  %v9333_v1 = vadd.s32 4294967169, %v5112_v21  ;;  %v4773_v48 = vmul.f32 %v13298_v45, %v15615_v13  ;;  %v15618_v21 = vld [vmem:[#allocation57_spill] sm:$0xff] }
 0x3a9   :  { %v13501_v42 = vmul.u32.u64.low %v5053_v54, %v5052_v57  ;;  %v13502_v40 = vmul.u32.u64.high %v5053_v54, %v5052_v57, %v13501_v42  ;;  %v5044_v41 = vsel %vm5038_vm12, %v5041_v38, %v5043_v47  ;;  %v4872_v8 = vshll.u32 %v13440_v53, %v4870_v58  ;;  %v15619_v53 = vld [vmem:[#allocation58_spill] sm:$0xff] }
 0x3aa   :  { %v13507_v59 = vmul.u32.u64.low %v5053_v54, %v5048_v28  ;;  %v13508_v15 = vmul.u32.u64.high %v5053_v54, %v5048_v28, %v13507_v59  ;;  %v4873_v3 = vshrl.u32 %v4855_v9, %v4871_v26  ;;  %v9327_v6 = vadd.s32 4294967294, %v4970_v62  ;;  %v15621_v42 = vld [vmem:[#allocation64_spill] sm:$0xff] }
 0x3ab   :  { %v5118_v50 = vadd.s32 1, %v9333_v1  ;;  %v4774_v30 = vmul.f32 %v13298_v45, %v15616_v18  ;;  %v4775_v17 = vmul.f32 %v13298_v45, %v15617_v20  ;;  %v4776_v51 = vmul.f32 %v13298_v45, %v15618_v21 }
 0x3ac   :  { %v4877_v61 = vshll.u32 %v4876_v11, 23  ;;  %v5060_v35 = vmul.u32 %v5053_v54, %v5044_v41  ;;  %vm5062_vm2 = vc.u32 %v13502_v40, %v13507_v59  ;;  %v5108_v37 = vand.u32 2147483647, %v13457_v56 }
 0x3ad   :  { %vm5119_vm13 = vcmp.gt.s32.totalorder %v5118_v50, 0  ;;  %v4777_v58 = vmul.f32 %v13298_v45, %v15619_v53  ;;  %vm9328_vm5 = vcmp.lt.s32.totalorder %v9327_v6, 0  ;;  %v5063_v5 = vadd.s32 1, %v13508_v15 }
 0x3ae   :  { %v5120_v31 = vsel %vm5119_vm13, %v5118_v50, 0  ;;  %v4767_v10 = vadd.f32 %v13450_v44, %v13432_v4  ;;  %v4778_v9 = vmul.f32 %v13298_v45, %v15620_v46  ;;  %v4783_v54 = vadd.f32 %v4773_v48, %v13454_v7 }
 0x3af   :  { %v4874_v38 = vor.u32 %v4873_v3, %v4872_v8  ;;  %v4878_v34 = vor.u32 4788187, %v4877_v61  ;;  %v5064_v26 = vsel %vm5062_vm2, %v5063_v5, %v13508_v15  ;;  %v5122_v60 = vand.u32 31, %v5120_v31 }
 0x3b0   :  { %v4784_v47 = vadd.f32 %v4774_v30, %v13472_v14  ;;  %v13531_v28 = vsel %vm9328_vm5, 0, %v9327_v6  ;;  %v5065_v11 = vadd.s32 %v5064_v26, %v5060_v35  ;;  %v5115_v57 = vand.u32 8388607, %v5108_v37 }
 0x3b1   :  { %v13535_v62 = vadd.f32 %v4775_v17, %v4764_v16  ;;  %v13537_v4 = vadd.f32 %v4776_v51, %v4765_v0  ;;  %v13539_v45 = vadd.f32 %v4777_v58, %v4766_v63  ;;  %v5123_v44 = vsub.s32 32, %v5122_v60 }
 0x3b2   :  { %v13541_v7 = vadd.f32 %v4778_v9, %v4767_v10  ;;  %v13544_v1 = vadd.f32 %v4783_v54, %v15621_v42  ;;  %v4881_v13 = vcvt.s32.f32 %v4874_v38  ;;  %v5066_v14 = vadd.s32 536870912, %v5065_v11 }
 0x3b3   :  { %v4879_v48 = vand.u32 2147483647, %v4878_v34  ;;  %v4978_v41 = vsub.s32 4294967266, %v13531_v28  ;;  %v5125_v15 = vshll.u32 %v15288_v52, %v5122_v60  ;;  %v5126_v16 = vshrl.u32 %v15286_v32, %v5123_v44 }
 0x3b4   :  { %v13549_v8 = vshrl.u32 %v5066_v14, 30  ;;  %v5116_v0 = vor.u32 8388608, %v5115_v57  ;;  %v5128_v63 = vshll.u32 %v15286_v32, %v5122_v60  ;;  %v5129_v3 = vshrl.u32 %v15281_v19, %v5123_v44 }
 0x3b5   :  { %v4958_v6 = vadd.s32 %v13403_v55, %v13411_v23  ;;  %v5121_v50 = vshrl.u32 %v5120_v31, 5  ;;  %v5131_v18 = vshll.u32 %v15281_v19, %v5122_v60  ;;  %v5132_v30 = vshrl.u32 %v15277_v27, %v5123_v44 }
 0x3b6   :  { %v4974_v20 = vsub.s32 32, %v13531_v28  ;;  %v5068_v17 = vshll.u32 %v13549_v8, 30  ;;  %v5134_v21 = vshll.u32 %v15277_v27, %v5122_v60  ;;  %v5214_v51 = vand.u32 2139095040, %v13544_v1 }
 0x3b7   :  { %v4882_v61 = vmul.f32 %v4881_v13, %v4879_v48  ;;  %v4979_v35 = vadd.s32 127, %v4978_v41  ;;  %v5127_v53 = vor.u32 %v5126_v16, %v5125_v15  ;;  %v5135_v58 = vshrl.u32 %v15279_v36, %v5123_v44 }
 0x3b8   :  { %v13562_v5 = vsub.s32 %v5065_v11, %v5068_v17  ;;  %v5130_v55 = vor.u32 %v5129_v3, %v5128_v63  ;;  %v5137_v23 = vshll.u32 %v15279_v36, %v5122_v60  ;;  %v5138_v31 = vshrl.u32 %v15304_v25, %v5123_v44 }
 0x3b9   :  { %v4975_v10 = vshll.u32 %v13482_v39, %v13531_v28  ;;  %v5133_v46 = vor.u32 %v5132_v30, %v5131_v18  ;;  %v5136_v9 = vor.u32 %v5135_v58, %v5134_v21  ;;  %vm5140_vm10 = vcmp.lt.s32.totalorder %v5121_v50, 1  ;;  %v15622_v28 = vld [vmem:[#allocation65_spill] sm:$0xff] }
 0x3ba   :  { %v4976_v54 = vshrl.u32 %v4958_v6, %v4974_v20  ;;  %v5071_v38 = vsub.s32 0, %v13562_v5  ;;  %vm5142_vm7 = vcmp.lt.s32.totalorder %v5121_v50, 3  ;;  %vm5143_vm9 = vcmp.lt.s32.totalorder %v5121_v50, 4 }
 0x3bb   :  { %v4980_v34 = vshll.u32 %v4979_v35, 23  ;;  %v5124_v26 = vshrl.u32 %v15288_v52, %v5123_v44  ;;  %vm5141_vm8 = vcmp.lt.s32.totalorder %v5121_v50, 2  ;;  %v5149_v11 = vsel %vm5143_vm9, %v5136_v9, 920167782 }
 0x3bc   :  { %v9330_v60 = vmin.u32 %v5071_v38, %v13562_v5  ;;  %v5139_v57 = vor.u32 %v5138_v31, %v5137_v23  ;;  %v5145_v42 = vsel %vm5143_vm9, %v5133_v46, 2102212464  ;;  %v5148_v39 = vsel %vm5140_vm10, %v5127_v53, %v5130_v55 }
 0x3bd   :  { %v13575_v13 = vadd.f32 %v4784_v47, %v15622_v28  ;;  %vm4801_vm1 = vcmp.lt.s32.totalorder %v13307_v43, 0  ;;  %v5150_v14 = vsel %vm5142_vm7, %v5133_v46, %v5149_v11  ;;  %v5156_v48 = vshll.u32 %v5116_v0, 8 }
 0x3be   :  { %vm13581_vm4 = vcmp.le.f32.partialorder %v4799_v33, 0.7853982  ;;  %v4883_v41 = vxor.u32 2147483648, %v4882_v61  ;;  %v5073_v15 = vclz %v9330_v60  ;;  %v5215_v16 = vshrl.u32 %v5214_v51, 23  ;;  %v15625_v60 = vld [vmem:[#allocation66_spill] sm:$0xff] }
 0x3bf   :  { %v5144_v63 = vsel %vm5140_vm10, %v5124_v26, %v5127_v53  ;;  %v5146_v3 = vsel %vm5142_vm7, %v5130_v55, %v5145_v42  ;;  %v5151_v47 = vsel %vm5141_vm8, %v5148_v39, %v5150_v14  ;;  %v5152_v6 = vsel %vm5140_vm10, %v5130_v55, %v5133_v46 }
 0x3c0   :  { %v4977_v18 = vor.u32 %v4976_v54, %v4975_v10  ;;  %v4981_v30 = vor.u32 4788187, %v4980_v34  ;;  %v9331_v0 = vadd.s32 4294967294, %v5073_v15  ;;  %v5153_v20 = vsel %vm5143_vm9, %v5139_v57, 1326507024 }
 0x3c1   :  { %v4885_v33 = vsub.s32 4, %v13407_v29  ;;  %v5154_v17 = vsel %vm5142_vm7, %v5136_v9, %v5153_v20  ;;  %v13592_v21 = vmul.u32.u64.low %v5156_v48, %v5151_v47  ;;  %v13593_v35 = vmul.u32.u64.high %v5156_v48, %v5151_v47, %v13592_v21  ;;  %v15628_v47 = vld [vmem:[#allocation69_spill] sm:$0xff] }
 0x3c2   :  { %vm9332_vm11 = vcmp.lt.s32.totalorder %v9331_v0, 0  ;;  %v5147_v51 = vsel %vm5141_vm8, %v5144_v63, %v5146_v3  ;;  %v5155_v53 = vsel %vm5141_vm8, %v5152_v6, %v5154_v17  ;;  %v9337_v58 = vadd.s32 4294967169, %v5215_v16  ;;  %v15627_v3 = vld [vmem:[#allocation68_spill] sm:$0xff] }
 0x3c3   :  { %v5061_v55 = vadd.s32 %v13507_v59, %v13502_v40  ;;  %v5076_v23 = vsel %vm9332_vm11, 0, %v9331_v0  ;;  %v13600_v31 = vmul.u32.u64.low %v5156_v48, %v5155_v53  ;;  %v13601_v10 = vmul.u32.u64.high %v5156_v48, %v5155_v53, %v13600_v31  ;;  %v15626_v40 = vld [vmem:[#allocation67_spill] sm:$0xff] }
 0x3c4   :  { %v4884_v46 = vsel %vm4801_vm1, %v4883_v41, %v4882_v61  ;;  %v4982_v9 = vand.u32 2147483647, %v4981_v30  ;;  %v4984_v54 = vcvt.s32.f32 %v4977_v18  ;;  %v5081_v38 = vsub.s32 4294967266, %v5076_v23 }
 0x3c5   :  { %v5077_v34 = vsub.s32 32, %v5076_v23  ;;  %v5163_v26 = vmul.u32 %v5156_v48, %v5147_v51  ;;  %v5166_v11 = vadd.s32 1, %v13593_v35  ;;  %v5221_v50 = vadd.s32 1, %v9337_v58 }
 0x3c6   :  { %v13608_v57 = vadd.f32 %v13535_v62, %v15625_v60  ;;  %v13612_v59 = vadd.f32 %v13537_v4, %v15626_v40  ;;  %v5082_v42 = vadd.s32 127, %v5081_v38  ;;  %v5211_v39 = vand.u32 2147483647, %v13544_v1 }
 0x3c7   :  { %v4886_v61 = vsel %vm4801_vm1, %v4885_v33, %v13407_v29  ;;  %v4887_v28 = vsel %vm13581_vm4, %v13307_v43, %v4884_v46  ;;  %vm5165_vm6 = vc.u32 %v13601_v10, %v13592_v21  ;;  %vm5222_vm0 = vcmp.gt.s32.totalorder %v5221_v50, 0 }
 0x3c8   :  { %v4985_v62 = vmul.f32 %v4984_v54, %v4982_v9  ;;  %v5078_v14 = vshll.u32 %v13562_v5, %v5076_v23  ;;  %v5167_v4 = vsel %vm5165_vm6, %v5166_v11, %v13593_v35  ;;  %v5223_v48 = vsel %vm5222_vm0, %v5221_v50, 0 }
 0x3c9   :  { %v5079_v41 = vshrl.u32 %v5061_v55, %v5077_v34  ;;  %v5083_v15 = vshll.u32 %v5082_v42, 23  ;;  %v5168_v16 = vadd.s32 %v5167_v4, %v5163_v26  ;;  %v5225_v63 = vand.u32 31, %v5223_v48 }
 0x3ca   :  { %v13627_v29 = vadd.f32 %v13539_v45, %v15627_v3  ;;  %v13631_v6 = vadd.f32 %v13541_v7, %v15628_v47  ;;  %v13635_v18 = vsel %vm13581_vm4, 0, %v4886_v61  ;;  %vm4904_vm3 = vcmp.lt.s32.totalorder %v13310_v24, 0 }
 0x3cb   :  { %v13639_v5 = vand.u32 3, %v13635_v18  ;;  %vm13643_vm14 = vcmp.le.f32.partialorder %v4902_v12, 0.7853982  ;;  %v5169_v45 = vadd.s32 536870912, %v5168_v16  ;;  %v5226_v0 = vsub.s32 32, %v5225_v63 }
 0x3cc   :  { %10008 = vcosq.f32 %v4887_v28  ;;  %v4986_v7 = vxor.u32 2147483648, %v4985_v62  ;;  %v4988_v20 = vsub.s32 4, %v13476_v49  ;;  %v5218_v44 = vand.u32 8388607, %v5211_v39 }
 0x3cd   :  { %v5080_v33 = vor.u32 %v5079_v41, %v5078_v14  ;;  %v5084_v17 = vor.u32 4788187, %v5083_v15  ;;  %v13650_v35 = vshrl.u32 %v5169_v45, 30  ;;  %v5224_v51 = vshrl.u32 %v5223_v48, 5 }
 0x3ce   :  { %v5228_v53 = vshll.u32 %v15288_v52, %v5225_v63  ;;  %v5229_v12 = vshrl.u32 %v15286_v32, %v5226_v0  ;;  %v5231_v58 = vshll.u32 %v15286_v32, %v5225_v63  ;;  %v5232_v55 = vshrl.u32 %v15281_v19, %v5226_v0 }
 0x3cf   :  { %v5171_v23 = vshll.u32 %v13650_v35, 30  ;;  %v5234_v31 = vshll.u32 %v15281_v19, %v5225_v63  ;;  %v5235_v46 = vshrl.u32 %v15277_v27, %v5226_v0  ;;  %v5237_v9 = vshll.u32 %v15277_v27, %v5225_v63 }
 0x3d0   :  { %10010 = vsinq.f32 %v4887_v28  ;;  %v4987_v54 = vsel %vm4904_vm3, %v4986_v7, %v4985_v62  ;;  %v5219_v38 = vor.u32 8388608, %v5218_v44  ;;  %v5238_v34 = vshrl.u32 %v15279_v36, %v5226_v0 }
 0x3d1   :  { %v5087_v26 = vcvt.s32.f32 %v5080_v33  ;;  %v13663_v11 = vsub.s32 %v5168_v16, %v5171_v23  ;;  %v5240_v50 = vshll.u32 %v15279_v36, %v5225_v63  ;;  %v5241_v60 = vshrl.u32 %v15304_v25, %v5226_v0 }
 0x3d2   :  { %v5085_v40 = vand.u32 2147483647, %v5084_v17  ;;  %v5227_v42 = vshrl.u32 %v15288_v52, %v5226_v0  ;;  %v5230_v61 = vor.u32 %v5229_v12, %v5228_v53  ;;  %v5233_v14 = vor.u32 %v5232_v55, %v5231_v58 }
 0x3d3   :  { %v5174_v28 = vsub.s32 0, %v13663_v11  ;;  %v5236_v4 = vor.u32 %v5235_v46, %v5234_v31  ;;  %v5239_v48 = vor.u32 %v5238_v34, %v5237_v9  ;;  %vm5243_vm15 = vcmp.lt.s32.totalorder %v5224_v51, 1 }
 0x3d4   :  { %v5091_v62 = vsub.s32 4, %v13549_v8  ;;  %v5242_v41 = vor.u32 %v5241_v60, %v5240_v50  ;;  %vm5246_vm12 = vcmp.lt.s32.totalorder %v5224_v51, 4  ;;  %v5317_v15 = vand.u32 2139095040, %v13575_v13 }
 0x3d5   :  { %v4990_v16 = vsel %vm13643_vm14, %v13310_v24, %v4987_v54  ;;  %vm5007_vm2 = vcmp.lt.s32.totalorder %v13315_v2, 0  ;;  %v9334_v63 = vmin.u32 %v5174_v28, %v13663_v11  ;;  %vm5245_vm13 = vcmp.lt.s32.totalorder %v5224_v51, 3 }
 0x3d6   :  { %v5259_v3 = vshll.u32 %v5219_v38, 8  ;;  %v13676_v47 = vpop.eup %10008  ;;  %v5088_v45 = vmul.f32 %v5087_v26, %v5085_v40  ;;  %vm5244_vm5 = vcmp.lt.s32.totalorder %v5224_v51, 2  ;;  %v5248_v0 = vsel %vm5246_vm12, %v5236_v4, 2102212464 }
 0x3d7   :  { %v5251_v7 = vsel %vm5243_vm15, %v5230_v61, %v5233_v14  ;;  %v5176_v44 = vclz %v9334_v63  ;;  %v5247_v33 = vsel %vm5243_vm15, %v5227_v42, %v5230_v61  ;;  %v5252_v17 = vsel %vm5246_vm12, %v5239_v48, 920167782 }
 0x3d8   :  { %v5255_v53 = vsel %vm5243_vm15, %v5233_v14, %v5236_v4  ;;  %vm4894_vm10 = vcmp.eq.s32.totalorder %v13639_v5, 0  ;;  %v5249_v12 = vsel %vm5245_vm13, %v5233_v14, %v5248_v0  ;;  %v5253_v58 = vsel %vm5245_vm13, %v5236_v4, %v5252_v17 }
 0x3d9   :  { %v5256_v55 = vsel %vm5246_vm12, %v5242_v41, 1326507024  ;;  %v5318_v23 = vshrl.u32 %v5317_v15, 23  ;;  %10012 = vcosq.f32 %v4990_v16  ;;  %vm13689_vm7 = vcmp.le.f32.partialorder %v5005_v22, 0.7853982 }
 0x3da   :  { %v9335_v46 = vadd.s32 4294967294, %v5176_v44  ;;  %v5254_v9 = vsel %vm5244_vm5, %v5251_v7, %v5253_v58  ;;  %v5257_v54 = vsel %vm5245_vm13, %v5239_v48, %v5256_v55  ;;  %v13695_v38 = vpop.eup %10010  ;;  %v5250_v22 = vsel %vm5244_vm5, %v5247_v33, %v5249_v12 }
 0x3db   :  { %v5258_v34 = vsel %vm5244_vm5, %v5255_v53, %v5257_v54  ;;  %v13698_v26 = vmul.u32.u64.low %v5259_v3, %v5254_v9  ;;  %v13699_v50 = vmul.u32.u64.high %v5259_v3, %v5254_v9, %v13698_v26  ;;  %v9341_v60 = vadd.s32 4294967169, %v5318_v23 }
 0x3dc   :  { %vm9336_vm9 = vcmp.lt.s32.totalorder %v9335_v46, 0  ;;  %v13703_v40 = vmul.u32.u64.low %v5259_v3, %v5258_v34  ;;  %v13704_v42 = vmul.u32.u64.high %v5259_v3, %v5258_v34, %v13703_v40  ;;  %vm4897_vm8 = vcmp.eq.s32.totalorder %v13639_v5, 2 }
 0x3dd   :  { %v5089_v61 = vxor.u32 2147483648, %v5088_v45  ;;  %v5179_v14 = vsel %vm9336_vm9, 0, %v9335_v46  ;;  %v5324_v28 = vadd.s32 1, %v9341_v60  ;;  %v4989_v4 = vsel %vm4904_vm3, %v4988_v20, %v13476_v49 }
 0x3de   :  { %v5164_v48 = vadd.s32 %v13592_v21, %v13601_v10  ;;  %v5180_v41 = vsub.s32 32, %v5179_v14  ;;  %v5184_v51 = vsub.s32 4294967266, %v5179_v14  ;;  %v5092_v15 = vsel %vm5007_vm2, %v5091_v62, %v13549_v8 }
 0x3df   :  { %v5266_v63 = vmul.u32 %v5259_v3, %v5250_v22  ;;  %v5269_v0 = vadd.s32 1, %v13699_v50  ;;  %vm5325_vm1 = vcmp.gt.s32.totalorder %v5324_v28, 0  ;;  %v15271_v7 = vxor.u32 2147483648, %v13695_v38 }
 0x3e0   :  { %v15270_v44 = vxor.u32 2147483648, %v13676_v47  ;;  %10014 = vsinq.f32 %v4990_v16  ;;  %v5185_v33 = vadd.s32 127, %v5184_v51  ;;  %v5090_v49 = vsel %vm5007_vm2, %v5089_v61, %v5088_v45 }
 0x3e1   :  { %vm5268_vm4 = vc.u32 %v13704_v42, %v13698_v26  ;;  %v5314_v21 = vand.u32 2147483647, %v13575_v13  ;;  %v5326_v10 = vsel %vm5325_vm1, %v5324_v28, 0  ;;  %v5181_v8 = vshll.u32 %v13663_v11, %v5179_v14 }
 0x3e2   :  { %v5182_v20 = vshrl.u32 %v5164_v48, %v5180_v41  ;;  %v5186_v62 = vshll.u32 %v5185_v33, 23  ;;  %v5270_v3 = vsel %vm5268_vm4, %v5269_v0, %v13699_v50  ;;  %v13729_v17 = vsel %vm13643_vm14, 0, %v4989_v4 }
 0x3e3   :  { %v13733_v16 = vsel %vm13689_vm7, 0, %v5092_v15  ;;  %v5271_v45 = vadd.s32 %v5270_v3, %v5266_v63  ;;  %v5328_v53 = vand.u32 31, %v5326_v10  ;;  %v13735_v12 = vpop.eup %10012  ;;  %v13742_v11 = vsel %vm4894_vm10, %v13676_v47, %v15271_v7 }
 0x3e4   :  { %15633 = vst [vmem:[#allocation106_spill] sm:$0xff] %v13735_v12  ;;  %v13749_v30 = vsel %vm4897_vm8, %v15270_v44, %v13695_v38  ;;  %v13752_v58 = vand.u32 3, %v13729_v17  ;;  %v13755_v55 = vand.u32 3, %v13733_v16  ;;  %v5093_v23 = vsel %vm13689_vm7, %v13315_v2, %v5090_v49 }
 0x3e5   :  { %v5272_v46 = vadd.s32 536870912, %v5271_v45  ;;  %v5321_v9 = vand.u32 8388607, %v5314_v21  ;;  %v5329_v54 = vsub.s32 32, %v5328_v53  ;;  %v5183_v34 = vor.u32 %v5182_v20, %v5181_v8 }
 0x3e6   :  { %v5187_v50 = vor.u32 4788187, %v5186_v62  ;;  %v13762_v60 = vshrl.u32 %v5326_v10, 5  ;;  %v5331_v22 = vshll.u32 %v15288_v52, %v5328_v53  ;;  %v5334_v14 = vshll.u32 %v15286_v32, %v5328_v53 }
 0x3e7   :  { %v13765_v40 = vshrl.u32 %v5272_v46, 30  ;;  %v5332_v61 = vshrl.u32 %v15286_v32, %v5329_v54  ;;  %v5335_v31 = vshrl.u32 %v15281_v19, %v5329_v54  ;;  %v5337_v28 = vshll.u32 %v15281_v19, %v5328_v53 }
 0x3e8   :  { %v5338_v4 = vshrl.u32 %v15277_v27, %v5329_v54  ;;  %v5340_v48 = vshll.u32 %v15277_v27, %v5328_v53  ;;  %v5341_v41 = vshrl.u32 %v15279_v36, %v5329_v54  ;;  %v15274_v51 = vxor.u32 2147483648, %v13735_v12 }
 0x3e9   :  { %10016 = vcosq.f32 %v5093_v23  ;;  %v5274_v15 = vshll.u32 %v13765_v40, 30  ;;  %v5343_v63 = vshll.u32 %v15279_v36, %v5328_v53  ;;  %vm4893_vm11 = vcmp.lt.s32.totalorder %v13639_v5, 2 }
 0x3ea   :  { %v13777_v0 = vpop.eup %10014  ;;  %vm5000_vm6 = vcmp.eq.s32.totalorder %v13752_v58, 2  ;;  %10018 = vsinq.f32 %v5093_v23  ;;  %v5190_v33 = vcvt.s32.f32 %v5183_v34  ;;  %v5322_v49 = vor.u32 8388608, %v5321_v9 }
 0x3eb   :  { %v5344_v10 = vshrl.u32 %v15304_v25, %v5329_v54  ;;  %vm4997_vm0 = vcmp.eq.s32.totalorder %v13752_v58, 0  ;;  %v13783_v8 = vsub.s32 %v5271_v45, %v5274_v15  ;;  %v5330_v20 = vshrl.u32 %v15288_v52, %v5329_v54 }
 0x3ec   :  { %v5333_v62 = vor.u32 %v5332_v61, %v5331_v22  ;;  %v5336_v3 = vor.u32 %v5335_v31, %v5334_v14  ;;  %v5188_v53 = vand.u32 2147483647, %v5187_v50  ;;  %v5339_v46 = vor.u32 %v5338_v4, %v5337_v28 }
 0x3ed   :  { %v5342_v44 = vor.u32 %v5341_v41, %v5340_v48  ;;  %vm5346_vm3 = vcmp.lt.s32.totalorder %v13762_v60, 1  ;;  %v15275_v7 = vxor.u32 2147483648, %v13777_v0  ;;  %vm5110_vm14 = vcmp.lt.s32.totalorder %v13457_v56, 0 }
 0x3ee   :  { %v5277_v23 = vsub.s32 0, %v13783_v8  ;;  %v5345_v9 = vor.u32 %v5344_v10, %v5343_v63  ;;  %vm5349_vm15 = vcmp.lt.s32.totalorder %v13762_v60, 4  ;;  %vm5348_vm12 = vcmp.lt.s32.totalorder %v13762_v60, 3 }
 0x3ef   :  { %v5351_v45 = vsel %vm5349_vm15, %v5339_v46, 2102212464  ;;  %v5362_v54 = vshll.u32 %v5322_v49, 8  ;;  %v5420_v34 = vand.u32 2139095040, %v13608_v57  ;;  %vm4996_vm2 = vcmp.lt.s32.totalorder %v13752_v58, 2 }
 0x3f0   :  { %v9338_v50 = vmin.u32 %v5277_v23, %v13783_v8  ;;  %vm5347_vm13 = vcmp.lt.s32.totalorder %v13762_v60, 2  ;;  %v5350_v22 = vsel %vm5346_vm3, %v5330_v20, %v5333_v62  ;;  %v5354_v61 = vsel %vm5346_vm3, %v5333_v62, %v5336_v3 }
 0x3f1   :  { %vm13804_vm5 = vcmp.le.f32.partialorder %v5108_v37, 0.7853982  ;;  %v5191_v31 = vmul.f32 %v5190_v33, %v5188_v53  ;;  %v5352_v28 = vsel %vm5348_vm12, %v5336_v3, %v5351_v45  ;;  %v5355_v4 = vsel %vm5349_vm15, %v5342_v44, 920167782 }
 0x3f2   :  { %v5358_v48 = vsel %vm5346_vm3, %v5336_v3, %v5339_v46  ;;  %vm4891_vm10 = vweird.f32 %v13307_v43  ;;  %v5194_v41 = vsub.s32 4, %v13650_v35  ;;  %v5279_v15 = vclz %v9338_v50 }
 0x3f3   :  { %v5356_v37 = vsel %vm5348_vm12, %v5339_v46, %v5355_v4  ;;  %v5359_v63 = vsel %vm5349_vm15, %v5345_v9, 1326507024  ;;  %vm4994_vm7 = vweird.f32 %v13310_v24  ;;  %vm5100_vm9 = vcmp.eq.s32.totalorder %v13755_v55, 0  ;;  %v13828_v62 = vpop.eup %10016 }
 0x3f4   :  { %v5353_v33 = vsel %vm5347_vm13, %v5350_v22, %v5352_v28  ;;  %v5357_v49 = vsel %vm5347_vm13, %v5354_v61, %v5356_v37  ;;  %v5360_v10 = vsel %vm5348_vm12, %v5342_v44, %v5359_v63  ;;  %v5421_v20 = vshrl.u32 %v5420_v34, 23  ;;  %15636 = vst [vmem:[#allocation107_spill] sm:$0xff] %v13828_v62  ;;  %v13836_v9 = vpop.eup %10018 }
 0x3f5   :  { %v9339_v3 = vadd.s32 4294967294, %v5279_v15  ;;  %v5361_v53 = vsel %vm5347_vm13, %v5358_v48, %v5360_v10  ;;  %v13832_v46 = vmul.u32.u64.low %v5362_v54, %v5357_v49  ;;  %v13833_v23 = vmul.u32.u64.high %v5362_v54, %v5357_v49, %v13832_v46  ;;  %15637 = vst [vmem:[#allocation108_spill] sm:$0xff] %v13836_v9 }
 0x3f6   :  { %v5192_v45 = vxor.u32 2147483648, %v5191_v31  ;;  %v13838_v50 = vmul.u32.u64.low %v5362_v54, %v5361_v53  ;;  %v13839_v22 = vmul.u32.u64.high %v5362_v54, %v5361_v53, %v13838_v50  ;;  %v9345_v61 = vadd.s32 4294967169, %v5421_v20 }
 0x3f7   :  { %v4900_v44 = vsel %vm4893_vm11, %v13742_v11, %v13749_v30  ;;  %v5002_v60 = vsel %vm5000_vm6, %v15274_v51, %v13777_v0  ;;  %vm5103_vm8 = vcmp.eq.s32.totalorder %v13755_v55, 2  ;;  %vm9340_vm1 = vcmp.lt.s32.totalorder %v9339_v3, 0 }
 0x3f8   :  { %v4999_v34 = vsel %vm4997_vm0, %v13735_v12, %v15275_v7  ;;  %v5282_v28 = vsel %vm9340_vm1, 0, %v9339_v3  ;;  %v5369_v4 = vmul.u32 %v5362_v54, %v5353_v33  ;;  %v5427_v48 = vadd.s32 1, %v9345_v61 }
 0x3f9   :  { %v5267_v5 = vadd.s32 %v13698_v26, %v13704_v42  ;;  %v5283_v11 = vsub.s32 32, %v5282_v28  ;;  %v5287_v30 = vsub.s32 4294967266, %v5282_v28  ;;  %v5372_v15 = vadd.s32 1, %v13833_v23 }
 0x3fa   :  { %v5193_v37 = vsel %vm5110_vm14, %v5192_v45, %v5191_v31  ;;  %v5195_v63 = vsel %vm5110_vm14, %v5194_v41, %v13650_v35  ;;  %vm5371_vm4 = vc.u32 %v13839_v22, %v13832_v46  ;;  %vm5428_vm11 = vcmp.gt.s32.totalorder %v5427_v48, 0 }
 0x3fb   :  { %v15273_v54 = vxor.u32 2147483648, %v13836_v9  ;;  %v15272_v33 = vxor.u32 2147483648, %v13828_v62  ;;  %v5288_v26 = vadd.s32 127, %v5287_v30  ;;  %v5373_v42 = vsel %vm5371_vm4, %v5372_v15, %v13833_v23 }
 0x3fc   :  { %v5003_v49 = vsel %vm4996_vm2, %v4999_v34, %v5002_v60  ;;  %v5374_v10 = vadd.s32 %v5373_v42, %v5369_v4  ;;  %v15276_v31 = vand.u32 2147483647, %v13608_v57  ;;  %v5429_v20 = vsel %vm5428_vm11, %v5427_v48, 0 }
 0x3fd   :  { %v5196_v35 = vsel %vm13804_vm5, %v13457_v56, %v5193_v37  ;;  %v5284_v41 = vshll.u32 %v13783_v8, %v5282_v28  ;;  %v5285_v3 = vshrl.u32 %v5267_v5, %v5283_v11  ;;  %v5289_v53 = vshll.u32 %v5288_v26, 23 }
 0x3fe   :  { %v13878_v45 = vsel %vm4891_vm10, nan, %v4900_v44  ;;  %v13882_v58 = vsel %vm13804_vm5, 0, %v5195_v63  ;;  %v5375_v23 = vadd.s32 536870912, %v5374_v10  ;;  %v5431_v50 = vand.u32 31, %v5429_v20 }
 0x3ff   :  { %v13886_v61 = vsel %vm4994_vm7, nan, %v5003_v49  ;;  %v13893_v8 = vsel %vm5100_vm9, %v13828_v62, %v15273_v54  ;;  %v13900_v14 = vsel %vm5103_vm8, %v15272_v33, %v13836_v9  ;;  %v13903_v44 = vand.u32 3, %v13882_v58 }
 0x400   :  { %10020 = vcosq.f32 %v5196_v35  ;;  %v13905_v60 = vshrl.u32 %v5375_v23, 30  ;;  %v5424_v34 = vand.u32 8388607, %v15276_v31  ;;  %v5432_v28 = vsub.s32 32, %v5431_v50 }
 0x401   :  { %v5286_v4 = vor.u32 %v5285_v3, %v5284_v41  ;;  %v5290_v48 = vor.u32 4788187, %v5289_v53  ;;  %v5430_v5 = vshrl.u32 %v5429_v20, 5  ;;  %v5434_v11 = vshll.u32 %v15288_v52, %v5431_v50 }
 0x402   :  { %v5377_v30 = vshll.u32 %v13905_v60, 30  ;;  %v5435_v15 = vshrl.u32 %v15286_v32, %v5432_v28  ;;  %v5437_v37 = vshll.u32 %v15286_v32, %v5431_v50  ;;  %v5440_v63 = vshll.u32 %v15281_v19, %v5431_v50 }
 0x403   :  { %v5438_v26 = vshrl.u32 %v15281_v19, %v5432_v28  ;;  %v5441_v42 = vshrl.u32 %v15277_v27, %v5432_v28  ;;  %v5443_v49 = vshll.u32 %v15277_v27, %v5431_v50  ;;  %v5444_v41 = vshrl.u32 %v15279_v36, %v5432_v28 }
 0x404   :  { %10022 = vsinq.f32 %v5196_v35  ;;  %v13918_v20 = vsub.s32 %v5374_v10, %v5377_v30  ;;  %v5425_v3 = vor.u32 8388608, %v5424_v34  ;;  %v5523_v53 = vand.u32 2139095040, %v13612_v59 }
 0x405   :  { %v5291_v23 = vand.u32 2147483647, %v5290_v48  ;;  %v5293_v33 = vcvt.s32.f32 %v5286_v4  ;;  %v5433_v54 = vshrl.u32 %v15288_v52, %v5432_v28  ;;  %v5446_v51 = vshll.u32 %v15279_v36, %v5431_v50 }
 0x406   :  { %vm5099_vm6 = vcmp.lt.s32.totalorder %v13755_v55, 2  ;;  %vm5213_vm0 = vcmp.lt.s32.totalorder %v13544_v1, 0  ;;  %v5380_v7 = vsub.s32 0, %v13918_v20  ;;  %v5436_v31 = vor.u32 %v5435_v15, %v5434_v11 }
 0x407   :  { %v5439_v27 = vor.u32 %v5438_v26, %v5437_v37  ;;  %v5447_v10 = vshrl.u32 %v15304_v25, %v5432_v28  ;;  %v5297_v35 = vsub.s32 4, %v13765_v40  ;;  %v5442_v34 = vor.u32 %v5441_v42, %v5440_v63 }
 0x408   :  { %v5445_v30 = vor.u32 %v5444_v41, %v5443_v49  ;;  %vm5449_vm3 = vcmp.lt.s32.totalorder %v5430_v5, 1  ;;  %v9342_v4 = vmin.u32 %v5380_v7, %v13918_v20  ;;  %vm5452_vm14 = vcmp.lt.s32.totalorder %v5430_v5, 4 }
 0x409   :  { %v13929_v48 = vshll.u32 %v5425_v3, 8  ;;  %v5524_v50 = vshrl.u32 %v5523_v53, 23  ;;  %vm5097_vm15 = vweird.f32 %v13315_v2  ;;  %v5294_v36 = vmul.f32 %v5293_v33, %v5291_v23 }
 0x40a   :  { %v5448_v19 = vor.u32 %v5447_v10, %v5446_v51  ;;  %vm5450_vm12 = vcmp.lt.s32.totalorder %v5430_v5, 2  ;;  %vm5451_vm2 = vcmp.lt.s32.totalorder %v5430_v5, 3  ;;  %v13932_v11 = vpop.eup %10020  ;;  %vm13936_vm13 = vcmp.le.f32.partialorder %v5211_v39, 0.7853982 }
 0x40b   :  { %15638 = vst [vmem:[#allocation109_spill] sm:$0xff] %v13932_v11  ;;  %v5382_v15 = vclz %v9342_v4  ;;  %v5453_v7 = vsel %vm5449_vm3, %v5433_v54, %v5436_v31  ;;  %v5454_v37 = vsel %vm5452_vm14, %v5442_v34, 2102212464  ;;  %v5457_v63 = vsel %vm5449_vm3, %v5436_v31, %v5439_v27 }
 0x40c   :  { %v5455_v26 = vsel %vm5451_vm2, %v5439_v27, %v5454_v37  ;;  %v5458_v51 = vsel %vm5452_vm14, %v5445_v30, 920167782  ;;  %v5461_v33 = vsel %vm5449_vm3, %v5439_v27, %v5442_v34  ;;  %v5462_v42 = vsel %vm5452_vm14, %v5448_v19, 1326507024 }
 0x40d   :  { %vm5203_vm5 = vcmp.eq.s32.totalorder %v13903_v44, 0  ;;  %v5370_v39 = vadd.s32 %v13832_v46, %v13839_v22  ;;  %v9343_v49 = vadd.s32 4294967294, %v5382_v15  ;;  %v5459_v41 = vsel %vm5451_vm2, %v5442_v34, %v5458_v51 }
 0x40e   :  { %v5463_v3 = vsel %vm5451_vm2, %v5445_v30, %v5462_v42  ;;  %v5295_v54 = vxor.u32 2147483648, %v5294_v36  ;;  %v5460_v53 = vsel %vm5450_vm12, %v5457_v63, %v5459_v41  ;;  %v9349_v23 = vadd.s32 4294967169, %v5524_v50  ;;  %v13951_v10 = vpop.eup %10022 }
 0x40f   :  { %v5464_v31 = vsel %vm5450_vm12, %v5461_v33, %v5463_v3  ;;  %15641 = vst [vmem:[#allocation110_spill] sm:$0xff] %v13951_v10  ;;  %vm9344_vm9 = vcmp.lt.s32.totalorder %v9343_v49, 0  ;;  %v5456_v27 = vsel %vm5450_vm12, %v5453_v7, %v5455_v26  ;;  %vm5206_vm8 = vcmp.eq.s32.totalorder %v13903_v44, 2 }
 0x410   :  { %v13955_v19 = vmul.u32.u64.low %v13929_v48, %v5464_v31  ;;  %v13956_v4 = vmul.u32.u64.high %v13929_v48, %v5464_v31, %v13955_v19  ;;  %v5385_v37 = vsel %vm9344_vm9, 0, %v9343_v49  ;;  %v5530_v34 = vadd.s32 1, %v9349_v23 }
 0x411   :  { %v13959_v46 = vmul.u32.u64.low %v13929_v48, %v5460_v53  ;;  %v13960_v22 = vmul.u32.u64.high %v13929_v48, %v5460_v53, %v13959_v46  ;;  %v5386_v30 = vsub.s32 32, %v5385_v37  ;;  %v5387_v50 = vshll.u32 %v13918_v20, %v5385_v37 }
 0x412   :  { %v5390_v15 = vsub.s32 4294967266, %v5385_v37  ;;  %v5106_v5 = vsel %vm5099_vm6, %v13893_v8, %v13900_v14  ;;  %v5296_v7 = vsel %vm5213_vm0, %v5295_v54, %v5294_v36  ;;  %v5298_v63 = vsel %vm5213_vm0, %v5297_v35, %v13765_v40 }
 0x413   :  { %vm5531_vm1 = vcmp.gt.s32.totalorder %v5530_v34, 0  ;;  %v5388_v26 = vshrl.u32 %v5370_v39, %v5386_v30  ;;  %v5472_v33 = vmul.u32 %v13929_v48, %v5456_v27  ;;  %vm5474_vm4 = vc.u32 %v13956_v4, %v13959_v46 }
 0x414   :  { %v5391_v51 = vadd.s32 127, %v5390_v15  ;;  %v15284_v20 = vxor.u32 2147483648, %v13951_v10  ;;  %v15283_v55 = vxor.u32 2147483648, %v13932_v11  ;;  %vm5316_vm11 = vcmp.lt.s32.totalorder %v13575_v13, 0 }
 0x415   :  { %v5475_v36 = vadd.s32 1, %v13960_v22  ;;  %v5532_v8 = vsel %vm5531_vm1, %v5530_v34, 0  ;;  %v13983_v40 = vsel %vm5097_vm15, nan, %v5106_v5  ;;  %v5389_v14 = vor.u32 %v5388_v26, %v5387_v50 }
 0x416   :  { %v5392_v35 = vshll.u32 %v5391_v51, 23  ;;  %v15285_v48 = vand.u32 2147483647, %v13612_v59  ;;  %v5299_v42 = vsel %vm13936_vm13, %v13544_v1, %v5296_v7  ;;  %v13991_v39 = vsel %vm13936_vm13, 0, %v5298_v63 }
 0x417   :  { %v5476_v49 = vsel %vm5474_vm4, %v5475_v36, %v13960_v22  ;;  %v5534_v41 = vand.u32 31, %v5532_v8  ;;  %v13995_v3 = vand.u32 3, %v13991_v39  ;;  %vm13999_vm6 = vcmp.le.f32.partialorder %v5314_v21, 0.7853982 }
 0x418   :  { %v5393_v53 = vor.u32 4788187, %v5392_v35  ;;  %v5396_v31 = vcvt.s32.f32 %v5389_v14  ;;  %v5477_v23 = vadd.s32 %v5476_v49, %v5472_v33  ;;  %v14008_v28 = vsel %vm5203_vm5, %v13932_v11, %v15284_v20 }
 0x419   :  { %v14015_v27 = vsel %vm5206_vm8, %v15283_v55, %v13951_v10  ;;  %v5400_v21 = vsub.s32 4, %v13905_v60  ;;  %v5535_v19 = vsub.s32 32, %v5534_v41  ;;  %10024 = vcosq.f32 %v5299_v42 }
 0x41a   :  { %v5394_v37 = vand.u32 2147483647, %v5393_v53  ;;  %v5478_v22 = vadd.s32 536870912, %v5477_v23  ;;  %v5527_v34 = vand.u32 8388607, %v15285_v48  ;;  %v5537_v30 = vshll.u32 %v15288_v52, %v5534_v41 }
 0x41b   :  { %v5538_v50 = vshrl.u32 %v15286_v32, %v5535_v19  ;;  %v5540_v15 = vshll.u32 %v15286_v32, %v5534_v41  ;;  %v15644_v5 = vmov 2131351028   ;;  %v5533_v51 = vshrl.u32 %v5532_v8, 5 }
 0x41c   :  { %v5541_v7 = vshrl.u32 %v15644_v5, %v5535_v19  ;;  %v5397_v63 = vmul.f32 %v5396_v31, %v5394_v37  ;;  %v14024_v26 = vshrl.u32 %v5478_v22, 30  ;;  %v15645_v33 = vmov 2102212464  }
 0x41d   :  { %v5546_v36 = vshll.u32 %v15645_v33, %v5534_v41  ;;  %v5543_v14 = vshll.u32 %v15644_v5, %v5534_v41  ;;  %v5544_v35 = vshrl.u32 %v15645_v33, %v5535_v19  ;;  %v15646_v49 = vmov 920167782  }
 0x41e   :  { %v5547_v53 = vshrl.u32 %v15646_v49, %v5535_v19  ;;  %v5549_v55 = vshll.u32 %v15646_v49, %v5534_v41  ;;  %10026 = vsinq.f32 %v5299_v42  ;;  %v5398_v20 = vxor.u32 2147483648, %v5397_v63 }
 0x41f   :  { %v5480_v48 = vshll.u32 %v14024_v26, 30  ;;  %v5528_v32 = vor.u32 8388608, %v5527_v34  ;;  %v5539_v52 = vor.u32 %v5538_v50, %v5537_v30  ;;  %v5542_v31 = vor.u32 %v5541_v7, %v5540_v15 }
 0x420   :  { %v5548_v37 = vor.u32 %v5547_v53, %v5546_v36  ;;  %v5550_v8 = vshrl.u32 %v15304_v25, %v5535_v19  ;;  %v5399_v22 = vsel %vm5316_vm11, %v5398_v20, %v5397_v63  ;;  %v15647_v24 = vmov 683565275  }
 0x421   :  { %v14035_v2 = vsub.s32 %v5477_v23, %v5480_v48  ;;  %v5536_v11 = vshrl.u32 %v15647_v24, %v5535_v19  ;;  %vm5552_vm0 = vcmp.lt.s32.totalorder %v5533_v51, 1  ;;  %vm5202_vm3 = vcmp.lt.s32.totalorder %v13903_v44, 2 }
 0x422   :  { %v5401_v42 = vsel %vm5316_vm11, %v5400_v21, %v13905_v60  ;;  %v5545_v41 = vor.u32 %v5544_v35, %v5543_v14  ;;  %v5551_v34 = vor.u32 %v5550_v8, %v5549_v55  ;;  %vm5555_vm14 = vcmp.lt.s32.totalorder %v5533_v51, 4 }
 0x423   :  { %v5483_v30 = vsub.s32 0, %v14035_v2  ;;  %vm5553_vm12 = vcmp.lt.s32.totalorder %v5533_v51, 2  ;;  %vm5554_vm2 = vcmp.lt.s32.totalorder %v5533_v51, 3  ;;  %v5568_v50 = vshll.u32 %v5528_v32, 8  ;;  %v14049_v15 = vpop.eup %10024 }
 0x424   :  { %v5402_v20 = vsel %vm13999_vm6, %v13575_v13, %v5399_v22  ;;  %v5557_v48 = vsel %vm5555_vm14, %v5545_v41, 2102212464  ;;  %v5560_v23 = vsel %vm5552_vm0, %v5539_v52, %v5542_v31  ;;  %v5561_v19 = vsel %vm5555_vm14, %v5548_v37, 920167782  ;;  %15648 = vst [vmem:[#allocation111_spill] sm:$0xff] %v14049_v15 }
 0x425   :  { %vm5306_vm13 = vcmp.eq.s32.totalorder %v13995_v3, 0  ;;  %vm5309_vm5 = vcmp.eq.s32.totalorder %v13995_v3, 2  ;;  %v14055_v60 = vsel %vm13999_vm6, 0, %v5401_v42  ;;  %vm5419_vm9 = vcmp.lt.s32.totalorder %v13608_v57, 0 }
 0x426   :  { %15649 = vst [vmem:[#allocation112_spill] sm:$0xff] %v14055_v60  ;;  %v9346_v32 = vmin.u32 %v5483_v30, %v14035_v2  ;;  %v5556_v55 = vsel %vm5552_vm0, %v5536_v11, %v5539_v52  ;;  %v5626_v21 = vand.u32 2139095040, %v13627_v29  ;;  %v5558_v7 = vsel %vm5554_vm2, %v5542_v31, %v5557_v48 }
 0x427   :  { %v5562_v63 = vsel %vm5554_vm2, %v5545_v41, %v5561_v19  ;;  %v5564_v36 = vsel %vm5552_vm0, %v5542_v31, %v5545_v41  ;;  %v5565_v14 = vsel %vm5555_vm14, %v5551_v34, 1326507024  ;;  %10028 = vcosq.f32 %v5402_v20 }
 0x428   :  { %v5485_v54 = vclz %v9346_v32  ;;  %v5563_v35 = vsel %vm5553_vm12, %v5560_v23, %v5562_v63  ;;  %v5566_v53 = vsel %vm5554_vm2, %v5548_v37, %v5565_v14  ;;  %v15650_v8 = vand.u32 2147483647, %v13608_v57  ;;  %v14078_v41 = vpop.eup %10026 }
 0x429   :  { %v5559_v11 = vsel %vm5553_vm12, %v5556_v55, %v5558_v7  ;;  %v5567_v22 = vsel %vm5553_vm12, %v5564_v36, %v5566_v53  ;;  %v14075_v42 = vmul.u32.u64.low %v5568_v50, %v5563_v35  ;;  %v14076_v31 = vmul.u32.u64.high %v5568_v50, %v5563_v35, %v14075_v42  ;;  %15653 = vst [vmem:[#allocation113_spill] sm:$0xff] %v14078_v41 }
 0x42a   :  { %vm14069_vm8 = vcmp.le.f32.partialorder %v15650_v8, 0.7853982  ;;  %v9347_v34 = vadd.s32 4294967294, %v5485_v54  ;;  %v14080_v30 = vmul.u32.u64.low %v5568_v50, %v5567_v22  ;;  %v14081_v48 = vmul.u32.u64.high %v5568_v50, %v5567_v22, %v14080_v30 }
 0x42b   :  { %v5627_v37 = vshrl.u32 %v5626_v21, 23  ;;  %v14084_v23 = vand.u32 3, %v14055_v60  ;;  %v5473_v19 = vadd.s32 %v13959_v46, %v13956_v4  ;;  %v5503_v32 = vsub.s32 4, %v14024_v26 }
 0x42c   :  { %v15296_v51 = vand.u32 2147483647, %v13627_v29  ;;  %v15294_v55 = vxor.u32 2147483648, %v14049_v15  ;;  %10030 = vsinq.f32 %v5402_v20  ;;  %vm9348_vm1 = vcmp.lt.s32.totalorder %v9347_v34, 0 }
 0x42d   :  { %v9353_v7 = vadd.s32 4294967169, %v5627_v37  ;;  %v15295_v63 = vxor.u32 2147483648, %v14078_v41  ;;  %v5488_v36 = vsel %vm9348_vm1, 0, %v9347_v34  ;;  %v5575_v14 = vmul.u32 %v5568_v50, %v5559_v11 }
 0x42e   :  { %v5578_v21 = vadd.s32 1, %v14076_v31  ;;  %v14097_v4 = vsel %vm5202_vm3, %v14008_v28, %v14015_v27  ;;  %v5489_v46 = vsub.s32 32, %v5488_v36  ;;  %v5490_v54 = vshll.u32 %v14035_v2, %v5488_v36 }
 0x42f   :  { %v5493_v35 = vsub.s32 4294967266, %v5488_v36  ;;  %vm5412_vm4 = vcmp.eq.s32.totalorder %v14084_v23, 2  ;;  %v5504_v20 = vsel %vm5419_vm9, %v5503_v32, %v14024_v26  ;;  %vm5577_vm11 = vc.u32 %v14081_v48, %v14075_v42 }
 0x430   :  { %v5633_v50 = vadd.s32 1, %v9353_v7  ;;  %v5491_v53 = vshrl.u32 %v5473_v19, %v5489_v46  ;;  %v5579_v11 = vsel %vm5577_vm11, %v5578_v21, %v14076_v31  ;;  %v5630_v44 = vand.u32 8388607, %v15296_v51 }
 0x431   :  { %v5494_v8 = vadd.s32 127, %v5493_v35  ;;  %v14113_v2 = vsel %vm5306_vm13, %v14049_v15, %v15295_v63  ;;  %v14120_v28 = vsel %vm5309_vm5, %v15294_v55, %v14078_v41  ;;  %v5580_v27 = vadd.s32 %v5579_v11, %v5575_v14  ;;  %v14122_v26 = vpop.eup %10028 }
 0x432   :  { %vm5634_vm6 = vcmp.gt.s32.totalorder %v5633_v50, 0  ;;  %vm5409_vm0 = vcmp.eq.s32.totalorder %v14084_v23, 0  ;;  %v5492_v22 = vor.u32 %v5491_v53, %v5490_v54  ;;  %v14127_v34 = vsel %vm14069_vm8, 0, %v5504_v20 }
 0x433   :  { %v5495_v31 = vshll.u32 %v5494_v8, 23  ;;  %v5635_v30 = vsel %vm5634_vm6, %v5633_v50, 0  ;;  %v5581_v37 = vadd.s32 536870912, %v5580_v27  ;;  %v5729_v7 = vand.u32 2139095040, %v13631_v6 }
 0x434   :  { %v5637_v19 = vand.u32 31, %v5635_v30  ;;  %v5499_v14 = vcvt.s32.f32 %v5492_v22  ;;  %v14132_v21 = vadd.s32 %v14075_v42, %v14081_v48  ;;  %v5631_v46 = vor.u32 8388608, %v5630_v44 }
 0x435   :  { %v5496_v36 = vor.u32 4788187, %v5495_v31  ;;  %v14135_v35 = vshrl.u32 %v5581_v37, 30  ;;  %v5636_v53 = vshrl.u32 %v5635_v30, 5  ;;  %v15654_v55 = vmov 2475754826  }
 0x436   :  { %v5638_v20 = vsub.s32 32, %v5637_v19  ;;  %v14137_v8 = vpop.eup %10030  ;;  %v5640_v11 = vshll.u32 %v15647_v24, %v5637_v19  ;;  %v5643_v63 = vshll.u32 %v15654_v55, %v5637_v19  ;;  %v5646_v31 = vshll.u32 %v15644_v5, %v5637_v19 }
 0x437   :  { %v5497_v50 = vand.u32 2147483647, %v5496_v36  ;;  %v5583_v22 = vshll.u32 %v14135_v35, 30  ;;  %v5649_v48 = vshll.u32 %v15645_v33, %v5637_v19  ;;  %v5652_v44 = vshll.u32 %v15646_v49, %v5637_v19 }
 0x438   :  { %v5641_v42 = vshrl.u32 %v15654_v55, %v5638_v20  ;;  %v5644_v30 = vshrl.u32 %v15644_v5, %v5638_v20  ;;  %v5647_v51 = vshrl.u32 %v15645_v33, %v5638_v20  ;;  %v5650_v36 = vshrl.u32 %v15646_v49, %v5638_v20 }
 0x439   :  { %v5500_v37 = vmul.f32 %v5499_v14, %v5497_v50  ;;  %v14150_v54 = vsub.s32 %v5580_v27, %v5583_v22  ;;  %v5653_v15 = vshrl.u32 %v15304_v25, %v5638_v20  ;;  %v5730_v41 = vshrl.u32 %v5729_v7, 23 }
 0x43a   :  { %v15655_v10 = vxor.u32 2147483648, %v14122_v26  ;;  %v5639_v50 = vshrl.u32 %v15647_v24, %v5638_v20  ;;  %v14159_v60 = vshll.u32 %v5631_v46, 8  ;;  %vm5305_vm3 = vcmp.lt.s32.totalorder %v13995_v3, 2 }
 0x43b   :  { %v5501_v14 = vxor.u32 2147483648, %v5500_v37  ;;  %vm5408_vm14 = vcmp.lt.s32.totalorder %v14084_v23, 2  ;;  %v5586_v27 = vsub.s32 0, %v14150_v54  ;;  %v5642_v22 = vor.u32 %v5641_v42, %v5640_v11 }
 0x43c   :  { %v5414_v19 = vsel %vm5412_vm4, %v15655_v10, %v14137_v8  ;;  %v5645_v25 = vor.u32 %v5644_v30, %v5643_v63  ;;  %v5648_v7 = vor.u32 %v5647_v51, %v5646_v31  ;;  %v5651_v43 = vor.u32 %v5650_v36, %v5649_v48 }
 0x43d   :  { %v5502_v32 = vsel %vm5419_vm9, %v5501_v14, %v5500_v37  ;;  %v5654_v62 = vor.u32 %v5653_v15, %v5652_v44  ;;  %vm5655_vm12 = vcmp.lt.s32.totalorder %v5636_v53, 1  ;;  %v15656_v10 = vxor.u32 2147483648, %v14137_v8 }
 0x43e   :  { %v9350_v20 = vmin.u32 %v5586_v27, %v14150_v54  ;;  %v5606_v9 = vsub.s32 4, %v14135_v35  ;;  %v9357_v12 = vadd.s32 4294967169, %v5730_v41  ;;  %vm5200_vm2 = vweird.f32 %v13457_v56 }
 0x43f   :  { %v5411_v46 = vsel %vm5409_vm0, %v14122_v26, %v15656_v10  ;;  %v5505_v51 = vsel %vm14069_vm8, %v13608_v57, %v5502_v32  ;;  %vm5656_vm13 = vcmp.lt.s32.totalorder %v5636_v53, 2  ;;  %vm5657_vm5 = vcmp.lt.s32.totalorder %v5636_v53, 3 }
 0x440   :  { %vm5658_vm9 = vcmp.lt.s32.totalorder %v5636_v53, 4  ;;  %vm5303_vm1 = vweird.f32 %v13544_v1  ;;  %vm5406_vm4 = vweird.f32 %v13575_v13  ;;  %vm5522_vm11 = vcmp.lt.s32.totalorder %v13612_v59, 0 }
 0x441   :  { %v5588_v15 = vclz %v9350_v20  ;;  %v5659_v63 = vsel %vm5655_vm12, %v5639_v50, %v5642_v22  ;;  %v5660_v11 = vsel %vm5658_vm9, %v5648_v7, 2102212464  ;;  %v5663_v41 = vsel %vm5655_vm12, %v5642_v22, %v5645_v25 }
 0x442   :  { %v5661_v31 = vsel %vm5657_vm5, %v5645_v25, %v5660_v11  ;;  %v5664_v42 = vsel %vm5658_vm9, %v5651_v43, 920167782  ;;  %v5667_v52 = vsel %vm5655_vm12, %v5645_v25, %v5648_v7  ;;  %v5668_v32 = vsel %vm5658_vm9, %v5654_v62, 1326507024 }
 0x443   :  { %10032 = vcosq.f32 %v5505_v51  ;;  %v9351_v48 = vadd.s32 4294967294, %v5588_v15  ;;  %v5665_v44 = vsel %vm5657_vm5, %v5648_v7, %v5664_v42  ;;  %v5669_v37 = vsel %vm5657_vm5, %v5651_v43, %v5668_v32 }
 0x444   :  { %10034 = vsinq.f32 %v5505_v51  ;;  %v5662_v30 = vsel %vm5656_vm13, %v5659_v63, %v5661_v31  ;;  %v5666_v36 = vsel %vm5656_vm13, %v5663_v41, %v5665_v44  ;;  %v5670_v14 = vsel %vm5656_vm13, %v5667_v52, %v5669_v37 }
 0x445   :  { %vm9352_vm8 = vcmp.lt.s32.totalorder %v9351_v48, 0  ;;  %v14190_v50 = vmul.u32.u64.low %v14159_v60, %v5670_v14  ;;  %v14191_v27 = vmul.u32.u64.high %v14159_v60, %v5670_v14, %v14190_v50  ;;  %v5736_v25 = vadd.s32 1, %v9357_v12 }
 0x446   :  { %v5591_v62 = vsel %vm9352_vm8, 0, %v9351_v48  ;;  %v14194_v22 = vmul.u32.u64.low %v14159_v60, %v5666_v36  ;;  %v14195_v10 = vmul.u32.u64.high %v14159_v60, %v5666_v36, %v14194_v22  ;;  %v15657_v43 = vand.u32 2147483647, %v13631_v6 }
 0x447   :  { %v5592_v20 = vsub.s32 32, %v5591_v62  ;;  %v5593_v51 = vshll.u32 %v14150_v54, %v5591_v62  ;;  %v5596_v53 = vsub.s32 4294967266, %v5591_v62  ;;  %vm5737_vm6 = vcmp.gt.s32.totalorder %v5736_v25, 0 }
 0x448   :  { %v5733_v7 = vand.u32 8388607, %v15657_v43  ;;  %v5312_v15 = vsel %vm5305_vm3, %v14113_v2, %v14120_v28  ;;  %v5415_v12 = vsel %vm5408_vm14, %v5411_v46, %v5414_v19  ;;  %v14208_v63 = vand.u32 3, %v14127_v34 }
 0x449   :  { %v5738_v11 = vsel %vm5737_vm6, %v5736_v25, 0  ;;  %v5594_v41 = vshrl.u32 %v14132_v21, %v5592_v20  ;;  %v5597_v31 = vadd.s32 127, %v5596_v53  ;;  %v5678_v42 = vmul.u32 %v14159_v60, %v5662_v30  ;;  %v15661_v25 = vld [vmem:[#allocation70_spill] sm:$0xff] }
 0x44a   :  { %vm5680_vm0 = vc.u32 %v14191_v27, %v14194_v22  ;;  %v5607_v3 = vsel %vm5522_vm11, %v5606_v9, %v14135_v35  ;;  %v5681_v2 = vadd.s32 1, %v14195_v10  ;;  %v5734_v23 = vor.u32 8388608, %v5733_v7 }
 0x44b   :  { %v5740_v28 = vand.u32 31, %v5738_v11  ;;  %v5210_v54 = vsel %vm5200_vm2, nan, %v14097_v4  ;;  %v15658_v21 = vand.u32 2147483647, %v13612_v59  ;;  %v5595_v60 = vor.u32 %v5594_v41, %v5593_v51 }
 0x44c   :  { %v5598_v46 = vshll.u32 %v5597_v31, 23  ;;  %v14229_v52 = vsel %vm5303_vm1, nan, %v5312_v15  ;;  %v14233_v9 = vsel %vm5406_vm4, nan, %v5415_v12  ;;  %v5682_v35 = vsel %vm5680_vm0, %v5681_v2, %v14195_v10  ;;  %v15662_v10 = vld [vmem:[#allocation71_spill] sm:$0xff] }
 0x44d   :  { %vm14223_vm3 = vcmp.le.f32.partialorder %v15658_v21, 0.7853982  ;;  %v5741_v32 = vsub.s32 32, %v5740_v28  ;;  %v14236_v4 = vpop.eup %10032  ;;  %v5602_v44 = vcvt.s32.f32 %v5595_v60  ;;  %v5683_v30 = vadd.s32 %v5682_v35, %v5678_v42 }
 0x44e   :  { %v5599_v48 = vor.u32 4788187, %v5598_v46  ;;  %v14240_v37 = vsel %vm14223_vm3, 0, %v5607_v3  ;;  %v14242_v36 = vpop.eup %10034  ;;  %vm5512_vm14 = vcmp.eq.s32.totalorder %v14208_v63, 0  ;;  %vm5515_vm12 = vcmp.eq.s32.totalorder %v14208_v63, 2 }
 0x44f   :  { %v14247_v14 = vand.u32 3, %v14240_v37  ;;  %v14249_v50 = vshll.u32 %v5734_v23, 8  ;;  %v14253_v62 = vmul.f32 %v13878_v45, %v15661_v25  ;;  %v14257_v43 = vmul.f32 %v13886_v61, %v15662_v10 }
 0x450   :  { %v5600_v7 = vand.u32 2147483647, %v5599_v48  ;;  %v5684_v20 = vadd.s32 536870912, %v5683_v30  ;;  %v5743_v51 = vshll.u32 %v15647_v24, %v5740_v28  ;;  %v5744_v53 = vshrl.u32 %v15654_v55, %v5741_v32 }
 0x451   :  { %v5746_v15 = vshll.u32 %v15654_v55, %v5740_v28  ;;  %v5747_v12 = vshrl.u32 %v15644_v5, %v5741_v32  ;;  %v5749_v41 = vshll.u32 %v15644_v5, %v5740_v28  ;;  %v5750_v31 = vshrl.u32 %v15645_v33, %v5741_v32 }
 0x452   :  { %v5603_v45 = vmul.f32 %v5602_v44, %v5600_v7  ;;  %v14265_v42 = vshrl.u32 %v5684_v20, 30  ;;  %v5739_v3 = vshrl.u32 %v5738_v11, 5  ;;  %v5752_v61 = vshll.u32 %v15645_v33, %v5740_v28 }
 0x453   :  { %v5753_v23 = vshrl.u32 %v15646_v49, %v5741_v32  ;;  %v5755_v21 = vshll.u32 %v15646_v49, %v5740_v28  ;;  %v15663_v60 = vmov 1326507024   ;;  %v5513_v46 = vxor.u32 2147483648, %v14242_v36 }
 0x454   :  { %v5756_v55 = vshrl.u32 %v15663_v60, %v5741_v32  ;;  %v5604_v35 = vxor.u32 2147483648, %v5603_v45  ;;  %v5686_v5 = vshll.u32 %v14265_v42, 30  ;;  %v5742_v48 = vshrl.u32 %v15647_v24, %v5741_v32  ;;  %v15664_v60 = vld [vmem:[#allocation72_spill] sm:$0xff]  ;;  %v15665_v32 = vld [vmem:[#allocation73_spill] sm:$0xff] }
 0x455   :  { %vm5511_vm13 = vcmp.lt.s32.totalorder %v14208_v63, 2  ;;  %v5745_v11 = vor.u32 %v5744_v53, %v5743_v51  ;;  %v5748_v44 = vor.u32 %v5747_v12, %v5746_v15  ;;  %v5751_v33 = vor.u32 %v5750_v31, %v5749_v41 }
 0x456   :  { %v5754_v7 = vor.u32 %v5753_v23, %v5752_v61  ;;  %v5605_v20 = vsel %vm5522_vm11, %v5604_v35, %v5603_v45  ;;  %v14278_v2 = vsub.s32 %v5683_v30, %v5686_v5  ;;  %vm5758_vm5 = vcmp.lt.s32.totalorder %v5739_v3, 1 }
 0x457   :  { %vm5761_vm9 = vcmp.lt.s32.totalorder %v5739_v3, 4  ;;  %v5608_v49 = vsel %vm14223_vm3, %v13612_v59, %v5605_v20  ;;  %v5757_v28 = vor.u32 %v5756_v55, %v5755_v21  ;;  %v5831_v24 = vmul.f32 %v13983_v40, %v15664_v60  ;;  %v15667_v20 = vld [vmem:[#allocation74_spill] sm:$0xff] }
 0x458   :  { %v5832_v51 = vmul.f32 %v5210_v54, %v15665_v32  ;;  %10036 = vcosq.f32 %v5608_v49  ;;  %v5689_v53 = vsub.s32 0, %v14278_v2  ;;  %vm5760_vm8 = vcmp.lt.s32.totalorder %v5739_v3, 3 }
 0x459   :  { %v5763_v15 = vsel %vm5761_vm9, %v5751_v33, 2102212464  ;;  %10038 = vsinq.f32 %v5608_v49  ;;  %vm5759_vm11 = vcmp.lt.s32.totalorder %v5739_v3, 2  ;;  %v5766_v30 = vsel %vm5758_vm5, %v5745_v11, %v5748_v44 }
 0x45a   :  { %v5767_v12 = vsel %vm5761_vm9, %v5754_v7, 920167782  ;;  %v5514_v40 = vsel %vm5512_vm14, %v14236_v4, %v5513_v46  ;;  %v15666_v54 = vxor.u32 2147483648, %v14236_v4  ;;  %v9354_v41 = vmin.u32 %v5689_v53, %v14278_v2 }
 0x45b   :  { %v5762_v31 = vsel %vm5758_vm5, %v5742_v48, %v5745_v11  ;;  %v5764_v45 = vsel %vm5760_vm8, %v5748_v44, %v5763_v15  ;;  %v5768_v61 = vsel %vm5760_vm8, %v5751_v33, %v5767_v12  ;;  %v5770_v23 = vsel %vm5758_vm5, %v5748_v44, %v5751_v33  ;;  %v15668_v15 = vld [vmem:[#allocation75_spill] sm:$0xff] }
 0x45c   :  { %v5517_v19 = vsel %vm5515_vm12, %v15666_v54, %v14242_v36  ;;  %v5771_v21 = vsel %vm5761_vm9, %v5757_v28, 1326507024  ;;  %v5691_v55 = vclz %v9354_v41  ;;  %v5769_v35 = vsel %vm5759_vm11, %v5766_v30, %v5768_v61 }
 0x45d   :  { %v5772_v5 = vsel %vm5760_vm8, %v5754_v7, %v5771_v21  ;;  %v5833_v49 = vmul.f32 %v14229_v52, %v15667_v20  ;;  %v14312_v48 = vmul.u32.u64.low %v14249_v50, %v5769_v35  ;;  %v14313_v11 = vmul.u32.u64.high %v14249_v50, %v5769_v35, %v14312_v48 }
 0x45e   :  { %v5773_v53 = vsel %vm5759_vm11, %v5770_v23, %v5772_v5  ;;  %v5834_v44 = vmul.f32 %v14233_v9, %v15668_v15  ;;  %v9355_v33 = vadd.s32 4294967294, %v5691_v55  ;;  %v5765_v28 = vsel %vm5759_vm11, %v5762_v31, %v5764_v45 }
 0x45f   :  { %v14320_v30 = vmul.u32.u64.low %v14249_v50, %v5773_v53  ;;  %v14321_v12 = vmul.u32.u64.high %v14249_v50, %v5773_v53, %v14320_v30  ;;  %vm15313_vm6 = vweird.f32 %v13608_v57  ;;  %v5839_v52 = vpack.c.bf16 %v14257_v43, %v14253_v62 }
 0x460   :  { %v5840_v7 = vpack.c.bf16 %v5832_v51, %v5831_v24  ;;  %v5841_v54 = vpack.c.bf16 %v5834_v44, %v5833_v49  ;;  %v5518_v41 = vsel %vm5511_vm13, %v5514_v40, %v5517_v19  ;;  %vm5614_vm0 = vcmp.lt.s32.totalorder %v14247_v14, 2  ;;  %v15669_v44 = vld [vmem:[#allocation76_spill] sm:$0xff] }
 0x461   :  { %v5679_v9 = vadd.s32 %v14194_v22, %v14191_v27  ;;  %vm9356_vm3 = vcmp.lt.s32.totalorder %v9355_v33, 0  ;;  %vm5618_vm14 = vcmp.eq.s32.totalorder %v14247_v14, 2  ;;  %v5781_v31 = vmul.u32 %v14249_v50, %v5765_v28  ;;  %5844 = vst [vmem:[#allocation2 + $0x100] sm:$0xff] %v5839_v52 }
 0x462   :  { %v5694_v3 = vsel %vm9356_vm3, 0, %v9355_v33  ;;  %v5784_v45 = vadd.s32 1, %v14313_v11  ;;  %5845 = vst [vmem:[#allocation2 + $0x110] sm:$0xff] %v5840_v7  ;;  %5846 = vst [vmem:[#allocation2 + $0x120] sm:$0xff] %v5841_v54  ;;  %v14334_v62 = vpop.eup %10036  ;;  %v5942_v51 = vadd.s32 3, %v13635_v18  ;;  %v5519_v22 = vsel %vm15313_vm6, nan, %v5518_v41 }
 0x463   :  { %v5695_v63 = vsub.s32 32, %v5694_v3  ;;  %v5696_v43 = vshll.u32 %v14278_v2, %v5694_v3  ;;  %v5699_v24 = vsub.s32 4294967266, %v5694_v3  ;;  %v14338_v27 = vpop.eup %10038  ;;  %vm5615_vm12 = vcmp.eq.s32.totalorder %v14247_v14, 0  ;;  %v15670_v54 = vld [vmem:[#allocation77_spill] sm:$0xff] }
 0x464   :  { %v5619_v50 = vxor.u32 2147483648, %v14334_v62  ;;  %vm5783_vm13 = vc.u32 %v14321_v12, %v14312_v48  ;;  %v5616_v40 = vxor.u32 2147483648, %v14338_v27  ;;  %vm15312_vm5 = vweird.f32 %v13612_v59 }
 0x465   :  { %v5697_v19 = vshrl.u32 %v5679_v9, %v5695_v63  ;;  %v5700_v61 = vadd.s32 127, %v5699_v24  ;;  %v5785_v2 = vsel %vm5783_vm13, %v5784_v45, %v14313_v11  ;;  %v6046_v21 = vadd.s32 3, %v13729_v17 }
 0x466   :  { %v5620_v18 = vsel %vm5618_vm14, %v5619_v50, %v14338_v27  ;;  %v5786_v23 = vadd.s32 %v5785_v2, %v5781_v31  ;;  %v5617_v55 = vsel %vm5615_vm12, %v14334_v62, %v5616_v40  ;;  %v5943_v49 = vand.u32 3, %v5942_v51 }
 0x467   :  { %v5698_v35 = vor.u32 %v5697_v19, %v5696_v43  ;;  %v5701_v5 = vshll.u32 %v5700_v61, 23  ;;  %v5621_v53 = vsel %vm5614_vm0, %v5617_v55, %v5620_v18  ;;  %v5835_v33 = vmul.f32 %v5519_v22, %v15669_v44 }
 0x468   :  { %v5787_v11 = vadd.s32 536870912, %v5786_v23  ;;  %v6150_v28 = vadd.s32 3, %v13733_v16  ;;  %v5622_v30 = vsel %vm15312_vm5, nan, %v5621_v53  ;;  %vm5945_vm9 = vcmp.eq.s32.totalorder %v5943_v49, 0 }
 0x469   :  { %v5702_v52 = vor.u32 4788187, %v5701_v5  ;;  %v5705_v17 = vcvt.s32.f32 %v5698_v35  ;;  %v5836_v41 = vmul.f32 %v5622_v30, %v15670_v54  ;;  %v6047_v3 = vand.u32 3, %v6046_v21  ;;  %v15679_v30 = vld [vmem:[#allocation108_spill] sm:$0xff] }
 0x46a   :  { %v14364_v7 = vshrl.u32 %v5787_v11, 30  ;;  %vm5948_vm8 = vcmp.eq.s32.totalorder %v5943_v49, 2  ;;  %v6151_v45 = vand.u32 3, %v6150_v28  ;;  %v5709_v16 = vsub.s32 4, %v14265_v42 }
 0x46b   :  { %v5703_v9 = vand.u32 2147483647, %v5702_v52  ;;  %v5842_v31 = vpack.c.bf16 %v5836_v41, %v5835_v33  ;;  %v6254_v43 = vadd.s32 3, %v13882_v58  ;;  %v15671_v24 = vand.u32 2147483647, %v13627_v29 }
 0x46c   :  { %v5789_v14 = vshll.u32 %v14364_v7, 30  ;;  %vm5625_vm0 = vcmp.lt.s32.totalorder %v13627_v29, 0  ;;  %vm5944_vm3 = vcmp.lt.s32.totalorder %v5943_v49, 2  ;;  %v15674_v61 = vxor.u32 2147483648, %v13695_v38 }
 0x46d   :  { %v5706_v63 = vmul.f32 %v5705_v17, %v5703_v9  ;;  %vm14372_vm11 = vcmp.le.f32.partialorder %v15671_v24, 0.7853982  ;;  %5847 = vst [vmem:[#allocation2 + $0x130] sm:$0xff] %v5842_v31  ;;  %v15675_v58 = vxor.u32 2147483648, %v13676_v47  ;;  %vm6049_vm14 = vcmp.eq.s32.totalorder %v6047_v3, 0 }
 0x46e   :  { %v14377_v22 = vsub.s32 %v5786_v23, %v5789_v14  ;;  %v5947_v2 = vsel %vm5945_vm9, %v13676_v47, %v15674_v61  ;;  %vm6052_vm12 = vcmp.eq.s32.totalorder %v6047_v3, 2  ;;  %vm6153_vm13 = vcmp.eq.s32.totalorder %v6151_v45, 0 }
 0x46f   :  { %v5707_v19 = vxor.u32 2147483648, %v5706_v63  ;;  %v5950_v18 = vsel %vm5948_vm8, %v15675_v58, %v13695_v38  ;;  %vm6156_vm5 = vcmp.eq.s32.totalorder %v6151_v45, 2  ;;  %v5710_v23 = vsel %vm5625_vm0, %v5709_v16, %v14265_v42  ;;  %v15677_v38 = vld [vmem:[#allocation106_spill] sm:$0xff]  ;;  %v15681_v42 = vld [vmem:[#allocation107_spill] sm:$0xff] }
 0x470   :  { %v5792_v21 = vsub.s32 0, %v14377_v22  ;;  %v14387_v35 = vand.u32 3, %v6254_v43  ;;  %v6358_v5 = vadd.s32 3, %v13991_v39  ;;  %v5951_v53 = vsel %vm5944_vm3, %v5947_v2, %v5950_v18  ;;  %v15684_v43 = vld [vmem:[#allocation112_spill] sm:$0xff]  ;;  %v15685_v58 = vld [vmem:[#allocation110_spill] sm:$0xff] }
 0x471   :  { %v5708_v55 = vsel %vm5625_vm0, %v5707_v19, %v5706_v63  ;;  %vm6048_vm9 = vcmp.lt.s32.totalorder %v6047_v3, 2  ;;  %v15676_v47 = vxor.u32 2147483648, %v13777_v0  ;;  %v15678_v33 = vxor.u32 2147483648, %v15677_v38 }
 0x472   :  { %v9358_v49 = vmin.u32 %v5792_v21, %v14377_v22  ;;  %vm6152_vm8 = vcmp.lt.s32.totalorder %v6151_v45, 2  ;;  %v15680_v52 = vxor.u32 2147483648, %v15679_v30  ;;  %v15682_v39 = vxor.u32 2147483648, %v15681_v42  ;;  %v15687_v21 = vld [vmem:[#allocation109_spill] sm:$0xff] }
 0x473   :  { %v6051_v11 = vsel %vm6049_vm14, %v15677_v38, %v15676_v47  ;;  %v6054_v28 = vsel %vm6052_vm12, %v15678_v33, %v13777_v0  ;;  %v5711_v9 = vsel %vm14372_vm11, %v13627_v29, %v5708_v55  ;;  %v14408_v14 = vsel %vm14372_vm11, 0, %v5710_v23 }
 0x474   :  { %v6155_v17 = vsel %vm6153_vm13, %v15681_v42, %v15680_v52  ;;  %v6158_v41 = vsel %vm6156_vm5, %v15682_v39, %v15679_v30  ;;  %v5782_v0 = vadd.s32 %v14312_v48, %v14321_v12  ;;  %v5794_v31 = vclz %v9358_v49  ;;  %v15691_v52 = vld [vmem:[#allocation111_spill] sm:$0xff] }
 0x475   :  { %v14414_v63 = vsel %vm4891_vm10, nan, %v5951_v53  ;;  %vm6257_vm0 = vcmp.eq.s32.totalorder %v14387_v35, 0  ;;  %v6359_v16 = vand.u32 3, %v6358_v5  ;;  %v6462_v24 = vadd.s32 3, %v15684_v43 }
 0x476   :  { %v9359_v19 = vadd.s32 4294967294, %v5794_v31  ;;  %v5812_v61 = vsub.s32 4, %v14364_v7  ;;  %v6055_v51 = vsel %vm6048_vm9, %v6051_v11, %v6054_v28  ;;  %v6159_v2 = vsel %vm6152_vm8, %v6155_v17, %v6158_v41  ;;  %v15689_v28 = vld [vmem:[#allocation113_spill] sm:$0xff] }
 0x477   :  { %10040 = vcosq.f32 %v5711_v9  ;;  %vm6256_vm5 = vcmp.lt.s32.totalorder %v14387_v35, 2  ;;  %v6463_v48 = vand.u32 3, %v6462_v24  ;;  %v6566_v12 = vadd.s32 3, %v14127_v34 }
 0x478   :  { %10042 = vsinq.f32 %v5711_v9  ;;  %vm9360_vm10 = vcmp.lt.s32.totalorder %v9359_v19, 0  ;;  %v15686_v18 = vxor.u32 2147483648, %v15685_v58  ;;  %v6670_v23 = vadd.s32 3, %v14240_v37 }
 0x479   :  { %v5797_v5 = vsel %vm9360_vm10, 0, %v9359_v19  ;;  %vm6260_vm11 = vcmp.eq.s32.totalorder %v14387_v35, 2  ;;  %vm6360_vm3 = vcmp.lt.s32.totalorder %v6359_v16, 2  ;;  %vm6361_vm14 = vcmp.eq.s32.totalorder %v6359_v16, 0 }
 0x47a   :  { %v6259_v55 = vsel %vm6257_vm0, %v15687_v21, %v15686_v18  ;;  %v5798_v3 = vsub.s32 32, %v5797_v5  ;;  %v5799_v49 = vshll.u32 %v14377_v22, %v5797_v5  ;;  %v5802_v53 = vsub.s32 4294967266, %v5797_v5 }
 0x47b   :  { %vm6364_vm12 = vcmp.eq.s32.totalorder %v6359_v16, 2  ;;  %vm5728_vm13 = vcmp.lt.s32.totalorder %v13631_v6, 0  ;;  %vm6465_vm9 = vcmp.eq.s32.totalorder %v6463_v48, 0  ;;  %vm6468_vm8 = vcmp.eq.s32.totalorder %v6463_v48, 2 }
 0x47c   :  { %v6567_v34 = vand.u32 3, %v6566_v12  ;;  %v6671_v47 = vand.u32 3, %v6670_v23  ;;  %v5800_v38 = vshrl.u32 %v5782_v0, %v5798_v3  ;;  %v5803_v11 = vadd.s32 127, %v5802_v53 }
 0x47d   :  { %v15688_v37 = vxor.u32 2147483648, %v15687_v21  ;;  %v15690_v30 = vxor.u32 2147483648, %v15689_v28  ;;  %v15692_v22 = vxor.u32 2147483648, %v15691_v52  ;;  %vm6464_vm0 = vcmp.lt.s32.totalorder %v6463_v48, 2 }
 0x47e   :  { %vm6569_vm10 = vcmp.eq.s32.totalorder %v6567_v34, 0  ;;  %vm6572_vm6 = vcmp.eq.s32.totalorder %v6567_v34, 2  ;;  %v5801_v39 = vor.u32 %v5800_v38, %v5799_v49  ;;  %v5804_v41 = vshll.u32 %v5803_v11, 23 }
 0x47f   :  { %v6262_v33 = vsel %vm6260_vm11, %v15688_v37, %v15685_v58  ;;  %v6363_v42 = vsel %vm6361_vm14, %v15691_v52, %v15690_v30  ;;  %v6366_v17 = vsel %vm6364_vm12, %v15692_v22, %v15689_v28  ;;  %v15693_v9 = vxor.u32 2147483648, %v14137_v8 }
 0x480   :  { %v15694_v31 = vxor.u32 2147483648, %v14122_v26  ;;  %vm6568_vm11 = vcmp.lt.s32.totalorder %v6567_v34, 2  ;;  %v6571_v43 = vsel %vm6569_vm10, %v14236_v4, %v5513_v46  ;;  %v15695_v24 = vxor.u32 2147483648, %v14236_v4 }
 0x481   :  { %v6467_v0 = vsel %vm6465_vm9, %v14122_v26, %v15693_v9  ;;  %vm6673_vm14 = vcmp.eq.s32.totalorder %v6671_v47, 0  ;;  %v5805_v12 = vor.u32 4788187, %v5804_v41  ;;  %v5808_v58 = vcvt.s32.f32 %v5801_v39  ;;  %v10041_v21 = vpop.eup %10040 }
 0x482   :  { %v6470_v45 = vsel %vm6468_vm8, %v15694_v31, %v14137_v8  ;;  %v6574_v19 = vsel %vm6572_vm6, %v15695_v24, %v14242_v36  ;;  %v6263_v18 = vsel %vm6256_vm5, %v6259_v55, %v6262_v33  ;;  %vm6672_vm12 = vcmp.lt.s32.totalorder %v6671_v47, 2  ;;  %v10043_v4 = vpop.eup %10042 }
 0x483   :  { %v6056_v26 = vsel %vm4994_vm7, nan, %v6055_v51  ;;  %v6367_v8 = vsel %vm6360_vm3, %v6363_v42, %v6366_v17  ;;  %v6675_v46 = vsel %vm6673_vm14, %v14334_v62, %v5616_v40  ;;  %vm6676_vm9 = vcmp.eq.s32.totalorder %v6671_v47, 2 }
 0x484   :  { %v5806_v36 = vand.u32 2147483647, %v5805_v12  ;;  %v6471_v5 = vsel %vm6464_vm0, %v6467_v0, %v6470_v45  ;;  %v6575_v3 = vsel %vm6568_vm11, %v6571_v43, %v6574_v19  ;;  %v6678_v35 = vsel %vm6676_vm9, %v5619_v50, %v14338_v27 }
 0x485   :  { %v15697_v55 = vand.u32 2147483647, %v13631_v6  ;;  %v6160_v40 = vsel %vm5097_vm15, nan, %v6159_v2  ;;  %v6264_v49 = vsel %vm5200_vm2, nan, %v6263_v18  ;;  %v6679_v48 = vsel %vm6672_vm12, %v6675_v46, %v6678_v35 }
 0x486   :  { %v5809_v53 = vmul.f32 %v5808_v58, %v5806_v36  ;;  %v5813_v34 = vsel %vm5728_vm13, %v5812_v61, %v14364_v7  ;;  %v6368_v62 = vsel %vm5303_vm1, nan, %v6367_v8  ;;  %v6774_v27 = vadd.s32 3, %v14408_v14  ;;  %v15704_v36 = vld [vmem:[#allocation79_spill] sm:$0xff] }
 0x487   :  { %vm14465_vm7 = vcmp.le.f32.partialorder %v15697_v55, 0.7853982  ;;  %v6472_v50 = vsel %vm5406_vm4, nan, %v6471_v5  ;;  %vm15701_vm6 = vweird.f32 %v13608_v57  ;;  %v6889_v56 = vmul.f32 %v14414_v63, %v15661_v25 }
 0x488   :  { %v6576_v2 = vsel %vm15701_vm6, nan, %v6575_v3  ;;  %v6890_v47 = vmul.f32 %v6056_v26, %v15662_v10  ;;  %v5810_v38 = vxor.u32 2147483648, %v5809_v53  ;;  %vm15702_vm15 = vweird.f32 %v13612_v59 }
 0x489   :  { %v6680_v7 = vsel %vm15702_vm15, nan, %v6679_v48  ;;  %v6891_v1 = vmul.f32 %v6160_v40, %v15664_v60  ;;  %v6892_v61 = vmul.f32 %v6264_v49, %v15665_v32  ;;  %v5716_v11 = vand.u32 3, %v14408_v14 }
 0x48a   :  { %v5815_v13 = vsel %vm14465_vm7, 0, %v5813_v34  ;;  %v5811_v57 = vsel %vm5728_vm13, %v5810_v38, %v5809_v53  ;;  %v6893_v25 = vmul.f32 %v6368_v62, %v15667_v20  ;;  %v6894_v10 = vmul.f32 %v6472_v50, %v15668_v15 }
 0x48b   :  { %v6895_v63 = vmul.f32 %v6576_v2, %v15669_v44  ;;  %v5814_v59 = vsel %vm14465_vm7, %v13631_v6, %v5811_v57  ;;  %v6775_v60 = vand.u32 3, %v6774_v27  ;;  %v6896_v32 = vmul.f32 %v6680_v7, %v15670_v54 }
 0x48c   :  { %v6899_v14 = vpack.c.bf16 %v6890_v47, %v6889_v56  ;;  %10044 = vcosq.f32 %v5814_v59  ;;  %v6900_v37 = vpack.c.bf16 %v6892_v61, %v6891_v1  ;;  %v6901_v33 = vpack.c.bf16 %v6894_v10, %v6893_v25 }
 0x48d   :  { %v5719_v28 = vxor.u32 2147483648, %v10043_v4  ;;  %v5722_v30 = vxor.u32 2147483648, %v10041_v21  ;;  %10046 = vsinq.f32 %v5814_v59  ;;  %v6902_v52 = vpack.c.bf16 %v6896_v32, %v6895_v63 }
 0x48e   :  { %6904 = vst [vmem:[#allocation2 + $0x108] sm:$0xff] %v6899_v14  ;;  %vm5718_vm2 = vcmp.eq.s32.totalorder %v5716_v11, 0  ;;  %vm5721_vm1 = vcmp.eq.s32.totalorder %v5716_v11, 2  ;;  %v6878_v20 = vadd.s32 3, %v5815_v13  ;;  %6905 = vst [vmem:[#allocation2 + $0x118] sm:$0xff] %v6900_v37  ;;  %vm6777_vm4 = vcmp.eq.s32.totalorder %v6775_v60, 0 }
 0x48f   :  { %6906 = vst [vmem:[#allocation2 + $0x128] sm:$0xff] %v6901_v33  ;;  %vm6780_vm5 = vcmp.eq.s32.totalorder %v6775_v60, 2  ;;  %6907 = vst [vmem:[#allocation2 + $0x138] sm:$0xff] %v6902_v52  ;;  %vm5717_vm3 = vcmp.lt.s32.totalorder %v5716_v11, 2  ;;  %v5720_v15 = vsel %vm5718_vm2, %v10041_v21, %v5719_v28  ;;  %v5723_v44 = vsel %vm5721_vm1, %v5722_v30, %v10043_v4 }
 0x490   :  { %v5819_v54 = vand.u32 3, %v5815_v13  ;;  %vm6776_vm13 = vcmp.lt.s32.totalorder %v6775_v60, 2  ;;  %v6779_v42 = vsel %vm6777_vm4, %v10041_v21, %v5719_v28  ;;  %v6782_v22 = vsel %vm6780_vm5, %v5722_v30, %v10043_v4  ;;  %v15703_v21 = vld [vmem:[#allocation78_spill] sm:$0xff] }
 0x491   :  { %v6879_v17 = vand.u32 3, %v6878_v20  ;;  %vm5715_vm8 = vweird.f32 %v13627_v29  ;;  %v5724_v39 = vsel %vm5717_vm3, %v5720_v15, %v5723_v44  ;;  %v6783_v41 = vsel %vm6776_vm13, %v6779_v42, %v6782_v22 }
 0x492   :  { %vm5824_vm0 = vcmp.eq.s32.totalorder %v5819_v54, 2  ;;  %vm5820_vm11 = vcmp.lt.s32.totalorder %v5819_v54, 2  ;;  %vm5821_vm14 = vcmp.eq.s32.totalorder %v5819_v54, 0  ;;  %v5725_v45 = vsel %vm5715_vm8, nan, %v5724_v39 }
 0x493   :  { %vm6884_vm10 = vcmp.eq.s32.totalorder %v6879_v17, 2  ;;  %vm6881_vm12 = vcmp.eq.s32.totalorder %v6879_v17, 0  ;;  %v6784_v24 = vsel %vm5715_vm8, nan, %v6783_v41  ;;  %vm6880_vm9 = vcmp.lt.s32.totalorder %v6879_v17, 2 }
 0x494   :  { %vm5818_vm7 = vweird.f32 %v13631_v6  ;;  %v5837_v23 = vmul.f32 %v5725_v45, %v15703_v21  ;;  %v6897_v8 = vmul.f32 %v6784_v24, %v15703_v21 }
 0x496   :  { %v10045_v9 = vpop.eup %10044 }
 0x497   :  { %v10047_v0 = vpop.eup %10046  ;;  %v5825_v31 = vxor.u32 2147483648, %v10045_v9 }
 0x498   :  { %v5822_v43 = vxor.u32 2147483648, %v10047_v0 }
 0x499   :  { %v5826_v19 = vsel %vm5824_vm0, %v5825_v31, %v10047_v0  ;;  %v6886_v12 = vsel %vm6884_vm10, %v5825_v31, %v10047_v0 }
 0x49a   :  { %v5823_v58 = vsel %vm5821_vm14, %v10045_v9, %v5822_v43  ;;  %v6883_v29 = vsel %vm6881_vm12, %v10045_v9, %v5822_v43 }
 0x49b   :  { %v5827_v18 = vsel %vm5820_vm11, %v5823_v58, %v5826_v19  ;;  %v6887_v26 = vsel %vm6880_vm9, %v6883_v29, %v6886_v12 }
 0x49c   :  { %v5828_v46 = vsel %vm5818_vm7, nan, %v5827_v18  ;;  %v6888_v4 = vsel %vm5818_vm7, nan, %v6887_v26 }
 0x49d   :  { %v5838_v5 = vmul.f32 %v5828_v46, %v15704_v36  ;;  %v6898_v3 = vmul.f32 %v6888_v4, %v15704_v36 }
 0x49f   :  { %v5843_v35 = vpack.c.bf16 %v5838_v5, %v5837_v23  ;;  %v6903_v55 = vpack.c.bf16 %v6898_v3, %v6897_v8 }
 0x4a1   :  { %5848 = vst [vmem:[#allocation2 + $0x140] sm:$0xff] %v5843_v35  ;;  %6908 = vst [vmem:[#allocation2 + $0x148] sm:$0xff] %v6903_v55 }
 0x4a2 PF:  { %v10048_v6 = vld [vmem:[#allocation17 + $0x4] ss:$8 sps:$4 sm:$0xff]   ;;  %v10050_v16 = vld [vmem:[#allocation17] ss:$8 sps:$4 sm:$0xff]   ;;  %v10051_v51 = vld [vmem:[#allocation17 + $0x14] ss:$8 sps:$4 sm:$0xff]  }
 0x4a3   :  { %7149 = vmatprep.subr.bf16.mxu0 %v10048_v6  ;;  %v10053_v40 = vld [vmem:[#allocation17 + $0x10] ss:$8 sps:$4 sm:$0xff]   ;;  %v10054_v49 = vld [vmem:[#allocation17 + $0x24] ss:$8 sps:$4 sm:$0xff]   ;;  %v10056_v48 = vld [vmem:[#allocation17 + $0x20] ss:$8 sps:$4 sm:$0xff]  }
 0x4a4   :  { %7150 = vmatpush1.bf16.msra.mxu0 %v10050_v16  ;;  %v10057_v53 = vld [vmem:[#allocation17 + $0x34] ss:$8 sps:$4 sm:$0xff]   ;;  %v10059_v34 = vld [vmem:[#allocation17 + $0x30] ss:$8 sps:$4 sm:$0xff]   ;;  %v10060_v62 = vld [vmem:[#allocation17 + $0x44] ss:$8 sps:$4 sm:$0xff]  }
 0x4a5   :  { %7151 = vmatprep.subr.bf16.mxu0 %v10051_v51  ;;  %v10062_v27 = vld [vmem:[#allocation17 + $0x40] ss:$8 sps:$4 sm:$0xff]   ;;  %v10063_v50 = vld [vmem:[#allocation17 + $0x54] ss:$8 sps:$4 sm:$0xff]   ;;  %v10065_v2 = vld [vmem:[#allocation17 + $0x50] ss:$8 sps:$4 sm:$0xff]  }
 0x4a6   :  { %v10066_v56 = vld [vmem:[#allocation17 + $0x64] ss:$8 sps:$4 sm:$0xff]   ;;  %v10068_v38 = vld [vmem:[#allocation17 + $0x60] ss:$8 sps:$4 sm:$0xff]   ;;  %v10069_v7 = vld [vmem:[#allocation17 + $0x74] ss:$8 sps:$4 sm:$0xff]  }
 0x4a7   :  { %v6910_v47 = vld [vmem:[#allocation2 + $0x8] sm:$0xff]  ;;  %v10071_v1 = vld [vmem:[#allocation17 + $0x70] ss:$8 sps:$4 sm:$0xff]   ;;  %v10075_v13 = vld [vmem:[#allocation17 + $0x94] ss:$8 sps:$4 sm:$0xff]   ;;  %vm8839_vm6 = vcmask 7168  }
 0x4a8   :  { %7152 = vmatpush1.bf16.msra.mxu0 %v10053_v40  ;;  %7181 = vmatprep.mubr.bf16.mxu0 %v6910_v47  ;;  %v10072_v61 = vld [vmem:[#allocation17 + $0x84] ss:$8 sps:$4 sm:$0xff]   ;;  %v10074_v11 = vld [vmem:[#allocation17 + $0x80] ss:$8 sps:$4 sm:$0xff]   ;;  %v10077_v57 = vld [vmem:[#allocation17 + $0x90] ss:$8 sps:$4 sm:$0xff]  }
 0x4a9   :  { %7153 = vmatprep.subr.bf16.mxu0 %v10054_v49  ;;  %v10078_v25 = vld [vmem:[#allocation17 + $0xa4] ss:$8 sps:$4 sm:$0xff]   ;;  %v10080_v10 = vld [vmem:[#allocation17 + $0xa0] ss:$8 sps:$4 sm:$0xff]   ;;  %v10081_v63 = vld [vmem:[#allocation17 + $0xb4] ss:$8 sps:$4 sm:$0xff]  }
 0x4aa   :  { %v10083_v59 = vld [vmem:[#allocation17 + $0xb0] ss:$8 sps:$4 sm:$0xff]   ;;  %v10084_v60 = vld [vmem:[#allocation17 + $0xc4] ss:$8 sps:$4 sm:$0xff]   ;;  %v10086_v32 = vld [vmem:[#allocation17 + $0xc0] ss:$8 sps:$4 sm:$0xff]  }
 0x4ab   :  { %v10087_v14 = vld [vmem:[#allocation17 + $0xd4] ss:$8 sps:$4 sm:$0xff]   ;;  %v10089_v37 = vld [vmem:[#allocation17 + $0xd0] ss:$8 sps:$4 sm:$0xff]   ;;  %v10090_v33 = vld [vmem:[#allocation17 + $0xe4] ss:$8 sps:$4 sm:$0xff]  }
 0x4ac   :  { %7154 = vmatpush1.bf16.msra.mxu0 %v10056_v48  ;;  %v10092_v28 = vld [vmem:[#allocation17 + $0xe0] ss:$8 sps:$4 sm:$0xff]   ;;  %v10093_v30 = vld [vmem:[#allocation17 + $0xf4] ss:$8 sps:$4 sm:$0xff]   ;;  %v10095_v52 = vld [vmem:[#allocation17 + $0xf0] ss:$8 sps:$4 sm:$0xff]  }
 0x4ad   :  { %7155 = vmatprep.subr.bf16.mxu0 %v10057_v53  ;;  %v6909_v20 = vld [vmem:[#allocation2] sm:$0xff]  ;;  %v6912_v15 = vld [vmem:[#allocation2 + $0x18] sm:$0xff]  ;;  %v6911_v44 = vld [vmem:[#allocation2 + $0x10] sm:$0xff]  ;;  %s10415_s22 = smov 1e-12  }
 0x4ae   :  { %v6914_v54 = vld [vmem:[#allocation2 + $0x28] sm:$0xff]  ;;  %v6913_v42 = vld [vmem:[#allocation2 + $0x20] sm:$0xff]  ;;  %v6916_v22 = vld [vmem:[#allocation2 + $0x38] sm:$0xff] }
 0x4af   :  { %v6915_v17 = vld [vmem:[#allocation2 + $0x30] sm:$0xff]  ;;  %v6918_v39 = vld [vmem:[#allocation2 + $0x48] sm:$0xff]  ;;  %v6917_v41 = vld [vmem:[#allocation2 + $0x40] sm:$0xff] }
 0x4b0   :  { %7156 = vmatpush1.bf16.msra.mxu0 %v10059_v34  ;;  %v6920_v9 = vld [vmem:[#allocation2 + $0x58] sm:$0xff]  ;;  %v6919_v0 = vld [vmem:[#allocation2 + $0x50] sm:$0xff]  ;;  %v6922_v31 = vld [vmem:[#allocation2 + $0x68] sm:$0xff] }
 0x4b1   :  { %7157 = vmatprep.subr.bf16.mxu0 %v10060_v62  ;;  %v6921_v45 = vld [vmem:[#allocation2 + $0x60] sm:$0xff]  ;;  %v6924_v43 = vld [vmem:[#allocation2 + $0x78] sm:$0xff]  ;;  %v6923_v24 = vld [vmem:[#allocation2 + $0x70] sm:$0xff] }
 0x4b2   :  { %v6926_v19 = vld [vmem:[#allocation2 + $0x88] sm:$0xff]  ;;  %v6925_v12 = vld [vmem:[#allocation2 + $0x80] sm:$0xff]  ;;  %v6928_v58 = vld [vmem:[#allocation2 + $0x98] sm:$0xff] }
 0x4b3   :  { %v6927_v29 = vld [vmem:[#allocation2 + $0x90] sm:$0xff]  ;;  %v6930_v18 = vld [vmem:[#allocation2 + $0xa8] sm:$0xff]  ;;  %v6929_v21 = vld [vmem:[#allocation2 + $0xa0] sm:$0xff] }
 0x4b4   :  { %7158 = vmatpush1.bf16.msra.mxu0 %v10062_v27  ;;  %v6932_v23 = vld [vmem:[#allocation2 + $0xb8] sm:$0xff]  ;;  %v6931_v26 = vld [vmem:[#allocation2 + $0xb0] sm:$0xff]  ;;  %v6934_v8 = vld [vmem:[#allocation2 + $0xc8] sm:$0xff] }
 0x4b5   :  { %7159 = vmatprep.subr.bf16.mxu0 %v10063_v50  ;;  %v6933_v46 = vld [vmem:[#allocation2 + $0xc0] sm:$0xff]  ;;  %v6936_v4 = vld [vmem:[#allocation2 + $0xd8] sm:$0xff]  ;;  %v6935_v36 = vld [vmem:[#allocation2 + $0xd0] sm:$0xff] }
 0x4b6   :  { %v6938_v5 = vld [vmem:[#allocation2 + $0xe8] sm:$0xff]  ;;  %v6937_v3 = vld [vmem:[#allocation2 + $0xe0] sm:$0xff]  ;;  %v6940_v35 = vld [vmem:[#allocation2 + $0xf8] sm:$0xff] }
 0x4b7   :  { %v6939_v55 = vld [vmem:[#allocation2 + $0xf0] sm:$0xff]  ;;  %v6942_v6 = vld [vmem:[#allocation2 + $0x108] sm:$0xff]  ;;  %v6941_v16 = vld [vmem:[#allocation2 + $0x100] sm:$0xff] }
 0x4b8   :  { %7160 = vmatpush1.bf16.msra.mxu0 %v10065_v2  ;;  %v6944_v51 = vld [vmem:[#allocation2 + $0x118] sm:$0xff]  ;;  %v6943_v40 = vld [vmem:[#allocation2 + $0x110] sm:$0xff]  ;;  %v6946_v49 = vld [vmem:[#allocation2 + $0x128] sm:$0xff] }
 0x4b9   :  { %7161 = vmatprep.subr.bf16.mxu0 %v10066_v56  ;;  %v6945_v48 = vld [vmem:[#allocation2 + $0x120] sm:$0xff]  ;;  %v6948_v53 = vld [vmem:[#allocation2 + $0x138] sm:$0xff]  ;;  %v6947_v34 = vld [vmem:[#allocation2 + $0x130] sm:$0xff] }
 0x4ba   :  { %v6950_v62 = vld [vmem:[#allocation2 + $0x148] sm:$0xff]  ;;  %v6949_v27 = vld [vmem:[#allocation2 + $0x140] sm:$0xff] }
 0x4bc   :  { %7162 = vmatpush1.bf16.msra.mxu0 %v10068_v38 }
 0x4bd   :  { %7163 = vmatprep.subr.bf16.mxu0 %v10069_v7 }
 0x4c0   :  { %7164 = vmatpush1.bf16.msra.mxu0 %v10071_v1 }
 0x4c1   :  { %7165 = vmatprep.subr.bf16.mxu0 %v10072_v61 }
 0x4c4   :  { %7166 = vmatpush1.bf16.msra.mxu0 %v10074_v11 }
 0x4c5   :  { %7167 = vmatprep.subr.bf16.mxu0 %v10075_v13 }
 0x4c8   :  { %7168 = vmatpush1.bf16.msra.mxu0 %v10077_v57 }
 0x4c9   :  { %7169 = vmatprep.subr.bf16.mxu0 %v10078_v25 }
 0x4cc   :  { %7170 = vmatpush1.bf16.msra.mxu0 %v10080_v10 }
 0x4cd   :  { %7171 = vmatprep.subr.bf16.mxu0 %v10081_v63 }
 0x4d0   :  { %7172 = vmatpush1.bf16.msra.mxu0 %v10083_v59 }
 0x4d1   :  { %7173 = vmatprep.subr.bf16.mxu0 %v10084_v60  ;;  %v14516_v60 = vld [vmem:[#allocation19 + $0x44] ss:$8 sps:$4 sm:$0xff]  }
 0x4d2   :  { %7758 = vmatprep.mubr.bf16.mxu1 %v14516_v60 }
 0x4d4   :  { %7174 = vmatpush1.bf16.msra.mxu0 %v10086_v32 }
 0x4d5   :  { %7175 = vmatprep.subr.bf16.mxu0 %v10087_v14 }
 0x4d8   :  { %7176 = vmatpush1.bf16.msra.mxu0 %v10089_v37 }
 0x4d9   :  { %7177 = vmatprep.subr.bf16.mxu0 %v10090_v33 }
 0x4dc   :  { %7178 = vmatpush1.bf16.msra.mxu0 %v10092_v28 }
 0x4dd   :  { %7179 = vmatprep.subr.bf16.mxu0 %v10093_v30 }
 0x4e0   :  { %7180 = vmatpush1.bf16.msra.mxu0 %v10095_v52 }
 0x4e3   :  { %7182 = vmatmul.mubr.bf16.vlgmr.msra.gmra.mrb[0].mxu0 %v6909_v20 }
 0x4e4   :  { %7191 = vmatprep.mubr.bf16.mxu0 %v6912_v15  ;;  %v6952_v15 = vld [vmem:[#allocation2 + $0x158] sm:$0xff] }
 0x4eb   :  { %7192 = vmatmul.mubr.bf16.gmra.mrb[4].mxu0 %v6911_v44 }
 0x4ec   :  { %7201 = vmatprep.mubr.bf16.mxu0 %v6914_v54  ;;  %v6951_v54 = vld [vmem:[#allocation2 + $0x150] sm:$0xff] }
 0x4f3   :  { %7202 = vmatmul.mubr.bf16.gmra.mrb[8].mxu0 %v6913_v42 }
 0x4f4   :  { %7211 = vmatprep.mubr.bf16.mxu0 %v6916_v22 }
 0x4fb   :  { %7212 = vmatmul.mubr.bf16.gmra.mrb[12].mxu0 %v6915_v17 }
 0x4fc   :  { %7221 = vmatprep.mubr.bf16.mxu0 %v6918_v39 }
 0x503   :  { %7222 = vmatmul.mubr.bf16.gmra.mrb[16].mxu0 %v6917_v41 }
 0x504   :  { %7231 = vmatprep.mubr.bf16.mxu0 %v6920_v9  ;;  %v6954_v9 = vld [vmem:[#allocation2 + $0x168] sm:$0xff] }
 0x50b   :  { %7232 = vmatmul.mubr.bf16.gmra.mrb[20].mxu0 %v6919_v0 }
 0x50c   :  { %7237 = vmatprep.mubr.bf16.mxu0 %v6922_v31  ;;  %v6953_v31 = vld [vmem:[#allocation2 + $0x160] sm:$0xff] }
 0x513   :  { %7238 = vmatmul.mubr.bf16.gmra.mrb[24].mxu0 %v6921_v45 }
 0x514   :  { %7243 = vmatprep.mubr.bf16.mxu0 %v6924_v43 }
 0x51b   :  { %7244 = vmatmul.mubr.bf16.gmra.mrb[28].mxu0 %v6923_v24 }
 0x51c   :  { %7249 = vmatprep.mubr.bf16.mxu0 %v6926_v19 }
 0x523   :  { %7250 = vmatmul.mubr.bf16.gmra.mrb[32].mxu0 %v6925_v12  ;;  %v6956_v12 = vld [vmem:[#allocation2 + $0x178] sm:$0xff] }
 0x524   :  { %7259 = vmatprep.mubr.bf16.mxu0 %v6928_v58  ;;  %v6955_v58 = vld [vmem:[#allocation2 + $0x170] sm:$0xff] }
 0x52b   :  { %7260 = vmatmul.mubr.bf16.gmra.mrb[36].mxu0 %v6927_v29 }
 0x52c   :  { %7269 = vmatprep.mubr.bf16.mxu0 %v6930_v18 }
 0x533   :  { %7270 = vmatmul.mubr.bf16.gmra.mrb[40].mxu0 %v6929_v21 }
 0x534   :  { %7279 = vmatprep.mubr.bf16.mxu0 %v6932_v23  ;;  %v14531_v23 = vld [vmem:[#allocation19 + $0x4] ss:$8 sps:$4 sm:$0xff]  }
 0x53b   :  { %7280 = vmatmul.mubr.bf16.gmra.mrb[44].mxu0 %v6931_v26 }
 0x53c   :  { %7289 = vmatprep.mubr.bf16.mxu0 %v6934_v8 }
 0x543   :  { %7290 = vmatmul.mubr.bf16.gmra.mrb[48].mxu0 %v6933_v46 }
 0x544   :  { %7299 = vmatprep.mubr.bf16.mxu0 %v6936_v4 }
 0x54b   :  { %7300 = vmatmul.mubr.bf16.gmra.mrb[52].mxu0 %v6935_v36 }
 0x54c   :  { %7305 = vmatprep.mubr.bf16.mxu0 %v6938_v5 }
 0x553   :  { %7306 = vmatmul.mubr.bf16.gmra.mrb[56].mxu0 %v6937_v3 }
 0x554   :  { %7311 = vmatprep.mubr.bf16.mxu0 %v6940_v35 }
 0x55b   :  { %7312 = vmatmul.mubr.bf16.gmra.mrb[60].mxu0 %v6939_v55 }
 0x55c   :  { %7317 = vmatprep.mubr.bf16.mxu0 %v6942_v6 }
 0x563   :  { %7318 = vmatmul.mubr.bf16.gmra.mrb[64].mxu0 %v6941_v16 }
 0x564   :  { %7327 = vmatprep.mubr.bf16.mxu0 %v6944_v51 }
 0x56b   :  { %7328 = vmatmul.mubr.bf16.gmra.mrb[68].mxu0 %v6943_v40 }
 0x56c   :  { %7337 = vmatprep.mubr.bf16.mxu0 %v6946_v49 }
 0x573   :  { %7338 = vmatmul.mubr.bf16.gmra.mrb[72].mxu0 %v6945_v48 }
 0x574   :  { %7347 = vmatprep.mubr.bf16.mxu0 %v6948_v53 }
 0x57b   :  { %7348 = vmatmul.mubr.bf16.gmra.mrb[76].mxu0 %v6947_v34 }
 0x57c   :  { %7357 = vmatprep.mubr.bf16.mxu0 %v6950_v62 }
 0x583   :  { %7358 = vmatmul.mubr.bf16.gmra.mrb[80].mxu0 %v6949_v27 }
 0x584   :  { %7367 = vmatprep.mubr.bf16.mxu0 %v6952_v15 }
 0x58b   :  { %7368 = vmatmul.mubr.bf16.gmra.mrb[84].mxu0 %v6951_v54 }
 0x58c   :  { %7373 = vmatprep.mubr.bf16.mxu0 %v6954_v9 }
 0x593   :  { %7374 = vmatmul.mubr.bf16.gmra.mrb[88].mxu0 %v6953_v31 }
 0x594   :  { %7379 = vmatprep.mubr.bf16.mxu0 %v6956_v12 }
 0x59b   :  { %7380 = vmatmul.mubr.bf16.gmra.mrb[92].mxu0 %v6955_v58 }
 0x59c   :  { %7718 = vmatprep.mubr.bf16.mxu0 %v14531_v23 }
 0x5b6   :  { %v7183_v50 = vpop.f32.mrb[0].mxu0 }
 0x5b7   :  { %v7185_v2 = vpop.f32.mrb[1].mxu0 }
 0x5b8   :  { %v7187_v56 = vpop.f32.mrb[2].mxu0 }
 0x5b9   :  { %v14508_v47 = vpack.c.bf16 %v7187_v56, %v7183_v50  ;;  %v7189_v38 = vpop.f32.mrb[3].mxu0 }
 0x5ba   :  { %v14510_v7 = vpack.c.bf16 %v7189_v38, %v7185_v2 }
 0x5be   :  { %v7193_v1 = vpop.f32.mrb[4].mxu0 }
 0x5bf   :  { %v7195_v61 = vpop.f32.mrb[5].mxu0 }
 0x5c0   :  { %v7197_v11 = vpop.f32.mrb[6].mxu0 }
 0x5c1   :  { %v14512_v13 = vpack.c.bf16 %v7197_v11, %v7193_v1  ;;  %v7199_v57 = vpop.f32.mrb[7].mxu0 }
 0x5c2   :  { %v14514_v25 = vpack.c.bf16 %v7199_v57, %v7195_v61 }
 0x5c6   :  { %v7203_v10 = vpop.f32.mrb[8].mxu0 }
 0x5c7   :  { %v7205_v63 = vpop.f32.mrb[9].mxu0 }
 0x5c8   :  { %v7207_v59 = vpop.f32.mrb[10].mxu0 }
 0x5c9   :  { %v14518_v32 = vpack.c.bf16 %v7207_v59, %v7203_v10  ;;  %v7209_v14 = vpop.f32.mrb[11].mxu0 }
 0x5ca   :  { %v14520_v37 = vpack.c.bf16 %v7209_v14, %v7205_v63 }
 0x5ce   :  { %v7213_v33 = vpop.f32.mrb[12].mxu0 }
 0x5cf   :  { %v7215_v28 = vpop.f32.mrb[13].mxu0 }
 0x5d0   :  { %v7217_v30 = vpop.f32.mrb[14].mxu0 }
 0x5d1   :  { %v14523_v52 = vpack.c.bf16 %v7217_v30, %v7213_v33  ;;  %v7219_v20 = vpop.f32.mrb[15].mxu0  ;;  %v7494_v30 = vld [vmem:[#allocation3 + $0x80] sm:$0xff] }
 0x5d2   :  { %v14525_v44 = vpack.c.bf16 %v7219_v20, %v7215_v28  ;;  %v7497_v20 = vld [vmem:[#allocation3 + $0x98] sm:$0xff] }
 0x5d6   :  { %v7223_v42 = vpop.f32.mrb[16].mxu0 }
 0x5d7   :  { %v7225_v22 = vpop.f32.mrb[17].mxu0 }
 0x5d8   :  { %v7227_v17 = vpop.f32.mrb[18].mxu0 }
 0x5d9   :  { %v14527_v39 = vpack.c.bf16 %v7227_v17, %v7223_v42  ;;  %v7229_v41 = vpop.f32.mrb[19].mxu0  ;;  %v7496_v42 = vld [vmem:[#allocation3 + $0x90] sm:$0xff] }
 0x5da   :  { %v14529_v0 = vpack.c.bf16 %v7229_v41, %v7225_v22  ;;  %v7500_v17 = vld [vmem:[#allocation3 + $0xb0] sm:$0xff]  ;;  %v7499_v41 = vld [vmem:[#allocation3 + $0xa8] sm:$0xff] }
 0x5de   :  { %v7233_v45 = vpop.f32.mrb[20].mxu0 }
 0x5df   :  { %v7234_v43 = vpop.f32.mrb[21].mxu0 }
 0x5e0   :  { %v7235_v24 = vpop.f32.mrb[22].mxu0 }
 0x5e1   :  { %v7236_v19 = vpop.f32.mrb[23].mxu0 }
 0x5e6   :  { %v7239_v29 = vpop.f32.mrb[24].mxu0 }
 0x5e7   :  { %v7240_v18 = vpop.f32.mrb[25].mxu0 }
 0x5e8   :  { %v7241_v21 = vpop.f32.mrb[26].mxu0 }
 0x5e9   :  { %v7242_v26 = vpop.f32.mrb[27].mxu0  ;;  %v7518_v21 = vld [vmem:[#allocation3 + $0x140] sm:$0xff] }
 0x5ee   :  { %v7245_v8 = vpop.f32.mrb[28].mxu0 }
 0x5ef   :  { %v7246_v46 = vpop.f32.mrb[29].mxu0  ;;  %v7521_v8 = vld [vmem:[#allocation3 + $0x158] sm:$0xff] }
 0x5f0   :  { %v7247_v4 = vpop.f32.mrb[30].mxu0 }
 0x5f1   :  { %v7248_v36 = vpop.f32.mrb[31].mxu0 }
 0x5f2   :  { %v7520_v36 = vld [vmem:[#allocation3 + $0x150] sm:$0xff] }
 0x5f6   :  { %v7251_v5 = vpop.f32.mrb[32].mxu0 }
 0x5f7   :  { %v7253_v3 = vpop.f32.mrb[33].mxu0 }
 0x5f8   :  { %v7255_v35 = vpop.f32.mrb[34].mxu0 }
 0x5f9   :  { %v7406_v55 = vpack.c.bf16 %v7255_v35, %v7251_v5  ;;  %v7257_v6 = vpop.f32.mrb[35].mxu0  ;;  %v7524_v35 = vld [vmem:[#allocation3 + $0x170] sm:$0xff] }
 0x5fa   :  { %v14534_v16 = vpack.c.bf16 %v7257_v6, %v7253_v3 }
 0x5fb   :  { %7686 = vmatprep.subr.bf16.mxu0 %v7406_v55  ;;  %9729 = vmatprep.subr.bf16.mxu1 %v7406_v55 }
 0x5fc   :  { %7687 = vmatpush1.bf16.msra.mxu0 %v14508_v47  ;;  %9745 = vmatpush1.bf16.msra.mxu1 %v14508_v47 }
 0x5fe   :  { %v7261_v51 = vpop.f32.mrb[36].mxu0 }
 0x5ff   :  { %v7263_v40 = vpop.f32.mrb[37].mxu0 }
 0x600   :  { %v7265_v49 = vpop.f32.mrb[38].mxu0 }
 0x601   :  { %v7407_v48 = vpack.c.bf16 %v7265_v49, %v7261_v51  ;;  %v7267_v53 = vpop.f32.mrb[39].mxu0  ;;  %v14564_v51 = vld [vmem:[#allocation19] ss:$8 sps:$4 sm:$0xff]   ;;  %v14566_v49 = vld [vmem:[#allocation19 + $0x54] ss:$8 sps:$4 sm:$0xff]  }
 0x602   :  { %v14538_v34 = vpack.c.bf16 %v7267_v53, %v7263_v40 }
 0x603   :  { %7688 = vmatprep.subr.bf16.mxu0 %v7407_v48  ;;  %9730 = vmatprep.subr.bf16.mxu1 %v7407_v48  ;;  %v14568_v48 = vld [vmem:[#allocation19 + $0x14] ss:$8 sps:$4 sm:$0xff]  }
 0x604   :  { %7689 = vmatpush1.bf16.msra.mxu0 %v14512_v13  ;;  %9746 = vmatpush1.bf16.msra.mxu1 %v14512_v13 }
 0x606   :  { %v7271_v62 = vpop.f32.mrb[40].mxu0 }
 0x607   :  { %v7273_v27 = vpop.f32.mrb[41].mxu0 }
 0x608   :  { %v7275_v50 = vpop.f32.mrb[42].mxu0 }
 0x609   :  { %v7408_v2 = vpack.c.bf16 %v7275_v50, %v7271_v62  ;;  %v7277_v56 = vpop.f32.mrb[43].mxu0 }
 0x60a   :  { %v7418_v38 = vpack.c.bf16 %v7277_v56, %v7273_v27  ;;  %v14576_v56 = vld [vmem:[#allocation19 + $0x10] ss:$8 sps:$4 sm:$0xff]  }
 0x60b   :  { %7690 = vmatprep.subr.bf16.mxu0 %v7408_v2  ;;  %9731 = vmatprep.subr.bf16.mxu1 %v7408_v2  ;;  %v14574_v2 = vld [vmem:[#allocation19 + $0x50] ss:$8 sps:$4 sm:$0xff]  }
 0x60c   :  { %7691 = vmatpush1.bf16.msra.mxu0 %v14518_v32  ;;  %9747 = vmatpush1.bf16.msra.mxu1 %v14518_v32  ;;  %v7493_v32 = vld [vmem:[#allocation3 + $0x78] sm:$0xff] }
 0x60e   :  { %v7281_v47 = vpop.f32.mrb[44].mxu0 }
 0x60f   :  { %v7283_v1 = vpop.f32.mrb[45].mxu0 }
 0x610   :  { %v7285_v61 = vpop.f32.mrb[46].mxu0 }
 0x611   :  { %v7409_v11 = vpack.c.bf16 %v7285_v61, %v7281_v47  ;;  %v7287_v57 = vpop.f32.mrb[47].mxu0  ;;  %v14578_v47 = vld [vmem:[#allocation19 + $0x64] ss:$8 sps:$4 sm:$0xff]  }
 0x612   :  { %v7419_v10 = vpack.c.bf16 %v7287_v57, %v7283_v1  ;;  %v14580_v1 = vld [vmem:[#allocation19 + $0x24] ss:$8 sps:$4 sm:$0xff]  }
 0x613   :  { %7692 = vmatprep.subr.bf16.mxu0 %v7409_v11  ;;  %9732 = vmatprep.subr.bf16.mxu1 %v7409_v11 }
 0x614   :  { %7693 = vmatpush1.bf16.msra.mxu0 %v14523_v52  ;;  %9748 = vmatpush1.bf16.msra.mxu1 %v14523_v52 }
 0x616   :  { %v7291_v13 = vpop.f32.mrb[48].mxu0 }
 0x617   :  { %v7293_v63 = vpop.f32.mrb[49].mxu0 }
 0x618   :  { %v7295_v59 = vpop.f32.mrb[50].mxu0 }
 0x619   :  { %v7410_v14 = vpack.c.bf16 %v7295_v59, %v7291_v13  ;;  %v7297_v33 = vpop.f32.mrb[51].mxu0  ;;  %v14588_v59 = vld [vmem:[#allocation19 + $0x20] ss:$8 sps:$4 sm:$0xff]  }
 0x61a   :  { %v7420_v28 = vpack.c.bf16 %v7297_v33, %v7293_v63  ;;  %v14586_v63 = vld [vmem:[#allocation19 + $0x60] ss:$8 sps:$4 sm:$0xff]   ;;  %v14590_v33 = vld [vmem:[#allocation19 + $0x74] ss:$8 sps:$4 sm:$0xff]  }
 0x61b   :  { %7694 = vmatprep.subr.bf16.mxu0 %v7410_v14  ;;  %9733 = vmatprep.subr.bf16.mxu1 %v7410_v14 }
 0x61c   :  { %7695 = vmatpush1.bf16.msra.mxu0 %v14527_v39  ;;  %9749 = vmatpush1.bf16.msra.mxu1 %v14527_v39 }
 0x61d   :  { %7696 = vmatprep.subr.bf16.mxu0 %v7494_v30  ;;  %9734 = vmatprep.subr.bf16.mxu1 %v7494_v30 }
 0x61e   :  { %v7301_v15 = vpop.f32.mrb[52].mxu0 }
 0x61f   :  { %v7302_v54 = vpop.f32.mrb[53].mxu0 }
 0x620   :  { %7697 = vmatpush1.bf16.msra.mxu0 %v7493_v32  ;;  %9750 = vmatpush1.bf16.msra.mxu1 %v7493_v32  ;;  %v7303_v52 = vpop.f32.mrb[54].mxu0  ;;  %v7519_v54 = vld [vmem:[#allocation3 + $0x148] sm:$0xff] }
 0x621   :  { %7698 = vmatprep.subr.bf16.mxu0 %v7497_v20  ;;  %9735 = vmatprep.subr.bf16.mxu1 %v7497_v20  ;;  %v7304_v22 = vpop.f32.mrb[55].mxu0  ;;  %v14598_v52 = vld [vmem:[#allocation19 + $0x70] ss:$8 sps:$4 sm:$0xff]  }
 0x622   :  { %v7495_v22 = vld [vmem:[#allocation3 + $0x88] sm:$0xff] }
 0x624   :  { %7699 = vmatpush1.bf16.msra.mxu0 %v7496_v42  ;;  %9751 = vmatpush1.bf16.msra.mxu1 %v7496_v42  ;;  %v14600_v42 = vld [vmem:[#allocation19 + $0x30] ss:$8 sps:$4 sm:$0xff]  }
 0x625   :  { %7700 = vmatprep.subr.bf16.mxu0 %v7500_v17  ;;  %9736 = vmatprep.subr.bf16.mxu1 %v7500_v17  ;;  %v14602_v17 = vld [vmem:[#allocation19 + $0x84] ss:$8 sps:$4 sm:$0xff]  }
 0x626   :  { %v7307_v39 = vpop.f32.mrb[56].mxu0 }
 0x627   :  { %v7308_v9 = vpop.f32.mrb[57].mxu0  ;;  %v7498_v39 = vld [vmem:[#allocation3 + $0xa0] sm:$0xff] }
 0x628   :  { %7701 = vmatpush1.bf16.msra.mxu0 %v7499_v41  ;;  %9752 = vmatpush1.bf16.msra.mxu1 %v7499_v41  ;;  %v7309_v31 = vpop.f32.mrb[58].mxu0  ;;  %v7522_v41 = vld [vmem:[#allocation3 + $0x160] sm:$0xff]  ;;  %v7525_v9 = vld [vmem:[#allocation3 + $0x178] sm:$0xff] }
 0x629   :  { %7702 = vmatprep.subr.bf16.mxu0 %v14534_v16  ;;  %9737 = vmatprep.subr.bf16.mxu1 %v14534_v16  ;;  %v7310_v45 = vpop.f32.mrb[59].mxu0  ;;  %v14562_v16 = vld [vmem:[#allocation19 + $0x40] ss:$8 sps:$4 sm:$0xff]   ;;  %v15705_v31 = vmov 0  }
 0x62a   :  { %v10110_v45 = vld [vmem:[#allocation19 + $0x80] ss:$8 sps:$4 sm:$0xff]  }
 0x62c   :  { %7703 = vmatpush1.bf16.msra.mxu0 %v14510_v7  ;;  %9753 = vmatpush1.bf16.msra.mxu1 %v14510_v7 }
 0x62d   :  { %7704 = vmatprep.subr.bf16.mxu0 %v14538_v34  ;;  %9738 = vmatprep.subr.bf16.mxu1 %v14538_v34 }
 0x62e   :  { %v7313_v43 = vpop.f32.mrb[60].mxu0 }
 0x62f   :  { %v7314_v24 = vpop.f32.mrb[61].mxu0  ;;  %v7501_v43 = vld [vmem:[#allocation3 + $0xb8] sm:$0xff] }
 0x630   :  { %7705 = vmatpush1.bf16.msra.mxu0 %v14514_v25  ;;  %9754 = vmatpush1.bf16.msra.mxu1 %v14514_v25  ;;  %v7315_v19 = vpop.f32.mrb[62].mxu0  ;;  %v10114_v24 = vld [vmem:[#allocation19 + $0x94] ss:$8 sps:$4 sm:$0xff]  }
 0x631   :  { %7706 = vmatprep.subr.bf16.mxu0 %v7418_v38  ;;  %9739 = vmatprep.subr.bf16.mxu1 %v7418_v38  ;;  %v7316_v12 = vpop.f32.mrb[63].mxu0  ;;  %v10116_v19 = vld [vmem:[#allocation19 + $0x90] ss:$8 sps:$4 sm:$0xff]  }
 0x632   :  { %v10120_v12 = vld [vmem:[#allocation19 + $0xa4] ss:$8 sps:$4 sm:$0xff]  }
 0x634   :  { %7707 = vmatpush1.bf16.msra.mxu0 %v14520_v37  ;;  %9755 = vmatpush1.bf16.msra.mxu1 %v14520_v37  ;;  %v7517_v37 = vld [vmem:[#allocation3 + $0x138] sm:$0xff] }
 0x635   :  { %7708 = vmatprep.subr.bf16.mxu0 %v7419_v10  ;;  %9740 = vmatprep.subr.bf16.mxu1 %v7419_v10 }
 0x636   :  { %v7319_v7 = vpop.f32.mrb[64].mxu0 }
 0x637   :  { %v7321_v58 = vpop.f32.mrb[65].mxu0 }
 0x638   :  { %7709 = vmatpush1.bf16.msra.mxu0 %v14525_v44  ;;  %9756 = vmatpush1.bf16.msra.mxu1 %v14525_v44  ;;  %v7323_v29 = vpop.f32.mrb[66].mxu0 }
 0x639   :  { %7710 = vmatprep.subr.bf16.mxu0 %v7420_v28  ;;  %9741 = vmatprep.subr.bf16.mxu1 %v7420_v28  ;;  %v7426_v25 = vpack.c.bf16 %v7323_v29, %v7319_v7  ;;  %v7325_v18 = vpop.f32.mrb[67].mxu0  ;;  %v14592_v28 = vld [vmem:[#allocation19 + $0x34] ss:$8 sps:$4 sm:$0xff]   ;;  %v10122_v7 = vld [vmem:[#allocation19 + $0xa0] ss:$8 sps:$4 sm:$0xff]  }
 0x63a   :  { %v7436_v26 = vpack.c.bf16 %v7325_v18, %v7321_v58  ;;  %v10126_v58 = vld [vmem:[#allocation19 + $0xb4] ss:$8 sps:$4 sm:$0xff]   ;;  %v10128_v29 = vld [vmem:[#allocation19 + $0xb0] ss:$8 sps:$4 sm:$0xff]   ;;  %v10134_v18 = vld [vmem:[#allocation19 + $0xc0] ss:$8 sps:$4 sm:$0xff]  }
 0x63c   :  { %7711 = vmatpush1.bf16.msra.mxu0 %v14529_v0  ;;  %9757 = vmatpush1.bf16.msra.mxu1 %v14529_v0  ;;  %v7523_v0 = vld [vmem:[#allocation3 + $0x168] sm:$0xff] }
 0x63d   :  { %9742 = vmatprep.subr.bf16.mxu1 %v7518_v21  ;;  %7712 = vmatprep.subr.bf16.mxu0 %v7518_v21  ;;  %v10135_v21 = vld [vmem:[#allocation19 + $0xd4] ss:$8 sps:$4 sm:$0xff]  }
 0x63e   :  { %v7329_v46 = vpop.f32.mrb[68].mxu0 }
 0x63f   :  { %v7331_v4 = vpop.f32.mrb[69].mxu0 }
 0x640   :  { %9758 = vmatpush1.bf16.msra.mxu1 %v7517_v37  ;;  %7713 = vmatpush1.bf16.msra.mxu0 %v7517_v37  ;;  %v7333_v44 = vpop.f32.mrb[70].mxu0  ;;  %v10138_v37 = vld [vmem:[#allocation19 + $0xe4] ss:$8 sps:$4 sm:$0xff]  }
 0x641   :  { %9743 = vmatprep.subr.bf16.mxu1 %v7521_v8  ;;  %7714 = vmatprep.subr.bf16.mxu0 %v7521_v8  ;;  %v7427_v5 = vpack.c.bf16 %v7333_v44, %v7329_v46  ;;  %v7335_v3 = vpop.f32.mrb[71].mxu0  ;;  %v10140_v8 = vld [vmem:[#allocation19 + $0xe0] ss:$8 sps:$4 sm:$0xff]   ;;  %v10141_v46 = vld [vmem:[#allocation19 + $0xf4] ss:$8 sps:$4 sm:$0xff]  }
 0x642   :  { %v7437_v55 = vpack.c.bf16 %v7335_v3, %v7331_v4  ;;  %v14608_v4 = vld [vmem:[#allocation19 + $0xf0] ss:$8 sps:$4 sm:$0xff]  }
 0x644   :  { %9759 = vmatpush1.bf16.msra.mxu1 %v7520_v36  ;;  %7715 = vmatpush1.bf16.msra.mxu0 %v7520_v36 }
 0x645   :  { %9744 = vmatprep.subr.bf16.mxu1 %v7524_v35  ;;  %7716 = vmatprep.subr.bf16.mxu0 %v7524_v35 }
 0x646   :  { %v7339_v6 = vpop.f32.mrb[72].mxu0 }
 0x647   :  { %v7341_v40 = vpop.f32.mrb[73].mxu0 }
 0x648   :  { %9760 = vmatpush1.bf16.msra.mxu1 %v7523_v0  ;;  %7717 = vmatpush1.bf16.msra.mxu0 %v7523_v0  ;;  %v7343_v53 = vpop.f32.mrb[74].mxu0 }
 0x649   :  { %v7428_v34 = vpack.c.bf16 %v7343_v53, %v7339_v6  ;;  %v7345_v62 = vpop.f32.mrb[75].mxu0  ;;  %9473 = vmatprep.subr.bf16.mxu1 %v7436_v26  ;;  %v10137_v26 = vld [vmem:[#allocation19 + $0xd0] ss:$8 sps:$4 sm:$0xff]  }
 0x64a   :  { %v7438_v27 = vpack.c.bf16 %v7345_v62, %v7341_v40 }
 0x64b   :  { %7759 = vmatmul.mubr.bf16.vlgmr.msra.gmra.mrb[0].mxu1 %v14562_v16  ;;  %7719 = vmatmul.mubr.bf16.vlgmr.msra.gmra.mrb[96].mxu0 %v14564_v51 }
 0x64c   :  { %7768 = vmatprep.mubr.bf16.mxu1 %v14566_v49  ;;  %7728 = vmatprep.mubr.bf16.mxu0 %v14568_v48 }
 0x64d   :  { %9474 = vmatpush3.bf16.msra.mxu1 %v7426_v25  ;;  %v10132_v25 = vld [vmem:[#allocation19 + $0xc4] ss:$8 sps:$4 sm:$0xff]  }
 0x64e   :  { %v7349_v50 = vpop.f32.mrb[76].mxu0  ;;  %9475 = vmatprep.subr.bf16.mxu1 %v7437_v55 }
 0x64f   :  { %v7351_v38 = vpop.f32.mrb[77].mxu0 }
 0x650   :  { %v7353_v61 = vpop.f32.mrb[78].mxu0 }
 0x651   :  { %v7429_v11 = vpack.c.bf16 %v7353_v61, %v7349_v50  ;;  %v7355_v57 = vpop.f32.mrb[79].mxu0  ;;  %9476 = vmatpush3.bf16.msra.mxu1 %v7427_v5 }
 0x652   :  { %v7439_v10 = vpack.c.bf16 %v7355_v57, %v7351_v38  ;;  %9477 = vmatprep.subr.bf16.mxu1 %v7438_v27 }
 0x653   :  { %7769 = vmatmul.mubr.bf16.gmra.mrb[4].mxu1 %v14574_v2  ;;  %7729 = vmatmul.mubr.bf16.gmra.mrb[100].mxu0 %v14576_v56 }
 0x654   :  { %7778 = vmatprep.mubr.bf16.mxu1 %v14578_v47  ;;  %7738 = vmatprep.mubr.bf16.mxu0 %v14580_v1 }
 0x655   :  { %9478 = vmatpush3.bf16.msra.mxu1 %v7428_v34 }
 0x656   :  { %v7359_v13 = vpop.f32.mrb[80].mxu0  ;;  %9479 = vmatprep.subr.bf16.mxu1 %v7439_v10 }
 0x657   :  { %v7361_v14 = vpop.f32.mrb[81].mxu0 }
 0x658   :  { %v7363_v30 = vpop.f32.mrb[82].mxu0 }
 0x659   :  { %v7430_v32 = vpack.c.bf16 %v7363_v30, %v7359_v13  ;;  %v7365_v20 = vpop.f32.mrb[83].mxu0  ;;  %9480 = vmatpush3.bf16.msra.mxu1 %v7429_v11 }
 0x65a   :  { %v7440_v15 = vpack.c.bf16 %v7365_v20, %v7361_v14 }
 0x65b   :  { %7779 = vmatmul.mubr.bf16.gmra.mrb[8].mxu1 %v14586_v63  ;;  %7739 = vmatmul.mubr.bf16.gmra.mrb[104].mxu0 %v14588_v59 }
 0x65c   :  { %7788 = vmatprep.mubr.bf16.mxu1 %v14590_v33  ;;  %7748 = vmatprep.mubr.bf16.mxu0 %v14592_v28 }
 0x65d   :  { %9481 = vmatprep.subr.bf16.mxu1 %v7440_v15 }
 0x65e   :  { %9482 = vmatpush3.bf16.msra.mxu1 %v7430_v32  ;;  %v7369_v44 = vpop.f32.mrb[84].mxu0 }
 0x65f   :  { %9483 = vmatprep.subr.bf16.mxu1 %v7519_v54  ;;  %v7370_v36 = vpop.f32.mrb[85].mxu0 }
 0x660   :  { %v7371_v5 = vpop.f32.mrb[86].mxu0 }
 0x661   :  { %v7372_v3 = vpop.f32.mrb[87].mxu0 }
 0x662   :  { %9484 = vmatpush3.bf16.msra.mxu1 %v7495_v22 }
 0x663   :  { %7789 = vmatmul.mubr.bf16.gmra.mrb[12].mxu1 %v14598_v52  ;;  %7749 = vmatmul.mubr.bf16.gmra.mrb[108].mxu0 %v14600_v42 }
 0x664   :  { %7798 = vmatprep.mubr.bf16.mxu1 %v14602_v17  ;;  %9485 = vmatprep.subr.bf16.mxu1 %v7522_v41 }
 0x665   :  { %8304 = vmatprep.mubr.bf16.mxu0 %v15705_v31 }
 0x666   :  { %9486 = vmatpush3.bf16.msra.mxu1 %v7498_v39  ;;  %v7375_v35 = vpop.f32.mrb[88].mxu0 }
 0x667   :  { %9487 = vmatprep.subr.bf16.mxu1 %v7525_v9  ;;  %v7376_v55 = vpop.f32.mrb[89].mxu0 }
 0x668   :  { %v7377_v0 = vpop.f32.mrb[90].mxu0 }
 0x669   :  { %v7378_v6 = vpop.f32.mrb[91].mxu0 }
 0x66a   :  { %9488 = vmatpush3.bf16.msra.mxu1 %v7501_v43 }
 0x66b   :  { %7799 = vmatmul.mubr.bf16.gmra.mrb[16].mxu1 %v10110_v45 }
 0x66c   :  { %7808 = vmatprep.mubr.bf16.mxu1 %v10114_v24 }
 0x66e   :  { %v7381_v40 = vpop.f32.mrb[92].mxu0 }
 0x66f   :  { %v7382_v53 = vpop.f32.mrb[93].mxu0 }
 0x670   :  { %v7383_v34 = vpop.f32.mrb[94].mxu0 }
 0x673   :  { %7809 = vmatmul.mubr.bf16.gmra.mrb[20].mxu1 %v10116_v19 }
 0x674   :  { %7818 = vmatprep.mubr.bf16.mxu1 %v10120_v12 }
 0x67b   :  { %7819 = vmatmul.mubr.bf16.gmra.mrb[24].mxu1 %v10122_v7 }
 0x67c   :  { %7828 = vmatprep.mubr.bf16.mxu1 %v10126_v58 }
 0x683   :  { %7829 = vmatmul.mubr.bf16.gmra.mrb[28].mxu1 %v10128_v29 }
 0x684   :  { %7838 = vmatprep.mubr.bf16.mxu1 %v10132_v25 }
 0x68b   :  { %7839 = vmatmul.mubr.bf16.gmra.mrb[32].mxu1 %v10134_v18 }
 0x68c   :  { %7848 = vmatprep.mubr.bf16.mxu1 %v10135_v21 }
 0x693   :  { %7849 = vmatmul.mubr.bf16.gmra.mrb[36].mxu1 %v10137_v26 }
 0x694   :  { %7858 = vmatprep.mubr.bf16.mxu1 %v10138_v37 }
 0x69b   :  { %7859 = vmatmul.mubr.bf16.gmra.mrb[40].mxu1 %v10140_v8 }
 0x69c   :  { %7868 = vmatprep.mubr.bf16.mxu1 %v10141_v46 }
 0x6a3   :  { %7869 = vmatmul.mubr.bf16.gmra.mrb[44].mxu1 %v14608_v4 }
 0x6a4   :  { %7911 = vmatprep.mubr.bf16.mxu1 %v14531_v23  ;;  %v7384_v23 = vpop.f32.mrb[95].mxu0 }
 0x6ab   :  { %7912 = vmatmul.mubr.bf16.vlgmr.msra.gmra.mrb[48].mxu1 %v14564_v51  ;;  %v14636_v51 = vld [vmem:[#allocation20 + $0x10] sm:$0xff]  }
 0x6ac   :  { %7919 = vmatprep.mubr.bf16.mxu1 %v14568_v48  ;;  %v14644_v48 = vld [vmem:[#allocation20 + $0x20] sm:$0xff]  }
 0x6b3   :  { %7920 = vmatmul.mubr.bf16.gmra.mrb[52].mxu1 %v14576_v56 }
 0x6b4   :  { %7927 = vmatprep.mubr.bf16.mxu1 %v14580_v1 }
 0x6bb   :  { %7928 = vmatmul.mubr.bf16.gmra.mrb[56].mxu1 %v14588_v59 }
 0x6bc   :  { %7935 = vmatprep.mubr.bf16.mxu1 %v14592_v28 }
 0x6c3   :  { %7936 = vmatmul.mubr.bf16.gmra.mrb[60].mxu1 %v14600_v42 }
 0x6c4   :  { %7943 = vmatprep.mubr.bf16.mxu1 %v14516_v60  ;;  %v14628_v60 = vld [vmem:[#allocation20] sm:$0xff]  }
 0x6c5   :  { %9665 = vmatprep.subr.bf16.mxu1 %v14628_v60 }
 0x6c6   :  { %9666 = vmatpush3.bf16.msra.mxu1 %v14628_v60 }
 0x6cb   :  { %7944 = vmatmul.mubr.bf16.gmra.mrb[64].mxu1 %v14562_v16  ;;  %v14632_v16 = vld [vmem:[#allocation20 + $0x8] sm:$0xff]  }
 0x6cc   :  { %7951 = vmatprep.mubr.bf16.mxu1 %v14566_v49  ;;  %9667 = vmatprep.subr.bf16.mxu1 %v14632_v16  ;;  %v14640_v49 = vld [vmem:[#allocation20 + $0x18] sm:$0xff]  }
 0x6cd   :  { %9668 = vmatpush3.bf16.msra.mxu1 %v14632_v16 }
 0x6ce   :  { %9669 = vmatprep.subr.bf16.mxu1 %v14636_v51 }
 0x6d1   :  { %9670 = vmatpush3.bf16.msra.mxu1 %v14636_v51 }
 0x6d2   :  { %9671 = vmatprep.subr.bf16.mxu1 %v14640_v49 }
 0x6d3   :  { %7952 = vmatmul.mubr.bf16.gmra.mrb[68].mxu1 %v14574_v2 }
 0x6d4   :  { %7959 = vmatprep.mubr.bf16.mxu1 %v14578_v47 }
 0x6d5   :  { %9672 = vmatpush3.bf16.msra.mxu1 %v14640_v49 }
 0x6d6   :  { %9673 = vmatprep.subr.bf16.mxu1 %v14644_v48 }
 0x6d9   :  { %9674 = vmatpush3.bf16.msra.mxu1 %v14644_v48 }
 0x6db   :  { %7960 = vmatmul.mubr.bf16.gmra.mrb[72].mxu1 %v14586_v63 }
 0x6dc   :  { %7967 = vmatprep.mubr.bf16.mxu1 %v14590_v33 }
 0x6e3   :  { %7968 = vmatmul.mubr.bf16.gmra.mrb[76].mxu1 %v14598_v52 }
 0x6e4   :  { %7975 = vmatprep.mubr.bf16.mxu1 %v14602_v17 }
 0x6eb   :  { %7976 = vmatmul.mubr.bf16.gmra.mrb[80].mxu1 %v10110_v45 }
 0x6ec   :  { %7983 = vmatprep.mubr.bf16.mxu1 %v10114_v24 }
 0x6f3   :  { %7984 = vmatmul.mubr.bf16.gmra.mrb[84].mxu1 %v10116_v19 }
 0x6f4   :  { %7991 = vmatprep.mubr.bf16.mxu1 %v10120_v12 }
 0x6fb   :  { %7992 = vmatmul.mubr.bf16.gmra.mrb[88].mxu1 %v10122_v7 }
 0x6fc   :  { %7999 = vmatprep.mubr.bf16.mxu1 %v10126_v58 }
 0x703   :  { %8000 = vmatmul.mubr.bf16.gmra.mrb[92].mxu1 %v10128_v29 }
 0x704   :  { %8007 = vmatprep.mubr.bf16.mxu1 %v10132_v25 }
 0x70b   :  { %8008 = vmatmul.mubr.bf16.gmra.mrb[96].mxu1 %v10134_v18 }
 0x70c   :  { %8015 = vmatprep.mubr.bf16.mxu1 %v10135_v21 }
 0x713   :  { %8016 = vmatmul.mubr.bf16.gmra.mrb[100].mxu1 %v10137_v26 }
 0x714   :  { %8023 = vmatprep.mubr.bf16.mxu1 %v10138_v37 }
 0x71b   :  { %8024 = vmatmul.mubr.bf16.gmra.mrb[104].mxu1 %v10140_v8 }
 0x71c   :  { %8031 = vmatprep.mubr.bf16.mxu1 %v10141_v46 }
 0x71e   :  { %v14646_v62 = vpop.f32.mrb[0].mxu1  ;;  %v7720_v27 = vpop.f32.mrb[96].mxu0 }
 0x71f   :  { %v14648_v50 = vpop.f32.mrb[1].mxu1  ;;  %v7722_v2 = vpop.f32.mrb[97].mxu0  ;;  %v8040_v24 = vmul.f32 %v7720_v27, %v7720_v27 }
 0x720   :  { %v14651_v56 = vpop.f32.mrb[2].mxu1  ;;  %v7724_v38 = vpop.f32.mrb[98].mxu0  ;;  %v8041_v12 = vmul.f32 %v7722_v2, %v7722_v2 }
 0x721   :  { %v14654_v47 = vpop.f32.mrb[3].mxu1  ;;  %v7726_v1 = vpop.f32.mrb[99].mxu0  ;;  %v8043_v29 = vmul.f32 %v7724_v38, %v7724_v38 }
 0x722   :  { %v8044_v21 = vmul.f32 %v7726_v1, %v7726_v1 }
 0x723   :  { %8032 = vmatmul.mubr.bf16.gmra.mrb[108].mxu1 %v14608_v4 }
 0x726   :  { %v14657_v61 = vpop.f32.mrb[4].mxu1  ;;  %v7730_v11 = vpop.f32.mrb[100].mxu0 }
 0x727   :  { %v14659_v57 = vpop.f32.mrb[5].mxu1  ;;  %v7732_v10 = vpop.f32.mrb[101].mxu0  ;;  %v8046_v3 = vmul.f32 %v7730_v11, %v7730_v11 }
 0x728   :  { %v14661_v13 = vpop.f32.mrb[6].mxu1  ;;  %v7734_v63 = vpop.f32.mrb[102].mxu0  ;;  %v8047_v55 = vmul.f32 %v7732_v10, %v7732_v10 }
 0x729   :  { %v14663_v59 = vpop.f32.mrb[7].mxu1  ;;  %v7736_v14 = vpop.f32.mrb[103].mxu0  ;;  %v8049_v53 = vmul.f32 %v7734_v63, %v7734_v63 }
 0x72a   :  { %v8050_v27 = vmul.f32 %v7736_v14, %v7736_v14 }
 0x72e   :  { %v14665_v33 = vpop.f32.mrb[8].mxu1  ;;  %v7740_v28 = vpop.f32.mrb[104].mxu0 }
 0x72f   :  { %v14667_v30 = vpop.f32.mrb[9].mxu1  ;;  %v7742_v32 = vpop.f32.mrb[105].mxu0  ;;  %v8052_v11 = vmul.f32 %v7740_v28, %v7740_v28 }
 0x730   :  { %v14669_v20 = vpop.f32.mrb[10].mxu1  ;;  %v7744_v15 = vpop.f32.mrb[106].mxu0  ;;  %v8053_v10 = vmul.f32 %v7742_v32, %v7742_v32 }
 0x731   :  { %v14671_v54 = vpop.f32.mrb[11].mxu1  ;;  %v7746_v52 = vpop.f32.mrb[107].mxu0  ;;  %v8055_v63 = vmul.f32 %v7744_v15, %v7744_v15 }
 0x732   :  { %v8056_v14 = vmul.f32 %v7746_v52, %v7746_v52 }
 0x736   :  { %v14673_v42 = vpop.f32.mrb[12].mxu1  ;;  %v14675_v22 = vpop.f32.mrb[108].mxu0 }
 0x737   :  { %v14677_v17 = vpop.f32.mrb[13].mxu1  ;;  %v14679_v41 = vpop.f32.mrb[109].mxu0  ;;  %v8058_v28 = vmul.f32 %v14675_v22, %v14675_v22 }
 0x738   :  { %v14681_v39 = vpop.f32.mrb[14].mxu1  ;;  %v14683_v9 = vpop.f32.mrb[110].mxu0  ;;  %v8059_v15 = vmul.f32 %v14679_v41, %v14679_v41 }
 0x739   :  { %v14685_v45 = vpop.f32.mrb[15].mxu1  ;;  %v14687_v43 = vpop.f32.mrb[111].mxu0 }
 0x73e   :  { %v7800_v19 = vpop.f32.mrb[16].mxu1 }
 0x73f   :  { %v8088_v7 = vmul.f32 %v7800_v19, %v7800_v19  ;;  %v7802_v58 = vpop.f32.mrb[17].mxu1 }
 0x740   :  { %v8089_v25 = vmul.f32 %v7802_v58, %v7802_v58  ;;  %v7804_v18 = vpop.f32.mrb[18].mxu1 }
 0x741   :  { %v8136_v26 = vadd.f32 %v8088_v7, %v8040_v24  ;;  %v8091_v37 = vmul.f32 %v7804_v18, %v7804_v18  ;;  %v7806_v8 = vpop.f32.mrb[19].mxu1 }
 0x742   :  { %v8137_v46 = vadd.f32 %v8089_v25, %v8041_v12  ;;  %v8092_v4 = vmul.f32 %v7806_v8, %v7806_v8 }
 0x743   :  { %v8139_v44 = vadd.f32 %v8091_v37, %v8043_v29 }
 0x744   :  { %v8140_v36 = vadd.f32 %v8092_v4, %v8044_v21 }
 0x745   :  { %v8200_v5 = vpack.c.bf16 %v8139_v44, %v8136_v26 }
 0x746   :  { %v7810_v35 = vpop.f32.mrb[20].mxu1  ;;  %v8201_v0 = vpack.c.bf16 %v8140_v36, %v8137_v46 }
 0x747   :  { %v8094_v6 = vmul.f32 %v7810_v35, %v7810_v35  ;;  %v7812_v40 = vpop.f32.mrb[21].mxu1 }
 0x748   :  { %v8095_v34 = vmul.f32 %v7812_v40, %v7812_v40  ;;  %v7814_v23 = vpop.f32.mrb[22].mxu1  ;;  %8272 = vmatprep.subr.bf16.mxu0 %v8201_v0 }
 0x749   :  { %v8142_v2 = vadd.f32 %v8094_v6, %v8046_v3  ;;  %v8097_v38 = vmul.f32 %v7814_v23, %v7814_v23  ;;  %v7816_v1 = vpop.f32.mrb[23].mxu1  ;;  %8273 = vmatpush1.bf16.msra.mxu0 %v8200_v5  ;;  %v8061_v6 = vmul.f32 %v14683_v9, %v14683_v9  ;;  %v8064_v9 = vmul.f32 %v14646_v62, %v14646_v62 }
 0x74a   :  { %v8143_v24 = vadd.f32 %v8095_v34, %v8047_v55  ;;  %v8098_v19 = vmul.f32 %v7816_v1, %v7816_v1  ;;  %v8062_v34 = vmul.f32 %v14687_v43, %v14687_v43  ;;  %v8065_v43 = vmul.f32 %v14648_v50, %v14648_v50 }
 0x74b   :  { %v8145_v12 = vadd.f32 %v8097_v38, %v8049_v53 }
 0x74c   :  { %v8146_v7 = vadd.f32 %v8098_v19, %v8050_v27 }
 0x74d   :  { %v8203_v58 = vpack.c.bf16 %v8145_v12, %v8142_v2 }
 0x74e   :  { %v7820_v29 = vpop.f32.mrb[24].mxu1  ;;  %v8204_v25 = vpack.c.bf16 %v8146_v7, %v8143_v24 }
 0x74f   :  { %v8100_v18 = vmul.f32 %v7820_v29, %v7820_v29  ;;  %v7822_v21 = vpop.f32.mrb[25].mxu1 }
 0x750   :  { %v8101_v26 = vmul.f32 %v7822_v21, %v7822_v21  ;;  %v7824_v37 = vpop.f32.mrb[26].mxu1  ;;  %8274 = vmatprep.subr.bf16.mxu0 %v8204_v25 }
 0x751   :  { %v8148_v8 = vadd.f32 %v8100_v18, %v8052_v11  ;;  %v8103_v46 = vmul.f32 %v7824_v37, %v7824_v37  ;;  %v7826_v4 = vpop.f32.mrb[27].mxu1  ;;  %8275 = vmatpush1.bf16.msra.mxu0 %v8203_v58 }
 0x752   :  { %v8149_v44 = vadd.f32 %v8101_v26, %v8053_v10  ;;  %v8104_v36 = vmul.f32 %v7826_v4, %v7826_v4  ;;  %v8067_v10 = vmul.f32 %v14651_v56, %v14651_v56  ;;  %v8070_v4 = vmul.f32 %v14657_v61, %v14657_v61 }
 0x753   :  { %v8151_v5 = vadd.f32 %v8103_v46, %v8055_v63  ;;  %v8068_v63 = vmul.f32 %v14654_v47, %v14654_v47  ;;  %v8071_v56 = vmul.f32 %v14659_v57, %v14659_v57  ;;  %v8073_v47 = vmul.f32 %v14661_v13, %v14661_v13 }
 0x754   :  { %v8152_v3 = vadd.f32 %v8104_v36, %v8056_v14  ;;  %v8077_v13 = vmul.f32 %v14667_v30, %v14667_v30 }
 0x755   :  { %v8206_v35 = vpack.c.bf16 %v8151_v5, %v8148_v8 }
 0x756   :  { %v7830_v32 = vpop.f32.mrb[28].mxu1  ;;  %v8207_v55 = vpack.c.bf16 %v8152_v3, %v8149_v44 }
 0x757   :  { %v8106_v0 = vmul.f32 %v7830_v32, %v7830_v32  ;;  %v7832_v52 = vpop.f32.mrb[29].mxu1 }
 0x758   :  { %v8107_v40 = vmul.f32 %v7832_v52, %v7832_v52  ;;  %v7834_v53 = vpop.f32.mrb[30].mxu1  ;;  %8276 = vmatprep.subr.bf16.mxu0 %v8207_v55 }
 0x759   :  { %v8154_v23 = vadd.f32 %v8106_v0, %v8058_v28  ;;  %v8109_v27 = vmul.f32 %v7834_v53, %v7834_v53  ;;  %v7836_v2 = vpop.f32.mrb[31].mxu1  ;;  %8277 = vmatpush1.bf16.msra.mxu0 %v8206_v35  ;;  %v8076_v53 = vmul.f32 %v14665_v33, %v14665_v33 }
 0x75a   :  { %v8155_v22 = vadd.f32 %v8107_v40, %v8059_v15  ;;  %v8110_v38 = vmul.f32 %v7836_v2, %v7836_v2  ;;  %v8074_v15 = vmul.f32 %v14663_v59, %v14663_v59  ;;  %v8079_v59 = vmul.f32 %v14669_v20, %v14669_v20 }
 0x75b   :  { %v8157_v1 = vadd.f32 %v8109_v27, %v8061_v6 }
 0x75c   :  { %v8158_v41 = vadd.f32 %v8110_v38, %v8062_v34 }
 0x75d   :  { %v8209_v24 = vpack.c.bf16 %v8157_v1, %v8154_v23 }
 0x75e   :  { %v7840_v19 = vpop.f32.mrb[32].mxu1  ;;  %v8210_v12 = vpack.c.bf16 %v8158_v41, %v8155_v22  ;;  %v8080_v41 = vmul.f32 %v14671_v54, %v14671_v54  ;;  %v8085_v54 = vmul.f32 %v14681_v39, %v14681_v39 }
 0x75f   :  { %v8112_v7 = vmul.f32 %v7840_v19, %v7840_v19  ;;  %v7842_v58 = vpop.f32.mrb[33].mxu1 }
 0x760   :  { %v8113_v11 = vmul.f32 %v7842_v58, %v7842_v58  ;;  %v7844_v29 = vpop.f32.mrb[34].mxu1  ;;  %8278 = vmatprep.subr.bf16.mxu0 %v8210_v12  ;;  %v14721_v58 = vld [vmem:[#allocation20 + $0x28] sm:$0xff]  }
 0x761   :  { %v8160_v25 = vadd.f32 %v8112_v7, %v8064_v9  ;;  %v8115_v18 = vmul.f32 %v7844_v29, %v7844_v29  ;;  %v7846_v21 = vpop.f32.mrb[35].mxu1  ;;  %8279 = vmatpush1.bf16.msra.mxu0 %v8209_v24  ;;  %v8083_v29 = vmul.f32 %v14677_v17, %v14677_v17  ;;  %9675 = vmatprep.subr.bf16.mxu1 %v14721_v58 }
 0x762   :  { %v8161_v26 = vadd.f32 %v8113_v11, %v8065_v43  ;;  %v8116_v62 = vmul.f32 %v7846_v21, %v7846_v21  ;;  %v8082_v43 = vmul.f32 %v14673_v42, %v14673_v42  ;;  %9676 = vmatpush3.bf16.msra.mxu1 %v14721_v58  ;;  %v8086_v42 = vmul.f32 %v14685_v45, %v14685_v45 }
 0x763   :  { %v8163_v37 = vadd.f32 %v8115_v18, %v8067_v10 }
 0x764   :  { %v8164_v14 = vadd.f32 %v8116_v62, %v8068_v63 }
 0x765   :  { %v8212_v8 = vpack.c.bf16 %v8163_v37, %v8160_v25 }
 0x766   :  { %v7850_v46 = vpop.f32.mrb[36].mxu1  ;;  %v8213_v50 = vpack.c.bf16 %v8164_v14, %v8161_v26 }
 0x767   :  { %v8118_v44 = vmul.f32 %v7850_v46, %v7850_v46  ;;  %v7852_v36 = vpop.f32.mrb[37].mxu1 }
 0x768   :  { %v8119_v5 = vmul.f32 %v7852_v36, %v7852_v36  ;;  %v7854_v3 = vpop.f32.mrb[38].mxu1  ;;  %8280 = vmatprep.subr.bf16.mxu0 %v8213_v50  ;;  %v14733_v50 = vld [vmem:[#allocation20 + $0x30] sm:$0xff]  }
 0x769   :  { %v8166_v35 = vadd.f32 %v8118_v44, %v8070_v4  ;;  %v8121_v28 = vmul.f32 %v7854_v3, %v7854_v3  ;;  %v7856_v32 = vpop.f32.mrb[39].mxu1  ;;  %8281 = vmatpush1.bf16.msra.mxu0 %v8212_v8  ;;  %9677 = vmatprep.subr.bf16.mxu1 %v14733_v50 }
 0x76a   :  { %v8167_v55 = vadd.f32 %v8119_v5, %v8071_v56  ;;  %v8122_v61 = vmul.f32 %v7856_v32, %v7856_v32  ;;  %9678 = vmatpush3.bf16.msra.mxu1 %v14733_v50  ;;  %v14741_v56 = vld [vmem:[#allocation20 + $0x38] sm:$0xff]  }
 0x76b   :  { %v8169_v0 = vadd.f32 %v8121_v28, %v8073_v47  ;;  %9679 = vmatprep.subr.bf16.mxu1 %v14741_v56 }
 0x76c   :  { %v8170_v52 = vadd.f32 %v8122_v61, %v8074_v15 }
 0x76d   :  { %v8215_v6 = vpack.c.bf16 %v8169_v0, %v8166_v35 }
 0x76e   :  { %v7860_v40 = vpop.f32.mrb[40].mxu1  ;;  %v8216_v57 = vpack.c.bf16 %v8170_v52, %v8167_v55  ;;  %9680 = vmatpush3.bf16.msra.mxu1 %v14741_v56 }
 0x76f   :  { %v8124_v34 = vmul.f32 %v7860_v40, %v7860_v40  ;;  %v7862_v23 = vpop.f32.mrb[41].mxu1 }
 0x770   :  { %v8125_v27 = vmul.f32 %v7862_v23, %v7862_v23  ;;  %v7864_v2 = vpop.f32.mrb[42].mxu1  ;;  %8282 = vmatprep.subr.bf16.mxu0 %v8216_v57 }
 0x771   :  { %v8172_v22 = vadd.f32 %v8124_v34, %v8076_v53  ;;  %v8127_v38 = vmul.f32 %v7864_v2, %v7864_v2  ;;  %v7866_v1 = vpop.f32.mrb[43].mxu1  ;;  %8283 = vmatpush1.bf16.msra.mxu0 %v8215_v6 }
 0x772   :  { %v8173_v24 = vadd.f32 %v8125_v27, %v8077_v13  ;;  %v8128_v33 = vmul.f32 %v7866_v1, %v7866_v1 }
 0x773   :  { %v8175_v19 = vadd.f32 %v8127_v38, %v8079_v59 }
 0x774   :  { %v8176_v12 = vadd.f32 %v8128_v33, %v8080_v41 }
 0x775   :  { %v8218_v9 = vpack.c.bf16 %v8175_v19, %v8172_v22 }
 0x776   :  { %v7870_v7 = vpop.f32.mrb[44].mxu1  ;;  %v8219_v30 = vpack.c.bf16 %v8176_v12, %v8173_v24 }
 0x777   :  { %v8130_v20 = vmul.f32 %v7870_v7, %v7870_v7  ;;  %v7872_v11 = vpop.f32.mrb[45].mxu1 }
 0x778   :  { %v8131_v10 = vmul.f32 %v7872_v11, %v7872_v11  ;;  %v7874_v25 = vpop.f32.mrb[46].mxu1  ;;  %8284 = vmatprep.subr.bf16.mxu0 %v8219_v30 }
 0x779   :  { %v8178_v18 = vadd.f32 %v8130_v20, %v8082_v43  ;;  %v8133_v21 = vmul.f32 %v7874_v25, %v7874_v25  ;;  %v7876_v63 = vpop.f32.mrb[47].mxu1  ;;  %8285 = vmatpush1.bf16.msra.mxu0 %v8218_v9 }
 0x77a   :  { %v8179_v26 = vadd.f32 %v8131_v10, %v8083_v29  ;;  %v8134_v62 = vmul.f32 %v7876_v63, %v7876_v63 }
 0x77b   :  { %v8181_v17 = vadd.f32 %v8133_v21, %v8085_v54 }
 0x77c   :  { %v8182_v37 = vadd.f32 %v8134_v62, %v8086_v42 }
 0x77d   :  { %v8221_v14 = vpack.c.bf16 %v8181_v17, %v8178_v18 }
 0x77e   :  { %v8222_v8 = vpack.c.bf16 %v8182_v37, %v8179_v26  ;;  %v9489_v46 = vpop.f32.mrb[48].mxu1 }
 0x77f   :  { %v9490_v4 = vpop.f32.mrb[49].mxu1 }
 0x780   :  { %8286 = vmatprep.subr.bf16.mxu0 %v8222_v8  ;;  %v14735_v39 = vadd.f32 %v9490_v4, %v9489_v46  ;;  %v9492_v44 = vpop.f32.mrb[50].mxu1 }
 0x781   :  { %8287 = vmatpush1.bf16.msra.mxu0 %v8221_v14  ;;  %v9493_v36 = vpop.f32.mrb[51].mxu1 }
 0x782   :  { %v14739_v45 = vadd.f32 %v9493_v36, %v9492_v44 }
 0x784   :  { %8305 = vmatmul.mubr.bf16.vlgmr.msra.gmra.mrb[112].mxu0 %v14628_v60  ;;  %v8045_v46 = vmul.f32 %v14739_v45, %v14739_v45 }
 0x785   :  { %8314 = vmatprep.mubr.bf16.mxu0 %v15705_v31 }
 0x786   :  { %v9495_v5 = vpop.f32.mrb[52].mxu1 }
 0x787   :  { %v9496_v3 = vpop.f32.mrb[53].mxu1 }
 0x788   :  { %v14747_v47 = vadd.f32 %v9496_v3, %v9495_v5  ;;  %v9498_v35 = vpop.f32.mrb[54].mxu1 }
 0x789   :  { %v9499_v28 = vpop.f32.mrb[55].mxu1 }
 0x78a   :  { %v14749_v32 = vadd.f32 %v9499_v28, %v9498_v35 }
 0x78c   :  { %8315 = vmatmul.mubr.bf16.gmra.mrb[116].mxu0 %v14632_v16 }
 0x78d   :  { %8324 = vmatprep.mubr.bf16.mxu0 %v15705_v31 }
 0x78e   :  { %v9501_v15 = vpop.f32.mrb[56].mxu1 }
 0x78f   :  { %v9502_v55 = vpop.f32.mrb[57].mxu1 }
 0x790   :  { %v14753_v61 = vadd.f32 %v9502_v55, %v9501_v15  ;;  %v9504_v0 = vpop.f32.mrb[58].mxu1  ;;  %v8048_v55 = vmul.f32 %v14747_v47, %v14747_v47 }
 0x791   :  { %v9505_v52 = vpop.f32.mrb[59].mxu1 }
 0x792   :  { %v14755_v6 = vadd.f32 %v9505_v52, %v9504_v0 }
 0x794   :  { %8325 = vmatmul.mubr.bf16.gmra.mrb[120].mxu0 %v14636_v51 }
 0x795   :  { %8334 = vmatprep.mubr.bf16.mxu0 %v15705_v31 }
 0x796   :  { %v9507_v40 = vpop.f32.mrb[60].mxu1 }
 0x797   :  { %v9508_v57 = vpop.f32.mrb[61].mxu1 }
 0x798   :  { %v14759_v53 = vadd.f32 %v9508_v57, %v9507_v40  ;;  %v9510_v34 = vpop.f32.mrb[62].mxu1 }
 0x799   :  { %v9511_v23 = vpop.f32.mrb[63].mxu1 }
 0x79a   :  { %v14761_v13 = vadd.f32 %v9511_v23, %v9510_v34 }
 0x79c   :  { %8335 = vmatmul.mubr.bf16.gmra.mrb[124].mxu0 %v14640_v49 }
 0x79d   :  { %8344 = vmatprep.mubr.bf16.mxu0 %v15705_v31 }
 0x79e   :  { %v9513_v27 = vpop.f32.mrb[64].mxu1 }
 0x79f   :  { %v9514_v2 = vpop.f32.mrb[65].mxu1 }
 0x7a0   :  { %v14765_v59 = vadd.f32 %v9514_v2, %v9513_v27  ;;  %v9516_v22 = vpop.f32.mrb[66].mxu1 }
 0x7a1   :  { %v9517_v38 = vpop.f32.mrb[67].mxu1 }
 0x7a2   :  { %v14767_v1 = vadd.f32 %v9517_v38, %v9516_v22 }
 0x7a4   :  { %8345 = vmatmul.mubr.bf16.gmra.mrb[128].mxu0 %v14644_v48 }
 0x7a5   :  { %8354 = vmatprep.mubr.bf16.mxu0 %v15705_v31 }
 0x7a6   :  { %v9519_v41 = vpop.f32.mrb[68].mxu1 }
 0x7a7   :  { %v9520_v24 = vpop.f32.mrb[69].mxu1 }
 0x7a8   :  { %v14771_v33 = vadd.f32 %v9520_v24, %v9519_v41  ;;  %v9522_v19 = vpop.f32.mrb[70].mxu1  ;;  %v8054_v41 = vmul.f32 %v14753_v61, %v14753_v61 }
 0x7a9   :  { %v9523_v12 = vpop.f32.mrb[71].mxu1 }
 0x7aa   :  { %v14773_v9 = vadd.f32 %v9523_v12, %v9522_v19  ;;  %v8057_v19 = vmul.f32 %v14755_v6, %v14755_v6 }
 0x7ac   :  { %8355 = vmatmul.mubr.bf16.gmra.mrb[132].mxu0 %v14721_v58 }
 0x7ad   :  { %8360 = vmatprep.mubr.bf16.mxu0 %v15705_v31 }
 0x7ae   :  { %v9525_v7 = vpop.f32.mrb[72].mxu1 }
 0x7af   :  { %v9526_v30 = vpop.f32.mrb[73].mxu1 }
 0x7b0   :  { %v14777_v43 = vadd.f32 %v9526_v30, %v9525_v7  ;;  %v9528_v20 = vpop.f32.mrb[74].mxu1 }
 0x7b1   :  { %v9529_v11 = vpop.f32.mrb[75].mxu1 }
 0x7b2   :  { %v14779_v29 = vadd.f32 %v9529_v11, %v9528_v20 }
 0x7b4   :  { %8361 = vmatmul.mubr.bf16.gmra.mrb[136].mxu0 %v14733_v50 }
 0x7b5   :  { %8366 = vmatprep.mubr.bf16.mxu0 %v15705_v31  ;;  %v8042_v31 = vmul.f32 %v14735_v39, %v14735_v39  ;;  %v8051_v39 = vmul.f32 %v14749_v32, %v14749_v32 }
 0x7b6   :  { %v9531_v10 = vpop.f32.mrb[76].mxu1 }
 0x7b7   :  { %v9532_v25 = vpop.f32.mrb[77].mxu1 }
 0x7b8   :  { %v14783_v54 = vadd.f32 %v9532_v25, %v9531_v10  ;;  %v9534_v18 = vpop.f32.mrb[78].mxu1 }
 0x7b9   :  { %v9535_v21 = vpop.f32.mrb[79].mxu1 }
 0x7ba   :  { %v14785_v63 = vadd.f32 %v9535_v21, %v9534_v18  ;;  %v8060_v21 = vmul.f32 %v14759_v53, %v14759_v53 }
 0x7bc   :  { %8367 = vmatmul.mubr.bf16.gmra.mrb[140].mxu0 %v14741_v56 }
 0x7bd   :  { %9649 = vmatprep.mubr.bf16.mxu0 %v14628_v60 }
 0x7be   :  { %v9537_v42 = vpop.f32.mrb[80].mxu1 }
 0x7bf   :  { %v9538_v26 = vpop.f32.mrb[81].mxu1 }
 0x7c0   :  { %v9539_v62 = vadd.f32 %v9538_v26, %v9537_v42  ;;  %v9540_v17 = vpop.f32.mrb[82].mxu1  ;;  %v8063_v26 = vmul.f32 %v14761_v13, %v14761_v13 }
 0x7c1   :  { %v9541_v37 = vpop.f32.mrb[83].mxu1 }
 0x7c2   :  { %v8090_v14 = vmul.f32 %v9539_v62, %v9539_v62  ;;  %v9542_v8 = vadd.f32 %v9541_v37, %v9540_v17 }
 0x7c4   :  { %v8138_v4 = vadd.f32 %v8090_v14, %v8042_v31  ;;  %v8093_v44 = vmul.f32 %v9542_v8, %v9542_v8 }
 0x7c6   :  { %v8141_v36 = vadd.f32 %v8093_v44, %v8045_v46  ;;  %v9543_v5 = vpop.f32.mrb[84].mxu1  ;;  %v8066_v44 = vmul.f32 %v14765_v59, %v14765_v59 }
 0x7c7   :  { %v9544_v3 = vpop.f32.mrb[85].mxu1 }
 0x7c8   :  { %v9545_v35 = vadd.f32 %v9544_v3, %v9543_v5  ;;  %v9546_v60 = vpop.f32.mrb[86].mxu1  ;;  %v8202_v28 = vpack.c.bf16 %v8141_v36, %v8138_v4  ;;  %v8069_v5 = vmul.f32 %v14767_v1, %v14767_v1 }
 0x7c9   :  { %v9547_v15 = vpop.f32.mrb[87].mxu1 }
 0x7ca   :  { %v8096_v0 = vmul.f32 %v9545_v35, %v9545_v35  ;;  %v9548_v52 = vadd.f32 %v9547_v15, %v9546_v60  ;;  %9633 = vmatprep.subr.bf16.mxu0 %v8202_v28 }
 0x7cb   :  { %9634 = vmatpush3.bf16.msra.mxu0 %v8202_v28 }
 0x7cc   :  { %v8144_v45 = vadd.f32 %v8096_v0, %v8048_v55  ;;  %v8099_v40 = vmul.f32 %v9548_v52, %v9548_v52 }
 0x7ce   :  { %v8147_v57 = vadd.f32 %v8099_v40, %v8051_v39  ;;  %v9549_v34 = vpop.f32.mrb[88].mxu1  ;;  %v8072_v39 = vmul.f32 %v14771_v33, %v14771_v33  ;;  %v8075_v40 = vmul.f32 %v14773_v9, %v14773_v9 }
 0x7cf   :  { %v9550_v23 = vpop.f32.mrb[89].mxu1 }
 0x7d0   :  { %v9551_v27 = vadd.f32 %v9550_v23, %v9549_v34  ;;  %v9552_v2 = vpop.f32.mrb[90].mxu1  ;;  %v8205_v22 = vpack.c.bf16 %v8147_v57, %v8144_v45 }
 0x7d1   :  { %v9553_v38 = vpop.f32.mrb[91].mxu1 }
 0x7d2   :  { %v8102_v47 = vmul.f32 %v9551_v27, %v9551_v27  ;;  %v9554_v24 = vadd.f32 %v9553_v38, %v9552_v2  ;;  %9635 = vmatprep.subr.bf16.mxu0 %v8205_v22 }
 0x7d3   :  { %9636 = vmatpush3.bf16.msra.mxu0 %v8205_v22 }
 0x7d4   :  { %v8150_v32 = vadd.f32 %v8102_v47, %v8054_v41  ;;  %v8105_v12 = vmul.f32 %v9554_v24, %v9554_v24  ;;  %v8078_v47 = vmul.f32 %v14777_v43, %v14777_v43 }
 0x7d6   :  { %v8153_v7 = vadd.f32 %v8105_v12, %v8057_v19  ;;  %v9555_v30 = vpop.f32.mrb[92].mxu1  ;;  %v8081_v19 = vmul.f32 %v14779_v29, %v14779_v29 }
 0x7d7   :  { %v9556_v20 = vpop.f32.mrb[93].mxu1 }
 0x7d8   :  { %v9557_v11 = vadd.f32 %v9556_v20, %v9555_v30  ;;  %v9558_v10 = vpop.f32.mrb[94].mxu1  ;;  %v8208_v25 = vpack.c.bf16 %v8153_v7, %v8150_v32 }
 0x7d9   :  { %v9559_v18 = vpop.f32.mrb[95].mxu1 }
 0x7da   :  { %v8108_v61 = vmul.f32 %v9557_v11, %v9557_v11  ;;  %v9560_v42 = vadd.f32 %v9559_v18, %v9558_v10  ;;  %9637 = vmatprep.subr.bf16.mxu0 %v8208_v25  ;;  %v8084_v18 = vmul.f32 %v14783_v54, %v14783_v54 }
 0x7db   :  { %9638 = vmatpush3.bf16.msra.mxu0 %v8208_v25 }
 0x7dc   :  { %v8156_v6 = vadd.f32 %v8108_v61, %v8060_v21  ;;  %v8111_v62 = vmul.f32 %v9560_v42, %v9560_v42  ;;  %v8087_v61 = vmul.f32 %v14785_v63, %v14785_v63 }
 0x7de   :  { %v8159_v17 = vadd.f32 %v8111_v62, %v8063_v26  ;;  %v9561_v37 = vpop.f32.mrb[96].mxu1 }
 0x7df   :  { %v9562_v31 = vpop.f32.mrb[97].mxu1 }
 0x7e0   :  { %v9563_v14 = vadd.f32 %v9562_v31, %v9561_v37  ;;  %v9564_v8 = vpop.f32.mrb[98].mxu1  ;;  %v8211_v46 = vpack.c.bf16 %v8159_v17, %v8156_v6 }
 0x7e1   :  { %v9565_v4 = vpop.f32.mrb[99].mxu1 }
 0x7e2   :  { %v8114_v53 = vmul.f32 %v9563_v14, %v9563_v14  ;;  %v9566_v36 = vadd.f32 %v9565_v4, %v9564_v8  ;;  %9639 = vmatprep.subr.bf16.mxu0 %v8211_v46 }
 0x7e3   :  { %9640 = vmatpush3.bf16.msra.mxu0 %v8211_v46 }
 0x7e4   :  { %v8162_v13 = vadd.f32 %v8114_v53, %v8066_v44  ;;  %v8117_v3 = vmul.f32 %v9566_v36, %v9566_v36 }
 0x7e6   :  { %v8165_v35 = vadd.f32 %v8117_v3, %v8069_v5  ;;  %v9567_v60 = vpop.f32.mrb[100].mxu1 }
 0x7e7   :  { %v9568_v28 = vpop.f32.mrb[101].mxu1 }
 0x7e8   :  { %v9569_v15 = vadd.f32 %v9568_v28, %v9567_v60  ;;  %v9570_v55 = vpop.f32.mrb[102].mxu1  ;;  %v8214_v0 = vpack.c.bf16 %v8165_v35, %v8162_v13 }
 0x7e9   :  { %v9571_v52 = vpop.f32.mrb[103].mxu1 }
 0x7ea   :  { %v8120_v59 = vmul.f32 %v9569_v15, %v9569_v15  ;;  %v9572_v45 = vadd.f32 %v9571_v52, %v9570_v55  ;;  %9641 = vmatprep.subr.bf16.mxu0 %v8214_v0 }
 0x7eb   :  { %9642 = vmatpush3.bf16.msra.mxu0 %v8214_v0  ;;  %v8499_v0 = vld [vmem:[#allocation4 + $0x28] sm:$0xff] }
 0x7ec   :  { %v8168_v1 = vadd.f32 %v8120_v59, %v8072_v39  ;;  %v8123_v57 = vmul.f32 %v9572_v45, %v9572_v45  ;;  %v8500_v39 = vld [vmem:[#allocation4 + $0x30] sm:$0xff] }
 0x7ee   :  { %v8171_v34 = vadd.f32 %v8123_v57, %v8075_v40  ;;  %v9573_v23 = vpop.f32.mrb[104].mxu1  ;;  %v8501_v57 = vld [vmem:[#allocation4 + $0x38] sm:$0xff] }
 0x7ef   :  { %v9574_v27 = vpop.f32.mrb[105].mxu1 }
 0x7f0   :  { %v9575_v2 = vadd.f32 %v9574_v27, %v9573_v23  ;;  %v9576_v22 = vpop.f32.mrb[106].mxu1  ;;  %v8217_v38 = vpack.c.bf16 %v8171_v34, %v8168_v1 }
 0x7f1   :  { %v9577_v41 = vpop.f32.mrb[107].mxu1 }
 0x7f2   :  { %v8126_v33 = vmul.f32 %v9575_v2, %v9575_v2  ;;  %v9578_v24 = vadd.f32 %v9577_v41, %v9576_v22  ;;  %9643 = vmatprep.subr.bf16.mxu0 %v8217_v38 }
 0x7f3   :  { %9644 = vmatpush3.bf16.msra.mxu0 %v8217_v38 }
 0x7f4   :  { %v8174_v9 = vadd.f32 %v8126_v33, %v8078_v47  ;;  %v8129_v32 = vmul.f32 %v9578_v24, %v9578_v24  ;;  %v8507_v24 = vld [vmem:[#allocation4 + $0x68] sm:$0xff] }
 0x7f6   :  { %v8177_v12 = vadd.f32 %v8129_v32, %v8081_v19  ;;  %v9579_v7 = vpop.f32.mrb[108].mxu1  ;;  %v8508_v19 = vld [vmem:[#allocation4 + $0x70] sm:$0xff] }
 0x7f7   :  { %v9580_v30 = vpop.f32.mrb[109].mxu1 }
 0x7f8   :  { %v9581_v20 = vadd.f32 %v9580_v30, %v9579_v7  ;;  %v9582_v11 = vpop.f32.mrb[110].mxu1  ;;  %v8220_v10 = vpack.c.bf16 %v8177_v12, %v8174_v9  ;;  %v8509_v9 = vld [vmem:[#allocation4 + $0x78] sm:$0xff] }
 0x7f9   :  { %v9583_v25 = vpop.f32.mrb[111].mxu1 }
 0x7fa   :  { %v8132_v43 = vmul.f32 %v9581_v20, %v9581_v20  ;;  %v9584_v21 = vadd.f32 %v9583_v25, %v9582_v11  ;;  %9645 = vmatprep.subr.bf16.mxu0 %v8220_v10 }
 0x7fb   :  { %9646 = vmatpush3.bf16.msra.mxu0 %v8220_v10 }
 0x7fc   :  { %v8180_v29 = vadd.f32 %v8132_v43, %v8084_v18  ;;  %v8135_v42 = vmul.f32 %v9584_v21, %v9584_v21 }
 0x7fe   :  { %v8183_v26 = vadd.f32 %v8135_v42, %v8087_v61 }
 0x800   :  { %v8223_v6 = vpack.c.bf16 %v8183_v26, %v8180_v29 }
 0x802   :  { %9647 = vmatprep.subr.bf16.mxu0 %v8223_v6 }
 0x803   :  { %9648 = vmatpush3.bf16.msra.mxu0 %v8223_v6 }
 0x806   :  { %9650 = vmatmul.mubr.bf16.vlgmr.msra.gmra.mrb[144].mxu0 %v14632_v16 }
 0x807   :  { %9653 = vmatprep.mubr.bf16.mxu0 %v14636_v51 }
 0x80e   :  { %9654 = vmatmul.mubr.bf16.gmra.mrb[148].mxu0 %v14640_v49 }
 0x80f   :  { %9657 = vmatprep.mubr.bf16.mxu0 %v14644_v48 }
 0x816   :  { %9658 = vmatmul.mubr.bf16.gmra.mrb[152].mxu0 %v14721_v58 }
 0x817   :  { %9661 = vmatprep.mubr.bf16.mxu0 %v14733_v50 }
 0x81e   :  { %9662 = vmatmul.mubr.bf16.gmra.mrb[156].mxu0 %v14741_v56 }
 0x857   :  { %v8306_v54 = vpop.f32.mrb[112].mxu0 }
 0x858   :  { %v8308_v63 = vpop.f32.mrb[113].mxu0 }
 0x859   :  { %v8310_v62 = vpop.f32.mrb[114].mxu0 }
 0x85a   :  { %v8464_v17 = vpack.c.bf16 %v8310_v62, %v8306_v54  ;;  %v8312_v37 = vpop.f32.mrb[115].mxu0  ;;  %v8516_v62 = vld [vmem:[#allocation4 + $0xb0] sm:$0xff] }
 0x85b   :  { %v8474_v31 = vpack.c.bf16 %v8312_v37, %v8308_v63  ;;  %v8515_v63 = vld [vmem:[#allocation4 + $0xa8] sm:$0xff] }
 0x85c   :  { %9681 = vmatprep.mubr.bf16.mxu1 %v8464_v17 }
 0x85f   :  { %v8316_v16 = vpop.f32.mrb[116].mxu0 }
 0x860   :  { %v8318_v14 = vpop.f32.mrb[117].mxu0 }
 0x861   :  { %v8320_v51 = vpop.f32.mrb[118].mxu0 }
 0x862   :  { %v8465_v8 = vpack.c.bf16 %v8320_v51, %v8316_v16  ;;  %v8322_v49 = vpop.f32.mrb[119].mxu0 }
 0x863   :  { %v8475_v46 = vpack.c.bf16 %v8322_v49, %v8318_v14  ;;  %v8517_v14 = vld [vmem:[#allocation4 + $0xb8] sm:$0xff] }
 0x864   :  { %9682 = vmatmul.mubr.bf16.vlgmr.msra.gmra.mrb[112].mxu1 %v8465_v8 }
 0x867   :  { %v8326_v48 = vpop.f32.mrb[120].mxu0 }
 0x868   :  { %v8328_v58 = vpop.f32.mrb[121].mxu0 }
 0x869   :  { %v8330_v4 = vpop.f32.mrb[122].mxu0 }
 0x86a   :  { %v8466_v50 = vpack.c.bf16 %v8330_v4, %v8326_v48  ;;  %v8332_v44 = vpop.f32.mrb[123].mxu0 }
 0x86b   :  { %v8476_v56 = vpack.c.bf16 %v8332_v44, %v8328_v58 }
 0x86c   :  { %9685 = vmatprep.mubr.bf16.mxu1 %v8466_v50 }
 0x86f   :  { %v8336_v53 = vpop.f32.mrb[124].mxu0 }
 0x870   :  { %v8338_v36 = vpop.f32.mrb[125].mxu0 }
 0x871   :  { %v8340_v5 = vpop.f32.mrb[126].mxu0 }
 0x872   :  { %v8467_v13 = vpack.c.bf16 %v8340_v5, %v8336_v53  ;;  %v8342_v3 = vpop.f32.mrb[127].mxu0 }
 0x873   :  { %v8477_v35 = vpack.c.bf16 %v8342_v3, %v8338_v36 }
 0x874   :  { %9686 = vmatmul.mubr.bf16.gmra.mrb[116].mxu1 %v8467_v13 }
 0x877   :  { %v8346_v60 = vpop.f32.mrb[128].mxu0 }
 0x878   :  { %v8348_v28 = vpop.f32.mrb[129].mxu0 }
 0x879   :  { %v8350_v15 = vpop.f32.mrb[130].mxu0 }
 0x87a   :  { %v8468_v55 = vpack.c.bf16 %v8350_v15, %v8346_v60  ;;  %v8352_v52 = vpop.f32.mrb[131].mxu0 }
 0x87b   :  { %v8478_v59 = vpack.c.bf16 %v8352_v52, %v8348_v28 }
 0x87c   :  { %9689 = vmatprep.mubr.bf16.mxu1 %v8468_v55 }
 0x87d   :  { %9690 = vmatmul.mubr.bf16.gmra.mrb[120].mxu1 %v8499_v0 }
 0x87e   :  { %9693 = vmatprep.mubr.bf16.mxu1 %v8500_v39 }
 0x87f   :  { %v8356_v45 = vpop.f32.mrb[132].mxu0 }
 0x880   :  { %v8357_v40 = vpop.f32.mrb[133].mxu0 }
 0x881   :  { %v8358_v1 = vpop.f32.mrb[134].mxu0 }
 0x882   :  { %v8359_v34 = vpop.f32.mrb[135].mxu0 }
 0x885   :  { %9694 = vmatmul.mubr.bf16.gmra.mrb[124].mxu1 %v8501_v57 }
 0x886   :  { %9697 = vmatprep.mubr.bf16.mxu1 %v8474_v31 }
 0x887   :  { %v8362_v23 = vpop.f32.mrb[136].mxu0 }
 0x888   :  { %v8363_v27 = vpop.f32.mrb[137].mxu0 }
 0x889   :  { %v8364_v2 = vpop.f32.mrb[138].mxu0 }
 0x88a   :  { %v8365_v22 = vpop.f32.mrb[139].mxu0 }
 0x88d   :  { %9698 = vmatmul.mubr.bf16.gmra.mrb[128].mxu1 %v8475_v46 }
 0x88e   :  { %9701 = vmatprep.mubr.bf16.mxu1 %v8476_v56 }
 0x88f   :  { %v8368_v38 = vpop.f32.mrb[140].mxu0 }
 0x890   :  { %v8369_v41 = vpop.f32.mrb[141].mxu0 }
 0x891   :  { %v8370_v47 = vpop.f32.mrb[142].mxu0 }
 0x892   :  { %v8371_v33 = vpop.f32.mrb[143].mxu0 }
 0x895   :  { %9702 = vmatmul.mubr.bf16.gmra.mrb[132].mxu1 %v8477_v35 }
 0x896   :  { %9705 = vmatprep.mubr.bf16.mxu1 %v8478_v59 }
 0x89d   :  { %9706 = vmatmul.mubr.bf16.gmra.mrb[136].mxu1 %v8507_v24 }
 0x89e   :  { %9709 = vmatprep.mubr.bf16.mxu1 %v8508_v19 }
 0x8a5   :  { %9710 = vmatmul.mubr.bf16.gmra.mrb[140].mxu1 %v8509_v9 }
 0x8d9   :  { %v9651_v32 = vpop.f32.mrb[144].mxu0 }
 0x8da   :  { %v8407_v12 = vpop.f32.mrb[145].mxu0 }
 0x8db   :  { %v9652_v7 = vpop.f32.mrb[146].mxu0 }
 0x8dc   :  { %v8485_v30 = vpack.c.bf16 %v9652_v7, %v9651_v32  ;;  %v8410_v20 = vpop.f32.mrb[147].mxu0 }
 0x8dd   :  { %v8484_v11 = vpack.c.bf16 %v8410_v20, %v8407_v12 }
 0x8df   :  { %9713 = vmatprep.mubr.bf16.mxu1 %v8484_v11 }
 0x8e0   :  { %9714 = vmatmul.mubr.bf16.gmra.mrb[144].mxu1 %v8485_v30 }
 0x8e1   :  { %v9655_v10 = vpop.f32.mrb[148].mxu0 }
 0x8e2   :  { %v8423_v25 = vpop.f32.mrb[149].mxu0 }
 0x8e3   :  { %v9656_v18 = vpop.f32.mrb[150].mxu0 }
 0x8e4   :  { %v8487_v43 = vpack.c.bf16 %v9656_v18, %v9655_v10  ;;  %v8426_v21 = vpop.f32.mrb[151].mxu0 }
 0x8e5   :  { %v8486_v61 = vpack.c.bf16 %v8426_v21, %v8423_v25 }
 0x8e7   :  { %9717 = vmatprep.mubr.bf16.mxu1 %v8486_v61 }
 0x8e8   :  { %9718 = vmatmul.mubr.bf16.gmra.mrb[148].mxu1 %v8487_v43 }
 0x8e9   :  { %v9659_v29 = vpop.f32.mrb[152].mxu0 }
 0x8ea   :  { %v8439_v42 = vpop.f32.mrb[153].mxu0 }
 0x8eb   :  { %v9660_v26 = vpop.f32.mrb[154].mxu0 }
 0x8ec   :  { %v8442_v6 = vpop.f32.mrb[155].mxu0 }
 0x8ed   :  { %v8488_v54 = vpack.c.bf16 %v8442_v6, %v8439_v42 }
 0x8ef   :  { %9721 = vmatprep.mubr.bf16.mxu1 %v8488_v54 }
 0x8f0   :  { %9722 = vmatmul.mubr.bf16.gmra.mrb[152].mxu1 %v8515_v63 }
 0x8f1   :  { %9725 = vmatprep.mubr.bf16.mxu1 %v8516_v62  ;;  %v9663_v17 = vpop.f32.mrb[156].mxu0 }
 0x8f2   :  { %v8453_v37 = vpop.f32.mrb[157].mxu0 }
 0x8f3   :  { %v9664_v31 = vpop.f32.mrb[158].mxu0 }
 0x8f4   :  { %v8455_v16 = vpop.f32.mrb[159].mxu0 }
 0x8f8   :  { %9726 = vmatmul.mubr.bf16.gmra.mrb[156].mxu1 %v8517_v14 }
 0x937   :  { %v14828_v51 = vpop.f32.mrb[112].mxu1 }
 0x938   :  { %v14830_v8 = vpop.f32.mrb[113].mxu1  ;;  %8747 = vadd.xlane.f32.xlu1 %v14828_v51 }
 0x939   :  { %8743 = vadd.xlane.f32.xlu0 %v14830_v8  ;;  %v14834_v49 = vpop.f32.mrb[114].mxu1 }
 0x93a   :  { %v14836_v46 = vpop.f32.mrb[115].mxu1 }
 0x93c   :  { %8749 = vadd.xlane.f32.xlu1 %v14834_v49 }
 0x93d   :  { %8745 = vadd.xlane.f32.xlu0 %v14836_v46 }
 0x947   :  { %v14840_v48 = vpop.f32.mrb[116].mxu1 }
 0x948   :  { %v14842_v58 = vpop.f32.mrb[117].mxu1 }
 0x949   :  { %8751 = vadd.xlane.f32.xlu0 %v14842_v58  ;;  %v14845_v4 = vpop.f32.mrb[118].mxu1 }
 0x94a   :  { %v14847_v50 = vpop.f32.mrb[119].mxu1 }
 0x94b   :  { %8753 = vadd.xlane.f32.xlu1 %v14847_v50 }
 0x94d   :  { %8755 = vadd.xlane.f32.xlu0 %v14840_v48 }
 0x94f   :  { %8757 = vadd.xlane.f32.xlu1 %v14845_v4 }
 0x950   :  { %v14852_v44 = vpop.f32.mrb[120].mxu1 }
 0x951   :  { %v14854_v56 = vpop.f32.mrb[121].mxu1 }
 0x952   :  { %8759 = vadd.xlane.f32.xlu0 %v14854_v56  ;;  %v14857_v53 = vpop.f32.mrb[122].mxu1 }
 0x953   :  { %v14859_v36 = vpop.f32.mrb[123].mxu1 }
 0x954   :  { %8761 = vadd.xlane.f32.xlu1 %v14859_v36 }
 0x956   :  { %8763 = vadd.xlane.f32.xlu0 %v14852_v44 }
 0x958   :  { %8765 = vadd.xlane.f32.xlu1 %v14857_v53  ;;  %v14864_v5 = vpop.f32.mrb[124].mxu1 }
 0x959   :  { %v14866_v13 = vpop.f32.mrb[125].mxu1 }
 0x95a   :  { %8767 = vadd.xlane.f32.xlu0 %v14866_v13  ;;  %v14869_v3 = vpop.f32.mrb[126].mxu1 }
 0x95b   :  { %v14871_v35 = vpop.f32.mrb[127].mxu1 }
 0x95c   :  { %8769 = vadd.xlane.f32.xlu1 %v14871_v35 }
 0x95e   :  { %8771 = vadd.xlane.f32.xlu0 %v14864_v5 }
 0x960   :  { %8773 = vadd.xlane.f32.xlu1 %v14869_v3  ;;  %v14876_v60 = vpop.f32.mrb[128].mxu1 }
 0x961   :  { %v14878_v28 = vpop.f32.mrb[129].mxu1 }
 0x962   :  { %8775 = vadd.xlane.f32.xlu0 %v14878_v28  ;;  %v14881_v15 = vpop.f32.mrb[130].mxu1 }
 0x963   :  { %v14883_v55 = vpop.f32.mrb[131].mxu1 }
 0x964   :  { %8777 = vadd.xlane.f32.xlu1 %v14883_v55 }
 0x966   :  { %8779 = vadd.xlane.f32.xlu0 %v14876_v60 }
 0x968   :  { %8781 = vadd.xlane.f32.xlu1 %v14881_v15  ;;  %v14888_v0 = vpop.f32.mrb[132].mxu1 }
 0x969   :  { %v14890_v52 = vpop.f32.mrb[133].mxu1 }
 0x96a   :  { %8783 = vadd.xlane.f32.xlu0 %v14890_v52  ;;  %v14893_v39 = vpop.f32.mrb[134].mxu1 }
 0x96b   :  { %v14895_v59 = vpop.f32.mrb[135].mxu1 }
 0x96c   :  { %8785 = vadd.xlane.f32.xlu1 %v14895_v59 }
 0x96e   :  { %8787 = vadd.xlane.f32.xlu0 %v14888_v0 }
 0x970   :  { %8789 = vadd.xlane.f32.xlu1 %v14893_v39  ;;  %v14900_v45 = vpop.f32.mrb[136].mxu1 }
 0x971   :  { %v14902_v40 = vpop.f32.mrb[137].mxu1 }
 0x972   :  { %8791 = vadd.xlane.f32.xlu0 %v14902_v40  ;;  %v14905_v1 = vpop.f32.mrb[138].mxu1 }
 0x973   :  { %v14907_v57 = vpop.f32.mrb[139].mxu1 }
 0x974   :  { %8793 = vadd.xlane.f32.xlu1 %v14907_v57 }
 0x976   :  { %8795 = vadd.xlane.f32.xlu0 %v14900_v45 }
 0x978   :  { %8797 = vadd.xlane.f32.xlu1 %v14905_v1  ;;  %v14912_v34 = vpop.f32.mrb[140].mxu1 }
 0x979   :  { %v14914_v23 = vpop.f32.mrb[141].mxu1 }
 0x97a   :  { %8799 = vadd.xlane.f32.xlu0 %v14914_v23  ;;  %v14917_v27 = vpop.f32.mrb[142].mxu1 }
 0x97b   :  { %v14919_v2 = vpop.f32.mrb[143].mxu1 }
 0x97c   :  { %8801 = vadd.xlane.f32.xlu1 %v14919_v2 }
 0x97e   :  { %8803 = vadd.xlane.f32.xlu0 %v14912_v34 }
 0x980   :  { %8805 = vadd.xlane.f32.xlu1 %v14917_v27 }
 0x9b3   :  { %v14924_v22 = vpop.f32.mrb[144].mxu1 }
 0x9b4   :  { %v14926_v38 = vpop.f32.mrb[145].mxu1 }
 0x9b5   :  { %8807 = vadd.xlane.f32.xlu1 %v14926_v38  ;;  %v14929_v41 = vpop.f32.mrb[146].mxu1 }
 0x9b6   :  { %v14931_v47 = vpop.f32.mrb[147].mxu1 }
 0x9b9   :  { %8811 = vadd.xlane.f32.xlu1 %v14924_v22 }
 0x9bb   :  { %v14934_v33 = vpop.f32.mrb[148].mxu1 }
 0x9bc   :  { %v14936_v24 = vpop.f32.mrb[149].mxu1 }
 0x9bd   :  { %8815 = vadd.xlane.f32.xlu1 %v14936_v24  ;;  %v14939_v19 = vpop.f32.mrb[150].mxu1 }
 0x9be   :  { %v14941_v9 = vpop.f32.mrb[151].mxu1 }
 0x9c1   :  { %8819 = vadd.xlane.f32.xlu1 %v14934_v33 }
 0x9c3   :  { %v14944_v32 = vpop.f32.mrb[152].mxu1 }
 0x9c4   :  { %15706 = vst [vmem:[#allocation30_spill] sm:$0xff] %v14944_v32  ;;  %v14946_v12 = vpop.f32.mrb[153].mxu1 }
 0x9c5   :  { %8823 = vadd.xlane.f32.xlu1 %v14946_v12  ;;  %v14949_v7 = vpop.f32.mrb[154].mxu1  ;;  %v8748_v18 = vpop.xlane.xlu1 %8747 }
 0x9c6   :  { %15707 = vst [vmem:[#allocation31_spill] sm:$0xff] %v14949_v7  ;;  %v8744_v30 = vpop.xlane.xlu0 %8743  ;;  %v14951_v20 = vpop.f32.mrb[155].mxu1  ;;  %v8843_v26 = vsel %vm8839_vm6, %v8748_v18, 0.0 }
 0x9c7   :  { %v8840_v21 = vsel %vm8839_vm6, %v8744_v30, 0.0 }
 0x9c9   :  { %8827 = vadd.xlane.f32.xlu1 %v14944_v32  ;;  %v8750_v6 = vpop.xlane.xlu1 %8749 }
 0x9ca   :  { %v8746_v11 = vpop.xlane.xlu0 %8745  ;;  %v8845_v63 = vsel %vm8839_vm6, %v8750_v6, 0.0 }
 0x9cb   :  { %v8841_v10 = vsel %vm8839_vm6, %v8746_v11, 0.0  ;;  %v14955_v25 = vpop.f32.mrb[156].mxu1 }
 0x9cc   :  { %15708 = vst [vmem:[#allocation40_spill] sm:$0xff] %v14955_v25  ;;  %v14957_v43 = vpop.f32.mrb[157].mxu1  ;;  %v8842_v29 = vadd.f32 %v8841_v10, %v8840_v21 }
 0x9cd   :  { %15709 = vst [vmem:[#allocation41_spill] sm:$0xff] %v14957_v43  ;;  %8831 = vadd.xlane.f32.xlu1 %v14957_v43  ;;  %v14961_v61 = vpop.f32.mrb[158].mxu1 }
 0x9ce   :  { %15710 = vst [vmem:[#allocation32_spill] sm:$0xff] %v14961_v61  ;;  %v14963_v42 = vpop.f32.mrb[159].mxu1  ;;  %v8844_v54 = vadd.f32 %v8843_v26, %v8842_v29 }
 0x9cf   :  { %15711 = vst [vmem:[#allocation42_spill] sm:$0xff] %v14963_v42 }
 0x9d0   :  { %v8846_v62 = vadd.f32 %v8845_v63, %v8844_v54 }
 0x9d1   :  { %8835 = vadd.xlane.f32.xlu1 %v14955_v25 }
 0x9d6   :  { %v8752_v17 = vpop.xlane.xlu0 %8751 }
 0x9d7   :  { %v8847_v37 = vsel %vm8839_vm6, %v8752_v17, 0.0 }
 0x9d8   :  { %v8848_v31 = vadd.f32 %v8847_v37, %v8846_v62  ;;  %v8754_v16 = vpop.xlane.xlu1 %8753 }
 0x9d9   :  { %v8849_v14 = vsel %vm8839_vm6, %v8754_v16, 0.0 }
 0x9da   :  { %v8850_v30 = vadd.f32 %v8849_v14, %v8848_v31  ;;  %v8756_v11 = vpop.xlane.xlu0 %8755 }
 0x9db   :  { %v8851_v10 = vsel %vm8839_vm6, %v8756_v11, 0.0 }
 0x9dc   :  { %v8852_v21 = vadd.f32 %v8851_v10, %v8850_v30  ;;  %v8758_v18 = vpop.xlane.xlu1 %8757 }
 0x9dd   :  { %v8853_v25 = vsel %vm8839_vm6, %v8758_v18, 0.0 }
 0x9de   :  { %v8854_v43 = vadd.f32 %v8853_v25, %v8852_v21 }
 0x9df   :  { %v8760_v29 = vpop.xlane.xlu0 %8759 }
 0x9e0   :  { %v8855_v26 = vsel %vm8839_vm6, %v8760_v29, 0.0 }
 0x9e1   :  { %v8856_v6 = vadd.f32 %v8855_v26, %v8854_v43  ;;  %v8762_v54 = vpop.xlane.xlu1 %8761 }
 0x9e2   :  { %v8857_v63 = vsel %vm8839_vm6, %v8762_v54, 0.0 }
 0x9e3   :  { %v8858_v62 = vadd.f32 %v8857_v63, %v8856_v6  ;;  %v8764_v17 = vpop.xlane.xlu0 %8763 }
 0x9e4   :  { %v8859_v37 = vsel %vm8839_vm6, %v8764_v17, 0.0 }
 0x9e5   :  { %v8860_v31 = vadd.f32 %v8859_v37, %v8858_v62  ;;  %v8766_v16 = vpop.xlane.xlu1 %8765 }
 0x9e6   :  { %v8861_v14 = vsel %vm8839_vm6, %v8766_v16, 0.0 }
 0x9e7   :  { %v8862_v30 = vadd.f32 %v8861_v14, %v8860_v31  ;;  %v8768_v11 = vpop.xlane.xlu0 %8767 }
 0x9e8   :  { %v8863_v10 = vsel %vm8839_vm6, %v8768_v11, 0.0 }
 0x9e9   :  { %v8864_v25 = vadd.f32 %v8863_v10, %v8862_v30  ;;  %v8770_v21 = vpop.xlane.xlu1 %8769 }
 0x9ea   :  { %v8865_v18 = vsel %vm8839_vm6, %v8770_v21, 0.0 }
 0x9eb   :  { %v8866_v43 = vadd.f32 %v8865_v18, %v8864_v25  ;;  %v8772_v29 = vpop.xlane.xlu0 %8771 }
 0x9ec   :  { %v8867_v26 = vsel %vm8839_vm6, %v8772_v29, 0.0 }
 0x9ed   :  { %v8868_v6 = vadd.f32 %v8867_v26, %v8866_v43  ;;  %v8774_v54 = vpop.xlane.xlu1 %8773 }
 0x9ee   :  { %v8869_v63 = vsel %vm8839_vm6, %v8774_v54, 0.0 }
 0x9ef   :  { %v8870_v62 = vadd.f32 %v8869_v63, %v8868_v6  ;;  %v8776_v17 = vpop.xlane.xlu0 %8775 }
 0x9f0   :  { %v8918_v31 = vsel %vm8839_vm6, %v8776_v17, 0.0 }
 0x9f1   :  { %8871 = vadd.xlane.f32.xlu0 %v8870_v62  ;;  %v8778_v37 = vpop.xlane.xlu1 %8777 }
 0x9f2   :  { %v8919_v16 = vsel %vm8839_vm6, %v8778_v37, 0.0 }
 0x9f3   :  { %v8920_v14 = vadd.f32 %v8919_v16, %v8918_v31  ;;  %v8780_v30 = vpop.xlane.xlu0 %8779 }
 0x9f4   :  { %v8921_v11 = vsel %vm8839_vm6, %v8780_v30, 0.0 }
 0x9f5   :  { %8809 = vadd.xlane.f32.xlu0 %v14931_v47  ;;  %v8922_v10 = vadd.f32 %v8921_v11, %v8920_v14  ;;  %v8782_v25 = vpop.xlane.xlu1 %8781 }
 0x9f6   :  { %v8923_v21 = vsel %vm8839_vm6, %v8782_v25, 0.0 }
 0x9f7   :  { %v8924_v18 = vadd.f32 %v8923_v21, %v8922_v10  ;;  %v8784_v43 = vpop.xlane.xlu0 %8783 }
 0x9f8   :  { %v8925_v29 = vsel %vm8839_vm6, %v8784_v43, 0.0 }
 0x9f9   :  { %8813 = vadd.xlane.f32.xlu0 %v14929_v41  ;;  %v8926_v26 = vadd.f32 %v8925_v29, %v8924_v18  ;;  %v8786_v6 = vpop.xlane.xlu1 %8785 }
 0x9fa   :  { %v8927_v54 = vsel %vm8839_vm6, %v8786_v6, 0.0 }
 0x9fb   :  { %v8928_v63 = vadd.f32 %v8927_v54, %v8926_v26  ;;  %v8788_v62 = vpop.xlane.xlu0 %8787 }
 0x9fc   :  { %v8929_v17 = vsel %vm8839_vm6, %v8788_v62, 0.0 }
 0x9fd   :  { %8817 = vadd.xlane.f32.xlu0 %v14941_v9  ;;  %v8930_v37 = vadd.f32 %v8929_v17, %v8928_v63  ;;  %v8790_v31 = vpop.xlane.xlu1 %8789 }
 0x9fe   :  { %v8931_v16 = vsel %vm8839_vm6, %v8790_v31, 0.0 }
 0x9ff   :  { %v8932_v14 = vadd.f32 %v8931_v16, %v8930_v37  ;;  %v8792_v30 = vpop.xlane.xlu0 %8791 }
 0xa00   :  { %v8933_v11 = vsel %vm8839_vm6, %v8792_v30, 0.0 }
 0xa01   :  { %8821 = vadd.xlane.f32.xlu0 %v14939_v19  ;;  %v8934_v10 = vadd.f32 %v8933_v11, %v8932_v14  ;;  %v8794_v25 = vpop.xlane.xlu1 %8793 }
 0xa02   :  { %v8935_v21 = vsel %vm8839_vm6, %v8794_v25, 0.0 }
 0xa03   :  { %v8936_v18 = vadd.f32 %v8935_v21, %v8934_v10  ;;  %v8796_v43 = vpop.xlane.xlu0 %8795 }
 0xa04   :  { %v8937_v29 = vsel %vm8839_vm6, %v8796_v43, 0.0 }
 0xa05   :  { %8825 = vadd.xlane.f32.xlu0 %v14951_v20  ;;  %v8938_v26 = vadd.f32 %v8937_v29, %v8936_v18  ;;  %v8798_v6 = vpop.xlane.xlu1 %8797 }
 0xa06   :  { %v8939_v54 = vsel %vm8839_vm6, %v8798_v6, 0.0 }
 0xa07   :  { %v8940_v63 = vadd.f32 %v8939_v54, %v8938_v26  ;;  %v8800_v62 = vpop.xlane.xlu0 %8799 }
 0xa08   :  { %v8941_v17 = vsel %vm8839_vm6, %v8800_v62, 0.0 }
 0xa09   :  { %8829 = vadd.xlane.f32.xlu0 %v14949_v7  ;;  %v8942_v37 = vadd.f32 %v8941_v17, %v8940_v63  ;;  %v8802_v31 = vpop.xlane.xlu1 %8801 }
 0xa0a   :  { %v8943_v16 = vsel %vm8839_vm6, %v8802_v31, 0.0 }
 0xa0b   :  { %v8944_v14 = vadd.f32 %v8943_v16, %v8942_v37  ;;  %v8804_v30 = vpop.xlane.xlu0 %8803 }
 0xa0c   :  { %v8945_v11 = vsel %vm8839_vm6, %v8804_v30, 0.0 }
 0xa0d   :  { %8833 = vadd.xlane.f32.xlu0 %v14963_v42  ;;  %v8946_v10 = vadd.f32 %v8945_v11, %v8944_v14  ;;  %v8806_v25 = vpop.xlane.xlu1 %8805 }
 0xa0e   :  { %v8947_v21 = vsel %vm8839_vm6, %v8806_v25, 0.0 }
 0xa0f   :  { %v8948_v18 = vadd.f32 %v8947_v21, %v8946_v10 }
 0xa11   :  { %8837 = vadd.xlane.f32.xlu0 %v14961_v61  ;;  %8949 = vadd.xlane.f32.xlu1 %v8948_v18 }
 0xa42   :  { %v8808_v43 = vpop.xlane.xlu1 %8807 }
 0xa43   :  { %v8996_v37 = vsel %vm8839_vm6, %v8808_v43, 0.0 }
 0xa46   :  { %v8812_v29 = vpop.xlane.xlu1 %8811 }
 0xa47   :  { %v8999_v30 = vsel %vm8839_vm6, %v8812_v29, 0.0 }
 0xa4a   :  { %v8816_v6 = vpop.xlane.xlu1 %8815 }
 0xa4e   :  { %v8820_v14 = vpop.xlane.xlu1 %8819 }
 0xa52   :  { %v8824_v42 = vpop.xlane.xlu1 %8823 }
 0xa7e   :  { %v8872_v26 = vpop.xlane.xlu0 %8871 }
 0xa7f   :  { %v8873_v54 = vrot.slane %v8872_v26, 4 }
 0xa81   :  { %v8874_v63 = vadd.f32 %v8873_v54, %v8872_v26  ;;  %v9003_v26 = vsel %vm8839_vm6, %v8816_v6, 0.0 }
 0xa82   :  { %v8810_v62 = vpop.xlane.xlu0 %8809 }
 0xa83   :  { %v8875_v17 = vrot.slane %v8874_v63, 2  ;;  %v8997_v31 = vsel %vm8839_vm6, %v8810_v62, 0.0 }
 0xa84   :  { %v8998_v16 = vadd.f32 %v8997_v31, %v8996_v37  ;;  %v9007_v37 = vsel %vm8839_vm6, %v8820_v14, 0.0 }
 0xa85   :  { %v8876_v11 = vadd.f32 %v8875_v17, %v8874_v63  ;;  %v8828_v17 = vpop.xlane.xlu1 %8827 }
 0xa86   :  { %v9000_v10 = vadd.f32 %v8999_v30, %v8998_v16  ;;  %v8814_v25 = vpop.xlane.xlu0 %8813  ;;  %v9011_v16 = vsel %vm8839_vm6, %v8824_v42, 0.0 }
 0xa87   :  { %v9001_v21 = vsel %vm8839_vm6, %v8814_v25, 0.0  ;;  %v8877_v18 = vrot.slane %v8876_v11, 1 }
 0xa88   :  { %v9002_v61 = vadd.f32 %v9001_v21, %v9000_v10 }
 0xa89   :  { %v8878_v54 = vadd.f32 %v8877_v18, %v8876_v11  ;;  %v8832_v11 = vpop.xlane.xlu1 %8831 }
 0xa8a   :  { %v9004_v7 = vadd.f32 %v9003_v26, %v9002_v61  ;;  %v8818_v32 = vpop.xlane.xlu0 %8817  ;;  %v9019_v18 = vsel %vm8839_vm6, %v8832_v11, 0.0 }
 0xa8b   :  { %v9005_v43 = vsel %vm8839_vm6, %v8818_v32, 0.0  ;;  %9881 = vpush %v8878_v54  ;;  %v9015_v32 = vsel %vm8839_vm6, %v8828_v17, 0.0 }
 0xa8c   :  { %v9006_v62 = vadd.f32 %v9005_v43, %v9004_v7 }
 0xa8e   :  { %v9008_v29 = vadd.f32 %v9007_v37, %v9006_v62  ;;  %v8822_v63 = vpop.xlane.xlu0 %8821  ;;  %v8836_v62 = vpop.xlane.xlu1 %8835 }
 0xa8f   :  { %v9009_v31 = vsel %vm8839_vm6, %v8822_v63, 0.0 }
 0xa90   :  { %v9010_v30 = vadd.f32 %v9009_v31, %v9008_v29  ;;  %v9023_v29 = vsel %vm8839_vm6, %v8836_v62, 0.0 }
 0xa92   :  { %v9012_v10 = vadd.f32 %v9011_v16, %v9010_v30  ;;  %v8826_v25 = vpop.xlane.xlu0 %8825 }
 0xa93   :  { %v9013_v6 = vsel %vm8839_vm6, %v8826_v25, 0.0 }
 0xa94   :  { %v9014_v61 = vadd.f32 %v9013_v6, %v9012_v10 }
 0xa96   :  { %v9016_v21 = vadd.f32 %v9015_v32, %v9014_v61  ;;  %v8830_v7 = vpop.xlane.xlu0 %8829 }
 0xa97   :  { %v9017_v14 = vsel %vm8839_vm6, %v8830_v7, 0.0 }
 0xa98   :  { %v9018_v26 = vadd.f32 %v9017_v14, %v9016_v21 }
 0xa9a   :  { %v9020_v54 = vadd.f32 %v9019_v18, %v9018_v26  ;;  %v8834_v43 = vpop.xlane.xlu0 %8833 }
 0xa9b   :  { %v9021_v42 = vsel %vm8839_vm6, %v8834_v43, 0.0 }
 0xa9c   :  { %v9022_v37 = vadd.f32 %v9021_v42, %v9020_v54 }
 0xa9e   :  { %v9024_v63 = vadd.f32 %v9023_v29, %v9022_v37  ;;  %v8838_v31 = vpop.xlane.xlu0 %8837  ;;  %v8950_v30 = vpop.xlane.xlu1 %8949 }
 0xa9f   :  { %v9025_v16 = vsel %vm8839_vm6, %v8838_v31, 0.0  ;;  %v8951_v10 = vrot.slane %v8950_v30, 4 }
 0xaa0   :  { %v9026_v17 = vadd.f32 %v9025_v16, %v9024_v63 }
 0xaa1   :  { %v8952_v25 = vadd.f32 %v8951_v10, %v8950_v30 }
 0xaa2   :  { %9027 = vadd.xlane.f32.xlu0 %v9026_v17 }
 0xaa3   :  { %v8953_v6 = vrot.slane %v8952_v25, 2 }
 0xaa5   :  { %v8954_v11 = vadd.f32 %v8953_v6, %v8952_v25 }
 0xaa7   :  { %v8955_v32 = vrot.slane %v8954_v11, 1 }
 0xaa9   :  { %v8956_v7 = vadd.f32 %v8955_v32, %v8954_v11 }
 0xabc   :  { %s9882_s0 = spop %9881 }
 0xabd   :  { %s8880_s23 = smax.f32 %s10415_s22, %s9882_s0 }
 0xabe   :  { %v8881_v61 = vstv %s8880_s23 }
 0xabf   :  { %10152 = vrcp.f32 %v8881_v61 }
 0xac9   :  { %v10153_v21 = vpop.eup %10152 }
 0xaca   :  { %9883 = vpush %v10153_v21 }
 0xacb   :  { %9885 = vpush %v8956_v7 }
 0xafb   :  { %s9884_s24 = spop %9883 }
 0xafc   :  { %s8884_s27 = smul.f32 %s9884_s24, %s10696_s30  ;;  %s9886_s21 = spop %9885 }
 0xafd   :  { %s8958_s8 = smax.f32 %s10415_s22, %s9886_s21  ;;  %s10416_s30 = smov [#allocation22]  }
 0xafe   :  { %v8885_v14 = vstv %s8884_s27  ;;  %v8959_v18 = vstv %s8958_s8  ;;  %s9127_s11 = sshll.u32 %s10416_s30, 4  ;;  %s9128_s11 = int_to_ptr.vmem [resolvable:$true] %s9127_s11 }
 0xaff   :  { %v8886_v26 = vmul.f32 %v8885_v14, %v14830_v8  ;;  %v8887_v54 = vmul.f32 %v8885_v14, %v14836_v46  ;;  %v8888_v43 = vmul.f32 %v14828_v51, %v8885_v14  ;;  %v8889_v62 = vmul.f32 %v14834_v49, %v8885_v14  ;;  %s10346_s12 = scalar_lea.vmem %s9128_s11, 2048  ;;  %p10351_p3 = scmp.lt.s32.totalorder %s9128_s11, %s9128_s11 }
 0xb00   :  { %v8890_v42 = vmul.f32 %v8885_v14, %v14842_v58  ;;  %v8891_v37 = vmul.f32 %v8885_v14, %v14847_v50  ;;  %v8892_v29 = vmul.f32 %v14840_v48, %v8885_v14  ;;  %v8893_v63 = vmul.f32 %v14845_v4, %v8885_v14  ;;  %p10347_p2 = scmp.ne.s32.totalorder %s9128_s11, %s10346_s12  ;;  %p10352_p4 = scmp.lt.s32.totalorder %s10346_s12, %s10346_s12 }
 0xb01   :  { %v8894_v31 = vmul.f32 %v8885_v14, %v14854_v56  ;;  %v8895_v16 = vmul.f32 %v8885_v14, %v14859_v36  ;;  %v8896_v8 = vmul.f32 %v14852_v44, %v8885_v14  ;;  %v8897_v46 = vmul.f32 %v14857_v53, %v8885_v14 }
 0xb02   :  { %v8898_v51 = vmul.f32 %v8885_v14, %v14866_v13  ;;  %v8899_v49 = vmul.f32 %v8885_v14, %v14871_v35  ;;  %v8900_v58 = vmul.f32 %v14864_v5, %v8885_v14  ;;  %v8901_v50 = vmul.f32 %v14869_v3, %v8885_v14  ;;  %p10353_p5 = por %p10352_p4, %p10351_p3 }
 0xb03   :  { %10154 = vrcp.f32 %v8959_v18 }
 0xb04   :  { %p10354_p6 = pnand %p10353_p5, %p10347_p2 }
 0xb0d   :  { %v10155_v48 = vpop.eup %10154 }
 0xb0e   :  { %9887 = vpush %v10155_v48 }
 0xb2f   :  { %v9028_v4 = vpop.xlane.xlu0 %9027 }
 0xb30   :  { %v9029_v56 = vrot.slane %v9028_v4, 4 }
 0xb32   :  { %v9030_v17 = vadd.f32 %v9029_v56, %v9028_v4 }
 0xb34   :  { %v9031_v36 = vrot.slane %v9030_v17, 2 }
 0xb36   :  { %v9032_v30 = vadd.f32 %v9031_v36, %v9030_v17 }
 0xb38   :  { %v9033_v44 = vrot.slane %v9032_v30, 1 }
 0xb3a   :  { %v9034_v10 = vadd.f32 %v9033_v44, %v9032_v30  ;;  %v15717_v30 = vld [vmem:[#allocation32_spill] sm:$0xff]  ;;  %v9074_v44 = vld [vmem:[#allocation22] sm:$0xff] }
 0xb3c   :  { %9889 = vpush %v9034_v10 }
 0xb3f   :  { %s9888_s20 = spop %9887 }
 0xb40   :  { %s8962_s28 = smul.f32 %s9888_s20, %s10712_s1 }
 0xb42   :  { %v8963_v53 = vstv %s8962_s28 }
 0xb43   :  { %v8964_v13 = vmul.f32 %v8963_v53, %v14878_v28  ;;  %v8965_v5 = vmul.f32 %v8963_v53, %v14883_v55  ;;  %v8966_v3 = vmul.f32 %v14876_v60, %v8963_v53  ;;  %v8967_v35 = vmul.f32 %v14881_v15, %v8963_v53 }
 0xb44   :  { %v8968_v25 = vmul.f32 %v8963_v53, %v14890_v52  ;;  %v8969_v6 = vmul.f32 %v8963_v53, %v14895_v59  ;;  %v8970_v61 = vmul.f32 %v14888_v0, %v8963_v53  ;;  %v8971_v11 = vmul.f32 %v14893_v39, %v8963_v53 }
 0xb45   :  { %v8972_v32 = vmul.f32 %v8963_v53, %v14902_v40  ;;  %v8973_v21 = vmul.f32 %v8963_v53, %v14907_v57  ;;  %v8974_v28 = vmul.f32 %v14900_v45, %v8963_v53  ;;  %v8975_v55 = vmul.f32 %v14905_v1, %v8963_v53 }
 0xb46   :  { %v8976_v60 = vmul.f32 %v8963_v53, %v14914_v23  ;;  %v8977_v15 = vmul.f32 %v8963_v53, %v14919_v2  ;;  %v8978_v52 = vmul.f32 %v14912_v34, %v8963_v53  ;;  %v8979_v59 = vmul.f32 %v14917_v27, %v8963_v53 }
 0xb47   :  { %v8980_v7 = vadd.f32 %v8964_v13, %v8886_v26  ;;  %v8981_v0 = vadd.f32 %v8965_v5, %v8887_v54  ;;  %v8982_v14 = vadd.f32 %v8966_v3, %v8888_v43  ;;  %v8983_v39 = vadd.f32 %v8967_v35, %v8889_v62  ;;  %v9076_v13 = vld [vmem:[#allocation22 + $0x10] sm:$0xff] }
 0xb48   :  { %v8984_v18 = vadd.f32 %v8968_v25, %v8890_v42  ;;  %v8985_v40 = vadd.f32 %v8969_v6, %v8891_v37  ;;  %v8986_v48 = vadd.f32 %v8970_v61, %v8892_v29  ;;  %v8987_v57 = vadd.f32 %v8971_v11, %v8893_v63  ;;  %v9078_v6 = vld [vmem:[#allocation22 + $0x20] sm:$0xff]  ;;  %v9079_v61 = vld [vmem:[#allocation22 + $0x28] sm:$0xff]  ;;  %v9080_v11 = vld [vmem:[#allocation22 + $0x30] sm:$0xff] }
 0xb49   :  { %v8988_v45 = vadd.f32 %v8972_v32, %v8894_v31  ;;  %v8989_v4 = vadd.f32 %v8973_v21, %v8895_v16  ;;  %v8990_v1 = vadd.f32 %v8974_v28, %v8896_v8  ;;  %v8991_v56 = vadd.f32 %v8975_v55, %v8897_v46  ;;  %v15712_v46 = vld [vmem:[#allocation30_spill] sm:$0xff] }
 0xb4a   :  { %v8992_v23 = vadd.f32 %v8976_v60, %v8898_v51  ;;  %v8993_v17 = vadd.f32 %v8977_v15, %v8899_v49  ;;  %v8994_v2 = vadd.f32 %v8978_v52, %v8900_v58  ;;  %v8995_v36 = vadd.f32 %v8979_v59, %v8901_v50  ;;  %v15713_v51 = vld [vmem:[#allocation31_spill] sm:$0xff]  ;;  %v15714_v49 = vld [vmem:[#allocation41_spill] sm:$0xff]  ;;  %v15715_v58 = vld [vmem:[#allocation42_spill] sm:$0xff] }
 0xb4b   :  { %v15716_v50 = vld [vmem:[#allocation40_spill] sm:$0xff]  ;;  %v9081_v60 = vld [vmem:[#allocation22 + $0x38] sm:$0xff]  ;;  %v9082_v15 = vld [vmem:[#allocation22 + $0x40] sm:$0xff] }
 0xb4c   :  { %v9083_v52 = vld [vmem:[#allocation22 + $0x48] sm:$0xff] }
 0xb6d   :  { %s9890_s4 = spop %9889 }
 0xb6e   :  { %s9036_s14 = smax.f32 %s10415_s22, %s9890_s4 }
 0xb6f   :  { %v9037_v34 = vstv %s9036_s14 }
 0xb70   :  { %10156 = vrcp.f32 %v9037_v34  ;;  %v9085_v34 = vld [vmem:[#allocation22 + $0x58] sm:$0xff] }
 0xb7a   :  { %v10157_v27 = vpop.eup %10156 }
 0xb7b   :  { %9891 = vpush %v10157_v27 }
 0xbac   :  { %s9892_s29 = spop %9891 }
 0xbad   :  { %s9040_s9 = smul.f32 %s9892_s29, %s10728_s6 }
 0xbaf   :  { %v9041_v26 = vstv %s9040_s9 }
 0xbb0   :  { %v9042_v54 = vmul.f32 %v9041_v26, %v14926_v38  ;;  %v9043_v43 = vmul.f32 %v9041_v26, %v14931_v47  ;;  %v9044_v62 = vmul.f32 %v14924_v22, %v9041_v26  ;;  %v9045_v42 = vmul.f32 %v14929_v41, %v9041_v26 }
 0xbb1   :  { %v9046_v37 = vmul.f32 %v9041_v26, %v14936_v24  ;;  %v9047_v29 = vmul.f32 %v9041_v26, %v14941_v9  ;;  %v9048_v63 = vmul.f32 %v14934_v33, %v9041_v26  ;;  %v9049_v31 = vmul.f32 %v14939_v19, %v9041_v26 }
 0xbb2   :  { %v9050_v16 = vmul.f32 %v9041_v26, %v14946_v12  ;;  %v9051_v8 = vmul.f32 %v9041_v26, %v14951_v20  ;;  %v9052_v38 = vmul.f32 %v15712_v46, %v9041_v26  ;;  %v9053_v47 = vmul.f32 %v15713_v51, %v9041_v26  ;;  %v9075_v12 = vld [vmem:[#allocation22 + $0x8] sm:$0xff]  ;;  %v9077_v20 = vld [vmem:[#allocation22 + $0x18] sm:$0xff] }
 0xbb3   :  { %v9054_v22 = vmul.f32 %v9041_v26, %v15714_v49  ;;  %v9055_v41 = vmul.f32 %v9041_v26, %v15715_v58  ;;  %v9056_v24 = vmul.f32 %v15716_v50, %v9041_v26  ;;  %v9057_v9 = vmul.f32 %v15717_v30, %v9041_v26 }
 0xbb4   :  { %v9058_v33 = vadd.f32 %v9042_v54, %v8980_v7  ;;  %v9059_v10 = vadd.f32 %v9043_v43, %v8981_v0  ;;  %v9060_v19 = vadd.f32 %v9044_v62, %v8982_v14  ;;  %v9061_v53 = vadd.f32 %v9045_v42, %v8983_v39  ;;  %v9084_v39 = vld [vmem:[#allocation22 + $0x50] sm:$0xff] }
 0xbb5   :  { %v9062_v5 = vadd.f32 %v9046_v37, %v8984_v18  ;;  %v9063_v3 = vadd.f32 %v9047_v29, %v8985_v40  ;;  %v9064_v35 = vadd.f32 %v9048_v63, %v8986_v48  ;;  %v9065_v25 = vadd.f32 %v9049_v31, %v8987_v57  ;;  %v9086_v18 = vld [vmem:[#allocation22 + $0x60] sm:$0xff]  ;;  %v9087_v40 = vld [vmem:[#allocation22 + $0x68] sm:$0xff]  ;;  %v9088_v48 = vld [vmem:[#allocation22 + $0x70] sm:$0xff] }
 0xbb6   :  { %v9066_v32 = vadd.f32 %v9050_v16, %v8988_v45  ;;  %v9067_v21 = vadd.f32 %v9051_v8, %v8989_v4  ;;  %v9068_v28 = vadd.f32 %v9052_v38, %v8990_v1  ;;  %v9069_v55 = vadd.f32 %v9053_v47, %v8991_v56  ;;  %v9089_v57 = vld [vmem:[#allocation22 + $0x78] sm:$0xff] }
 0xbb7   :  { %v9070_v59 = vadd.f32 %v9054_v22, %v8992_v23  ;;  %v9071_v7 = vadd.f32 %v9055_v41, %v8993_v17  ;;  %v9072_v0 = vadd.f32 %v9056_v24, %v8994_v2  ;;  %v9073_v14 = vadd.f32 %v9057_v9, %v8995_v36 }
 0xbb8   :  { %v9090_v27 = vadd.f32 %v9074_v44, %v9058_v33  ;;  %v9091_v26 = vadd.f32 %v9075_v12, %v9059_v10  ;;  %v9092_v54 = vadd.f32 %v9076_v13, %v9060_v19  ;;  %v9093_v45 = vadd.f32 %v9077_v20, %v9061_v53 }
 0xbb9   :  { %v9094_v4 = vadd.f32 %v9078_v6, %v9062_v5  ;;  %v9095_v1 = vadd.f32 %v9079_v61, %v9063_v3  ;;  %v9096_v56 = vadd.f32 %v9080_v11, %v9064_v35  ;;  %v9097_v43 = vadd.f32 %v9081_v60, %v9065_v25 }
 0xbba   :  { %v9098_v23 = vadd.f32 %v9082_v15, %v9066_v32  ;;  %v9099_v17 = vadd.f32 %v9083_v52, %v9067_v21  ;;  %v9100_v2 = vadd.f32 %v9084_v39, %v9068_v28  ;;  %v9101_v36 = vadd.f32 %v9085_v34, %v9069_v55  ;;  %9106 = vst [vmem:[#allocation22] sm:$0xff] %v9090_v27 }
 0xbbb   :  { %9107 = vst [vmem:[#allocation22 + $0x8] sm:$0xff] %v9091_v26  ;;  %9108 = vst [vmem:[#allocation22 + $0x10] sm:$0xff] %v9092_v54  ;;  %v9102_v62 = vadd.f32 %v9086_v18, %v9070_v59  ;;  %v9103_v42 = vadd.f32 %v9087_v40, %v9071_v7  ;;  %v9104_v37 = vadd.f32 %v9088_v48, %v9072_v0 }
 0xbbc   :  { %9109 = vst [vmem:[#allocation22 + $0x18] sm:$0xff] %v9093_v45  ;;  %v9105_v29 = vadd.f32 %v9089_v57, %v9073_v14  ;;  %9110 = vst [vmem:[#allocation22 + $0x20] sm:$0xff] %v9094_v4 }
 0xbbd   :  { %9111 = vst [vmem:[#allocation22 + $0x28] sm:$0xff] %v9095_v1  ;;  %9112 = vst [vmem:[#allocation22 + $0x30] sm:$0xff] %v9096_v56 }
 0xbbe   :  { %9113 = vst [vmem:[#allocation22 + $0x38] sm:$0xff] %v9097_v43  ;;  %9114 = vst [vmem:[#allocation22 + $0x40] sm:$0xff] %v9098_v23 }
 0xbbf   :  { %9115 = vst [vmem:[#allocation22 + $0x48] sm:$0xff] %v9099_v17  ;;  %9116 = vst [vmem:[#allocation22 + $0x50] sm:$0xff] %v9100_v2 }
 0xbc0   :  { %9117 = vst [vmem:[#allocation22 + $0x58] sm:$0xff] %v9101_v36  ;;  %9118 = vst [vmem:[#allocation22 + $0x60] sm:$0xff] %v9102_v62 }
 0xbc1   :  { %9119 = vst [vmem:[#allocation22 + $0x68] sm:$0xff] %v9103_v42  ;;  %9120 = vst [vmem:[#allocation22 + $0x70] sm:$0xff] %v9104_v37 }
 0xbc2   :  { %9121 = vst [vmem:[#allocation22 + $0x78] sm:$0xff] %v9105_v29 }
 0xbc3   :  { %10357 = shalt.err (!%p10354_p6)
}
 0xbc4   :  { %s10358_s16 = scalar_lea.hbm %s15099_s10, 2048 }
 0xbc5   :  { %p10359_p7 = scmp.ne.s32.totalorder %s15099_s10, %s10358_s16  ;;  %p10362_p8 = scmp.lt.u32.totalorder %s10358_s16, %s15099_s10 }
 0xbc7   :  { %p10364_p9 = pnand %p10362_p8, %p10359_p7 }
 0xbc9   :  { %10367 = shalt.err (!%p10364_p9)
}
 0xbca   :  { %9133 = dma.vmem_to_hbm [thread:$0]  %s9128_s11, 2048, %s15099_s10, [#allocation8], %s10384_s25, %s10384_s25, %s10385_s26  }
 0xbcb   :  { %10380 = dma.done.wait [#allocation8], 2048  }
 0xbcc   :  { %10381 = vsyncadd [#allocation8], 4294965248 }
 0xbcd   :  { %9137 = vsyncpa [#allocation7], 1 }
 0xbce   :  { %9138 = vsyncpa [#allocation12], 1 }
 0xbcf   :  { %9139 = vsyncpa [#allocation15], 1 }
 0xbd0   :  { %9140 = vsyncpa [#allocation18], 1 }
 0xbd1   :  { %9141 = vsyncpa [#allocation21], 1 }
 0xbd2   :  { %9142 = vsyncpa [#allocation8], 1 }
 0xbd3   :  { %9143 = vsyncpa [#allocation9], 1 }

</bundles_post_ra>
